<compile_context>
chip_gen: v6e
topology: v6e:2x2x1
jax: 0.10.0
libtpu: 0.0.40
codegen_flags: <defaults>
</compile_context>

<pallas_src>
import functools

import jax
import jax.numpy as jnp
from jax.experimental import pallas as pl
from jax.experimental.pallas import tpu as pltpu


def _fused_mlp_kernel(x_ref, w1_ref, b1_ref, w2_ref, b2_ref,
                      w3_ref, b3_ref, w4_ref, b4_ref, o_ref):
    """Fused 4-layer MLP: relu(linear) x4, bf16 matmuls with f32 accumulation.

    Layers 1-3 use fully VMEM-resident operands and are recomputed on each of
    the (two) grid steps -- with batch=2 that is negligible MXU work compared
    to the weight DMA.  Layer 4 consumes only this step's (512, tn) weight
    slice and writes this step's (M, tn) output block.
    """
    h1 = jnp.maximum(
        jnp.dot(x_ref[...], w1_ref[...], preferred_element_type=jnp.float32)
        + b1_ref[...], 0.0)
    h2 = jnp.maximum(
        jnp.dot(h1.astype(w2_ref.dtype), w2_ref[...],
                preferred_element_type=jnp.float32) + b2_ref[...], 0.0)
    h3 = jnp.maximum(
        jnp.dot(h2.astype(w3_ref.dtype), w3_ref[...],
                preferred_element_type=jnp.float32) + b3_ref[...], 0.0)
    h4 = jnp.maximum(
        jnp.dot(h3.astype(w4_ref.dtype), w4_ref[...],
                preferred_element_type=jnp.float32) + b4_ref[...], 0.0)
    o_ref[...] = h4.astype(o_ref.dtype)


@functools.partial(jax.jit, static_argnames=("n_out_tiles",))
def diffusion_model_forward(batch_image, params, *, n_out_tiles=2):
    """Forward pass: linear1 -> linear2 -> d_linear2 -> d_linear1 (ReLU each).

    batch_image: (M, 4096) float32
    params: [(w1,b1),(w2,b2),(w3,b3),(w4,b4)] with w as (in, out) float32.
    Returns (M, 4096) float32.
    """
    (w1, b1), (w2, b2), (w3, b3), (w4, b4) = params
    M, K1 = batch_image.shape
    D1 = w1.shape[1]   # 512
    D2 = w2.shape[1]   # 64
    D3 = w3.shape[1]   # 512
    N = w4.shape[1]    # 4096
    assert (K1, D1, D2, D3) == (w1.shape[0], w2.shape[0], w3.shape[0], w4.shape[0])
    assert N % n_out_tiles == 0
    tn = N // n_out_tiles

    # bf16 weight/activation streaming, f32 bias + accumulation (cast once,
    # outside the kernel).
    xb = batch_image.astype(jnp.bfloat16)
    w1b, w2b, w3b, w4b = (w.astype(jnp.bfloat16) for w in (w1, w2, w3, w4))
    b1r, b2r, b3r, b4r = (b.reshape(1, -1).astype(jnp.float32)
                          for b in (b1, b2, b3, b4))

    return pl.pallas_call(
        _fused_mlp_kernel,
        out_shape=jax.ShapeDtypeStruct((M, N), jnp.float32),
        grid_spec=pltpu.PrefetchScalarGridSpec(
            num_scalar_prefetch=0,
            grid=(n_out_tiles,),
            in_specs=[
                pl.BlockSpec((M, K1), lambda j: (0, 0)),    # x        (resident)
                pl.BlockSpec((K1, D1), lambda j: (0, 0)),   # w1       (resident)
                pl.BlockSpec((1, D1), lambda j: (0, 0)),    # b1
                pl.BlockSpec((D1, D2), lambda j: (0, 0)),   # w2
                pl.BlockSpec((1, D2), lambda j: (0, 0)),    # b2
                pl.BlockSpec((D2, D3), lambda j: (0, 0)),   # w3
                pl.BlockSpec((1, D3), lambda j: (0, 0)),    # b3
                pl.BlockSpec((D3, tn), lambda j: (0, j)),   # w4 slice (streamed)
                pl.BlockSpec((1, tn), lambda j: (0, j)),    # b4 slice
            ],
            out_specs=pl.BlockSpec((M, tn), lambda j: (0, j)),
        ),
        compiler_params=pltpu.CompilerParams(
            dimension_semantics=("parallel",),
            vmem_limit_bytes=32 << 20,
        ),
    )(xb, w1b, b1r, w2b, b2r, w3b, b3r, w4b, b4r)


def init_params(key):
    """Deterministic synthetic parameters matching the PyTorch module's shapes.

    PyTorch nn.Linear(in, out) has weight (out, in) and bias (out,); weights
    are stored already transposed to (in, out) for the kernel.
    """
    dims = [(4096, 512), (512, 64), (64, 512), (512, 4096)]
    params = []
    for (fan_in, fan_out) in dims:
        key, kw, kb = jax.random.split(key, 3)
        bound = 1.0 / jnp.sqrt(fan_in)
        w = jax.random.uniform(kw, (fan_in, fan_out), jnp.float32, -bound, bound)
        b = jax.random.uniform(kb, (fan_out,), jnp.float32, -bound, bound)
        params.append((w, b))
    return params


def _reference_forward(batch_image, params):
    """Pure-JAX reference using the identical bf16-weight / f32-acc recipe."""
    h = batch_image
    for (w, b) in params:
        y = jnp.dot(h.astype(jnp.bfloat16), w.astype(jnp.bfloat16),
                    preferred_element_type=jnp.float32)
        h = jnp.maximum(y + b, 0.0)
    return h


if __name__ == "__main__":
    key = jax.random.PRNGKey(0)
    key, kx = jax.random.split(key)

    batch = 2
    batch_image = jax.random.normal(kx, (batch, 4096), dtype=jnp.float32)
    params = init_params(key)

    out = diffusion_model_forward(batch_image, params)
    out = jax.block_until_ready(out)

    ref = _reference_forward(batch_image, params)
    assert out.shape == (batch, 4096)
    assert out.dtype == jnp.float32
    assert jnp.allclose(out, ref, atol=1e-2, rtol=1e-2), float(
        jnp.max(jnp.abs(out - ref)))

    print("KERNEL_OK")
</pallas_src>

<mosaic_0001>
module attributes {stable_mosaic.version = 11 : i64} {
  func.func @_fused_mlp_kernel(%arg0: i32, %arg1: memref<2x4096xbf16, #tpu.memory_space<vmem>>, %arg2: memref<4096x512xbf16, #tpu.memory_space<vmem>>, %arg3: memref<1x512xf32, #tpu.memory_space<vmem>>, %arg4: memref<512x64xbf16, #tpu.memory_space<vmem>>, %arg5: memref<1x64xf32, #tpu.memory_space<vmem>>, %arg6: memref<64x512xbf16, #tpu.memory_space<vmem>>, %arg7: memref<1x512xf32, #tpu.memory_space<vmem>>, %arg8: memref<512x2048xbf16, #tpu.memory_space<vmem>>, %arg9: memref<1x2048xf32, #tpu.memory_space<vmem>>, %arg10: memref<2x2048xf32, #tpu.memory_space<vmem>>) attributes {dimension_semantics = [#tpu.dimension_semantics<parallel>], iteration_bounds = array<i64: 2>, scalar_prefetch = 0 : i64, scratch_operands = 0 : i64, tpu.core_type = #tpu.core_type<tc>, window_params = [{pipeline_mode = #tpu.pipeline_mode<synchronous>, transform_indices = @transform_0, window_bounds = array<i64: 2, 4096>}, {pipeline_mode = #tpu.pipeline_mode<synchronous>, transform_indices = @transform_1, window_bounds = array<i64: 4096, 512>}, {pipeline_mode = #tpu.pipeline_mode<synchronous>, transform_indices = @transform_2, window_bounds = array<i64: 1, 512>}, {pipeline_mode = #tpu.pipeline_mode<synchronous>, transform_indices = @transform_3, window_bounds = array<i64: 512, 64>}, {pipeline_mode = #tpu.pipeline_mode<synchronous>, transform_indices = @transform_4, window_bounds = array<i64: 1, 64>}, {pipeline_mode = #tpu.pipeline_mode<synchronous>, transform_indices = @transform_5, window_bounds = array<i64: 64, 512>}, {pipeline_mode = #tpu.pipeline_mode<synchronous>, transform_indices = @transform_6, window_bounds = array<i64: 1, 512>}, {transform_indices = @transform_7, window_bounds = array<i64: 512, 2048>}, {transform_indices = @transform_8, window_bounds = array<i64: 1, 2048>}, {transform_indices = @transform_9, window_bounds = array<i64: 2, 2048>}]} {
    %c0 = arith.constant 0 : index
    %c0_0 = arith.constant 0 : index
    %0 = vector.load %arg1[%c0, %c0_0] : memref<2x4096xbf16, #tpu.memory_space<vmem>>, vector<2x4096xbf16>
    %c0_1 = arith.constant 0 : index
    %c0_2 = arith.constant 0 : index
    %1 = vector.load %arg2[%c0_1, %c0_2] : memref<4096x512xbf16, #tpu.memory_space<vmem>>, vector<4096x512xbf16>
    %cst = arith.constant dense<0.000000e+00> : vector<2x512xf32>
    %2 = tpu.matmul %0, %1, %cst {dimension_numbers = #tpu.dot_dimension_numbers<[1], [0], [0], [1], [0, 0, 1, 1], [], []>} : vector<2x4096xbf16>, vector<4096x512xbf16>, vector<2x512xf32> -> vector<2x512xf32>
    %c0_3 = arith.constant 0 : index
    %c0_4 = arith.constant 0 : index
    %3 = vector.load %arg3[%c0_3, %c0_4] : memref<1x512xf32, #tpu.memory_space<vmem>>, vector<1x512xf32>
    %4 = vector.broadcast %3 : vector<1x512xf32> to vector<2x512xf32>
    %5 = arith.addf %2, %4 : vector<2x512xf32>
    %cst_5 = arith.constant 0.000000e+00 : f32
    %6 = vector.broadcast %cst_5 : f32 to vector<2x512xf32>
    %7 = arith.maximumf %5, %6 : vector<2x512xf32>
    %8 = arith.truncf %7 : vector<2x512xf32> to vector<2x512xbf16>
    %c0_6 = arith.constant 0 : index
    %c0_7 = arith.constant 0 : index
    %9 = vector.load %arg4[%c0_6, %c0_7] : memref<512x64xbf16, #tpu.memory_space<vmem>>, vector<512x64xbf16>
    %cst_8 = arith.constant dense<0.000000e+00> : vector<2x64xf32>
    %10 = tpu.matmul %8, %9, %cst_8 {dimension_numbers = #tpu.dot_dimension_numbers<[1], [0], [0], [1], [0, 0, 1, 1], [], []>} : vector<2x512xbf16>, vector<512x64xbf16>, vector<2x64xf32> -> vector<2x64xf32>
    %c0_9 = arith.constant 0 : index
    %c0_10 = arith.constant 0 : index
    %11 = vector.load %arg5[%c0_9, %c0_10] : memref<1x64xf32, #tpu.memory_space<vmem>>, vector<1x64xf32>
    %12 = vector.broadcast %11 : vector<1x64xf32> to vector<2x64xf32>
    %13 = arith.addf %10, %12 : vector<2x64xf32>
    %cst_11 = arith.constant 0.000000e+00 : f32
    %14 = vector.broadcast %cst_11 : f32 to vector<2x64xf32>
    %15 = arith.maximumf %13, %14 : vector<2x64xf32>
    %16 = arith.truncf %15 : vector<2x64xf32> to vector<2x64xbf16>
    %c0_12 = arith.constant 0 : index
    %c0_13 = arith.constant 0 : index
    %17 = vector.load %arg6[%c0_12, %c0_13] : memref<64x512xbf16, #tpu.memory_space<vmem>>, vector<64x512xbf16>
    %cst_14 = arith.constant dense<0.000000e+00> : vector<2x512xf32>
    %18 = tpu.matmul %16, %17, %cst_14 {dimension_numbers = #tpu.dot_dimension_numbers<[1], [0], [0], [1], [0, 0, 1, 1], [], []>} : vector<2x64xbf16>, vector<64x512xbf16>, vector<2x512xf32> -> vector<2x512xf32>
    %c0_15 = arith.constant 0 : index
    %c0_16 = arith.constant 0 : index
    %19 = vector.load %arg7[%c0_15, %c0_16] : memref<1x512xf32, #tpu.memory_space<vmem>>, vector<1x512xf32>
    %20 = vector.broadcast %19 : vector<1x512xf32> to vector<2x512xf32>
    %21 = arith.addf %18, %20 : vector<2x512xf32>
    %cst_17 = arith.constant 0.000000e+00 : f32
    %22 = vector.broadcast %cst_17 : f32 to vector<2x512xf32>
    %23 = arith.maximumf %21, %22 : vector<2x512xf32>
    %24 = arith.truncf %23 : vector<2x512xf32> to vector<2x512xbf16>
    %c0_18 = arith.constant 0 : index
    %c0_19 = arith.constant 0 : index
    %25 = vector.load %arg8[%c0_18, %c0_19] : memref<512x2048xbf16, #tpu.memory_space<vmem>>, vector<512x2048xbf16>
    %cst_20 = arith.constant dense<0.000000e+00> : vector<2x2048xf32>
    %26 = tpu.matmul %24, %25, %cst_20 {dimension_numbers = #tpu.dot_dimension_numbers<[1], [0], [0], [1], [0, 0, 1, 1], [], []>} : vector<2x512xbf16>, vector<512x2048xbf16>, vector<2x2048xf32> -> vector<2x2048xf32>
    %c0_21 = arith.constant 0 : index
    %c0_22 = arith.constant 0 : index
    %27 = vector.load %arg9[%c0_21, %c0_22] : memref<1x2048xf32, #tpu.memory_space<vmem>>, vector<1x2048xf32>
    %28 = vector.broadcast %27 : vector<1x2048xf32> to vector<2x2048xf32>
    %29 = arith.addf %26, %28 : vector<2x2048xf32>
    %cst_23 = arith.constant 0.000000e+00 : f32
    %30 = vector.broadcast %cst_23 : f32 to vector<2x2048xf32>
    %31 = arith.maximumf %29, %30 : vector<2x2048xf32>
    %c0_24 = arith.constant 0 : index
    %c0_25 = arith.constant 0 : index
    %32 = vector.load %arg10[%c0_24, %c0_25] : memref<2x2048xf32, #tpu.memory_space<vmem>>, vector<2x2048xf32>
    tpu.vector_store %arg10[%c0_24, %c0_25], %31 {strides = array<i32>} : memref<2x2048xf32, #tpu.memory_space<vmem>>, vector<2x2048xf32>,
    return
  }
  func.func @transform_0(%arg0: i32) -> (i32, i32) {
    %c0_i32 = arith.constant 0 : i32
    %c0_i32_0 = arith.constant 0 : i32
    %c0_i32_1 = arith.constant 0 : i32
    return %c0_i32, %c0_i32_0 : i32, i32
  }
  func.func @transform_1(%arg0: i32) -> (i32, i32) {
    %c0_i32 = arith.constant 0 : i32
    %c0_i32_0 = arith.constant 0 : i32
    %c0_i32_1 = arith.constant 0 : i32
    return %c0_i32, %c0_i32_0 : i32, i32
  }
  func.func @transform_2(%arg0: i32) -> (i32, i32) {
    %c0_i32 = arith.constant 0 : i32
    %c0_i32_0 = arith.constant 0 : i32
    %c0_i32_1 = arith.constant 0 : i32
    return %c0_i32, %c0_i32_0 : i32, i32
  }
  func.func @transform_3(%arg0: i32) -> (i32, i32) {
    %c0_i32 = arith.constant 0 : i32
    %c0_i32_0 = arith.constant 0 : i32
    %c0_i32_1 = arith.constant 0 : i32
    return %c0_i32, %c0_i32_0 : i32, i32
  }
  func.func @transform_4(%arg0: i32) -> (i32, i32) {
    %c0_i32 = arith.constant 0 : i32
    %c0_i32_0 = arith.constant 0 : i32
    %c0_i32_1 = arith.constant 0 : i32
    return %c0_i32, %c0_i32_0 : i32, i32
  }
  func.func @transform_5(%arg0: i32) -> (i32, i32) {
    %c0_i32 = arith.constant 0 : i32
    %c0_i32_0 = arith.constant 0 : i32
    %c0_i32_1 = arith.constant 0 : i32
    return %c0_i32, %c0_i32_0 : i32, i32
  }
  func.func @transform_6(%arg0: i32) -> (i32, i32) {
    %c0_i32 = arith.constant 0 : i32
    %c0_i32_0 = arith.constant 0 : i32
    %c0_i32_1 = arith.constant 0 : i32
    return %c0_i32, %c0_i32_0 : i32, i32
  }
  func.func @transform_7(%arg0: i32) -> (i32, i32) {
    %c0_i32 = arith.constant 0 : i32
    %c0_i32_0 = arith.constant 0 : i32
    return %c0_i32, %arg0 : i32, i32
  }
  func.func @transform_8(%arg0: i32) -> (i32, i32) {
    %c0_i32 = arith.constant 0 : i32
    %c0_i32_0 = arith.constant 0 : i32
    return %c0_i32, %arg0 : i32, i32
  }
  func.func @transform_9(%arg0: i32) -> (i32, i32) {
    %c0_i32 = arith.constant 0 : i32
    %c0_i32_0 = arith.constant 0 : i32
    return %c0_i32, %arg0 : i32, i32
  }
}

</mosaic_0001>

<bundles_post_ra>
// kernel: diffusion_model_forward.1
= control target key start
LH: loop header
LB: loop body
LE: loop exit
PB: predicated region body
PF: predicated region fallthrough
CT: control target
= control target key end

     0   :  { %14 = vsyncpa [#allocation4], 0  ;;  %s22406_s0 = inlined_call_operand.vmem [shape: bf16[2,4096], index: 0, kind: input, shape index: {}]   ;;  %s22407_s1 = inlined_call_operand.vmem [shape: bf16[4096,512], index: 1, kind: input, shape index: {}]   ;;  %s22408_s2 = inlined_call_operand.vmem [shape: f32[1,512], index: 2, kind: input, shape index: {}]   ;;  %s22409_s3 = inlined_call_operand.vmem [shape: bf16[512,64], index: 3, kind: input, shape index: {}]   ;;  %s22410_s4 = inlined_call_operand.vmem [shape: f32[1,64], index: 4, kind: input, shape index: {}]   ;;  %s22411_s5 = inlined_call_operand.vmem [shape: bf16[64,512], index: 5, kind: input, shape index: {}]   ;;  %s22412_s6 = inlined_call_operand.vmem [shape: f32[1,512], index: 6, kind: input, shape index: {}]   ;;  %s22413_s7 = inlined_call_operand.vmem [shape: bf16[512,4096], index: 7, kind: input, shape index: {}]   ;;  %s22414_s8 = inlined_call_operand.vmem [shape: f32[1,4096], index: 8, kind: input, shape index: {}]   ;;  %s22415_s9 = inlined_call_operand.hbm [shape: f32[2,4096], index: 9, kind: output, shape index: {}]  }
   0x1   :  { %16 = vsyncpa [#allocation4 + $0x1], 0  ;;  %s17087_s30 = smov 0   ;;  %s17089_s10 = smov 0  }
   0x2   :  { %s17091_s11 = smov 0   ;;  %s17093_s12 = smov 0  }
   0x3 LB: > { %s17108_s13 = sadd.s32 4294967295, %s17031_s12   ;;  %s13683_s14 = sadd.s32 4294967294, %s17031_s12   ;;  %s17031_s12 = sphi %s17093_s12, %s22423_s12   ;;  %s17027_s11 = sphi %s17091_s11, %s22422_s11   ;;  %s17023_s10 = sphi %s17089_s10, %s22421_s10   ;;  %s17019_s30 = sphi %s17087_s30, %s22420_s30  }
   0x4   : > { %s17112_s15 = sadd.s32 1, %s17031_s12   ;;  %s176_s16 = sadd.s32 1, %s17027_s11 }
   0x5   : > { %s173_s17 = ssub.s32 %s17031_s12, %s17112_s15  ;;  %p183_p0 = scmp.ne.s32.totalorder %s17027_s11, %s17023_s10 }
   0x6   : > { %p174_p1 = scmp.eq.s32.totalorder %s173_s17, 0  ;;  %p184_p2 = scmp.eq.s32.totalorder %s17031_s12, 0 }
   0x7   : > { %p239_p3 = scmp.eq.s32.totalorder %s17108_s13, 1  ;;  %p244_p4 = scmp.ne.s32.totalorder %s17023_s10, %s17019_s30 }
   0x8   : > { %s17124_s18 = scalar_select %p174_p1, %s17027_s11, %s176_s16  }
   0x9   : > { %p185_p5 = por %p184_p2, %p183_p0  ;;  %p17126_p6 = por %p239_p3, %p183_p0 }
   0xa   : > { %p245_p7 = scmp.eq.s32.totalorder %s13683_s14, 1  ;;  %p22416_p9 = scmp.ge.s32.totalorder %s17031_s12, 2 }
   0xc   : > { %p17130_p8 = por %p245_p7, %p244_p4  ;;  %282 = sbr.rel (%p22416_p9) target bundleno = 277 (0x115), region = 44 }
  0x11   : > { %285 = sbr.rel (!%p185_p5) target bundleno = 277 (0x115), region = 48  ;;  %s287_s21 = sand.u32 (%p185_p5), 1, %s17027_s11  }
  0x12   : > { %s15285_s22 = sshll.u32 (%p185_p5), %s17031_s12, 6  ;;  %s13686_s23 = sshll.u32 (%p185_p5), %s287_s21, 12 }
  0x13   : > { %s17142_s26 = scalar_lea.vmem (%p185_p5), %s22413_s7, %s15285_s22  ;;  %s17147_s27 = scalar_lea.vmem (%p185_p5), [#allocation2], %s13686_s23 }
  0x14   : > { %v305_v0 = vld [vmem:[%s17142_s26] sm:$0xff] (%p185_p5)  ;;  %v307_v1 = vld [vmem:[%s17142_s26 + $0x8] sm:$0xff] (%p185_p5)  ;;  %v309_v2 = vld [vmem:[%s17142_s26 + $0x10] sm:$0xff] (%p185_p5) }
  0x15   : > { %306 = vst [vmem:[%s17147_s27] sm:$0xff] (%p185_p5), %v305_v0  ;;  %308 = vst [vmem:[%s17147_s27 + $0x8] sm:$0xff] (%p185_p5), %v307_v1  ;;  %v311_v3 = vld [vmem:[%s17142_s26 + $0x18] sm:$0xff] (%p185_p5)  ;;  %v313_v4 = vld [vmem:[%s17142_s26 + $0x20] sm:$0xff] (%p185_p5) }
  0x16   : > { %310 = vst [vmem:[%s17147_s27 + $0x10] sm:$0xff] %v309_v2  ;;  %v315_v5 = vld [vmem:[%s17142_s26 + $0x28] sm:$0xff]  ;;  %312 = vst [vmem:[%s17147_s27 + $0x18] sm:$0xff] %v311_v3  ;;  %v317_v6 = vld [vmem:[%s17142_s26 + $0x30] sm:$0xff] }
  0x17   : > { %314 = vst [vmem:[%s17147_s27 + $0x20] sm:$0xff] %v313_v4  ;;  %316 = vst [vmem:[%s17147_s27 + $0x28] sm:$0xff] %v315_v5  ;;  %v319_v7 = vld [vmem:[%s17142_s26 + $0x38] sm:$0xff]  ;;  %v321_v8 = vld [vmem:[%s17142_s26 + $0x80] sm:$0xff] }
  0x18   : > { %318 = vst [vmem:[%s17147_s27 + $0x30] sm:$0xff] %v317_v6  ;;  %320 = vst [vmem:[%s17147_s27 + $0x38] sm:$0xff] %v319_v7  ;;  %v323_v9 = vld [vmem:[%s17142_s26 + $0x88] sm:$0xff]  ;;  %v325_v10 = vld [vmem:[%s17142_s26 + $0x90] sm:$0xff] }
  0x19   : > { %322 = vst [vmem:[%s17147_s27 + $0x40] sm:$0xff] %v321_v8  ;;  %v327_v11 = vld [vmem:[%s17142_s26 + $0x98] sm:$0xff]  ;;  %324 = vst [vmem:[%s17147_s27 + $0x48] sm:$0xff] %v323_v9  ;;  %v329_v12 = vld [vmem:[%s17142_s26 + $0xa0] sm:$0xff] }
  0x1a   : > { %326 = vst [vmem:[%s17147_s27 + $0x50] sm:$0xff] %v325_v10  ;;  %328 = vst [vmem:[%s17147_s27 + $0x58] sm:$0xff] %v327_v11  ;;  %v331_v13 = vld [vmem:[%s17142_s26 + $0xa8] sm:$0xff]  ;;  %v333_v14 = vld [vmem:[%s17142_s26 + $0xb0] sm:$0xff] }
  0x1b   : > { %330 = vst [vmem:[%s17147_s27 + $0x60] sm:$0xff] %v329_v12  ;;  %332 = vst [vmem:[%s17147_s27 + $0x68] sm:$0xff] %v331_v13  ;;  %v335_v15 = vld [vmem:[%s17142_s26 + $0xb8] sm:$0xff]  ;;  %v337_v16 = vld [vmem:[%s17142_s26 + $0x100] sm:$0xff] }
  0x1c   : > { %334 = vst [vmem:[%s17147_s27 + $0x70] sm:$0xff] %v333_v14  ;;  %v339_v17 = vld [vmem:[%s17142_s26 + $0x108] sm:$0xff]  ;;  %336 = vst [vmem:[%s17147_s27 + $0x78] sm:$0xff] %v335_v15  ;;  %v341_v18 = vld [vmem:[%s17142_s26 + $0x110] sm:$0xff] }
  0x1d   : > { %338 = vst [vmem:[%s17147_s27 + $0x80] sm:$0xff] %v337_v16  ;;  %340 = vst [vmem:[%s17147_s27 + $0x88] sm:$0xff] %v339_v17  ;;  %v343_v19 = vld [vmem:[%s17142_s26 + $0x118] sm:$0xff]  ;;  %v345_v20 = vld [vmem:[%s17142_s26 + $0x120] sm:$0xff] }
  0x1e   : > { %342 = vst [vmem:[%s17147_s27 + $0x90] sm:$0xff] %v341_v18  ;;  %344 = vst [vmem:[%s17147_s27 + $0x98] sm:$0xff] %v343_v19  ;;  %v347_v21 = vld [vmem:[%s17142_s26 + $0x128] sm:$0xff]  ;;  %v349_v22 = vld [vmem:[%s17142_s26 + $0x130] sm:$0xff] }
  0x1f   : > { %346 = vst [vmem:[%s17147_s27 + $0xa0] sm:$0xff] %v345_v20  ;;  %v351_v23 = vld [vmem:[%s17142_s26 + $0x138] sm:$0xff]  ;;  %348 = vst [vmem:[%s17147_s27 + $0xa8] sm:$0xff] %v347_v21  ;;  %v353_v24 = vld [vmem:[%s17142_s26 + $0x180] sm:$0xff] }
  0x20   : > { %350 = vst [vmem:[%s17147_s27 + $0xb0] sm:$0xff] %v349_v22  ;;  %352 = vst [vmem:[%s17147_s27 + $0xb8] sm:$0xff] %v351_v23  ;;  %v355_v25 = vld [vmem:[%s17142_s26 + $0x188] sm:$0xff]  ;;  %v357_v26 = vld [vmem:[%s17142_s26 + $0x190] sm:$0xff] }
  0x21   : > { %354 = vst [vmem:[%s17147_s27 + $0xc0] sm:$0xff] %v353_v24  ;;  %356 = vst [vmem:[%s17147_s27 + $0xc8] sm:$0xff] %v355_v25  ;;  %v359_v27 = vld [vmem:[%s17142_s26 + $0x198] sm:$0xff]  ;;  %v361_v28 = vld [vmem:[%s17142_s26 + $0x1a0] sm:$0xff] }
  0x22   : > { %358 = vst [vmem:[%s17147_s27 + $0xd0] sm:$0xff] %v357_v26  ;;  %v363_v29 = vld [vmem:[%s17142_s26 + $0x1a8] sm:$0xff]  ;;  %360 = vst [vmem:[%s17147_s27 + $0xd8] sm:$0xff] %v359_v27  ;;  %v365_v30 = vld [vmem:[%s17142_s26 + $0x1b0] sm:$0xff] }
  0x23   : > { %362 = vst [vmem:[%s17147_s27 + $0xe0] sm:$0xff] %v361_v28  ;;  %364 = vst [vmem:[%s17147_s27 + $0xe8] sm:$0xff] %v363_v29  ;;  %v367_v31 = vld [vmem:[%s17142_s26 + $0x1b8] sm:$0xff]  ;;  %v369_v32 = vld [vmem:[%s17142_s26 + $0x200] sm:$0xff] }
  0x24   : > { %366 = vst [vmem:[%s17147_s27 + $0xf0] sm:$0xff] %v365_v30  ;;  %368 = vst [vmem:[%s17147_s27 + $0xf8] sm:$0xff] %v367_v31  ;;  %v371_v33 = vld [vmem:[%s17142_s26 + $0x208] sm:$0xff]  ;;  %v373_v34 = vld [vmem:[%s17142_s26 + $0x210] sm:$0xff] }
  0x25   : > { %370 = vst [vmem:[%s17147_s27 + $0x100] sm:$0xff] %v369_v32  ;;  %v375_v35 = vld [vmem:[%s17142_s26 + $0x218] sm:$0xff]  ;;  %372 = vst [vmem:[%s17147_s27 + $0x108] sm:$0xff] %v371_v33  ;;  %v377_v36 = vld [vmem:[%s17142_s26 + $0x220] sm:$0xff] }
  0x26   : > { %374 = vst [vmem:[%s17147_s27 + $0x110] sm:$0xff] %v373_v34  ;;  %376 = vst [vmem:[%s17147_s27 + $0x118] sm:$0xff] %v375_v35  ;;  %v379_v37 = vld [vmem:[%s17142_s26 + $0x228] sm:$0xff]  ;;  %v381_v38 = vld [vmem:[%s17142_s26 + $0x230] sm:$0xff] }
  0x27   : > { %378 = vst [vmem:[%s17147_s27 + $0x120] sm:$0xff] %v377_v36  ;;  %380 = vst [vmem:[%s17147_s27 + $0x128] sm:$0xff] %v379_v37  ;;  %v383_v39 = vld [vmem:[%s17142_s26 + $0x238] sm:$0xff]  ;;  %v385_v40 = vld [vmem:[%s17142_s26 + $0x280] sm:$0xff] }
  0x28   : > { %382 = vst [vmem:[%s17147_s27 + $0x130] sm:$0xff] %v381_v38  ;;  %v387_v41 = vld [vmem:[%s17142_s26 + $0x288] sm:$0xff]  ;;  %384 = vst [vmem:[%s17147_s27 + $0x138] sm:$0xff] %v383_v39  ;;  %v389_v42 = vld [vmem:[%s17142_s26 + $0x290] sm:$0xff] }
  0x29   : > { %386 = vst [vmem:[%s17147_s27 + $0x140] sm:$0xff] %v385_v40  ;;  %388 = vst [vmem:[%s17147_s27 + $0x148] sm:$0xff] %v387_v41  ;;  %v391_v43 = vld [vmem:[%s17142_s26 + $0x298] sm:$0xff]  ;;  %v393_v44 = vld [vmem:[%s17142_s26 + $0x2a0] sm:$0xff] }
  0x2a   : > { %390 = vst [vmem:[%s17147_s27 + $0x150] sm:$0xff] %v389_v42  ;;  %392 = vst [vmem:[%s17147_s27 + $0x158] sm:$0xff] %v391_v43  ;;  %v395_v45 = vld [vmem:[%s17142_s26 + $0x2a8] sm:$0xff]  ;;  %v397_v46 = vld [vmem:[%s17142_s26 + $0x2b0] sm:$0xff] }
  0x2b   : > { %394 = vst [vmem:[%s17147_s27 + $0x160] sm:$0xff] %v393_v44  ;;  %v399_v47 = vld [vmem:[%s17142_s26 + $0x2b8] sm:$0xff]  ;;  %396 = vst [vmem:[%s17147_s27 + $0x168] sm:$0xff] %v395_v45  ;;  %v401_v48 = vld [vmem:[%s17142_s26 + $0x300] sm:$0xff] }
  0x2c   : > { %398 = vst [vmem:[%s17147_s27 + $0x170] sm:$0xff] %v397_v46  ;;  %400 = vst [vmem:[%s17147_s27 + $0x178] sm:$0xff] %v399_v47  ;;  %v403_v49 = vld [vmem:[%s17142_s26 + $0x308] sm:$0xff]  ;;  %v405_v50 = vld [vmem:[%s17142_s26 + $0x310] sm:$0xff] }
  0x2d   : > { %402 = vst [vmem:[%s17147_s27 + $0x180] sm:$0xff] %v401_v48  ;;  %404 = vst [vmem:[%s17147_s27 + $0x188] sm:$0xff] %v403_v49  ;;  %v407_v51 = vld [vmem:[%s17142_s26 + $0x318] sm:$0xff]  ;;  %v409_v52 = vld [vmem:[%s17142_s26 + $0x320] sm:$0xff] }
  0x2e   : > { %406 = vst [vmem:[%s17147_s27 + $0x190] sm:$0xff] %v405_v50  ;;  %v411_v53 = vld [vmem:[%s17142_s26 + $0x328] sm:$0xff]  ;;  %408 = vst [vmem:[%s17147_s27 + $0x198] sm:$0xff] %v407_v51  ;;  %v413_v54 = vld [vmem:[%s17142_s26 + $0x330] sm:$0xff] }
  0x2f   : > { %410 = vst [vmem:[%s17147_s27 + $0x1a0] sm:$0xff] %v409_v52  ;;  %412 = vst [vmem:[%s17147_s27 + $0x1a8] sm:$0xff] %v411_v53  ;;  %v415_v55 = vld [vmem:[%s17142_s26 + $0x338] sm:$0xff]  ;;  %v417_v56 = vld [vmem:[%s17142_s26 + $0x380] sm:$0xff] }
  0x30   : > { %414 = vst [vmem:[%s17147_s27 + $0x1b0] sm:$0xff] %v413_v54  ;;  %416 = vst [vmem:[%s17147_s27 + $0x1b8] sm:$0xff] %v415_v55  ;;  %v419_v57 = vld [vmem:[%s17142_s26 + $0x388] sm:$0xff]  ;;  %v421_v58 = vld [vmem:[%s17142_s26 + $0x390] sm:$0xff] }
  0x31   : > { %418 = vst [vmem:[%s17147_s27 + $0x1c0] sm:$0xff] %v417_v56  ;;  %v423_v59 = vld [vmem:[%s17142_s26 + $0x398] sm:$0xff]  ;;  %420 = vst [vmem:[%s17147_s27 + $0x1c8] sm:$0xff] %v419_v57  ;;  %v425_v60 = vld [vmem:[%s17142_s26 + $0x3a0] sm:$0xff] }
  0x32   : > { %422 = vst [vmem:[%s17147_s27 + $0x1d0] sm:$0xff] %v421_v58  ;;  %424 = vst [vmem:[%s17147_s27 + $0x1d8] sm:$0xff] %v423_v59  ;;  %v427_v61 = vld [vmem:[%s17142_s26 + $0x3a8] sm:$0xff]  ;;  %v429_v62 = vld [vmem:[%s17142_s26 + $0x3b0] sm:$0xff] }
  0x33   : > { %426 = vst [vmem:[%s17147_s27 + $0x1e0] sm:$0xff] %v425_v60  ;;  %428 = vst [vmem:[%s17147_s27 + $0x1e8] sm:$0xff] %v427_v61  ;;  %v431_v63 = vld [vmem:[%s17142_s26 + $0x3b8] sm:$0xff]  ;;  %v433_v0 = vld [vmem:[%s17142_s26 + $0x400] sm:$0xff] }
  0x34   : > { %430 = vst [vmem:[%s17147_s27 + $0x1f0] sm:$0xff] %v429_v62  ;;  %v435_v1 = vld [vmem:[%s17142_s26 + $0x408] sm:$0xff]  ;;  %432 = vst [vmem:[%s17147_s27 + $0x1f8] sm:$0xff] %v431_v63  ;;  %v437_v2 = vld [vmem:[%s17142_s26 + $0x410] sm:$0xff] }
  0x35   : > { %434 = vst [vmem:[%s17147_s27 + $0x200] sm:$0xff] %v433_v0  ;;  %436 = vst [vmem:[%s17147_s27 + $0x208] sm:$0xff] %v435_v1  ;;  %v439_v3 = vld [vmem:[%s17142_s26 + $0x418] sm:$0xff]  ;;  %v441_v4 = vld [vmem:[%s17142_s26 + $0x420] sm:$0xff] }
  0x36   : > { %438 = vst [vmem:[%s17147_s27 + $0x210] sm:$0xff] %v437_v2  ;;  %440 = vst [vmem:[%s17147_s27 + $0x218] sm:$0xff] %v439_v3  ;;  %v443_v5 = vld [vmem:[%s17142_s26 + $0x428] sm:$0xff]  ;;  %v445_v6 = vld [vmem:[%s17142_s26 + $0x430] sm:$0xff] }
  0x37   : > { %442 = vst [vmem:[%s17147_s27 + $0x220] sm:$0xff] %v441_v4  ;;  %v447_v7 = vld [vmem:[%s17142_s26 + $0x438] sm:$0xff]  ;;  %444 = vst [vmem:[%s17147_s27 + $0x228] sm:$0xff] %v443_v5  ;;  %v449_v8 = vld [vmem:[%s17142_s26 + $0x480] sm:$0xff] }
  0x38   : > { %446 = vst [vmem:[%s17147_s27 + $0x230] sm:$0xff] %v445_v6  ;;  %448 = vst [vmem:[%s17147_s27 + $0x238] sm:$0xff] %v447_v7  ;;  %v451_v9 = vld [vmem:[%s17142_s26 + $0x488] sm:$0xff]  ;;  %v453_v10 = vld [vmem:[%s17142_s26 + $0x490] sm:$0xff] }
  0x39   : > { %450 = vst [vmem:[%s17147_s27 + $0x240] sm:$0xff] %v449_v8  ;;  %452 = vst [vmem:[%s17147_s27 + $0x248] sm:$0xff] %v451_v9  ;;  %v455_v11 = vld [vmem:[%s17142_s26 + $0x498] sm:$0xff]  ;;  %v457_v12 = vld [vmem:[%s17142_s26 + $0x4a0] sm:$0xff] }
  0x3a   : > { %454 = vst [vmem:[%s17147_s27 + $0x250] sm:$0xff] %v453_v10  ;;  %v459_v13 = vld [vmem:[%s17142_s26 + $0x4a8] sm:$0xff]  ;;  %456 = vst [vmem:[%s17147_s27 + $0x258] sm:$0xff] %v455_v11  ;;  %v461_v14 = vld [vmem:[%s17142_s26 + $0x4b0] sm:$0xff] }
  0x3b   : > { %458 = vst [vmem:[%s17147_s27 + $0x260] sm:$0xff] %v457_v12  ;;  %460 = vst [vmem:[%s17147_s27 + $0x268] sm:$0xff] %v459_v13  ;;  %v463_v15 = vld [vmem:[%s17142_s26 + $0x4b8] sm:$0xff]  ;;  %v465_v16 = vld [vmem:[%s17142_s26 + $0x500] sm:$0xff] }
  0x3c   : > { %462 = vst [vmem:[%s17147_s27 + $0x270] sm:$0xff] %v461_v14  ;;  %464 = vst [vmem:[%s17147_s27 + $0x278] sm:$0xff] %v463_v15  ;;  %v467_v17 = vld [vmem:[%s17142_s26 + $0x508] sm:$0xff]  ;;  %v469_v18 = vld [vmem:[%s17142_s26 + $0x510] sm:$0xff] }
  0x3d   : > { %466 = vst [vmem:[%s17147_s27 + $0x280] sm:$0xff] %v465_v16  ;;  %v471_v19 = vld [vmem:[%s17142_s26 + $0x518] sm:$0xff]  ;;  %468 = vst [vmem:[%s17147_s27 + $0x288] sm:$0xff] %v467_v17  ;;  %v473_v20 = vld [vmem:[%s17142_s26 + $0x520] sm:$0xff] }
  0x3e   : > { %470 = vst [vmem:[%s17147_s27 + $0x290] sm:$0xff] %v469_v18  ;;  %472 = vst [vmem:[%s17147_s27 + $0x298] sm:$0xff] %v471_v19  ;;  %v475_v21 = vld [vmem:[%s17142_s26 + $0x528] sm:$0xff]  ;;  %v477_v22 = vld [vmem:[%s17142_s26 + $0x530] sm:$0xff] }
  0x3f   : > { %474 = vst [vmem:[%s17147_s27 + $0x2a0] sm:$0xff] %v473_v20  ;;  %476 = vst [vmem:[%s17147_s27 + $0x2a8] sm:$0xff] %v475_v21  ;;  %v479_v23 = vld [vmem:[%s17142_s26 + $0x538] sm:$0xff]  ;;  %v481_v24 = vld [vmem:[%s17142_s26 + $0x580] sm:$0xff] }
  0x40   : > { %478 = vst [vmem:[%s17147_s27 + $0x2b0] sm:$0xff] %v477_v22  ;;  %v483_v25 = vld [vmem:[%s17142_s26 + $0x588] sm:$0xff]  ;;  %480 = vst [vmem:[%s17147_s27 + $0x2b8] sm:$0xff] %v479_v23  ;;  %v485_v26 = vld [vmem:[%s17142_s26 + $0x590] sm:$0xff] }
  0x41   : > { %482 = vst [vmem:[%s17147_s27 + $0x2c0] sm:$0xff] %v481_v24  ;;  %484 = vst [vmem:[%s17147_s27 + $0x2c8] sm:$0xff] %v483_v25  ;;  %v487_v27 = vld [vmem:[%s17142_s26 + $0x598] sm:$0xff]  ;;  %v489_v28 = vld [vmem:[%s17142_s26 + $0x5a0] sm:$0xff] }
  0x42   : > { %486 = vst [vmem:[%s17147_s27 + $0x2d0] sm:$0xff] %v485_v26  ;;  %488 = vst [vmem:[%s17147_s27 + $0x2d8] sm:$0xff] %v487_v27  ;;  %v491_v29 = vld [vmem:[%s17142_s26 + $0x5a8] sm:$0xff]  ;;  %v493_v30 = vld [vmem:[%s17142_s26 + $0x5b0] sm:$0xff] }
  0x43   : > { %490 = vst [vmem:[%s17147_s27 + $0x2e0] sm:$0xff] %v489_v28  ;;  %v495_v31 = vld [vmem:[%s17142_s26 + $0x5b8] sm:$0xff]  ;;  %492 = vst [vmem:[%s17147_s27 + $0x2e8] sm:$0xff] %v491_v29  ;;  %v497_v32 = vld [vmem:[%s17142_s26 + $0x600] sm:$0xff] }
  0x44   : > { %494 = vst [vmem:[%s17147_s27 + $0x2f0] sm:$0xff] %v493_v30  ;;  %496 = vst [vmem:[%s17147_s27 + $0x2f8] sm:$0xff] %v495_v31  ;;  %v499_v33 = vld [vmem:[%s17142_s26 + $0x608] sm:$0xff]  ;;  %v501_v34 = vld [vmem:[%s17142_s26 + $0x610] sm:$0xff] }
  0x45   : > { %498 = vst [vmem:[%s17147_s27 + $0x300] sm:$0xff] %v497_v32  ;;  %500 = vst [vmem:[%s17147_s27 + $0x308] sm:$0xff] %v499_v33  ;;  %v503_v35 = vld [vmem:[%s17142_s26 + $0x618] sm:$0xff]  ;;  %v505_v36 = vld [vmem:[%s17142_s26 + $0x620] sm:$0xff] }
  0x46   : > { %502 = vst [vmem:[%s17147_s27 + $0x310] sm:$0xff] %v501_v34  ;;  %v507_v37 = vld [vmem:[%s17142_s26 + $0x628] sm:$0xff]  ;;  %504 = vst [vmem:[%s17147_s27 + $0x318] sm:$0xff] %v503_v35  ;;  %v509_v38 = vld [vmem:[%s17142_s26 + $0x630] sm:$0xff] }
  0x47   : > { %506 = vst [vmem:[%s17147_s27 + $0x320] sm:$0xff] %v505_v36  ;;  %508 = vst [vmem:[%s17147_s27 + $0x328] sm:$0xff] %v507_v37  ;;  %v511_v39 = vld [vmem:[%s17142_s26 + $0x638] sm:$0xff]  ;;  %v513_v40 = vld [vmem:[%s17142_s26 + $0x680] sm:$0xff] }
  0x48   : > { %510 = vst [vmem:[%s17147_s27 + $0x330] sm:$0xff] %v509_v38  ;;  %512 = vst [vmem:[%s17147_s27 + $0x338] sm:$0xff] %v511_v39  ;;  %v515_v41 = vld [vmem:[%s17142_s26 + $0x688] sm:$0xff]  ;;  %v517_v42 = vld [vmem:[%s17142_s26 + $0x690] sm:$0xff] }
  0x49   : > { %514 = vst [vmem:[%s17147_s27 + $0x340] sm:$0xff] %v513_v40  ;;  %v519_v43 = vld [vmem:[%s17142_s26 + $0x698] sm:$0xff]  ;;  %516 = vst [vmem:[%s17147_s27 + $0x348] sm:$0xff] %v515_v41  ;;  %v521_v44 = vld [vmem:[%s17142_s26 + $0x6a0] sm:$0xff] }
  0x4a   : > { %518 = vst [vmem:[%s17147_s27 + $0x350] sm:$0xff] %v517_v42  ;;  %520 = vst [vmem:[%s17147_s27 + $0x358] sm:$0xff] %v519_v43  ;;  %v523_v45 = vld [vmem:[%s17142_s26 + $0x6a8] sm:$0xff]  ;;  %v525_v46 = vld [vmem:[%s17142_s26 + $0x6b0] sm:$0xff] }
  0x4b   : > { %522 = vst [vmem:[%s17147_s27 + $0x360] sm:$0xff] %v521_v44  ;;  %524 = vst [vmem:[%s17147_s27 + $0x368] sm:$0xff] %v523_v45  ;;  %v527_v47 = vld [vmem:[%s17142_s26 + $0x6b8] sm:$0xff]  ;;  %v529_v48 = vld [vmem:[%s17142_s26 + $0x700] sm:$0xff] }
  0x4c   : > { %526 = vst [vmem:[%s17147_s27 + $0x370] sm:$0xff] %v525_v46  ;;  %v531_v49 = vld [vmem:[%s17142_s26 + $0x708] sm:$0xff]  ;;  %528 = vst [vmem:[%s17147_s27 + $0x378] sm:$0xff] %v527_v47  ;;  %v533_v50 = vld [vmem:[%s17142_s26 + $0x710] sm:$0xff] }
  0x4d   : > { %530 = vst [vmem:[%s17147_s27 + $0x380] sm:$0xff] %v529_v48  ;;  %532 = vst [vmem:[%s17147_s27 + $0x388] sm:$0xff] %v531_v49  ;;  %v535_v51 = vld [vmem:[%s17142_s26 + $0x718] sm:$0xff]  ;;  %v537_v52 = vld [vmem:[%s17142_s26 + $0x720] sm:$0xff] }
  0x4e   : > { %534 = vst [vmem:[%s17147_s27 + $0x390] sm:$0xff] %v533_v50  ;;  %536 = vst [vmem:[%s17147_s27 + $0x398] sm:$0xff] %v535_v51  ;;  %v539_v53 = vld [vmem:[%s17142_s26 + $0x728] sm:$0xff]  ;;  %v541_v54 = vld [vmem:[%s17142_s26 + $0x730] sm:$0xff] }
  0x4f   : > { %538 = vst [vmem:[%s17147_s27 + $0x3a0] sm:$0xff] %v537_v52  ;;  %v543_v55 = vld [vmem:[%s17142_s26 + $0x738] sm:$0xff]  ;;  %540 = vst [vmem:[%s17147_s27 + $0x3a8] sm:$0xff] %v539_v53  ;;  %v545_v56 = vld [vmem:[%s17142_s26 + $0x780] sm:$0xff] }
  0x50   : > { %542 = vst [vmem:[%s17147_s27 + $0x3b0] sm:$0xff] %v541_v54  ;;  %544 = vst [vmem:[%s17147_s27 + $0x3b8] sm:$0xff] %v543_v55  ;;  %v547_v57 = vld [vmem:[%s17142_s26 + $0x788] sm:$0xff]  ;;  %v549_v58 = vld [vmem:[%s17142_s26 + $0x790] sm:$0xff] }
  0x51   : > { %546 = vst [vmem:[%s17147_s27 + $0x3c0] sm:$0xff] %v545_v56  ;;  %548 = vst [vmem:[%s17147_s27 + $0x3c8] sm:$0xff] %v547_v57  ;;  %v551_v59 = vld [vmem:[%s17142_s26 + $0x798] sm:$0xff]  ;;  %v553_v60 = vld [vmem:[%s17142_s26 + $0x7a0] sm:$0xff] }
  0x52   : > { %550 = vst [vmem:[%s17147_s27 + $0x3d0] sm:$0xff] %v549_v58  ;;  %v555_v61 = vld [vmem:[%s17142_s26 + $0x7a8] sm:$0xff]  ;;  %552 = vst [vmem:[%s17147_s27 + $0x3d8] sm:$0xff] %v551_v59  ;;  %v557_v62 = vld [vmem:[%s17142_s26 + $0x7b0] sm:$0xff] }
  0x53   : > { %554 = vst [vmem:[%s17147_s27 + $0x3e0] sm:$0xff] %v553_v60  ;;  %556 = vst [vmem:[%s17147_s27 + $0x3e8] sm:$0xff] %v555_v61  ;;  %v559_v63 = vld [vmem:[%s17142_s26 + $0x7b8] sm:$0xff]  ;;  %v561_v0 = vld [vmem:[%s17142_s26 + $0x800] sm:$0xff] }
  0x54   : > { %558 = vst [vmem:[%s17147_s27 + $0x3f0] sm:$0xff] %v557_v62  ;;  %560 = vst [vmem:[%s17147_s27 + $0x3f8] sm:$0xff] %v559_v63  ;;  %v563_v1 = vld [vmem:[%s17142_s26 + $0x808] sm:$0xff]  ;;  %v565_v2 = vld [vmem:[%s17142_s26 + $0x810] sm:$0xff] }
  0x55   : > { %562 = vst [vmem:[%s17147_s27 + $0x400] sm:$0xff] %v561_v0  ;;  %v567_v3 = vld [vmem:[%s17142_s26 + $0x818] sm:$0xff]  ;;  %564 = vst [vmem:[%s17147_s27 + $0x408] sm:$0xff] %v563_v1  ;;  %v569_v4 = vld [vmem:[%s17142_s26 + $0x820] sm:$0xff] }
  0x56   : > { %566 = vst [vmem:[%s17147_s27 + $0x410] sm:$0xff] %v565_v2  ;;  %568 = vst [vmem:[%s17147_s27 + $0x418] sm:$0xff] %v567_v3  ;;  %v571_v5 = vld [vmem:[%s17142_s26 + $0x828] sm:$0xff]  ;;  %v573_v6 = vld [vmem:[%s17142_s26 + $0x830] sm:$0xff] }
  0x57   : > { %570 = vst [vmem:[%s17147_s27 + $0x420] sm:$0xff] %v569_v4  ;;  %572 = vst [vmem:[%s17147_s27 + $0x428] sm:$0xff] %v571_v5  ;;  %v575_v7 = vld [vmem:[%s17142_s26 + $0x838] sm:$0xff]  ;;  %v577_v8 = vld [vmem:[%s17142_s26 + $0x880] sm:$0xff] }
  0x58   : > { %574 = vst [vmem:[%s17147_s27 + $0x430] sm:$0xff] %v573_v6  ;;  %v579_v9 = vld [vmem:[%s17142_s26 + $0x888] sm:$0xff]  ;;  %576 = vst [vmem:[%s17147_s27 + $0x438] sm:$0xff] %v575_v7  ;;  %v581_v10 = vld [vmem:[%s17142_s26 + $0x890] sm:$0xff] }
  0x59   : > { %578 = vst [vmem:[%s17147_s27 + $0x440] sm:$0xff] %v577_v8  ;;  %580 = vst [vmem:[%s17147_s27 + $0x448] sm:$0xff] %v579_v9  ;;  %v583_v11 = vld [vmem:[%s17142_s26 + $0x898] sm:$0xff]  ;;  %v585_v12 = vld [vmem:[%s17142_s26 + $0x8a0] sm:$0xff] }
  0x5a   : > { %582 = vst [vmem:[%s17147_s27 + $0x450] sm:$0xff] %v581_v10  ;;  %584 = vst [vmem:[%s17147_s27 + $0x458] sm:$0xff] %v583_v11  ;;  %v587_v13 = vld [vmem:[%s17142_s26 + $0x8a8] sm:$0xff]  ;;  %v589_v14 = vld [vmem:[%s17142_s26 + $0x8b0] sm:$0xff] }
  0x5b   : > { %586 = vst [vmem:[%s17147_s27 + $0x460] sm:$0xff] %v585_v12  ;;  %v591_v15 = vld [vmem:[%s17142_s26 + $0x8b8] sm:$0xff]  ;;  %588 = vst [vmem:[%s17147_s27 + $0x468] sm:$0xff] %v587_v13  ;;  %v593_v16 = vld [vmem:[%s17142_s26 + $0x900] sm:$0xff] }
  0x5c   : > { %590 = vst [vmem:[%s17147_s27 + $0x470] sm:$0xff] %v589_v14  ;;  %592 = vst [vmem:[%s17147_s27 + $0x478] sm:$0xff] %v591_v15  ;;  %v595_v17 = vld [vmem:[%s17142_s26 + $0x908] sm:$0xff]  ;;  %v597_v18 = vld [vmem:[%s17142_s26 + $0x910] sm:$0xff] }
  0x5d   : > { %594 = vst [vmem:[%s17147_s27 + $0x480] sm:$0xff] %v593_v16  ;;  %596 = vst [vmem:[%s17147_s27 + $0x488] sm:$0xff] %v595_v17  ;;  %v599_v19 = vld [vmem:[%s17142_s26 + $0x918] sm:$0xff]  ;;  %v601_v20 = vld [vmem:[%s17142_s26 + $0x920] sm:$0xff] }
  0x5e   : > { %598 = vst [vmem:[%s17147_s27 + $0x490] sm:$0xff] %v597_v18  ;;  %v603_v21 = vld [vmem:[%s17142_s26 + $0x928] sm:$0xff]  ;;  %600 = vst [vmem:[%s17147_s27 + $0x498] sm:$0xff] %v599_v19  ;;  %v605_v22 = vld [vmem:[%s17142_s26 + $0x930] sm:$0xff] }
  0x5f   : > { %602 = vst [vmem:[%s17147_s27 + $0x4a0] sm:$0xff] %v601_v20  ;;  %604 = vst [vmem:[%s17147_s27 + $0x4a8] sm:$0xff] %v603_v21  ;;  %v607_v23 = vld [vmem:[%s17142_s26 + $0x938] sm:$0xff]  ;;  %v609_v24 = vld [vmem:[%s17142_s26 + $0x980] sm:$0xff] }
  0x60   : > { %606 = vst [vmem:[%s17147_s27 + $0x4b0] sm:$0xff] %v605_v22  ;;  %608 = vst [vmem:[%s17147_s27 + $0x4b8] sm:$0xff] %v607_v23  ;;  %v611_v25 = vld [vmem:[%s17142_s26 + $0x988] sm:$0xff]  ;;  %v613_v26 = vld [vmem:[%s17142_s26 + $0x990] sm:$0xff] }
  0x61   : > { %610 = vst [vmem:[%s17147_s27 + $0x4c0] sm:$0xff] %v609_v24  ;;  %v615_v27 = vld [vmem:[%s17142_s26 + $0x998] sm:$0xff]  ;;  %612 = vst [vmem:[%s17147_s27 + $0x4c8] sm:$0xff] %v611_v25  ;;  %v617_v28 = vld [vmem:[%s17142_s26 + $0x9a0] sm:$0xff] }
  0x62   : > { %614 = vst [vmem:[%s17147_s27 + $0x4d0] sm:$0xff] %v613_v26  ;;  %616 = vst [vmem:[%s17147_s27 + $0x4d8] sm:$0xff] %v615_v27  ;;  %v619_v29 = vld [vmem:[%s17142_s26 + $0x9a8] sm:$0xff]  ;;  %v621_v30 = vld [vmem:[%s17142_s26 + $0x9b0] sm:$0xff] }
  0x63   : > { %618 = vst [vmem:[%s17147_s27 + $0x4e0] sm:$0xff] %v617_v28  ;;  %620 = vst [vmem:[%s17147_s27 + $0x4e8] sm:$0xff] %v619_v29  ;;  %v623_v31 = vld [vmem:[%s17142_s26 + $0x9b8] sm:$0xff]  ;;  %v625_v32 = vld [vmem:[%s17142_s26 + $0xa00] sm:$0xff] }
  0x64   : > { %622 = vst [vmem:[%s17147_s27 + $0x4f0] sm:$0xff] %v621_v30  ;;  %v627_v33 = vld [vmem:[%s17142_s26 + $0xa08] sm:$0xff]  ;;  %624 = vst [vmem:[%s17147_s27 + $0x4f8] sm:$0xff] %v623_v31  ;;  %v629_v34 = vld [vmem:[%s17142_s26 + $0xa10] sm:$0xff] }
  0x65   : > { %626 = vst [vmem:[%s17147_s27 + $0x500] sm:$0xff] %v625_v32  ;;  %628 = vst [vmem:[%s17147_s27 + $0x508] sm:$0xff] %v627_v33  ;;  %v631_v35 = vld [vmem:[%s17142_s26 + $0xa18] sm:$0xff]  ;;  %v633_v36 = vld [vmem:[%s17142_s26 + $0xa20] sm:$0xff] }
  0x66   : > { %630 = vst [vmem:[%s17147_s27 + $0x510] sm:$0xff] %v629_v34  ;;  %632 = vst [vmem:[%s17147_s27 + $0x518] sm:$0xff] %v631_v35  ;;  %v635_v37 = vld [vmem:[%s17142_s26 + $0xa28] sm:$0xff]  ;;  %v637_v38 = vld [vmem:[%s17142_s26 + $0xa30] sm:$0xff] }
  0x67   : > { %634 = vst [vmem:[%s17147_s27 + $0x520] sm:$0xff] %v633_v36  ;;  %v639_v39 = vld [vmem:[%s17142_s26 + $0xa38] sm:$0xff]  ;;  %636 = vst [vmem:[%s17147_s27 + $0x528] sm:$0xff] %v635_v37  ;;  %v641_v40 = vld [vmem:[%s17142_s26 + $0xa80] sm:$0xff] }
  0x68   : > { %638 = vst [vmem:[%s17147_s27 + $0x530] sm:$0xff] %v637_v38  ;;  %640 = vst [vmem:[%s17147_s27 + $0x538] sm:$0xff] %v639_v39  ;;  %v643_v41 = vld [vmem:[%s17142_s26 + $0xa88] sm:$0xff]  ;;  %v645_v42 = vld [vmem:[%s17142_s26 + $0xa90] sm:$0xff] }
  0x69   : > { %642 = vst [vmem:[%s17147_s27 + $0x540] sm:$0xff] %v641_v40  ;;  %644 = vst [vmem:[%s17147_s27 + $0x548] sm:$0xff] %v643_v41  ;;  %v647_v43 = vld [vmem:[%s17142_s26 + $0xa98] sm:$0xff]  ;;  %v649_v44 = vld [vmem:[%s17142_s26 + $0xaa0] sm:$0xff] }
  0x6a   : > { %646 = vst [vmem:[%s17147_s27 + $0x550] sm:$0xff] %v645_v42  ;;  %v651_v45 = vld [vmem:[%s17142_s26 + $0xaa8] sm:$0xff]  ;;  %648 = vst [vmem:[%s17147_s27 + $0x558] sm:$0xff] %v647_v43  ;;  %v653_v46 = vld [vmem:[%s17142_s26 + $0xab0] sm:$0xff] }
  0x6b   : > { %650 = vst [vmem:[%s17147_s27 + $0x560] sm:$0xff] %v649_v44  ;;  %652 = vst [vmem:[%s17147_s27 + $0x568] sm:$0xff] %v651_v45  ;;  %v655_v47 = vld [vmem:[%s17142_s26 + $0xab8] sm:$0xff]  ;;  %v657_v48 = vld [vmem:[%s17142_s26 + $0xb00] sm:$0xff] }
  0x6c   : > { %654 = vst [vmem:[%s17147_s27 + $0x570] sm:$0xff] %v653_v46  ;;  %656 = vst [vmem:[%s17147_s27 + $0x578] sm:$0xff] %v655_v47  ;;  %v659_v49 = vld [vmem:[%s17142_s26 + $0xb08] sm:$0xff]  ;;  %v661_v50 = vld [vmem:[%s17142_s26 + $0xb10] sm:$0xff] }
  0x6d   : > { %658 = vst [vmem:[%s17147_s27 + $0x580] sm:$0xff] %v657_v48  ;;  %v663_v51 = vld [vmem:[%s17142_s26 + $0xb18] sm:$0xff]  ;;  %660 = vst [vmem:[%s17147_s27 + $0x588] sm:$0xff] %v659_v49  ;;  %v665_v52 = vld [vmem:[%s17142_s26 + $0xb20] sm:$0xff] }
  0x6e   : > { %662 = vst [vmem:[%s17147_s27 + $0x590] sm:$0xff] %v661_v50  ;;  %664 = vst [vmem:[%s17147_s27 + $0x598] sm:$0xff] %v663_v51  ;;  %v667_v53 = vld [vmem:[%s17142_s26 + $0xb28] sm:$0xff]  ;;  %v669_v54 = vld [vmem:[%s17142_s26 + $0xb30] sm:$0xff] }
  0x6f   : > { %666 = vst [vmem:[%s17147_s27 + $0x5a0] sm:$0xff] %v665_v52  ;;  %668 = vst [vmem:[%s17147_s27 + $0x5a8] sm:$0xff] %v667_v53  ;;  %v671_v55 = vld [vmem:[%s17142_s26 + $0xb38] sm:$0xff]  ;;  %v673_v56 = vld [vmem:[%s17142_s26 + $0xb80] sm:$0xff] }
  0x70   : > { %670 = vst [vmem:[%s17147_s27 + $0x5b0] sm:$0xff] %v669_v54  ;;  %v675_v57 = vld [vmem:[%s17142_s26 + $0xb88] sm:$0xff]  ;;  %672 = vst [vmem:[%s17147_s27 + $0x5b8] sm:$0xff] %v671_v55  ;;  %v677_v58 = vld [vmem:[%s17142_s26 + $0xb90] sm:$0xff] }
  0x71   : > { %674 = vst [vmem:[%s17147_s27 + $0x5c0] sm:$0xff] %v673_v56  ;;  %676 = vst [vmem:[%s17147_s27 + $0x5c8] sm:$0xff] %v675_v57  ;;  %v679_v59 = vld [vmem:[%s17142_s26 + $0xb98] sm:$0xff]  ;;  %v681_v60 = vld [vmem:[%s17142_s26 + $0xba0] sm:$0xff] }
  0x72   : > { %678 = vst [vmem:[%s17147_s27 + $0x5d0] sm:$0xff] %v677_v58  ;;  %680 = vst [vmem:[%s17147_s27 + $0x5d8] sm:$0xff] %v679_v59  ;;  %v683_v61 = vld [vmem:[%s17142_s26 + $0xba8] sm:$0xff]  ;;  %v685_v62 = vld [vmem:[%s17142_s26 + $0xbb0] sm:$0xff] }
  0x73   : > { %682 = vst [vmem:[%s17147_s27 + $0x5e0] sm:$0xff] %v681_v60  ;;  %v687_v63 = vld [vmem:[%s17142_s26 + $0xbb8] sm:$0xff]  ;;  %684 = vst [vmem:[%s17147_s27 + $0x5e8] sm:$0xff] %v683_v61  ;;  %v689_v0 = vld [vmem:[%s17142_s26 + $0xc00] sm:$0xff] }
  0x74   : > { %686 = vst [vmem:[%s17147_s27 + $0x5f0] sm:$0xff] %v685_v62  ;;  %688 = vst [vmem:[%s17147_s27 + $0x5f8] sm:$0xff] %v687_v63  ;;  %v691_v1 = vld [vmem:[%s17142_s26 + $0xc08] sm:$0xff]  ;;  %v693_v2 = vld [vmem:[%s17142_s26 + $0xc10] sm:$0xff] }
  0x75   : > { %690 = vst [vmem:[%s17147_s27 + $0x600] sm:$0xff] %v689_v0  ;;  %692 = vst [vmem:[%s17147_s27 + $0x608] sm:$0xff] %v691_v1  ;;  %v695_v3 = vld [vmem:[%s17142_s26 + $0xc18] sm:$0xff]  ;;  %v697_v4 = vld [vmem:[%s17142_s26 + $0xc20] sm:$0xff] }
  0x76   : > { %694 = vst [vmem:[%s17147_s27 + $0x610] sm:$0xff] %v693_v2  ;;  %v699_v5 = vld [vmem:[%s17142_s26 + $0xc28] sm:$0xff]  ;;  %696 = vst [vmem:[%s17147_s27 + $0x618] sm:$0xff] %v695_v3  ;;  %v701_v6 = vld [vmem:[%s17142_s26 + $0xc30] sm:$0xff] }
  0x77   : > { %698 = vst [vmem:[%s17147_s27 + $0x620] sm:$0xff] %v697_v4  ;;  %700 = vst [vmem:[%s17147_s27 + $0x628] sm:$0xff] %v699_v5  ;;  %v703_v7 = vld [vmem:[%s17142_s26 + $0xc38] sm:$0xff]  ;;  %v705_v8 = vld [vmem:[%s17142_s26 + $0xc80] sm:$0xff] }
  0x78   : > { %702 = vst [vmem:[%s17147_s27 + $0x630] sm:$0xff] %v701_v6  ;;  %704 = vst [vmem:[%s17147_s27 + $0x638] sm:$0xff] %v703_v7  ;;  %v707_v9 = vld [vmem:[%s17142_s26 + $0xc88] sm:$0xff]  ;;  %v709_v10 = vld [vmem:[%s17142_s26 + $0xc90] sm:$0xff] }
  0x79   : > { %706 = vst [vmem:[%s17147_s27 + $0x640] sm:$0xff] %v705_v8  ;;  %v711_v11 = vld [vmem:[%s17142_s26 + $0xc98] sm:$0xff]  ;;  %708 = vst [vmem:[%s17147_s27 + $0x648] sm:$0xff] %v707_v9  ;;  %v713_v12 = vld [vmem:[%s17142_s26 + $0xca0] sm:$0xff] }
  0x7a   : > { %710 = vst [vmem:[%s17147_s27 + $0x650] sm:$0xff] %v709_v10  ;;  %712 = vst [vmem:[%s17147_s27 + $0x658] sm:$0xff] %v711_v11  ;;  %v715_v13 = vld [vmem:[%s17142_s26 + $0xca8] sm:$0xff]  ;;  %v717_v14 = vld [vmem:[%s17142_s26 + $0xcb0] sm:$0xff] }
  0x7b   : > { %714 = vst [vmem:[%s17147_s27 + $0x660] sm:$0xff] %v713_v12  ;;  %716 = vst [vmem:[%s17147_s27 + $0x668] sm:$0xff] %v715_v13  ;;  %v719_v15 = vld [vmem:[%s17142_s26 + $0xcb8] sm:$0xff]  ;;  %v721_v16 = vld [vmem:[%s17142_s26 + $0xd00] sm:$0xff] }
  0x7c   : > { %718 = vst [vmem:[%s17147_s27 + $0x670] sm:$0xff] %v717_v14  ;;  %v723_v17 = vld [vmem:[%s17142_s26 + $0xd08] sm:$0xff]  ;;  %720 = vst [vmem:[%s17147_s27 + $0x678] sm:$0xff] %v719_v15  ;;  %v725_v18 = vld [vmem:[%s17142_s26 + $0xd10] sm:$0xff] }
  0x7d   : > { %722 = vst [vmem:[%s17147_s27 + $0x680] sm:$0xff] %v721_v16  ;;  %724 = vst [vmem:[%s17147_s27 + $0x688] sm:$0xff] %v723_v17  ;;  %v727_v19 = vld [vmem:[%s17142_s26 + $0xd18] sm:$0xff]  ;;  %v729_v20 = vld [vmem:[%s17142_s26 + $0xd20] sm:$0xff] }
  0x7e   : > { %726 = vst [vmem:[%s17147_s27 + $0x690] sm:$0xff] %v725_v18  ;;  %728 = vst [vmem:[%s17147_s27 + $0x698] sm:$0xff] %v727_v19  ;;  %v731_v21 = vld [vmem:[%s17142_s26 + $0xd28] sm:$0xff]  ;;  %v733_v22 = vld [vmem:[%s17142_s26 + $0xd30] sm:$0xff] }
  0x7f   : > { %730 = vst [vmem:[%s17147_s27 + $0x6a0] sm:$0xff] %v729_v20  ;;  %v735_v23 = vld [vmem:[%s17142_s26 + $0xd38] sm:$0xff]  ;;  %732 = vst [vmem:[%s17147_s27 + $0x6a8] sm:$0xff] %v731_v21  ;;  %v737_v24 = vld [vmem:[%s17142_s26 + $0xd80] sm:$0xff] }
  0x80   : > { %734 = vst [vmem:[%s17147_s27 + $0x6b0] sm:$0xff] %v733_v22  ;;  %736 = vst [vmem:[%s17147_s27 + $0x6b8] sm:$0xff] %v735_v23  ;;  %v739_v25 = vld [vmem:[%s17142_s26 + $0xd88] sm:$0xff]  ;;  %v741_v26 = vld [vmem:[%s17142_s26 + $0xd90] sm:$0xff] }
  0x81   : > { %738 = vst [vmem:[%s17147_s27 + $0x6c0] sm:$0xff] %v737_v24  ;;  %740 = vst [vmem:[%s17147_s27 + $0x6c8] sm:$0xff] %v739_v25  ;;  %v743_v27 = vld [vmem:[%s17142_s26 + $0xd98] sm:$0xff]  ;;  %v745_v28 = vld [vmem:[%s17142_s26 + $0xda0] sm:$0xff] }
  0x82   : > { %742 = vst [vmem:[%s17147_s27 + $0x6d0] sm:$0xff] %v741_v26  ;;  %v747_v29 = vld [vmem:[%s17142_s26 + $0xda8] sm:$0xff]  ;;  %744 = vst [vmem:[%s17147_s27 + $0x6d8] sm:$0xff] %v743_v27  ;;  %v749_v30 = vld [vmem:[%s17142_s26 + $0xdb0] sm:$0xff] }
  0x83   : > { %746 = vst [vmem:[%s17147_s27 + $0x6e0] sm:$0xff] %v745_v28  ;;  %748 = vst [vmem:[%s17147_s27 + $0x6e8] sm:$0xff] %v747_v29  ;;  %v751_v31 = vld [vmem:[%s17142_s26 + $0xdb8] sm:$0xff]  ;;  %v753_v32 = vld [vmem:[%s17142_s26 + $0xe00] sm:$0xff] }
  0x84   : > { %750 = vst [vmem:[%s17147_s27 + $0x6f0] sm:$0xff] %v749_v30  ;;  %752 = vst [vmem:[%s17147_s27 + $0x6f8] sm:$0xff] %v751_v31  ;;  %v755_v33 = vld [vmem:[%s17142_s26 + $0xe08] sm:$0xff]  ;;  %v757_v34 = vld [vmem:[%s17142_s26 + $0xe10] sm:$0xff] }
  0x85   : > { %754 = vst [vmem:[%s17147_s27 + $0x700] sm:$0xff] %v753_v32  ;;  %v759_v35 = vld [vmem:[%s17142_s26 + $0xe18] sm:$0xff]  ;;  %756 = vst [vmem:[%s17147_s27 + $0x708] sm:$0xff] %v755_v33  ;;  %v761_v36 = vld [vmem:[%s17142_s26 + $0xe20] sm:$0xff] }
  0x86   : > { %758 = vst [vmem:[%s17147_s27 + $0x710] sm:$0xff] %v757_v34  ;;  %760 = vst [vmem:[%s17147_s27 + $0x718] sm:$0xff] %v759_v35  ;;  %v763_v37 = vld [vmem:[%s17142_s26 + $0xe28] sm:$0xff]  ;;  %v765_v38 = vld [vmem:[%s17142_s26 + $0xe30] sm:$0xff] }
  0x87   : > { %762 = vst [vmem:[%s17147_s27 + $0x720] sm:$0xff] %v761_v36  ;;  %764 = vst [vmem:[%s17147_s27 + $0x728] sm:$0xff] %v763_v37  ;;  %v767_v39 = vld [vmem:[%s17142_s26 + $0xe38] sm:$0xff]  ;;  %v769_v40 = vld [vmem:[%s17142_s26 + $0xe80] sm:$0xff] }
  0x88   : > { %766 = vst [vmem:[%s17147_s27 + $0x730] sm:$0xff] %v765_v38  ;;  %v771_v41 = vld [vmem:[%s17142_s26 + $0xe88] sm:$0xff]  ;;  %768 = vst [vmem:[%s17147_s27 + $0x738] sm:$0xff] %v767_v39  ;;  %v773_v42 = vld [vmem:[%s17142_s26 + $0xe90] sm:$0xff] }
  0x89   : > { %770 = vst [vmem:[%s17147_s27 + $0x740] sm:$0xff] %v769_v40  ;;  %772 = vst [vmem:[%s17147_s27 + $0x748] sm:$0xff] %v771_v41  ;;  %v775_v43 = vld [vmem:[%s17142_s26 + $0xe98] sm:$0xff]  ;;  %v777_v44 = vld [vmem:[%s17142_s26 + $0xea0] sm:$0xff] }
  0x8a   : > { %774 = vst [vmem:[%s17147_s27 + $0x750] sm:$0xff] %v773_v42  ;;  %776 = vst [vmem:[%s17147_s27 + $0x758] sm:$0xff] %v775_v43  ;;  %v779_v45 = vld [vmem:[%s17142_s26 + $0xea8] sm:$0xff]  ;;  %v781_v46 = vld [vmem:[%s17142_s26 + $0xeb0] sm:$0xff] }
  0x8b   : > { %778 = vst [vmem:[%s17147_s27 + $0x760] sm:$0xff] %v777_v44  ;;  %v783_v47 = vld [vmem:[%s17142_s26 + $0xeb8] sm:$0xff]  ;;  %780 = vst [vmem:[%s17147_s27 + $0x768] sm:$0xff] %v779_v45  ;;  %v785_v48 = vld [vmem:[%s17142_s26 + $0xf00] sm:$0xff] }
  0x8c   : > { %782 = vst [vmem:[%s17147_s27 + $0x770] sm:$0xff] %v781_v46  ;;  %784 = vst [vmem:[%s17147_s27 + $0x778] sm:$0xff] %v783_v47  ;;  %v787_v49 = vld [vmem:[%s17142_s26 + $0xf08] sm:$0xff]  ;;  %v789_v50 = vld [vmem:[%s17142_s26 + $0xf10] sm:$0xff] }
  0x8d   : > { %786 = vst [vmem:[%s17147_s27 + $0x780] sm:$0xff] %v785_v48  ;;  %788 = vst [vmem:[%s17147_s27 + $0x788] sm:$0xff] %v787_v49  ;;  %v791_v51 = vld [vmem:[%s17142_s26 + $0xf18] sm:$0xff]  ;;  %v793_v52 = vld [vmem:[%s17142_s26 + $0xf20] sm:$0xff] }
  0x8e   : > { %790 = vst [vmem:[%s17147_s27 + $0x790] sm:$0xff] %v789_v50  ;;  %v795_v53 = vld [vmem:[%s17142_s26 + $0xf28] sm:$0xff]  ;;  %792 = vst [vmem:[%s17147_s27 + $0x798] sm:$0xff] %v791_v51  ;;  %v797_v54 = vld [vmem:[%s17142_s26 + $0xf30] sm:$0xff] }
  0x8f   : > { %794 = vst [vmem:[%s17147_s27 + $0x7a0] sm:$0xff] %v793_v52  ;;  %796 = vst [vmem:[%s17147_s27 + $0x7a8] sm:$0xff] %v795_v53  ;;  %v799_v55 = vld [vmem:[%s17142_s26 + $0xf38] sm:$0xff]  ;;  %v801_v56 = vld [vmem:[%s17142_s26 + $0xf80] sm:$0xff] }
  0x90   : > { %798 = vst [vmem:[%s17147_s27 + $0x7b0] sm:$0xff] %v797_v54  ;;  %800 = vst [vmem:[%s17147_s27 + $0x7b8] sm:$0xff] %v799_v55  ;;  %v803_v57 = vld [vmem:[%s17142_s26 + $0xf88] sm:$0xff]  ;;  %v805_v58 = vld [vmem:[%s17142_s26 + $0xf90] sm:$0xff] }
  0x91   : > { %802 = vst [vmem:[%s17147_s27 + $0x7c0] sm:$0xff] %v801_v56  ;;  %v807_v59 = vld [vmem:[%s17142_s26 + $0xf98] sm:$0xff]  ;;  %804 = vst [vmem:[%s17147_s27 + $0x7c8] sm:$0xff] %v803_v57  ;;  %v809_v60 = vld [vmem:[%s17142_s26 + $0xfa0] sm:$0xff] }
  0x92   : > { %806 = vst [vmem:[%s17147_s27 + $0x7d0] sm:$0xff] %v805_v58  ;;  %808 = vst [vmem:[%s17147_s27 + $0x7d8] sm:$0xff] %v807_v59  ;;  %v811_v61 = vld [vmem:[%s17142_s26 + $0xfa8] sm:$0xff]  ;;  %v813_v62 = vld [vmem:[%s17142_s26 + $0xfb0] sm:$0xff] }
  0x93   : > { %810 = vst [vmem:[%s17147_s27 + $0x7e0] sm:$0xff] %v809_v60  ;;  %812 = vst [vmem:[%s17147_s27 + $0x7e8] sm:$0xff] %v811_v61  ;;  %v815_v63 = vld [vmem:[%s17142_s26 + $0xfb8] sm:$0xff]  ;;  %v817_v0 = vld [vmem:[%s17142_s26 + $0x1000] sm:$0xff] }
  0x94   : > { %814 = vst [vmem:[%s17147_s27 + $0x7f0] sm:$0xff] %v813_v62  ;;  %v819_v1 = vld [vmem:[%s17142_s26 + $0x1008] sm:$0xff]  ;;  %816 = vst [vmem:[%s17147_s27 + $0x7f8] sm:$0xff] %v815_v63  ;;  %v821_v2 = vld [vmem:[%s17142_s26 + $0x1010] sm:$0xff] }
  0x95   : > { %818 = vst [vmem:[%s17147_s27 + $0x800] sm:$0xff] %v817_v0  ;;  %820 = vst [vmem:[%s17147_s27 + $0x808] sm:$0xff] %v819_v1  ;;  %v823_v3 = vld [vmem:[%s17142_s26 + $0x1018] sm:$0xff]  ;;  %v825_v4 = vld [vmem:[%s17142_s26 + $0x1020] sm:$0xff] }
  0x96   : > { %822 = vst [vmem:[%s17147_s27 + $0x810] sm:$0xff] %v821_v2  ;;  %824 = vst [vmem:[%s17147_s27 + $0x818] sm:$0xff] %v823_v3  ;;  %v827_v5 = vld [vmem:[%s17142_s26 + $0x1028] sm:$0xff]  ;;  %v829_v6 = vld [vmem:[%s17142_s26 + $0x1030] sm:$0xff] }
  0x97   : > { %826 = vst [vmem:[%s17147_s27 + $0x820] sm:$0xff] %v825_v4  ;;  %v831_v7 = vld [vmem:[%s17142_s26 + $0x1038] sm:$0xff]  ;;  %828 = vst [vmem:[%s17147_s27 + $0x828] sm:$0xff] %v827_v5  ;;  %v833_v8 = vld [vmem:[%s17142_s26 + $0x1080] sm:$0xff] }
  0x98   : > { %830 = vst [vmem:[%s17147_s27 + $0x830] sm:$0xff] %v829_v6  ;;  %832 = vst [vmem:[%s17147_s27 + $0x838] sm:$0xff] %v831_v7  ;;  %v835_v9 = vld [vmem:[%s17142_s26 + $0x1088] sm:$0xff]  ;;  %v837_v10 = vld [vmem:[%s17142_s26 + $0x1090] sm:$0xff] }
  0x99   : > { %834 = vst [vmem:[%s17147_s27 + $0x840] sm:$0xff] %v833_v8  ;;  %836 = vst [vmem:[%s17147_s27 + $0x848] sm:$0xff] %v835_v9  ;;  %v839_v11 = vld [vmem:[%s17142_s26 + $0x1098] sm:$0xff]  ;;  %v841_v12 = vld [vmem:[%s17142_s26 + $0x10a0] sm:$0xff] }
  0x9a   : > { %838 = vst [vmem:[%s17147_s27 + $0x850] sm:$0xff] %v837_v10  ;;  %v843_v13 = vld [vmem:[%s17142_s26 + $0x10a8] sm:$0xff]  ;;  %840 = vst [vmem:[%s17147_s27 + $0x858] sm:$0xff] %v839_v11  ;;  %v845_v14 = vld [vmem:[%s17142_s26 + $0x10b0] sm:$0xff] }
  0x9b   : > { %842 = vst [vmem:[%s17147_s27 + $0x860] sm:$0xff] %v841_v12  ;;  %844 = vst [vmem:[%s17147_s27 + $0x868] sm:$0xff] %v843_v13  ;;  %v847_v15 = vld [vmem:[%s17142_s26 + $0x10b8] sm:$0xff]  ;;  %v849_v16 = vld [vmem:[%s17142_s26 + $0x1100] sm:$0xff] }
  0x9c   : > { %846 = vst [vmem:[%s17147_s27 + $0x870] sm:$0xff] %v845_v14  ;;  %848 = vst [vmem:[%s17147_s27 + $0x878] sm:$0xff] %v847_v15  ;;  %v851_v17 = vld [vmem:[%s17142_s26 + $0x1108] sm:$0xff]  ;;  %v853_v18 = vld [vmem:[%s17142_s26 + $0x1110] sm:$0xff] }
  0x9d   : > { %850 = vst [vmem:[%s17147_s27 + $0x880] sm:$0xff] %v849_v16  ;;  %v855_v19 = vld [vmem:[%s17142_s26 + $0x1118] sm:$0xff]  ;;  %852 = vst [vmem:[%s17147_s27 + $0x888] sm:$0xff] %v851_v17  ;;  %v857_v20 = vld [vmem:[%s17142_s26 + $0x1120] sm:$0xff] }
  0x9e   : > { %854 = vst [vmem:[%s17147_s27 + $0x890] sm:$0xff] %v853_v18  ;;  %856 = vst [vmem:[%s17147_s27 + $0x898] sm:$0xff] %v855_v19  ;;  %v859_v21 = vld [vmem:[%s17142_s26 + $0x1128] sm:$0xff]  ;;  %v861_v22 = vld [vmem:[%s17142_s26 + $0x1130] sm:$0xff] }
  0x9f   : > { %858 = vst [vmem:[%s17147_s27 + $0x8a0] sm:$0xff] %v857_v20  ;;  %860 = vst [vmem:[%s17147_s27 + $0x8a8] sm:$0xff] %v859_v21  ;;  %v863_v23 = vld [vmem:[%s17142_s26 + $0x1138] sm:$0xff]  ;;  %v865_v24 = vld [vmem:[%s17142_s26 + $0x1180] sm:$0xff] }
  0xa0   : > { %862 = vst [vmem:[%s17147_s27 + $0x8b0] sm:$0xff] %v861_v22  ;;  %v867_v25 = vld [vmem:[%s17142_s26 + $0x1188] sm:$0xff]  ;;  %864 = vst [vmem:[%s17147_s27 + $0x8b8] sm:$0xff] %v863_v23  ;;  %v869_v26 = vld [vmem:[%s17142_s26 + $0x1190] sm:$0xff] }
  0xa1   : > { %866 = vst [vmem:[%s17147_s27 + $0x8c0] sm:$0xff] %v865_v24  ;;  %868 = vst [vmem:[%s17147_s27 + $0x8c8] sm:$0xff] %v867_v25  ;;  %v871_v27 = vld [vmem:[%s17142_s26 + $0x1198] sm:$0xff]  ;;  %v873_v28 = vld [vmem:[%s17142_s26 + $0x11a0] sm:$0xff] }
  0xa2   : > { %870 = vst [vmem:[%s17147_s27 + $0x8d0] sm:$0xff] %v869_v26  ;;  %872 = vst [vmem:[%s17147_s27 + $0x8d8] sm:$0xff] %v871_v27  ;;  %v875_v29 = vld [vmem:[%s17142_s26 + $0x11a8] sm:$0xff]  ;;  %v877_v30 = vld [vmem:[%s17142_s26 + $0x11b0] sm:$0xff] }
  0xa3   : > { %874 = vst [vmem:[%s17147_s27 + $0x8e0] sm:$0xff] %v873_v28  ;;  %v879_v31 = vld [vmem:[%s17142_s26 + $0x11b8] sm:$0xff]  ;;  %876 = vst [vmem:[%s17147_s27 + $0x8e8] sm:$0xff] %v875_v29  ;;  %v881_v32 = vld [vmem:[%s17142_s26 + $0x1200] sm:$0xff] }
  0xa4   : > { %878 = vst [vmem:[%s17147_s27 + $0x8f0] sm:$0xff] %v877_v30  ;;  %880 = vst [vmem:[%s17147_s27 + $0x8f8] sm:$0xff] %v879_v31  ;;  %v883_v33 = vld [vmem:[%s17142_s26 + $0x1208] sm:$0xff]  ;;  %v885_v34 = vld [vmem:[%s17142_s26 + $0x1210] sm:$0xff] }
  0xa5   : > { %882 = vst [vmem:[%s17147_s27 + $0x900] sm:$0xff] %v881_v32  ;;  %884 = vst [vmem:[%s17147_s27 + $0x908] sm:$0xff] %v883_v33  ;;  %v887_v35 = vld [vmem:[%s17142_s26 + $0x1218] sm:$0xff]  ;;  %v889_v36 = vld [vmem:[%s17142_s26 + $0x1220] sm:$0xff] }
  0xa6   : > { %886 = vst [vmem:[%s17147_s27 + $0x910] sm:$0xff] %v885_v34  ;;  %v891_v37 = vld [vmem:[%s17142_s26 + $0x1228] sm:$0xff]  ;;  %888 = vst [vmem:[%s17147_s27 + $0x918] sm:$0xff] %v887_v35  ;;  %v893_v38 = vld [vmem:[%s17142_s26 + $0x1230] sm:$0xff] }
  0xa7   : > { %890 = vst [vmem:[%s17147_s27 + $0x920] sm:$0xff] %v889_v36  ;;  %892 = vst [vmem:[%s17147_s27 + $0x928] sm:$0xff] %v891_v37  ;;  %v895_v39 = vld [vmem:[%s17142_s26 + $0x1238] sm:$0xff]  ;;  %v897_v40 = vld [vmem:[%s17142_s26 + $0x1280] sm:$0xff] }
  0xa8   : > { %894 = vst [vmem:[%s17147_s27 + $0x930] sm:$0xff] %v893_v38  ;;  %896 = vst [vmem:[%s17147_s27 + $0x938] sm:$0xff] %v895_v39  ;;  %v899_v41 = vld [vmem:[%s17142_s26 + $0x1288] sm:$0xff]  ;;  %v901_v42 = vld [vmem:[%s17142_s26 + $0x1290] sm:$0xff] }
  0xa9   : > { %898 = vst [vmem:[%s17147_s27 + $0x940] sm:$0xff] %v897_v40  ;;  %v903_v43 = vld [vmem:[%s17142_s26 + $0x1298] sm:$0xff]  ;;  %900 = vst [vmem:[%s17147_s27 + $0x948] sm:$0xff] %v899_v41  ;;  %v905_v44 = vld [vmem:[%s17142_s26 + $0x12a0] sm:$0xff] }
  0xaa   : > { %902 = vst [vmem:[%s17147_s27 + $0x950] sm:$0xff] %v901_v42  ;;  %904 = vst [vmem:[%s17147_s27 + $0x958] sm:$0xff] %v903_v43  ;;  %v907_v45 = vld [vmem:[%s17142_s26 + $0x12a8] sm:$0xff]  ;;  %v909_v46 = vld [vmem:[%s17142_s26 + $0x12b0] sm:$0xff] }
  0xab   : > { %906 = vst [vmem:[%s17147_s27 + $0x960] sm:$0xff] %v905_v44  ;;  %908 = vst [vmem:[%s17147_s27 + $0x968] sm:$0xff] %v907_v45  ;;  %v911_v47 = vld [vmem:[%s17142_s26 + $0x12b8] sm:$0xff]  ;;  %v913_v48 = vld [vmem:[%s17142_s26 + $0x1300] sm:$0xff] }
  0xac   : > { %910 = vst [vmem:[%s17147_s27 + $0x970] sm:$0xff] %v909_v46  ;;  %v915_v49 = vld [vmem:[%s17142_s26 + $0x1308] sm:$0xff]  ;;  %912 = vst [vmem:[%s17147_s27 + $0x978] sm:$0xff] %v911_v47  ;;  %v917_v50 = vld [vmem:[%s17142_s26 + $0x1310] sm:$0xff] }
  0xad   : > { %914 = vst [vmem:[%s17147_s27 + $0x980] sm:$0xff] %v913_v48  ;;  %916 = vst [vmem:[%s17147_s27 + $0x988] sm:$0xff] %v915_v49  ;;  %v919_v51 = vld [vmem:[%s17142_s26 + $0x1318] sm:$0xff]  ;;  %v921_v52 = vld [vmem:[%s17142_s26 + $0x1320] sm:$0xff] }
  0xae   : > { %918 = vst [vmem:[%s17147_s27 + $0x990] sm:$0xff] %v917_v50  ;;  %920 = vst [vmem:[%s17147_s27 + $0x998] sm:$0xff] %v919_v51  ;;  %v923_v53 = vld [vmem:[%s17142_s26 + $0x1328] sm:$0xff]  ;;  %v925_v54 = vld [vmem:[%s17142_s26 + $0x1330] sm:$0xff] }
  0xaf   : > { %922 = vst [vmem:[%s17147_s27 + $0x9a0] sm:$0xff] %v921_v52  ;;  %v927_v55 = vld [vmem:[%s17142_s26 + $0x1338] sm:$0xff]  ;;  %924 = vst [vmem:[%s17147_s27 + $0x9a8] sm:$0xff] %v923_v53  ;;  %v929_v56 = vld [vmem:[%s17142_s26 + $0x1380] sm:$0xff] }
  0xb0   : > { %926 = vst [vmem:[%s17147_s27 + $0x9b0] sm:$0xff] %v925_v54  ;;  %928 = vst [vmem:[%s17147_s27 + $0x9b8] sm:$0xff] %v927_v55  ;;  %v931_v57 = vld [vmem:[%s17142_s26 + $0x1388] sm:$0xff]  ;;  %v933_v58 = vld [vmem:[%s17142_s26 + $0x1390] sm:$0xff] }
  0xb1   : > { %930 = vst [vmem:[%s17147_s27 + $0x9c0] sm:$0xff] %v929_v56  ;;  %932 = vst [vmem:[%s17147_s27 + $0x9c8] sm:$0xff] %v931_v57  ;;  %v935_v59 = vld [vmem:[%s17142_s26 + $0x1398] sm:$0xff]  ;;  %v937_v60 = vld [vmem:[%s17142_s26 + $0x13a0] sm:$0xff] }
  0xb2   : > { %934 = vst [vmem:[%s17147_s27 + $0x9d0] sm:$0xff] %v933_v58  ;;  %v939_v61 = vld [vmem:[%s17142_s26 + $0x13a8] sm:$0xff]  ;;  %936 = vst [vmem:[%s17147_s27 + $0x9d8] sm:$0xff] %v935_v59  ;;  %v941_v62 = vld [vmem:[%s17142_s26 + $0x13b0] sm:$0xff] }
  0xb3   : > { %938 = vst [vmem:[%s17147_s27 + $0x9e0] sm:$0xff] %v937_v60  ;;  %940 = vst [vmem:[%s17147_s27 + $0x9e8] sm:$0xff] %v939_v61  ;;  %v943_v63 = vld [vmem:[%s17142_s26 + $0x13b8] sm:$0xff]  ;;  %v945_v0 = vld [vmem:[%s17142_s26 + $0x1400] sm:$0xff] }
  0xb4   : > { %942 = vst [vmem:[%s17147_s27 + $0x9f0] sm:$0xff] %v941_v62  ;;  %944 = vst [vmem:[%s17147_s27 + $0x9f8] sm:$0xff] %v943_v63  ;;  %v947_v1 = vld [vmem:[%s17142_s26 + $0x1408] sm:$0xff]  ;;  %v949_v2 = vld [vmem:[%s17142_s26 + $0x1410] sm:$0xff] }
  0xb5   : > { %946 = vst [vmem:[%s17147_s27 + $0xa00] sm:$0xff] %v945_v0  ;;  %v951_v3 = vld [vmem:[%s17142_s26 + $0x1418] sm:$0xff]  ;;  %948 = vst [vmem:[%s17147_s27 + $0xa08] sm:$0xff] %v947_v1  ;;  %v953_v4 = vld [vmem:[%s17142_s26 + $0x1420] sm:$0xff] }
  0xb6   : > { %950 = vst [vmem:[%s17147_s27 + $0xa10] sm:$0xff] %v949_v2  ;;  %952 = vst [vmem:[%s17147_s27 + $0xa18] sm:$0xff] %v951_v3  ;;  %v955_v5 = vld [vmem:[%s17142_s26 + $0x1428] sm:$0xff]  ;;  %v957_v6 = vld [vmem:[%s17142_s26 + $0x1430] sm:$0xff] }
  0xb7   : > { %954 = vst [vmem:[%s17147_s27 + $0xa20] sm:$0xff] %v953_v4  ;;  %956 = vst [vmem:[%s17147_s27 + $0xa28] sm:$0xff] %v955_v5  ;;  %v959_v7 = vld [vmem:[%s17142_s26 + $0x1438] sm:$0xff]  ;;  %v961_v8 = vld [vmem:[%s17142_s26 + $0x1480] sm:$0xff] }
  0xb8   : > { %958 = vst [vmem:[%s17147_s27 + $0xa30] sm:$0xff] %v957_v6  ;;  %v963_v9 = vld [vmem:[%s17142_s26 + $0x1488] sm:$0xff]  ;;  %960 = vst [vmem:[%s17147_s27 + $0xa38] sm:$0xff] %v959_v7  ;;  %v965_v10 = vld [vmem:[%s17142_s26 + $0x1490] sm:$0xff] }
  0xb9   : > { %962 = vst [vmem:[%s17147_s27 + $0xa40] sm:$0xff] %v961_v8  ;;  %964 = vst [vmem:[%s17147_s27 + $0xa48] sm:$0xff] %v963_v9  ;;  %v967_v11 = vld [vmem:[%s17142_s26 + $0x1498] sm:$0xff]  ;;  %v969_v12 = vld [vmem:[%s17142_s26 + $0x14a0] sm:$0xff] }
  0xba   : > { %966 = vst [vmem:[%s17147_s27 + $0xa50] sm:$0xff] %v965_v10  ;;  %968 = vst [vmem:[%s17147_s27 + $0xa58] sm:$0xff] %v967_v11  ;;  %v971_v13 = vld [vmem:[%s17142_s26 + $0x14a8] sm:$0xff]  ;;  %v973_v14 = vld [vmem:[%s17142_s26 + $0x14b0] sm:$0xff] }
  0xbb   : > { %970 = vst [vmem:[%s17147_s27 + $0xa60] sm:$0xff] %v969_v12  ;;  %v975_v15 = vld [vmem:[%s17142_s26 + $0x14b8] sm:$0xff]  ;;  %972 = vst [vmem:[%s17147_s27 + $0xa68] sm:$0xff] %v971_v13  ;;  %v977_v16 = vld [vmem:[%s17142_s26 + $0x1500] sm:$0xff] }
  0xbc   : > { %974 = vst [vmem:[%s17147_s27 + $0xa70] sm:$0xff] %v973_v14  ;;  %976 = vst [vmem:[%s17147_s27 + $0xa78] sm:$0xff] %v975_v15  ;;  %v979_v17 = vld [vmem:[%s17142_s26 + $0x1508] sm:$0xff]  ;;  %v981_v18 = vld [vmem:[%s17142_s26 + $0x1510] sm:$0xff] }
  0xbd   : > { %978 = vst [vmem:[%s17147_s27 + $0xa80] sm:$0xff] %v977_v16  ;;  %980 = vst [vmem:[%s17147_s27 + $0xa88] sm:$0xff] %v979_v17  ;;  %v983_v19 = vld [vmem:[%s17142_s26 + $0x1518] sm:$0xff]  ;;  %v985_v20 = vld [vmem:[%s17142_s26 + $0x1520] sm:$0xff] }
  0xbe   : > { %982 = vst [vmem:[%s17147_s27 + $0xa90] sm:$0xff] %v981_v18  ;;  %v987_v21 = vld [vmem:[%s17142_s26 + $0x1528] sm:$0xff]  ;;  %984 = vst [vmem:[%s17147_s27 + $0xa98] sm:$0xff] %v983_v19  ;;  %v989_v22 = vld [vmem:[%s17142_s26 + $0x1530] sm:$0xff] }
  0xbf   : > { %986 = vst [vmem:[%s17147_s27 + $0xaa0] sm:$0xff] %v985_v20  ;;  %988 = vst [vmem:[%s17147_s27 + $0xaa8] sm:$0xff] %v987_v21  ;;  %v991_v23 = vld [vmem:[%s17142_s26 + $0x1538] sm:$0xff]  ;;  %v993_v24 = vld [vmem:[%s17142_s26 + $0x1580] sm:$0xff] }
  0xc0   : > { %990 = vst [vmem:[%s17147_s27 + $0xab0] sm:$0xff] %v989_v22  ;;  %992 = vst [vmem:[%s17147_s27 + $0xab8] sm:$0xff] %v991_v23  ;;  %v995_v25 = vld [vmem:[%s17142_s26 + $0x1588] sm:$0xff]  ;;  %v997_v26 = vld [vmem:[%s17142_s26 + $0x1590] sm:$0xff] }
  0xc1   : > { %994 = vst [vmem:[%s17147_s27 + $0xac0] sm:$0xff] %v993_v24  ;;  %v999_v27 = vld [vmem:[%s17142_s26 + $0x1598] sm:$0xff]  ;;  %996 = vst [vmem:[%s17147_s27 + $0xac8] sm:$0xff] %v995_v25  ;;  %v1001_v28 = vld [vmem:[%s17142_s26 + $0x15a0] sm:$0xff] }
  0xc2   : > { %998 = vst [vmem:[%s17147_s27 + $0xad0] sm:$0xff] %v997_v26  ;;  %1000 = vst [vmem:[%s17147_s27 + $0xad8] sm:$0xff] %v999_v27  ;;  %v1003_v29 = vld [vmem:[%s17142_s26 + $0x15a8] sm:$0xff]  ;;  %v1005_v30 = vld [vmem:[%s17142_s26 + $0x15b0] sm:$0xff] }
  0xc3   : > { %1002 = vst [vmem:[%s17147_s27 + $0xae0] sm:$0xff] %v1001_v28  ;;  %1004 = vst [vmem:[%s17147_s27 + $0xae8] sm:$0xff] %v1003_v29  ;;  %v1007_v31 = vld [vmem:[%s17142_s26 + $0x15b8] sm:$0xff]  ;;  %v1009_v32 = vld [vmem:[%s17142_s26 + $0x1600] sm:$0xff] }
  0xc4   : > { %1006 = vst [vmem:[%s17147_s27 + $0xaf0] sm:$0xff] %v1005_v30  ;;  %v1011_v33 = vld [vmem:[%s17142_s26 + $0x1608] sm:$0xff]  ;;  %1008 = vst [vmem:[%s17147_s27 + $0xaf8] sm:$0xff] %v1007_v31  ;;  %v1013_v34 = vld [vmem:[%s17142_s26 + $0x1610] sm:$0xff] }
  0xc5   : > { %1010 = vst [vmem:[%s17147_s27 + $0xb00] sm:$0xff] %v1009_v32  ;;  %1012 = vst [vmem:[%s17147_s27 + $0xb08] sm:$0xff] %v1011_v33  ;;  %v1015_v35 = vld [vmem:[%s17142_s26 + $0x1618] sm:$0xff]  ;;  %v1017_v36 = vld [vmem:[%s17142_s26 + $0x1620] sm:$0xff] }
  0xc6   : > { %1014 = vst [vmem:[%s17147_s27 + $0xb10] sm:$0xff] %v1013_v34  ;;  %1016 = vst [vmem:[%s17147_s27 + $0xb18] sm:$0xff] %v1015_v35  ;;  %v1019_v37 = vld [vmem:[%s17142_s26 + $0x1628] sm:$0xff]  ;;  %v1021_v38 = vld [vmem:[%s17142_s26 + $0x1630] sm:$0xff] }
  0xc7   : > { %1018 = vst [vmem:[%s17147_s27 + $0xb20] sm:$0xff] %v1017_v36  ;;  %v1023_v39 = vld [vmem:[%s17142_s26 + $0x1638] sm:$0xff]  ;;  %1020 = vst [vmem:[%s17147_s27 + $0xb28] sm:$0xff] %v1019_v37  ;;  %v1025_v40 = vld [vmem:[%s17142_s26 + $0x1680] sm:$0xff] }
  0xc8   : > { %1022 = vst [vmem:[%s17147_s27 + $0xb30] sm:$0xff] %v1021_v38  ;;  %1024 = vst [vmem:[%s17147_s27 + $0xb38] sm:$0xff] %v1023_v39  ;;  %v1027_v41 = vld [vmem:[%s17142_s26 + $0x1688] sm:$0xff]  ;;  %v1029_v42 = vld [vmem:[%s17142_s26 + $0x1690] sm:$0xff] }
  0xc9   : > { %1026 = vst [vmem:[%s17147_s27 + $0xb40] sm:$0xff] %v1025_v40  ;;  %1028 = vst [vmem:[%s17147_s27 + $0xb48] sm:$0xff] %v1027_v41  ;;  %v1031_v43 = vld [vmem:[%s17142_s26 + $0x1698] sm:$0xff]  ;;  %v1033_v44 = vld [vmem:[%s17142_s26 + $0x16a0] sm:$0xff] }
  0xca   : > { %1030 = vst [vmem:[%s17147_s27 + $0xb50] sm:$0xff] %v1029_v42  ;;  %v1035_v45 = vld [vmem:[%s17142_s26 + $0x16a8] sm:$0xff]  ;;  %1032 = vst [vmem:[%s17147_s27 + $0xb58] sm:$0xff] %v1031_v43  ;;  %v1037_v46 = vld [vmem:[%s17142_s26 + $0x16b0] sm:$0xff] }
  0xcb   : > { %1034 = vst [vmem:[%s17147_s27 + $0xb60] sm:$0xff] %v1033_v44  ;;  %1036 = vst [vmem:[%s17147_s27 + $0xb68] sm:$0xff] %v1035_v45  ;;  %v1039_v47 = vld [vmem:[%s17142_s26 + $0x16b8] sm:$0xff]  ;;  %v1041_v48 = vld [vmem:[%s17142_s26 + $0x1700] sm:$0xff] }
  0xcc   : > { %1038 = vst [vmem:[%s17147_s27 + $0xb70] sm:$0xff] %v1037_v46  ;;  %1040 = vst [vmem:[%s17147_s27 + $0xb78] sm:$0xff] %v1039_v47  ;;  %v1043_v49 = vld [vmem:[%s17142_s26 + $0x1708] sm:$0xff]  ;;  %v1045_v50 = vld [vmem:[%s17142_s26 + $0x1710] sm:$0xff] }
  0xcd   : > { %1042 = vst [vmem:[%s17147_s27 + $0xb80] sm:$0xff] %v1041_v48  ;;  %v1047_v51 = vld [vmem:[%s17142_s26 + $0x1718] sm:$0xff]  ;;  %1044 = vst [vmem:[%s17147_s27 + $0xb88] sm:$0xff] %v1043_v49  ;;  %v1049_v52 = vld [vmem:[%s17142_s26 + $0x1720] sm:$0xff] }
  0xce   : > { %1046 = vst [vmem:[%s17147_s27 + $0xb90] sm:$0xff] %v1045_v50  ;;  %1048 = vst [vmem:[%s17147_s27 + $0xb98] sm:$0xff] %v1047_v51  ;;  %v1051_v53 = vld [vmem:[%s17142_s26 + $0x1728] sm:$0xff]  ;;  %v1053_v54 = vld [vmem:[%s17142_s26 + $0x1730] sm:$0xff] }
  0xcf   : > { %1050 = vst [vmem:[%s17147_s27 + $0xba0] sm:$0xff] %v1049_v52  ;;  %1052 = vst [vmem:[%s17147_s27 + $0xba8] sm:$0xff] %v1051_v53  ;;  %v1055_v55 = vld [vmem:[%s17142_s26 + $0x1738] sm:$0xff]  ;;  %v1057_v56 = vld [vmem:[%s17142_s26 + $0x1780] sm:$0xff] }
  0xd0   : > { %1054 = vst [vmem:[%s17147_s27 + $0xbb0] sm:$0xff] %v1053_v54  ;;  %v1059_v57 = vld [vmem:[%s17142_s26 + $0x1788] sm:$0xff]  ;;  %1056 = vst [vmem:[%s17147_s27 + $0xbb8] sm:$0xff] %v1055_v55  ;;  %v1061_v58 = vld [vmem:[%s17142_s26 + $0x1790] sm:$0xff] }
  0xd1   : > { %1058 = vst [vmem:[%s17147_s27 + $0xbc0] sm:$0xff] %v1057_v56  ;;  %1060 = vst [vmem:[%s17147_s27 + $0xbc8] sm:$0xff] %v1059_v57  ;;  %v1063_v59 = vld [vmem:[%s17142_s26 + $0x1798] sm:$0xff]  ;;  %v1065_v60 = vld [vmem:[%s17142_s26 + $0x17a0] sm:$0xff] }
  0xd2   : > { %1062 = vst [vmem:[%s17147_s27 + $0xbd0] sm:$0xff] %v1061_v58  ;;  %1064 = vst [vmem:[%s17147_s27 + $0xbd8] sm:$0xff] %v1063_v59  ;;  %v1067_v61 = vld [vmem:[%s17142_s26 + $0x17a8] sm:$0xff]  ;;  %v1069_v62 = vld [vmem:[%s17142_s26 + $0x17b0] sm:$0xff] }
  0xd3   : > { %1066 = vst [vmem:[%s17147_s27 + $0xbe0] sm:$0xff] %v1065_v60  ;;  %v1071_v63 = vld [vmem:[%s17142_s26 + $0x17b8] sm:$0xff]  ;;  %1068 = vst [vmem:[%s17147_s27 + $0xbe8] sm:$0xff] %v1067_v61  ;;  %v1073_v0 = vld [vmem:[%s17142_s26 + $0x1800] sm:$0xff] }
  0xd4   : > { %1070 = vst [vmem:[%s17147_s27 + $0xbf0] sm:$0xff] %v1069_v62  ;;  %1072 = vst [vmem:[%s17147_s27 + $0xbf8] sm:$0xff] %v1071_v63  ;;  %v1075_v1 = vld [vmem:[%s17142_s26 + $0x1808] sm:$0xff]  ;;  %v1077_v2 = vld [vmem:[%s17142_s26 + $0x1810] sm:$0xff] }
  0xd5   : > { %1074 = vst [vmem:[%s17147_s27 + $0xc00] sm:$0xff] %v1073_v0  ;;  %1076 = vst [vmem:[%s17147_s27 + $0xc08] sm:$0xff] %v1075_v1  ;;  %v1079_v3 = vld [vmem:[%s17142_s26 + $0x1818] sm:$0xff]  ;;  %v1081_v4 = vld [vmem:[%s17142_s26 + $0x1820] sm:$0xff] }
  0xd6   : > { %1078 = vst [vmem:[%s17147_s27 + $0xc10] sm:$0xff] %v1077_v2  ;;  %v1083_v5 = vld [vmem:[%s17142_s26 + $0x1828] sm:$0xff]  ;;  %1080 = vst [vmem:[%s17147_s27 + $0xc18] sm:$0xff] %v1079_v3  ;;  %v1085_v6 = vld [vmem:[%s17142_s26 + $0x1830] sm:$0xff] }
  0xd7   : > { %1082 = vst [vmem:[%s17147_s27 + $0xc20] sm:$0xff] %v1081_v4  ;;  %1084 = vst [vmem:[%s17147_s27 + $0xc28] sm:$0xff] %v1083_v5  ;;  %v1087_v7 = vld [vmem:[%s17142_s26 + $0x1838] sm:$0xff]  ;;  %v1089_v8 = vld [vmem:[%s17142_s26 + $0x1880] sm:$0xff] }
  0xd8   : > { %1086 = vst [vmem:[%s17147_s27 + $0xc30] sm:$0xff] %v1085_v6  ;;  %1088 = vst [vmem:[%s17147_s27 + $0xc38] sm:$0xff] %v1087_v7  ;;  %v1091_v9 = vld [vmem:[%s17142_s26 + $0x1888] sm:$0xff]  ;;  %v1093_v10 = vld [vmem:[%s17142_s26 + $0x1890] sm:$0xff] }
  0xd9   : > { %1090 = vst [vmem:[%s17147_s27 + $0xc40] sm:$0xff] %v1089_v8  ;;  %v1095_v11 = vld [vmem:[%s17142_s26 + $0x1898] sm:$0xff]  ;;  %1092 = vst [vmem:[%s17147_s27 + $0xc48] sm:$0xff] %v1091_v9  ;;  %v1097_v12 = vld [vmem:[%s17142_s26 + $0x18a0] sm:$0xff] }
  0xda   : > { %1094 = vst [vmem:[%s17147_s27 + $0xc50] sm:$0xff] %v1093_v10  ;;  %1096 = vst [vmem:[%s17147_s27 + $0xc58] sm:$0xff] %v1095_v11  ;;  %v1099_v13 = vld [vmem:[%s17142_s26 + $0x18a8] sm:$0xff]  ;;  %v1101_v14 = vld [vmem:[%s17142_s26 + $0x18b0] sm:$0xff] }
  0xdb   : > { %1098 = vst [vmem:[%s17147_s27 + $0xc60] sm:$0xff] %v1097_v12  ;;  %1100 = vst [vmem:[%s17147_s27 + $0xc68] sm:$0xff] %v1099_v13  ;;  %v1103_v15 = vld [vmem:[%s17142_s26 + $0x18b8] sm:$0xff]  ;;  %v1105_v16 = vld [vmem:[%s17142_s26 + $0x1900] sm:$0xff] }
  0xdc   : > { %1102 = vst [vmem:[%s17147_s27 + $0xc70] sm:$0xff] %v1101_v14  ;;  %v1107_v17 = vld [vmem:[%s17142_s26 + $0x1908] sm:$0xff]  ;;  %1104 = vst [vmem:[%s17147_s27 + $0xc78] sm:$0xff] %v1103_v15  ;;  %v1109_v18 = vld [vmem:[%s17142_s26 + $0x1910] sm:$0xff] }
  0xdd   : > { %1106 = vst [vmem:[%s17147_s27 + $0xc80] sm:$0xff] %v1105_v16  ;;  %1108 = vst [vmem:[%s17147_s27 + $0xc88] sm:$0xff] %v1107_v17  ;;  %v1111_v19 = vld [vmem:[%s17142_s26 + $0x1918] sm:$0xff]  ;;  %v1113_v20 = vld [vmem:[%s17142_s26 + $0x1920] sm:$0xff] }
  0xde   : > { %1110 = vst [vmem:[%s17147_s27 + $0xc90] sm:$0xff] %v1109_v18  ;;  %1112 = vst [vmem:[%s17147_s27 + $0xc98] sm:$0xff] %v1111_v19  ;;  %v1115_v21 = vld [vmem:[%s17142_s26 + $0x1928] sm:$0xff]  ;;  %v1117_v22 = vld [vmem:[%s17142_s26 + $0x1930] sm:$0xff] }
  0xdf   : > { %1114 = vst [vmem:[%s17147_s27 + $0xca0] sm:$0xff] %v1113_v20  ;;  %v1119_v23 = vld [vmem:[%s17142_s26 + $0x1938] sm:$0xff]  ;;  %1116 = vst [vmem:[%s17147_s27 + $0xca8] sm:$0xff] %v1115_v21  ;;  %v1121_v24 = vld [vmem:[%s17142_s26 + $0x1980] sm:$0xff] }
  0xe0   : > { %1118 = vst [vmem:[%s17147_s27 + $0xcb0] sm:$0xff] %v1117_v22  ;;  %1120 = vst [vmem:[%s17147_s27 + $0xcb8] sm:$0xff] %v1119_v23  ;;  %v1123_v25 = vld [vmem:[%s17142_s26 + $0x1988] sm:$0xff]  ;;  %v1125_v26 = vld [vmem:[%s17142_s26 + $0x1990] sm:$0xff] }
  0xe1   : > { %1122 = vst [vmem:[%s17147_s27 + $0xcc0] sm:$0xff] %v1121_v24  ;;  %1124 = vst [vmem:[%s17147_s27 + $0xcc8] sm:$0xff] %v1123_v25  ;;  %v1127_v27 = vld [vmem:[%s17142_s26 + $0x1998] sm:$0xff]  ;;  %v1129_v28 = vld [vmem:[%s17142_s26 + $0x19a0] sm:$0xff] }
  0xe2   : > { %1126 = vst [vmem:[%s17147_s27 + $0xcd0] sm:$0xff] %v1125_v26  ;;  %v1131_v29 = vld [vmem:[%s17142_s26 + $0x19a8] sm:$0xff]  ;;  %1128 = vst [vmem:[%s17147_s27 + $0xcd8] sm:$0xff] %v1127_v27  ;;  %v1133_v30 = vld [vmem:[%s17142_s26 + $0x19b0] sm:$0xff] }
  0xe3   : > { %1130 = vst [vmem:[%s17147_s27 + $0xce0] sm:$0xff] %v1129_v28  ;;  %1132 = vst [vmem:[%s17147_s27 + $0xce8] sm:$0xff] %v1131_v29  ;;  %v1135_v31 = vld [vmem:[%s17142_s26 + $0x19b8] sm:$0xff]  ;;  %v1137_v32 = vld [vmem:[%s17142_s26 + $0x1a00] sm:$0xff] }
  0xe4   : > { %1134 = vst [vmem:[%s17147_s27 + $0xcf0] sm:$0xff] %v1133_v30  ;;  %1136 = vst [vmem:[%s17147_s27 + $0xcf8] sm:$0xff] %v1135_v31  ;;  %v1139_v33 = vld [vmem:[%s17142_s26 + $0x1a08] sm:$0xff]  ;;  %v1141_v34 = vld [vmem:[%s17142_s26 + $0x1a10] sm:$0xff] }
  0xe5   : > { %1138 = vst [vmem:[%s17147_s27 + $0xd00] sm:$0xff] %v1137_v32  ;;  %v1143_v35 = vld [vmem:[%s17142_s26 + $0x1a18] sm:$0xff]  ;;  %1140 = vst [vmem:[%s17147_s27 + $0xd08] sm:$0xff] %v1139_v33  ;;  %v1145_v36 = vld [vmem:[%s17142_s26 + $0x1a20] sm:$0xff] }
  0xe6   : > { %1142 = vst [vmem:[%s17147_s27 + $0xd10] sm:$0xff] %v1141_v34  ;;  %1144 = vst [vmem:[%s17147_s27 + $0xd18] sm:$0xff] %v1143_v35  ;;  %v1147_v37 = vld [vmem:[%s17142_s26 + $0x1a28] sm:$0xff]  ;;  %v1149_v38 = vld [vmem:[%s17142_s26 + $0x1a30] sm:$0xff] }
  0xe7   : > { %1146 = vst [vmem:[%s17147_s27 + $0xd20] sm:$0xff] %v1145_v36  ;;  %1148 = vst [vmem:[%s17147_s27 + $0xd28] sm:$0xff] %v1147_v37  ;;  %v1151_v39 = vld [vmem:[%s17142_s26 + $0x1a38] sm:$0xff]  ;;  %v1153_v40 = vld [vmem:[%s17142_s26 + $0x1a80] sm:$0xff] }
  0xe8   : > { %1150 = vst [vmem:[%s17147_s27 + $0xd30] sm:$0xff] %v1149_v38  ;;  %v1155_v41 = vld [vmem:[%s17142_s26 + $0x1a88] sm:$0xff]  ;;  %1152 = vst [vmem:[%s17147_s27 + $0xd38] sm:$0xff] %v1151_v39  ;;  %v1157_v42 = vld [vmem:[%s17142_s26 + $0x1a90] sm:$0xff] }
  0xe9   : > { %1154 = vst [vmem:[%s17147_s27 + $0xd40] sm:$0xff] %v1153_v40  ;;  %1156 = vst [vmem:[%s17147_s27 + $0xd48] sm:$0xff] %v1155_v41  ;;  %v1159_v43 = vld [vmem:[%s17142_s26 + $0x1a98] sm:$0xff]  ;;  %v1161_v44 = vld [vmem:[%s17142_s26 + $0x1aa0] sm:$0xff] }
  0xea   : > { %1158 = vst [vmem:[%s17147_s27 + $0xd50] sm:$0xff] %v1157_v42  ;;  %1160 = vst [vmem:[%s17147_s27 + $0xd58] sm:$0xff] %v1159_v43  ;;  %v1163_v45 = vld [vmem:[%s17142_s26 + $0x1aa8] sm:$0xff]  ;;  %v1165_v46 = vld [vmem:[%s17142_s26 + $0x1ab0] sm:$0xff] }
  0xeb   : > { %1162 = vst [vmem:[%s17147_s27 + $0xd60] sm:$0xff] %v1161_v44  ;;  %v1167_v47 = vld [vmem:[%s17142_s26 + $0x1ab8] sm:$0xff]  ;;  %1164 = vst [vmem:[%s17147_s27 + $0xd68] sm:$0xff] %v1163_v45  ;;  %v1169_v48 = vld [vmem:[%s17142_s26 + $0x1b00] sm:$0xff] }
  0xec   : > { %1166 = vst [vmem:[%s17147_s27 + $0xd70] sm:$0xff] %v1165_v46  ;;  %1168 = vst [vmem:[%s17147_s27 + $0xd78] sm:$0xff] %v1167_v47  ;;  %v1171_v49 = vld [vmem:[%s17142_s26 + $0x1b08] sm:$0xff]  ;;  %v1173_v50 = vld [vmem:[%s17142_s26 + $0x1b10] sm:$0xff] }
  0xed   : > { %1170 = vst [vmem:[%s17147_s27 + $0xd80] sm:$0xff] %v1169_v48  ;;  %1172 = vst [vmem:[%s17147_s27 + $0xd88] sm:$0xff] %v1171_v49  ;;  %v1175_v51 = vld [vmem:[%s17142_s26 + $0x1b18] sm:$0xff]  ;;  %v1177_v52 = vld [vmem:[%s17142_s26 + $0x1b20] sm:$0xff] }
  0xee   : > { %1174 = vst [vmem:[%s17147_s27 + $0xd90] sm:$0xff] %v1173_v50  ;;  %v1179_v53 = vld [vmem:[%s17142_s26 + $0x1b28] sm:$0xff]  ;;  %1176 = vst [vmem:[%s17147_s27 + $0xd98] sm:$0xff] %v1175_v51  ;;  %v1181_v54 = vld [vmem:[%s17142_s26 + $0x1b30] sm:$0xff] }
  0xef   : > { %1178 = vst [vmem:[%s17147_s27 + $0xda0] sm:$0xff] %v1177_v52  ;;  %1180 = vst [vmem:[%s17147_s27 + $0xda8] sm:$0xff] %v1179_v53  ;;  %v1183_v55 = vld [vmem:[%s17142_s26 + $0x1b38] sm:$0xff]  ;;  %v1185_v56 = vld [vmem:[%s17142_s26 + $0x1b80] sm:$0xff] }
  0xf0   : > { %1182 = vst [vmem:[%s17147_s27 + $0xdb0] sm:$0xff] %v1181_v54  ;;  %1184 = vst [vmem:[%s17147_s27 + $0xdb8] sm:$0xff] %v1183_v55  ;;  %v1187_v57 = vld [vmem:[%s17142_s26 + $0x1b88] sm:$0xff]  ;;  %v1189_v58 = vld [vmem:[%s17142_s26 + $0x1b90] sm:$0xff] }
  0xf1   : > { %1186 = vst [vmem:[%s17147_s27 + $0xdc0] sm:$0xff] %v1185_v56  ;;  %v1191_v59 = vld [vmem:[%s17142_s26 + $0x1b98] sm:$0xff]  ;;  %1188 = vst [vmem:[%s17147_s27 + $0xdc8] sm:$0xff] %v1187_v57  ;;  %v1193_v60 = vld [vmem:[%s17142_s26 + $0x1ba0] sm:$0xff] }
  0xf2   : > { %1190 = vst [vmem:[%s17147_s27 + $0xdd0] sm:$0xff] %v1189_v58  ;;  %1192 = vst [vmem:[%s17147_s27 + $0xdd8] sm:$0xff] %v1191_v59  ;;  %v1195_v61 = vld [vmem:[%s17142_s26 + $0x1ba8] sm:$0xff]  ;;  %v1197_v62 = vld [vmem:[%s17142_s26 + $0x1bb0] sm:$0xff] }
  0xf3   : > { %1194 = vst [vmem:[%s17147_s27 + $0xde0] sm:$0xff] %v1193_v60  ;;  %1196 = vst [vmem:[%s17147_s27 + $0xde8] sm:$0xff] %v1195_v61  ;;  %v1199_v63 = vld [vmem:[%s17142_s26 + $0x1bb8] sm:$0xff]  ;;  %v1201_v0 = vld [vmem:[%s17142_s26 + $0x1c00] sm:$0xff] }
  0xf4   : > { %1198 = vst [vmem:[%s17147_s27 + $0xdf0] sm:$0xff] %v1197_v62  ;;  %v1203_v1 = vld [vmem:[%s17142_s26 + $0x1c08] sm:$0xff]  ;;  %1200 = vst [vmem:[%s17147_s27 + $0xdf8] sm:$0xff] %v1199_v63  ;;  %v1205_v2 = vld [vmem:[%s17142_s26 + $0x1c10] sm:$0xff] }
  0xf5   : > { %1202 = vst [vmem:[%s17147_s27 + $0xe00] sm:$0xff] %v1201_v0  ;;  %1204 = vst [vmem:[%s17147_s27 + $0xe08] sm:$0xff] %v1203_v1  ;;  %v1207_v3 = vld [vmem:[%s17142_s26 + $0x1c18] sm:$0xff]  ;;  %v1209_v4 = vld [vmem:[%s17142_s26 + $0x1c20] sm:$0xff] }
  0xf6   : > { %1206 = vst [vmem:[%s17147_s27 + $0xe10] sm:$0xff] %v1205_v2  ;;  %1208 = vst [vmem:[%s17147_s27 + $0xe18] sm:$0xff] %v1207_v3  ;;  %v1211_v5 = vld [vmem:[%s17142_s26 + $0x1c28] sm:$0xff]  ;;  %v1213_v6 = vld [vmem:[%s17142_s26 + $0x1c30] sm:$0xff] }
  0xf7   : > { %1210 = vst [vmem:[%s17147_s27 + $0xe20] sm:$0xff] %v1209_v4  ;;  %v1215_v7 = vld [vmem:[%s17142_s26 + $0x1c38] sm:$0xff]  ;;  %1212 = vst [vmem:[%s17147_s27 + $0xe28] sm:$0xff] %v1211_v5  ;;  %v1217_v8 = vld [vmem:[%s17142_s26 + $0x1c80] sm:$0xff] }
  0xf8   : > { %1214 = vst [vmem:[%s17147_s27 + $0xe30] sm:$0xff] %v1213_v6  ;;  %1216 = vst [vmem:[%s17147_s27 + $0xe38] sm:$0xff] %v1215_v7  ;;  %v1219_v9 = vld [vmem:[%s17142_s26 + $0x1c88] sm:$0xff]  ;;  %v1221_v10 = vld [vmem:[%s17142_s26 + $0x1c90] sm:$0xff] }
  0xf9   : > { %1218 = vst [vmem:[%s17147_s27 + $0xe40] sm:$0xff] %v1217_v8  ;;  %1220 = vst [vmem:[%s17147_s27 + $0xe48] sm:$0xff] %v1219_v9  ;;  %v1223_v11 = vld [vmem:[%s17142_s26 + $0x1c98] sm:$0xff]  ;;  %v1225_v12 = vld [vmem:[%s17142_s26 + $0x1ca0] sm:$0xff] }
  0xfa   : > { %1222 = vst [vmem:[%s17147_s27 + $0xe50] sm:$0xff] %v1221_v10  ;;  %v1227_v13 = vld [vmem:[%s17142_s26 + $0x1ca8] sm:$0xff]  ;;  %1224 = vst [vmem:[%s17147_s27 + $0xe58] sm:$0xff] %v1223_v11  ;;  %v1229_v14 = vld [vmem:[%s17142_s26 + $0x1cb0] sm:$0xff] }
  0xfb   : > { %1226 = vst [vmem:[%s17147_s27 + $0xe60] sm:$0xff] %v1225_v12  ;;  %1228 = vst [vmem:[%s17147_s27 + $0xe68] sm:$0xff] %v1227_v13  ;;  %v1231_v15 = vld [vmem:[%s17142_s26 + $0x1cb8] sm:$0xff]  ;;  %v1233_v16 = vld [vmem:[%s17142_s26 + $0x1d00] sm:$0xff] }
  0xfc   : > { %1230 = vst [vmem:[%s17147_s27 + $0xe70] sm:$0xff] %v1229_v14  ;;  %1232 = vst [vmem:[%s17147_s27 + $0xe78] sm:$0xff] %v1231_v15  ;;  %v1235_v17 = vld [vmem:[%s17142_s26 + $0x1d08] sm:$0xff]  ;;  %v1237_v18 = vld [vmem:[%s17142_s26 + $0x1d10] sm:$0xff] }
  0xfd   : > { %1234 = vst [vmem:[%s17147_s27 + $0xe80] sm:$0xff] %v1233_v16  ;;  %v1239_v19 = vld [vmem:[%s17142_s26 + $0x1d18] sm:$0xff]  ;;  %1236 = vst [vmem:[%s17147_s27 + $0xe88] sm:$0xff] %v1235_v17  ;;  %v1241_v20 = vld [vmem:[%s17142_s26 + $0x1d20] sm:$0xff] }
  0xfe   : > { %1238 = vst [vmem:[%s17147_s27 + $0xe90] sm:$0xff] %v1237_v18  ;;  %1240 = vst [vmem:[%s17147_s27 + $0xe98] sm:$0xff] %v1239_v19  ;;  %v1243_v21 = vld [vmem:[%s17142_s26 + $0x1d28] sm:$0xff]  ;;  %v1245_v22 = vld [vmem:[%s17142_s26 + $0x1d30] sm:$0xff] }
  0xff   : > { %1242 = vst [vmem:[%s17147_s27 + $0xea0] sm:$0xff] %v1241_v20  ;;  %1244 = vst [vmem:[%s17147_s27 + $0xea8] sm:$0xff] %v1243_v21  ;;  %v1247_v23 = vld [vmem:[%s17142_s26 + $0x1d38] sm:$0xff]  ;;  %v1249_v24 = vld [vmem:[%s17142_s26 + $0x1d80] sm:$0xff] }
 0x100   : > { %1246 = vst [vmem:[%s17147_s27 + $0xeb0] sm:$0xff] %v1245_v22  ;;  %v1251_v25 = vld [vmem:[%s17142_s26 + $0x1d88] sm:$0xff]  ;;  %1248 = vst [vmem:[%s17147_s27 + $0xeb8] sm:$0xff] %v1247_v23  ;;  %v1253_v26 = vld [vmem:[%s17142_s26 + $0x1d90] sm:$0xff] }
 0x101   : > { %1250 = vst [vmem:[%s17147_s27 + $0xec0] sm:$0xff] %v1249_v24  ;;  %1252 = vst [vmem:[%s17147_s27 + $0xec8] sm:$0xff] %v1251_v25  ;;  %v1255_v27 = vld [vmem:[%s17142_s26 + $0x1d98] sm:$0xff]  ;;  %v1257_v28 = vld [vmem:[%s17142_s26 + $0x1da0] sm:$0xff] }
 0x102   : > { %1254 = vst [vmem:[%s17147_s27 + $0xed0] sm:$0xff] %v1253_v26  ;;  %1256 = vst [vmem:[%s17147_s27 + $0xed8] sm:$0xff] %v1255_v27  ;;  %v1259_v29 = vld [vmem:[%s17142_s26 + $0x1da8] sm:$0xff]  ;;  %v1261_v30 = vld [vmem:[%s17142_s26 + $0x1db0] sm:$0xff] }
 0x103   : > { %1258 = vst [vmem:[%s17147_s27 + $0xee0] sm:$0xff] %v1257_v28  ;;  %v1263_v31 = vld [vmem:[%s17142_s26 + $0x1db8] sm:$0xff]  ;;  %1260 = vst [vmem:[%s17147_s27 + $0xee8] sm:$0xff] %v1259_v29  ;;  %v1265_v32 = vld [vmem:[%s17142_s26 + $0x1e00] sm:$0xff] }
 0x104   : > { %1262 = vst [vmem:[%s17147_s27 + $0xef0] sm:$0xff] %v1261_v30  ;;  %1264 = vst [vmem:[%s17147_s27 + $0xef8] sm:$0xff] %v1263_v31  ;;  %v1267_v33 = vld [vmem:[%s17142_s26 + $0x1e08] sm:$0xff]  ;;  %v1269_v34 = vld [vmem:[%s17142_s26 + $0x1e10] sm:$0xff] }
 0x105   : > { %1266 = vst [vmem:[%s17147_s27 + $0xf00] sm:$0xff] %v1265_v32  ;;  %1268 = vst [vmem:[%s17147_s27 + $0xf08] sm:$0xff] %v1267_v33  ;;  %v1271_v35 = vld [vmem:[%s17142_s26 + $0x1e18] sm:$0xff]  ;;  %v1273_v36 = vld [vmem:[%s17142_s26 + $0x1e20] sm:$0xff] }
 0x106   : > { %1270 = vst [vmem:[%s17147_s27 + $0xf10] sm:$0xff] %v1269_v34  ;;  %v1275_v37 = vld [vmem:[%s17142_s26 + $0x1e28] sm:$0xff]  ;;  %1272 = vst [vmem:[%s17147_s27 + $0xf18] sm:$0xff] %v1271_v35  ;;  %v1277_v38 = vld [vmem:[%s17142_s26 + $0x1e30] sm:$0xff] }
 0x107   : > { %1274 = vst [vmem:[%s17147_s27 + $0xf20] sm:$0xff] %v1273_v36  ;;  %1276 = vst [vmem:[%s17147_s27 + $0xf28] sm:$0xff] %v1275_v37  ;;  %v1279_v39 = vld [vmem:[%s17142_s26 + $0x1e38] sm:$0xff]  ;;  %v1281_v40 = vld [vmem:[%s17142_s26 + $0x1e80] sm:$0xff] }
 0x108   : > { %1278 = vst [vmem:[%s17147_s27 + $0xf30] sm:$0xff] %v1277_v38  ;;  %1280 = vst [vmem:[%s17147_s27 + $0xf38] sm:$0xff] %v1279_v39  ;;  %v1283_v41 = vld [vmem:[%s17142_s26 + $0x1e88] sm:$0xff]  ;;  %v1285_v42 = vld [vmem:[%s17142_s26 + $0x1e90] sm:$0xff] }
 0x109   : > { %1282 = vst [vmem:[%s17147_s27 + $0xf40] sm:$0xff] %v1281_v40  ;;  %v1287_v43 = vld [vmem:[%s17142_s26 + $0x1e98] sm:$0xff]  ;;  %1284 = vst [vmem:[%s17147_s27 + $0xf48] sm:$0xff] %v1283_v41  ;;  %v1289_v44 = vld [vmem:[%s17142_s26 + $0x1ea0] sm:$0xff] }
 0x10a   : > { %1286 = vst [vmem:[%s17147_s27 + $0xf50] sm:$0xff] %v1285_v42  ;;  %1288 = vst [vmem:[%s17147_s27 + $0xf58] sm:$0xff] %v1287_v43  ;;  %v1291_v45 = vld [vmem:[%s17142_s26 + $0x1ea8] sm:$0xff]  ;;  %v1293_v46 = vld [vmem:[%s17142_s26 + $0x1eb0] sm:$0xff] }
 0x10b   : > { %1290 = vst [vmem:[%s17147_s27 + $0xf60] sm:$0xff] %v1289_v44  ;;  %1292 = vst [vmem:[%s17147_s27 + $0xf68] sm:$0xff] %v1291_v45  ;;  %v1295_v47 = vld [vmem:[%s17142_s26 + $0x1eb8] sm:$0xff]  ;;  %v1297_v48 = vld [vmem:[%s17142_s26 + $0x1f00] sm:$0xff] }
 0x10c   : > { %1294 = vst [vmem:[%s17147_s27 + $0xf70] sm:$0xff] %v1293_v46  ;;  %v1299_v49 = vld [vmem:[%s17142_s26 + $0x1f08] sm:$0xff]  ;;  %1296 = vst [vmem:[%s17147_s27 + $0xf78] sm:$0xff] %v1295_v47  ;;  %v1301_v50 = vld [vmem:[%s17142_s26 + $0x1f10] sm:$0xff] }
 0x10d   : > { %1298 = vst [vmem:[%s17147_s27 + $0xf80] sm:$0xff] %v1297_v48  ;;  %1300 = vst [vmem:[%s17147_s27 + $0xf88] sm:$0xff] %v1299_v49  ;;  %v1303_v51 = vld [vmem:[%s17142_s26 + $0x1f18] sm:$0xff]  ;;  %v1305_v52 = vld [vmem:[%s17142_s26 + $0x1f20] sm:$0xff] }
 0x10e   : > { %1302 = vst [vmem:[%s17147_s27 + $0xf90] sm:$0xff] %v1301_v50  ;;  %1304 = vst [vmem:[%s17147_s27 + $0xf98] sm:$0xff] %v1303_v51  ;;  %v1307_v53 = vld [vmem:[%s17142_s26 + $0x1f28] sm:$0xff]  ;;  %v1309_v54 = vld [vmem:[%s17142_s26 + $0x1f30] sm:$0xff] }
 0x10f   : > { %1306 = vst [vmem:[%s17147_s27 + $0xfa0] sm:$0xff] %v1305_v52  ;;  %v1311_v55 = vld [vmem:[%s17142_s26 + $0x1f38] sm:$0xff]  ;;  %1308 = vst [vmem:[%s17147_s27 + $0xfa8] sm:$0xff] %v1307_v53  ;;  %v1313_v56 = vld [vmem:[%s17142_s26 + $0x1f80] sm:$0xff] }
 0x110   : > { %1310 = vst [vmem:[%s17147_s27 + $0xfb0] sm:$0xff] %v1309_v54  ;;  %1312 = vst [vmem:[%s17147_s27 + $0xfb8] sm:$0xff] %v1311_v55  ;;  %v1315_v57 = vld [vmem:[%s17142_s26 + $0x1f88] sm:$0xff]  ;;  %v1317_v58 = vld [vmem:[%s17142_s26 + $0x1f90] sm:$0xff] }
 0x111   : > { %1314 = vst [vmem:[%s17147_s27 + $0xfc0] sm:$0xff] %v1313_v56  ;;  %1316 = vst [vmem:[%s17147_s27 + $0xfc8] sm:$0xff] %v1315_v57  ;;  %v1319_v59 = vld [vmem:[%s17142_s26 + $0x1f98] sm:$0xff]  ;;  %v1321_v60 = vld [vmem:[%s17142_s26 + $0x1fa0] sm:$0xff] }
 0x112   : > { %1318 = vst [vmem:[%s17147_s27 + $0xfd0] sm:$0xff] %v1317_v58  ;;  %v1323_v61 = vld [vmem:[%s17142_s26 + $0x1fa8] sm:$0xff]  ;;  %1320 = vst [vmem:[%s17147_s27 + $0xfd8] sm:$0xff] %v1319_v59  ;;  %v1325_v62 = vld [vmem:[%s17142_s26 + $0x1fb0] sm:$0xff] }
 0x113   : > { %1322 = vst [vmem:[%s17147_s27 + $0xfe0] sm:$0xff] %v1321_v60  ;;  %1324 = vst [vmem:[%s17147_s27 + $0xfe8] sm:$0xff] %v1323_v61  ;;  %v1327_v63 = vld [vmem:[%s17142_s26 + $0x1fb8] sm:$0xff] }
 0x114   : > { %1326 = vst [vmem:[%s17147_s27 + $0xff0] sm:$0xff] %v1325_v62  ;;  %1328 = vst [vmem:[%s17147_s27 + $0xff8] sm:$0xff] %v1327_v63 }
 0x115 PF: > { %p13689_p10 = scmp.ge.s32.totalorder %s17031_s12, 1  ;;  %p1341_p11 = scmp.lt.s32.totalorder %s17031_s12, 3 }
 0x117   : > { %p1342_p12 = pnand %p13689_p10, %p1341_p11 }
 0x118   : > { %s21734_s24 = sand.u32 (!%p1342_p12), 1, %s17023_s10   ;;  %s13692_s16 = sshll.u32 (!%p1342_p12), %s17108_s13, 4 }
 0x119   : > { %1345 = sbr.rel (%p1342_p12) target bundleno = 2588 (0xa1c), region = 75  ;;  %s13690_s25 = sshll.u32 (!%p1342_p12), %s21734_s24, 12 }
 0x11a   : > { %s21737_s26 = scalar_lea.vmem (!%p1342_p12), [#allocation2], %s13690_s25  ;;  %p1389_p13 = scmp.lt.s32.totalorder (!%p1342_p12), %s13692_s16, 31 }
 0x11b   : > { %s13691_s23 = sshll.u32 (!%p1342_p12), %s21734_s24, 5  ;;  %s17036_s21 = smov (!%p1342_p12), [#allocation3]  }
 0x11c   : > { %s22149_s25 = scalar_lea.vmem (!%p1342_p12), [#allocation3], %s13691_s23 }
 0x11d   : > { %s13609_s27 = sshll.u32 (!%p1342_p12), %s22149_s25, 4  ;;  %s13610_s27 = int_to_ptr.vmem [resolvable:$true] %s13609_s27 }
 0x11e   : > { %v15373_v0 = vld [vmem:[%s22407_s1 + $0xe4] ss:$16 sps:$4 sm:$0xff]   ;;  %v15377_v2 = vld [vmem:[%s22407_s1 + $0xe0] ss:$16 sps:$4 sm:$0xff]   ;;  %v2425_v36 = vlaneseq  ;;  %v17033_v37 = vmov 1966171168  }
 0x11f   : > { %v15375_v1 = vld [vmem:[%s22407_s1 + $0x2e4] ss:$16 sps:$4 sm:$0xff]   ;;  %7797 = vmatprep.subr.bf16.mxu0 %v15373_v0  ;;  %v15378_v3 = vld [vmem:[%s22407_s1 + $0x2e0] ss:$16 sps:$4 sm:$0xff]   ;;  %v2451_v38 = vunpack.c.l.s4 %v17033_v37  ;;  %vm9580_vm0 = vcmask 523264   ;;  %s22425_s16 = smov (!%p1389_p13, %s13692_s16), 31 }
 0x120   : > { %7838 = vmatprep.subr.bf16.mxu1 %v15375_v1  ;;  %v15379_v4 = vld [vmem:[%s22407_s1 + $0xc4] ss:$16 sps:$4 sm:$0xff]   ;;  %7798 = vmatpush1.bf16.msra.mxu0 %v15377_v2  ;;  %v15383_v6 = vld [vmem:[%s22407_s1 + $0xc0] ss:$16 sps:$4 sm:$0xff]   ;;  %v18289_v42 = vshrl.u32 %v2425_v36, 7  ;;  %s22033_s22 = scalar_lea.vmem %s22414_s8, %s22425_s16  ;;  %s13595_s16 = scalar_lea.sflag [#allocation4], %s21734_s24 }
 0x121   : > { %7839 = vmatpush1.bf16.msra.mxu1 %v15378_v3  ;;  %v15381_v5 = vld [vmem:[%s22407_s1 + $0x2c4] ss:$16 sps:$4 sm:$0xff]   ;;  %7799 = vmatprep.subr.bf16.mxu0 %v15379_v4  ;;  %v15384_v7 = vld [vmem:[%s22407_s1 + $0x2c0] ss:$16 sps:$4 sm:$0xff]   ;;  %v2452_v43 = vunpack.c.0.s8 %v2451_v38  ;;  %s16971_s17 = scalar_lea.vmem %s13610_s27, 512 }
 0x122   : > { %7840 = vmatprep.subr.bf16.mxu1 %v15381_v5  ;;  %v15385_v8 = vld [vmem:[%s22407_s1 + $0xa4] ss:$16 sps:$4 sm:$0xff]   ;;  %v15389_v10 = vld [vmem:[%s22407_s1 + $0xa0] ss:$16 sps:$4 sm:$0xff]   ;;  %p16972_p0 = scmp.ne.s32.totalorder %s13610_s27, %s16971_s17 }
 0x123   : > { %v15387_v9 = vld [vmem:[%s22407_s1 + $0x2a4] ss:$16 sps:$4 sm:$0xff]   ;;  %v15390_v11 = vld [vmem:[%s22407_s1 + $0x2a0] ss:$16 sps:$4 sm:$0xff]   ;;  %v18307_v49 = vsub.s32 %v2452_v43, %v18289_v42 }
 0x124   : > { %7800 = vmatpush1.bf16.msra.mxu0 %v15383_v6  ;;  %v15391_v12 = vld [vmem:[%s22407_s1 + $0x84] ss:$16 sps:$4 sm:$0xff]   ;;  %v15395_v14 = vld [vmem:[%s22407_s1 + $0x80] ss:$16 sps:$4 sm:$0xff]   ;;  %p16973_p1 = pnand %p16972_p0, %p17126_p6 }
 0x125   : > { %7841 = vmatpush1.bf16.msra.mxu1 %v15384_v7  ;;  %7801 = vmatprep.subr.bf16.mxu0 %v15385_v8  ;;  %v15393_v13 = vld [vmem:[%s22407_s1 + $0x284] ss:$16 sps:$4 sm:$0xff]   ;;  %v15396_v15 = vld [vmem:[%s22407_s1 + $0x280] ss:$16 sps:$4 sm:$0xff]  }
 0x126   : > { %7842 = vmatprep.subr.bf16.mxu1 %v15387_v9  ;;  %v15397_v16 = vld [vmem:[%s22407_s1 + $0x64] ss:$16 sps:$4 sm:$0xff]   ;;  %v15401_v18 = vld [vmem:[%s22407_s1 + $0x60] ss:$16 sps:$4 sm:$0xff]   ;;  %p16974_p2 = pneg %p16973_p1 }
 0x127   : > { %v15399_v17 = vld [vmem:[%s22407_s1 + $0x264] ss:$16 sps:$4 sm:$0xff]   ;;  %v15402_v19 = vld [vmem:[%s22407_s1 + $0x260] ss:$16 sps:$4 sm:$0xff]  }
 0x128   : > { %7802 = vmatpush1.bf16.msra.mxu0 %v15389_v10  ;;  %v15403_v20 = vld [vmem:[%s22407_s1 + $0x44] ss:$16 sps:$4 sm:$0xff]   ;;  %v15407_v22 = vld [vmem:[%s22407_s1 + $0x40] ss:$16 sps:$4 sm:$0xff]  }
 0x129   : > { %7843 = vmatpush1.bf16.msra.mxu1 %v15390_v11  ;;  %7803 = vmatprep.subr.bf16.mxu0 %v15391_v12  ;;  %v15405_v21 = vld [vmem:[%s22407_s1 + $0x244] ss:$16 sps:$4 sm:$0xff]   ;;  %v15408_v23 = vld [vmem:[%s22407_s1 + $0x240] ss:$16 sps:$4 sm:$0xff]  }
 0x12a   : > { %7844 = vmatprep.subr.bf16.mxu1 %v15393_v13  ;;  %v15409_v24 = vld [vmem:[%s22407_s1 + $0x24] ss:$16 sps:$4 sm:$0xff]   ;;  %v15413_v26 = vld [vmem:[%s22407_s1 + $0x20] ss:$16 sps:$4 sm:$0xff]  }
 0x12b   : > { %v15411_v25 = vld [vmem:[%s22407_s1 + $0x224] ss:$16 sps:$4 sm:$0xff]   ;;  %v15414_v27 = vld [vmem:[%s22407_s1 + $0x220] ss:$16 sps:$4 sm:$0xff]  }
 0x12c   : > { %7804 = vmatpush1.bf16.msra.mxu0 %v15395_v14  ;;  %v15415_v28 = vld [vmem:[%s22407_s1 + $0x4] ss:$16 sps:$4 sm:$0xff]   ;;  %v15419_v30 = vld [vmem:[%s22407_s1] ss:$16 sps:$4 sm:$0xff]  }
 0x12d   : > { %7845 = vmatpush1.bf16.msra.mxu1 %v15396_v15  ;;  %7805 = vmatprep.subr.bf16.mxu0 %v15397_v16  ;;  %v15417_v29 = vld [vmem:[%s22407_s1 + $0x204] ss:$16 sps:$4 sm:$0xff]   ;;  %v15420_v31 = vld [vmem:[%s22407_s1 + $0x200] ss:$16 sps:$4 sm:$0xff]  }
 0x12e   : > { %7846 = vmatprep.subr.bf16.mxu1 %v15399_v17  ;;  %v15421_v32 = vld [vmem:[%s22407_s1 + $0x1e4] ss:$16 sps:$4 sm:$0xff]   ;;  %v15425_v34 = vld [vmem:[%s22407_s1 + $0x1e0] ss:$16 sps:$4 sm:$0xff]  }
 0x12f   : > { %v15423_v33 = vld [vmem:[%s22407_s1 + $0x3e4] ss:$16 sps:$4 sm:$0xff]   ;;  %v15426_v35 = vld [vmem:[%s22407_s1 + $0x3e0] ss:$16 sps:$4 sm:$0xff]  }
 0x130   : > { %7806 = vmatpush1.bf16.msra.mxu0 %v15401_v18  ;;  %v15427_v39 = vld [vmem:[%s22407_s1 + $0x1c4] ss:$16 sps:$4 sm:$0xff]   ;;  %v15431_v41 = vld [vmem:[%s22407_s1 + $0x1c0] ss:$16 sps:$4 sm:$0xff]  }
 0x131   : > { %7847 = vmatpush1.bf16.msra.mxu1 %v15402_v19  ;;  %7807 = vmatprep.subr.bf16.mxu0 %v15403_v20  ;;  %v15429_v40 = vld [vmem:[%s22407_s1 + $0x3c4] ss:$16 sps:$4 sm:$0xff]   ;;  %v15432_v44 = vld [vmem:[%s22407_s1 + $0x3c0] ss:$16 sps:$4 sm:$0xff]  }
 0x132   : > { %7848 = vmatprep.subr.bf16.mxu1 %v15405_v21  ;;  %v15433_v45 = vld [vmem:[%s22407_s1 + $0x1a4] ss:$16 sps:$4 sm:$0xff]   ;;  %v15437_v47 = vld [vmem:[%s22407_s1 + $0x1a0] ss:$16 sps:$4 sm:$0xff]  }
 0x133   : > { %v15435_v46 = vld [vmem:[%s22407_s1 + $0x3a4] ss:$16 sps:$4 sm:$0xff]   ;;  %v15438_v48 = vld [vmem:[%s22407_s1 + $0x3a0] ss:$16 sps:$4 sm:$0xff]  }
 0x134   : > { %7808 = vmatpush1.bf16.msra.mxu0 %v15407_v22  ;;  %v15439_v50 = vld [vmem:[%s22407_s1 + $0x184] ss:$16 sps:$4 sm:$0xff]   ;;  %v15443_v53 = vld [vmem:[%s22407_s1 + $0x180] ss:$16 sps:$4 sm:$0xff]  }
 0x135   : > { %7849 = vmatpush1.bf16.msra.mxu1 %v15408_v23  ;;  %7809 = vmatprep.subr.bf16.mxu0 %v15409_v24  ;;  %v15441_v51 = vld [vmem:[%s22407_s1 + $0x384] ss:$16 sps:$4 sm:$0xff]   ;;  %v15444_v55 = vld [vmem:[%s22407_s1 + $0x380] ss:$16 sps:$4 sm:$0xff]  }
 0x136   : > { %7850 = vmatprep.subr.bf16.mxu1 %v15411_v25  ;;  %v1395_v52 = vld [vmem:[%s22406_s0] sm:$0xff] }
 0x137   : > { %v2456_v54 = vrot.slane %v1395_v52, %v18307_v49  ;;  %v15445_v56 = vld [vmem:[%s22407_s1 + $0x164] ss:$16 sps:$4 sm:$0xff]   ;;  %v15449_v59 = vld [vmem:[%s22407_s1 + $0x160] ss:$16 sps:$4 sm:$0xff]   ;;  %v2449_v1 = vcombine.high %v1395_v52, %v1395_v52 }
 0x138   : > { %7810 = vmatpush1.bf16.msra.mxu0 %v15413_v26  ;;  %v15447_v57 = vld [vmem:[%s22407_s1 + $0x364] ss:$16 sps:$4 sm:$0xff]   ;;  %v15450_v61 = vld [vmem:[%s22407_s1 + $0x360] ss:$16 sps:$4 sm:$0xff]  }
 0x139   : > { %7851 = vmatpush1.bf16.msra.mxu1 %v15414_v27  ;;  %7811 = vmatprep.subr.bf16.mxu0 %v15415_v28  ;;  %v2464_v58 = vcombine.high %v2456_v54, %v2456_v54  ;;  %v15451_v62 = vld [vmem:[%s22407_s1 + $0x144] ss:$16 sps:$4 sm:$0xff]   ;;  %v15455_v2 = vld [vmem:[%s22407_s1 + $0x140] ss:$16 sps:$4 sm:$0xff]   ;;  %v18365_v6 = vrot.slane %v2449_v1, %v18307_v49  ;;  %v18385_v13 = vrot.slane %v2456_v54, %v18307_v49 }
 0x13a   : > { %7852 = vmatprep.subr.bf16.mxu1 %v15417_v29  ;;  %v15453_v63 = vld [vmem:[%s22407_s1 + $0x344] ss:$16 sps:$4 sm:$0xff]   ;;  %v15456_v3 = vld [vmem:[%s22407_s1 + $0x340] ss:$16 sps:$4 sm:$0xff]  }
 0x13b   : > { %v18335_v60 = vrot.slane %v2464_v58, %v18307_v49  ;;  %v15457_v4 = vld [vmem:[%s22407_s1 + $0x124] ss:$16 sps:$4 sm:$0xff]   ;;  %v15461_v7 = vld [vmem:[%s22407_s1 + $0x120] ss:$16 sps:$4 sm:$0xff]   ;;  %v2465_v11 = vcombine.high %v18365_v6, %v18365_v6  ;;  %v18401_v18 = vcombine.high %v18385_v13, %v18385_v13 }
 0x13c   : > { %7812 = vmatpush1.bf16.msra.mxu0 %v15419_v30  ;;  %v15459_v5 = vld [vmem:[%s22407_s1 + $0x324] ss:$16 sps:$4 sm:$0xff]   ;;  %v15462_v8 = vld [vmem:[%s22407_s1 + $0x320] ss:$16 sps:$4 sm:$0xff]  }
 0x13d   : > { %7853 = vmatpush1.bf16.msra.mxu1 %v15420_v31  ;;  %7813 = vmatprep.subr.bf16.mxu0 %v15421_v32  ;;  %v18348_v0 = vcombine.high %v18335_v60, %v18335_v60  ;;  %v15463_v9 = vld [vmem:[%s22407_s1 + $0x104] ss:$16 sps:$4 sm:$0xff]   ;;  %v15467_v12 = vld [vmem:[%s22407_s1 + $0x100] ss:$16 sps:$4 sm:$0xff]   ;;  %v18397_v17 = vrot.slane %v2465_v11, %v18307_v49 }
 0x13e   : > { %7854 = vmatprep.subr.bf16.mxu1 %v15423_v33  ;;  %7829 = vmatprep.mubr.bf16.mxu0 %v18335_v60  ;;  %v15465_v10 = vld [vmem:[%s22407_s1 + $0x304] ss:$16 sps:$4 sm:$0xff]   ;;  %v15468_v14 = vld [vmem:[%s22407_s1 + $0x300] ss:$16 sps:$4 sm:$0xff]  }
 0x13f   : > { %7870 = vmatprep.mubr.bf16.mxu1 %v18348_v0  ;;  %v15471_v15 = vld [vmem:[%s22407_s1 + $0x4e4] ss:$16 sps:$4 sm:$0xff]   ;;  %v15469_v19 = vld [vmem:[%s22407_s1 + $0x4e0] ss:$16 sps:$4 sm:$0xff]   ;;  %v18417_v23 = vcombine.high %v18397_v17, %v18397_v17 }
 0x140   : > { %7814 = vmatpush2.bf16.msra.mxu0 %v15425_v34  ;;  %v15474_v16 = vld [vmem:[%s22407_s1 + $0x6e4] ss:$16 sps:$4 sm:$0xff]   ;;  %v15472_v20 = vld [vmem:[%s22407_s1 + $0x6e0] ss:$16 sps:$4 sm:$0xff]  }
 0x141   : > { %7855 = vmatpush2.bf16.msra.mxu1 %v15426_v35  ;;  %7815 = vmatprep.subr.bf16.mxu0 %v15427_v39  ;;  %v15477_v21 = vld [vmem:[%s22407_s1 + $0x4c4] ss:$16 sps:$4 sm:$0xff]   ;;  %v15475_v24 = vld [vmem:[%s22407_s1 + $0x4c0] ss:$16 sps:$4 sm:$0xff]  }
 0x142   : > { %7856 = vmatprep.subr.bf16.mxu1 %v15429_v40  ;;  %v15480_v22 = vld [vmem:[%s22407_s1 + $0x6c4] ss:$16 sps:$4 sm:$0xff]   ;;  %v15478_v25 = vld [vmem:[%s22407_s1 + $0x6c0] ss:$16 sps:$4 sm:$0xff]  }
 0x143   : > { %v15483_v26 = vld [vmem:[%s22407_s1 + $0x4a4] ss:$16 sps:$4 sm:$0xff]   ;;  %v15481_v28 = vld [vmem:[%s22407_s1 + $0x4a0] ss:$16 sps:$4 sm:$0xff]  }
 0x144   : > { %7816 = vmatpush2.bf16.msra.mxu0 %v15431_v41  ;;  %v15486_v27 = vld [vmem:[%s22407_s1 + $0x6a4] ss:$16 sps:$4 sm:$0xff]   ;;  %v15484_v29 = vld [vmem:[%s22407_s1 + $0x6a0] ss:$16 sps:$4 sm:$0xff]  }
 0x145   : > { %7857 = vmatpush2.bf16.msra.mxu1 %v15432_v44  ;;  %7817 = vmatprep.subr.bf16.mxu0 %v15433_v45  ;;  %v15489_v30 = vld [vmem:[%s22407_s1 + $0x484] ss:$16 sps:$4 sm:$0xff]   ;;  %v15487_v32 = vld [vmem:[%s22407_s1 + $0x480] ss:$16 sps:$4 sm:$0xff]  }
 0x146   : > { %7858 = vmatprep.subr.bf16.mxu1 %v15435_v46  ;;  %v15492_v31 = vld [vmem:[%s22407_s1 + $0x684] ss:$16 sps:$4 sm:$0xff]   ;;  %v15490_v33 = vld [vmem:[%s22407_s1 + $0x680] ss:$16 sps:$4 sm:$0xff]  }
 0x147   : > { %v15495_v34 = vld [vmem:[%s22407_s1 + $0x464] ss:$16 sps:$4 sm:$0xff]   ;;  %v15493_v36 = vld [vmem:[%s22407_s1 + $0x460] ss:$16 sps:$4 sm:$0xff]  }
 0x148   : > { %7818 = vmatpush2.bf16.msra.mxu0 %v15437_v47  ;;  %v15498_v35 = vld [vmem:[%s22407_s1 + $0x664] ss:$16 sps:$4 sm:$0xff]   ;;  %v15496_v37 = vld [vmem:[%s22407_s1 + $0x660] ss:$16 sps:$4 sm:$0xff]  }
 0x149   : > { %7859 = vmatpush2.bf16.msra.mxu1 %v15438_v48  ;;  %7819 = vmatprep.subr.bf16.mxu0 %v15439_v50  ;;  %v15501_v38 = vld [vmem:[%s22407_s1 + $0x444] ss:$16 sps:$4 sm:$0xff]   ;;  %v15499_v40 = vld [vmem:[%s22407_s1 + $0x440] ss:$16 sps:$4 sm:$0xff]  }
 0x14a   : > { %7860 = vmatprep.subr.bf16.mxu1 %v15441_v51  ;;  %v15504_v39 = vld [vmem:[%s22407_s1 + $0x644] ss:$16 sps:$4 sm:$0xff]   ;;  %v15502_v41 = vld [vmem:[%s22407_s1 + $0x640] ss:$16 sps:$4 sm:$0xff]  }
 0x14b   : > { %v15507_v43 = vld [vmem:[%s22407_s1 + $0x424] ss:$16 sps:$4 sm:$0xff]   ;;  %v15505_v45 = vld [vmem:[%s22407_s1 + $0x420] ss:$16 sps:$4 sm:$0xff]  }
 0x14c   : > { %7820 = vmatpush2.bf16.msra.mxu0 %v15443_v53  ;;  %v15510_v44 = vld [vmem:[%s22407_s1 + $0x624] ss:$16 sps:$4 sm:$0xff]   ;;  %v15508_v46 = vld [vmem:[%s22407_s1 + $0x620] ss:$16 sps:$4 sm:$0xff]  }
 0x14d   : > { %7861 = vmatpush2.bf16.msra.mxu1 %v15444_v55  ;;  %7821 = vmatprep.subr.bf16.mxu0 %v15445_v56  ;;  %v15513_v47 = vld [vmem:[%s22407_s1 + $0x404] ss:$16 sps:$4 sm:$0xff]   ;;  %v15511_v50 = vld [vmem:[%s22407_s1 + $0x400] ss:$16 sps:$4 sm:$0xff]  }
 0x14e   : > { %7862 = vmatprep.subr.bf16.mxu1 %v15447_v57  ;;  %v15516_v48 = vld [vmem:[%s22407_s1 + $0x604] ss:$16 sps:$4 sm:$0xff]   ;;  %v15514_v51 = vld [vmem:[%s22407_s1 + $0x600] ss:$16 sps:$4 sm:$0xff]  }
 0x14f   : > { %v15519_v52 = vld [vmem:[%s22407_s1 + $0x5e4] ss:$16 sps:$4 sm:$0xff]   ;;  %v15517_v54 = vld [vmem:[%s22407_s1 + $0x5e0] ss:$16 sps:$4 sm:$0xff]  }
 0x150   : > { %7822 = vmatpush2.bf16.msra.mxu0 %v15449_v59  ;;  %v15522_v53 = vld [vmem:[%s22407_s1 + $0x7e4] ss:$16 sps:$4 sm:$0xff]   ;;  %v15520_v55 = vld [vmem:[%s22407_s1 + $0x7e0] ss:$16 sps:$4 sm:$0xff]  }
 0x151   : > { %7863 = vmatpush2.bf16.msra.mxu1 %v15450_v61  ;;  %7823 = vmatprep.subr.bf16.mxu0 %v15451_v62  ;;  %v15525_v56 = vld [vmem:[%s22407_s1 + $0x5c4] ss:$16 sps:$4 sm:$0xff]   ;;  %v15523_v58 = vld [vmem:[%s22407_s1 + $0x5c0] ss:$16 sps:$4 sm:$0xff]  }
 0x152   : > { %7864 = vmatprep.subr.bf16.mxu1 %v15453_v63  ;;  %v15528_v57 = vld [vmem:[%s22407_s1 + $0x7c4] ss:$16 sps:$4 sm:$0xff]   ;;  %v15526_v59 = vld [vmem:[%s22407_s1 + $0x7c0] ss:$16 sps:$4 sm:$0xff]  }
 0x153   : > { %v15531_v61 = vld [vmem:[%s22407_s1 + $0x5a4] ss:$16 sps:$4 sm:$0xff]   ;;  %v15529_v63 = vld [vmem:[%s22407_s1 + $0x5a0] ss:$16 sps:$4 sm:$0xff]  }
 0x154   : > { %7824 = vmatpush2.bf16.msra.mxu0 %v15455_v2  ;;  %v15534_v62 = vld [vmem:[%s22407_s1 + $0x7a4] ss:$16 sps:$4 sm:$0xff]   ;;  %v15532_v1 = vld [vmem:[%s22407_s1 + $0x7a0] ss:$16 sps:$4 sm:$0xff]  }
 0x155   : > { %7865 = vmatpush2.bf16.msra.mxu1 %v15456_v3  ;;  %7825 = vmatprep.subr.bf16.mxu0 %v15457_v4  ;;  %v15537_v2 = vld [vmem:[%s22407_s1 + $0x584] ss:$16 sps:$4 sm:$0xff]   ;;  %v15535_v4 = vld [vmem:[%s22407_s1 + $0x580] ss:$16 sps:$4 sm:$0xff]  }
 0x156   : > { %7866 = vmatprep.subr.bf16.mxu1 %v15459_v5  ;;  %v15540_v3 = vld [vmem:[%s22407_s1 + $0x784] ss:$16 sps:$4 sm:$0xff]   ;;  %v15538_v5 = vld [vmem:[%s22407_s1 + $0x780] ss:$16 sps:$4 sm:$0xff]  }
 0x157   : > { %v15549_v11 = vld [vmem:[%s22407_s1 + $0x544] ss:$16 sps:$4 sm:$0xff]  }
 0x158   : > { %7826 = vmatpush2.bf16.msra.mxu0 %v15461_v7  ;;  %v15543_v7 = vld [vmem:[%s22407_s1 + $0x564] ss:$16 sps:$4 sm:$0xff]  }
 0x159   : > { %7867 = vmatpush2.bf16.msra.mxu1 %v15462_v8  ;;  %7827 = vmatprep.subr.bf16.mxu0 %v15463_v9  ;;  %v15546_v8 = vld [vmem:[%s22407_s1 + $0x764] ss:$16 sps:$4 sm:$0xff]   ;;  %v15541_v9 = vld [vmem:[%s22407_s1 + $0x560] ss:$16 sps:$4 sm:$0xff]  }
 0x15a   : > { %7868 = vmatprep.subr.bf16.mxu1 %v15465_v10  ;;  %v15544_v10 = vld [vmem:[%s22407_s1 + $0x760] ss:$16 sps:$4 sm:$0xff]  }
 0x15c   : > { %7828 = vmatpush2.bf16.msra.mxu0 %v15467_v12  ;;  %v15552_v12 = vld [vmem:[%s22407_s1 + $0x744] ss:$16 sps:$4 sm:$0xff]  }
 0x15d   : > { %7869 = vmatpush2.bf16.msra.mxu1 %v15468_v14  ;;  %7879 = vmatprep.subr.bf16.mxu0 %v15471_v15  ;;  %v15547_v14 = vld [vmem:[%s22407_s1 + $0x540] ss:$16 sps:$4 sm:$0xff]  }
 0x15e   : > { %7920 = vmatprep.subr.bf16.mxu1 %v15474_v16  ;;  %v15550_v15 = vld [vmem:[%s22407_s1 + $0x740] ss:$16 sps:$4 sm:$0xff]   ;;  %v15555_v16 = vld [vmem:[%s22407_s1 + $0x524] ss:$16 sps:$4 sm:$0xff]  }
 0x15f   : > { %7830 = vmatmul.mubr.bf16.vlgmr.msra.gmra.mxu0 %v18385_v13 }
 0x160   : > { %7871 = vmatmul.mubr.bf16.vlgmr.msra.gmra.mxu1 %v18401_v18  ;;  %7880 = vmatpush1.bf16.msra.mxu0 %v15469_v19  ;;  %v15558_v19 = vld [vmem:[%s22407_s1 + $0x724] ss:$16 sps:$4 sm:$0xff]  }
 0x161   : > { %7921 = vmatpush1.bf16.msra.mxu1 %v15472_v20  ;;  %7881 = vmatprep.subr.bf16.mxu0 %v15477_v21  ;;  %v15553_v20 = vld [vmem:[%s22407_s1 + $0x520] ss:$16 sps:$4 sm:$0xff]  }
 0x162   : > { %7922 = vmatprep.subr.bf16.mxu1 %v15480_v22  ;;  %7911 = vmatprep.mubr.bf16.mxu0 %v18397_v17  ;;  %v15556_v21 = vld [vmem:[%s22407_s1 + $0x720] ss:$16 sps:$4 sm:$0xff]   ;;  %v15561_v22 = vld [vmem:[%s22407_s1 + $0x504] ss:$16 sps:$4 sm:$0xff]  }
 0x163   : > { %7952 = vmatprep.mubr.bf16.mxu1 %v18417_v23 }
 0x164   : > { %7882 = vmatpush1.bf16.msra.mxu0 %v15475_v24  ;;  %v15564_v24 = vld [vmem:[%s22407_s1 + $0x704] ss:$16 sps:$4 sm:$0xff]  }
 0x165   : > { %7923 = vmatpush1.bf16.msra.mxu1 %v15478_v25  ;;  %7883 = vmatprep.subr.bf16.mxu0 %v15483_v26  ;;  %v15559_v25 = vld [vmem:[%s22407_s1 + $0x500] ss:$16 sps:$4 sm:$0xff]   ;;  %v18596_v26 = vrot.slane %v18365_v6, %v18307_v49 }
 0x166   : > { %7924 = vmatprep.subr.bf16.mxu1 %v15486_v27  ;;  %v15562_v27 = vld [vmem:[%s22407_s1 + $0x700] ss:$16 sps:$4 sm:$0xff]  }
 0x167   : > { %v18609_v6 = vcombine.high %v18596_v26, %v18596_v26 }
 0x168   : > { %7884 = vmatpush1.bf16.msra.mxu0 %v15481_v28  ;;  %v15568_v28 = vld [vmem:[%s22407_s1 + $0x8e4] ss:$16 sps:$4 sm:$0xff]  }
 0x169   : > { %7925 = vmatpush1.bf16.msra.mxu1 %v15484_v29  ;;  %7885 = vmatprep.subr.bf16.mxu0 %v15489_v30  ;;  %v15571_v29 = vld [vmem:[%s22407_s1 + $0xae4] ss:$16 sps:$4 sm:$0xff]   ;;  %v15566_v30 = vld [vmem:[%s22407_s1 + $0x8e0] ss:$16 sps:$4 sm:$0xff]  }
 0x16a   : > { %7926 = vmatprep.subr.bf16.mxu1 %v15492_v31  ;;  %v15569_v31 = vld [vmem:[%s22407_s1 + $0xae0] ss:$16 sps:$4 sm:$0xff]  }
 0x16c   : > { %7886 = vmatpush1.bf16.msra.mxu0 %v15487_v32  ;;  %v18620_v32 = vld [vmem:[%s22406_s0 + $0x8] sm:$0xff] }
 0x16d   : > { %7927 = vmatpush1.bf16.msra.mxu1 %v15490_v33  ;;  %7887 = vmatprep.subr.bf16.mxu0 %v15495_v34  ;;  %v15574_v33 = vld [vmem:[%s22407_s1 + $0x8c4] ss:$16 sps:$4 sm:$0xff]  }
 0x16e   : > { %7928 = vmatprep.subr.bf16.mxu1 %v15498_v35  ;;  %v15577_v34 = vld [vmem:[%s22407_s1 + $0xac4] ss:$16 sps:$4 sm:$0xff]   ;;  %v18630_v35 = vrot.slane %v18620_v32, %v18307_v49 }
 0x170   : > { %7888 = vmatpush1.bf16.msra.mxu0 %v15493_v36  ;;  %v2513_v36 = vcombine.high %v18630_v35, %v18630_v35 }
 0x171   : > { %7929 = vmatpush1.bf16.msra.mxu1 %v15496_v37  ;;  %7889 = vmatprep.subr.bf16.mxu0 %v15501_v38  ;;  %v15572_v37 = vld [vmem:[%s22407_s1 + $0x8c0] ss:$16 sps:$4 sm:$0xff]  }
 0x172   : > { %7930 = vmatprep.subr.bf16.mxu1 %v15504_v39  ;;  %v15575_v38 = vld [vmem:[%s22407_s1 + $0xac0] ss:$16 sps:$4 sm:$0xff]   ;;  %v15580_v39 = vld [vmem:[%s22407_s1 + $0x8a4] ss:$16 sps:$4 sm:$0xff]  }
 0x174   : > { %7890 = vmatpush1.bf16.msra.mxu0 %v15499_v40  ;;  %v15583_v40 = vld [vmem:[%s22407_s1 + $0xaa4] ss:$16 sps:$4 sm:$0xff]  }
 0x175   : > { %7931 = vmatpush1.bf16.msra.mxu1 %v15502_v41  ;;  %7891 = vmatprep.subr.bf16.mxu0 %v15507_v43  ;;  %v18649_v41 = vrot.slane %v2513_v36, %v18307_v49  ;;  %v15644_v36 = vld [vmem:[%s22407_s1 + $0x940] ss:$16 sps:$4 sm:$0xff]  }
 0x176   : > { %7932 = vmatprep.subr.bf16.mxu1 %v15510_v44  ;;  %v15578_v44 = vld [vmem:[%s22407_s1 + $0x8a0] ss:$16 sps:$4 sm:$0xff]  }
 0x177   : > { %v18654_v43 = vcombine.high %v18649_v41, %v18649_v41 }
 0x178   : > { %7892 = vmatpush1.bf16.msra.mxu0 %v15505_v45  ;;  %v15581_v45 = vld [vmem:[%s22407_s1 + $0xaa0] ss:$16 sps:$4 sm:$0xff]  }
 0x179   : > { %7933 = vmatpush1.bf16.msra.mxu1 %v15508_v46  ;;  %7893 = vmatprep.subr.bf16.mxu0 %v15513_v47  ;;  %v15586_v46 = vld [vmem:[%s22407_s1 + $0x884] ss:$16 sps:$4 sm:$0xff]  }
 0x17a   : > { %7934 = vmatprep.subr.bf16.mxu1 %v15516_v48  ;;  %v15589_v47 = vld [vmem:[%s22407_s1 + $0xa84] ss:$16 sps:$4 sm:$0xff]   ;;  %v15584_v48 = vld [vmem:[%s22407_s1 + $0x880] ss:$16 sps:$4 sm:$0xff]  }
 0x17c   : > { %7894 = vmatpush1.bf16.msra.mxu0 %v15511_v50  ;;  %v15587_v50 = vld [vmem:[%s22407_s1 + $0xa80] ss:$16 sps:$4 sm:$0xff]  }
 0x17d   : > { %7935 = vmatpush1.bf16.msra.mxu1 %v15514_v51  ;;  %7895 = vmatprep.subr.bf16.mxu0 %v15519_v52  ;;  %v15592_v51 = vld [vmem:[%s22407_s1 + $0x864] ss:$16 sps:$4 sm:$0xff]  }
 0x17e   : > { %7936 = vmatprep.subr.bf16.mxu1 %v15522_v53  ;;  %v15595_v52 = vld [vmem:[%s22407_s1 + $0xa64] ss:$16 sps:$4 sm:$0xff]   ;;  %v15590_v53 = vld [vmem:[%s22407_s1 + $0x860] ss:$16 sps:$4 sm:$0xff]  }
 0x180   : > { %7896 = vmatpush2.bf16.msra.mxu0 %v15517_v54  ;;  %v15593_v54 = vld [vmem:[%s22407_s1 + $0xa60] ss:$16 sps:$4 sm:$0xff]  }
 0x181   : > { %7937 = vmatpush2.bf16.msra.mxu1 %v15520_v55  ;;  %7897 = vmatprep.subr.bf16.mxu0 %v15525_v56  ;;  %v15598_v55 = vld [vmem:[%s22407_s1 + $0x844] ss:$16 sps:$4 sm:$0xff]  }
 0x182   : > { %7938 = vmatprep.subr.bf16.mxu1 %v15528_v57  ;;  %v15601_v56 = vld [vmem:[%s22407_s1 + $0xa44] ss:$16 sps:$4 sm:$0xff]   ;;  %v15596_v57 = vld [vmem:[%s22407_s1 + $0x840] ss:$16 sps:$4 sm:$0xff]  }
 0x184   : > { %7898 = vmatpush2.bf16.msra.mxu0 %v15523_v58  ;;  %v15599_v58 = vld [vmem:[%s22407_s1 + $0xa40] ss:$16 sps:$4 sm:$0xff]  }
 0x185   : > { %7939 = vmatpush2.bf16.msra.mxu1 %v15526_v59  ;;  %7899 = vmatprep.subr.bf16.mxu0 %v15531_v61  ;;  %v15604_v59 = vld [vmem:[%s22407_s1 + $0x824] ss:$16 sps:$4 sm:$0xff]  }
 0x186   : > { %7940 = vmatprep.subr.bf16.mxu1 %v15534_v62  ;;  %v15607_v61 = vld [vmem:[%s22407_s1 + $0xa24] ss:$16 sps:$4 sm:$0xff]   ;;  %v15602_v62 = vld [vmem:[%s22407_s1 + $0x820] ss:$16 sps:$4 sm:$0xff]  }
 0x188   : > { %7900 = vmatpush2.bf16.msra.mxu0 %v15529_v63  ;;  %v15605_v63 = vld [vmem:[%s22407_s1 + $0xa20] ss:$16 sps:$4 sm:$0xff]  }
 0x189   : > { %7941 = vmatpush2.bf16.msra.mxu1 %v15532_v1  ;;  %7901 = vmatprep.subr.bf16.mxu0 %v15537_v2  ;;  %v15610_v1 = vld [vmem:[%s22407_s1 + $0x804] ss:$16 sps:$4 sm:$0xff]  }
 0x18a   : > { %7942 = vmatprep.subr.bf16.mxu1 %v15540_v3  ;;  %v15613_v2 = vld [vmem:[%s22407_s1 + $0xa04] ss:$16 sps:$4 sm:$0xff]   ;;  %v15608_v3 = vld [vmem:[%s22407_s1 + $0x800] ss:$16 sps:$4 sm:$0xff]  }
 0x18c   : > { %7902 = vmatpush2.bf16.msra.mxu0 %v15535_v4  ;;  %v15611_v4 = vld [vmem:[%s22407_s1 + $0xa00] ss:$16 sps:$4 sm:$0xff]  }
 0x18d   : > { %7943 = vmatpush2.bf16.msra.mxu1 %v15538_v5  ;;  %7903 = vmatprep.subr.bf16.mxu0 %v15543_v7  ;;  %v15616_v5 = vld [vmem:[%s22407_s1 + $0x9e4] ss:$16 sps:$4 sm:$0xff]  }
 0x18e   : > { %7944 = vmatprep.subr.bf16.mxu1 %v15546_v8  ;;  %v15619_v7 = vld [vmem:[%s22407_s1 + $0xbe4] ss:$16 sps:$4 sm:$0xff]   ;;  %v15614_v8 = vld [vmem:[%s22407_s1 + $0x9e0] ss:$16 sps:$4 sm:$0xff]  }
 0x190   : > { %7904 = vmatpush2.bf16.msra.mxu0 %v15541_v9  ;;  %v15617_v9 = vld [vmem:[%s22407_s1 + $0xbe0] ss:$16 sps:$4 sm:$0xff]  }
 0x191   : > { %7945 = vmatpush2.bf16.msra.mxu1 %v15544_v10  ;;  %7905 = vmatprep.subr.bf16.mxu0 %v15549_v11  ;;  %v15622_v10 = vld [vmem:[%s22407_s1 + $0x9c4] ss:$16 sps:$4 sm:$0xff]  }
 0x192   : > { %7946 = vmatprep.subr.bf16.mxu1 %v15552_v12  ;;  %v15625_v11 = vld [vmem:[%s22407_s1 + $0xbc4] ss:$16 sps:$4 sm:$0xff]   ;;  %v15620_v12 = vld [vmem:[%s22407_s1 + $0x9c0] ss:$16 sps:$4 sm:$0xff]  }
 0x194   : > { %7906 = vmatpush2.bf16.msra.mxu0 %v15547_v14  ;;  %v15623_v14 = vld [vmem:[%s22407_s1 + $0xbc0] ss:$16 sps:$4 sm:$0xff]  }
 0x195   : > { %7947 = vmatpush2.bf16.msra.mxu1 %v15550_v15  ;;  %7907 = vmatprep.subr.bf16.mxu0 %v15555_v16  ;;  %v15628_v15 = vld [vmem:[%s22407_s1 + $0x9a4] ss:$16 sps:$4 sm:$0xff]  }
 0x196   : > { %7948 = vmatprep.subr.bf16.mxu1 %v15558_v19  ;;  %v15631_v16 = vld [vmem:[%s22407_s1 + $0xba4] ss:$16 sps:$4 sm:$0xff]   ;;  %v15626_v19 = vld [vmem:[%s22407_s1 + $0x9a0] ss:$16 sps:$4 sm:$0xff]  }
 0x198   : > { %7908 = vmatpush2.bf16.msra.mxu0 %v15553_v20  ;;  %v15629_v20 = vld [vmem:[%s22407_s1 + $0xba0] ss:$16 sps:$4 sm:$0xff]  }
 0x199   : > { %7949 = vmatpush2.bf16.msra.mxu1 %v15556_v21  ;;  %7909 = vmatprep.subr.bf16.mxu0 %v15561_v22  ;;  %v15634_v21 = vld [vmem:[%s22407_s1 + $0x984] ss:$16 sps:$4 sm:$0xff]  }
 0x19a   : > { %7950 = vmatprep.subr.bf16.mxu1 %v15564_v24  ;;  %v15637_v22 = vld [vmem:[%s22407_s1 + $0xb84] ss:$16 sps:$4 sm:$0xff]   ;;  %v15632_v24 = vld [vmem:[%s22407_s1 + $0x980] ss:$16 sps:$4 sm:$0xff]  }
 0x19c   : > { %7910 = vmatpush2.bf16.msra.mxu0 %v15559_v25  ;;  %v15635_v25 = vld [vmem:[%s22407_s1 + $0xb80] ss:$16 sps:$4 sm:$0xff]  }
 0x19d   : > { %7951 = vmatpush2.bf16.msra.mxu1 %v15562_v27  ;;  %7961 = vmatprep.subr.bf16.mxu0 %v15568_v28  ;;  %v15640_v27 = vld [vmem:[%s22407_s1 + $0x964] ss:$16 sps:$4 sm:$0xff]  }
 0x19e   : > { %8002 = vmatprep.subr.bf16.mxu1 %v15571_v29  ;;  %v15643_v28 = vld [vmem:[%s22407_s1 + $0xb64] ss:$16 sps:$4 sm:$0xff]   ;;  %v15638_v29 = vld [vmem:[%s22407_s1 + $0x960] ss:$16 sps:$4 sm:$0xff]  }
 0x19f   : > { %7912 = vmatmul.mubr.bf16.vlgmr.msra.gmra.mxu0 %v18596_v26 }
 0x1a0   : > { %7953 = vmatmul.mubr.bf16.vlgmr.msra.gmra.mxu1 %v18609_v6  ;;  %7962 = vmatpush1.bf16.msra.mxu0 %v15566_v30  ;;  %v15641_v30 = vld [vmem:[%s22407_s1 + $0xb60] ss:$16 sps:$4 sm:$0xff]  }
 0x1a1   : > { %8003 = vmatpush1.bf16.msra.mxu1 %v15569_v31  ;;  %7963 = vmatprep.subr.bf16.mxu0 %v15574_v33  ;;  %v15646_v31 = vld [vmem:[%s22407_s1 + $0x944] ss:$16 sps:$4 sm:$0xff]  }
 0x1a2   : > { %8004 = vmatprep.subr.bf16.mxu1 %v15577_v34  ;;  %7993 = vmatprep.mubr.bf16.mxu0 %v18649_v41  ;;  %v15649_v33 = vld [vmem:[%s22407_s1 + $0xb44] ss:$16 sps:$4 sm:$0xff]   ;;  %v2498_v34 = vcombine.high %v18620_v32, %v18620_v32 }
 0x1a3   : > { %8034 = vmatprep.mubr.bf16.mxu1 %v18654_v43  ;;  %v15655_v32 = vld [vmem:[%s22407_s1 + $0xb24] ss:$16 sps:$4 sm:$0xff]  }
 0x1a4   : > { %7964 = vmatpush1.bf16.msra.mxu0 %v15572_v37  ;;  %v15647_v37 = vld [vmem:[%s22407_s1 + $0xb40] ss:$16 sps:$4 sm:$0xff]  }
 0x1a5   : > { %8005 = vmatpush1.bf16.msra.mxu1 %v15575_v38  ;;  %7965 = vmatprep.subr.bf16.mxu0 %v15580_v39  ;;  %v15652_v38 = vld [vmem:[%s22407_s1 + $0x924] ss:$16 sps:$4 sm:$0xff]   ;;  %v18804_v39 = vrot.slane %v2498_v34, %v18307_v49  ;;  %v15713_v34 = vld [vmem:[%s22407_s1 + $0xfe0] ss:$16 sps:$4 sm:$0xff]  }
 0x1a6   : > { %8006 = vmatprep.subr.bf16.mxu1 %v15583_v40  ;;  %v15650_v40 = vld [vmem:[%s22407_s1 + $0x920] ss:$16 sps:$4 sm:$0xff]  }
 0x1a8   : > { %7966 = vmatpush1.bf16.msra.mxu0 %v15578_v44  ;;  %v15653_v44 = vld [vmem:[%s22407_s1 + $0xb20] ss:$16 sps:$4 sm:$0xff]  }
 0x1a9   : > { %8007 = vmatpush1.bf16.msra.mxu1 %v15581_v45  ;;  %7967 = vmatprep.subr.bf16.mxu0 %v15586_v46  ;;  %v15658_v45 = vld [vmem:[%s22407_s1 + $0x904] ss:$16 sps:$4 sm:$0xff]  }
 0x1aa   : > { %8008 = vmatprep.subr.bf16.mxu1 %v15589_v47  ;;  %v15661_v46 = vld [vmem:[%s22407_s1 + $0xb04] ss:$16 sps:$4 sm:$0xff]   ;;  %v2514_v47 = vcombine.high %v18804_v39, %v18804_v39 }
 0x1ac   : > { %7968 = vmatpush1.bf16.msra.mxu0 %v15584_v48  ;;  %v15656_v48 = vld [vmem:[%s22407_s1 + $0x900] ss:$16 sps:$4 sm:$0xff]  }
 0x1ad   : > { %8009 = vmatpush1.bf16.msra.mxu1 %v15587_v50  ;;  %7969 = vmatprep.subr.bf16.mxu0 %v15592_v51  ;;  %v18825_v50 = vrot.slane %v18630_v35, %v18307_v49  ;;  %v15659_v51 = vld [vmem:[%s22407_s1 + $0xb00] ss:$16 sps:$4 sm:$0xff]  }
 0x1ae   : > { %8010 = vmatprep.subr.bf16.mxu1 %v15595_v52  ;;  %v15664_v52 = vld [vmem:[%s22407_s1 + $0xce4] ss:$16 sps:$4 sm:$0xff]  }
 0x1af   : > { %v18841_v35 = vcombine.high %v18825_v50, %v18825_v50 }
 0x1b0   : > { %7970 = vmatpush1.bf16.msra.mxu0 %v15590_v53  ;;  %v15667_v53 = vld [vmem:[%s22407_s1 + $0xee4] ss:$16 sps:$4 sm:$0xff]  }
 0x1b1   : > { %8011 = vmatpush1.bf16.msra.mxu1 %v15593_v54  ;;  %7971 = vmatprep.subr.bf16.mxu0 %v15598_v55  ;;  %v18837_v54 = vrot.slane %v2514_v47, %v18307_v49  ;;  %v15662_v55 = vld [vmem:[%s22407_s1 + $0xce0] ss:$16 sps:$4 sm:$0xff]   ;;  %v15730_v47 = vld [vmem:[%s22407_s1 + $0xd84] ss:$16 sps:$4 sm:$0xff]  }
 0x1b2   : > { %8012 = vmatprep.subr.bf16.mxu1 %v15601_v56  ;;  %v15665_v56 = vld [vmem:[%s22407_s1 + $0xee0] ss:$16 sps:$4 sm:$0xff]  }
 0x1b4   : > { %7972 = vmatpush1.bf16.msra.mxu0 %v15596_v57  ;;  %v15670_v57 = vld [vmem:[%s22407_s1 + $0xcc4] ss:$16 sps:$4 sm:$0xff]  }
 0x1b5   : > { %8013 = vmatpush1.bf16.msra.mxu1 %v15599_v58  ;;  %7973 = vmatprep.subr.bf16.mxu0 %v15604_v59  ;;  %v15673_v58 = vld [vmem:[%s22407_s1 + $0xec4] ss:$16 sps:$4 sm:$0xff]   ;;  %v18857_v59 = vcombine.high %v18837_v54, %v18837_v54 }
 0x1b6   : > { %8014 = vmatprep.subr.bf16.mxu1 %v15607_v61  ;;  %v15668_v61 = vld [vmem:[%s22407_s1 + $0xcc0] ss:$16 sps:$4 sm:$0xff]  }
 0x1b8   : > { %7974 = vmatpush1.bf16.msra.mxu0 %v15602_v62  ;;  %v15671_v62 = vld [vmem:[%s22407_s1 + $0xec0] ss:$16 sps:$4 sm:$0xff]  }
 0x1b9   : > { %8015 = vmatpush1.bf16.msra.mxu1 %v15605_v63  ;;  %7975 = vmatprep.subr.bf16.mxu0 %v15610_v1  ;;  %v15676_v63 = vld [vmem:[%s22407_s1 + $0xca4] ss:$16 sps:$4 sm:$0xff]  }
 0x1ba   : > { %8016 = vmatprep.subr.bf16.mxu1 %v15613_v2  ;;  %v15679_v1 = vld [vmem:[%s22407_s1 + $0xea4] ss:$16 sps:$4 sm:$0xff]   ;;  %v15674_v2 = vld [vmem:[%s22407_s1 + $0xca0] ss:$16 sps:$4 sm:$0xff]  }
 0x1bc   : > { %7976 = vmatpush1.bf16.msra.mxu0 %v15608_v3  ;;  %v15677_v3 = vld [vmem:[%s22407_s1 + $0xea0] ss:$16 sps:$4 sm:$0xff]  }
 0x1bd   : > { %8017 = vmatpush1.bf16.msra.mxu1 %v15611_v4  ;;  %7977 = vmatprep.subr.bf16.mxu0 %v15616_v5  ;;  %v15682_v4 = vld [vmem:[%s22407_s1 + $0xc84] ss:$16 sps:$4 sm:$0xff]  }
 0x1be   : > { %8018 = vmatprep.subr.bf16.mxu1 %v15619_v7  ;;  %v15685_v5 = vld [vmem:[%s22407_s1 + $0xe84] ss:$16 sps:$4 sm:$0xff]   ;;  %v15680_v7 = vld [vmem:[%s22407_s1 + $0xc80] ss:$16 sps:$4 sm:$0xff]  }
 0x1c0   : > { %7978 = vmatpush2.bf16.msra.mxu0 %v15614_v8  ;;  %v15683_v8 = vld [vmem:[%s22407_s1 + $0xe80] ss:$16 sps:$4 sm:$0xff]  }
 0x1c1   : > { %8019 = vmatpush2.bf16.msra.mxu1 %v15617_v9  ;;  %7979 = vmatprep.subr.bf16.mxu0 %v15622_v10  ;;  %v15688_v9 = vld [vmem:[%s22407_s1 + $0xc64] ss:$16 sps:$4 sm:$0xff]  }
 0x1c2   : > { %8020 = vmatprep.subr.bf16.mxu1 %v15625_v11  ;;  %v15691_v10 = vld [vmem:[%s22407_s1 + $0xe64] ss:$16 sps:$4 sm:$0xff]   ;;  %v15686_v11 = vld [vmem:[%s22407_s1 + $0xc60] ss:$16 sps:$4 sm:$0xff]  }
 0x1c4   : > { %7980 = vmatpush2.bf16.msra.mxu0 %v15620_v12  ;;  %v15689_v12 = vld [vmem:[%s22407_s1 + $0xe60] ss:$16 sps:$4 sm:$0xff]  }
 0x1c5   : > { %8021 = vmatpush2.bf16.msra.mxu1 %v15623_v14  ;;  %7981 = vmatprep.subr.bf16.mxu0 %v15628_v15  ;;  %v15694_v14 = vld [vmem:[%s22407_s1 + $0xc44] ss:$16 sps:$4 sm:$0xff]  }
 0x1c6   : > { %8022 = vmatprep.subr.bf16.mxu1 %v15631_v16  ;;  %v15697_v15 = vld [vmem:[%s22407_s1 + $0xe44] ss:$16 sps:$4 sm:$0xff]   ;;  %v15692_v16 = vld [vmem:[%s22407_s1 + $0xc40] ss:$16 sps:$4 sm:$0xff]  }
 0x1c8   : > { %7982 = vmatpush2.bf16.msra.mxu0 %v15626_v19  ;;  %v15695_v19 = vld [vmem:[%s22407_s1 + $0xe40] ss:$16 sps:$4 sm:$0xff]  }
 0x1c9   : > { %8023 = vmatpush2.bf16.msra.mxu1 %v15629_v20  ;;  %7983 = vmatprep.subr.bf16.mxu0 %v15634_v21  ;;  %v15700_v20 = vld [vmem:[%s22407_s1 + $0xc24] ss:$16 sps:$4 sm:$0xff]  }
 0x1ca   : > { %8024 = vmatprep.subr.bf16.mxu1 %v15637_v22  ;;  %v15703_v21 = vld [vmem:[%s22407_s1 + $0xe24] ss:$16 sps:$4 sm:$0xff]   ;;  %v15698_v22 = vld [vmem:[%s22407_s1 + $0xc20] ss:$16 sps:$4 sm:$0xff]  }
 0x1cc   : > { %7984 = vmatpush2.bf16.msra.mxu0 %v15632_v24  ;;  %v15701_v24 = vld [vmem:[%s22407_s1 + $0xe20] ss:$16 sps:$4 sm:$0xff]  }
 0x1cd   : > { %8025 = vmatpush2.bf16.msra.mxu1 %v15635_v25  ;;  %7985 = vmatprep.subr.bf16.mxu0 %v15640_v27  ;;  %v15706_v25 = vld [vmem:[%s22407_s1 + $0xc04] ss:$16 sps:$4 sm:$0xff]  }
 0x1ce   : > { %8026 = vmatprep.subr.bf16.mxu1 %v15643_v28  ;;  %v15709_v27 = vld [vmem:[%s22407_s1 + $0xe04] ss:$16 sps:$4 sm:$0xff]   ;;  %v15704_v28 = vld [vmem:[%s22407_s1 + $0xc00] ss:$16 sps:$4 sm:$0xff]  }
 0x1d0   : > { %7986 = vmatpush2.bf16.msra.mxu0 %v15638_v29  ;;  %v15707_v29 = vld [vmem:[%s22407_s1 + $0xe00] ss:$16 sps:$4 sm:$0xff]  }
 0x1d1   : > { %8027 = vmatpush2.bf16.msra.mxu1 %v15641_v30  ;;  %7987 = vmatprep.subr.bf16.mxu0 %v15646_v31  ;;  %v15712_v30 = vld [vmem:[%s22407_s1 + $0xde4] ss:$16 sps:$4 sm:$0xff]  }
 0x1d2   : > { %8028 = vmatprep.subr.bf16.mxu1 %v15649_v33  ;;  %v15715_v31 = vld [vmem:[%s22407_s1 + $0xfe4] ss:$16 sps:$4 sm:$0xff]   ;;  %v15710_v33 = vld [vmem:[%s22407_s1 + $0xde0] ss:$16 sps:$4 sm:$0xff]  }
 0x1d4   : > { %7988 = vmatpush2.bf16.msra.mxu0 %v15644_v36  ;;  %v15718_v36 = vld [vmem:[%s22407_s1 + $0xdc4] ss:$16 sps:$4 sm:$0xff]  }
 0x1d5   : > { %8029 = vmatpush2.bf16.msra.mxu1 %v15647_v37  ;;  %7989 = vmatprep.subr.bf16.mxu0 %v15652_v38  ;;  %v15721_v37 = vld [vmem:[%s22407_s1 + $0xfc4] ss:$16 sps:$4 sm:$0xff]   ;;  %v15716_v38 = vld [vmem:[%s22407_s1 + $0xdc0] ss:$16 sps:$4 sm:$0xff]  }
 0x1d6   : > { %8030 = vmatprep.subr.bf16.mxu1 %v15655_v32  ;;  %v15719_v32 = vld [vmem:[%s22407_s1 + $0xfc0] ss:$16 sps:$4 sm:$0xff]  }
 0x1d8   : > { %7990 = vmatpush2.bf16.msra.mxu0 %v15650_v40  ;;  %v15724_v40 = vld [vmem:[%s22407_s1 + $0xda4] ss:$16 sps:$4 sm:$0xff]  }
 0x1d9   : > { %8031 = vmatpush2.bf16.msra.mxu1 %v15653_v44  ;;  %7991 = vmatprep.subr.bf16.mxu0 %v15658_v45  ;;  %v15727_v44 = vld [vmem:[%s22407_s1 + $0xfa4] ss:$16 sps:$4 sm:$0xff]   ;;  %v15722_v45 = vld [vmem:[%s22407_s1 + $0xda0] ss:$16 sps:$4 sm:$0xff]  }
 0x1da   : > { %8032 = vmatprep.subr.bf16.mxu1 %v15661_v46  ;;  %v15725_v46 = vld [vmem:[%s22407_s1 + $0xfa0] ss:$16 sps:$4 sm:$0xff]  }
 0x1dc   : > { %7992 = vmatpush2.bf16.msra.mxu0 %v15656_v48  ;;  %v15733_v48 = vld [vmem:[%s22407_s1 + $0xf84] ss:$16 sps:$4 sm:$0xff]  }
 0x1dd   : > { %8033 = vmatpush2.bf16.msra.mxu1 %v15659_v51  ;;  %8043 = vmatprep.subr.bf16.mxu0 %v15664_v52  ;;  %v15728_v51 = vld [vmem:[%s22407_s1 + $0xd80] ss:$16 sps:$4 sm:$0xff]  }
 0x1de   : > { %8084 = vmatprep.subr.bf16.mxu1 %v15667_v53  ;;  %v15731_v52 = vld [vmem:[%s22407_s1 + $0xf80] ss:$16 sps:$4 sm:$0xff]   ;;  %v15736_v53 = vld [vmem:[%s22407_s1 + $0xd64] ss:$16 sps:$4 sm:$0xff]  }
 0x1df   : > { %7994 = vmatmul.mubr.bf16.vlgmr.msra.gmra.mxu0 %v18825_v50 }
 0x1e0   : > { %8035 = vmatmul.mubr.bf16.vlgmr.msra.gmra.mxu1 %v18841_v35  ;;  %8044 = vmatpush1.bf16.msra.mxu0 %v15662_v55  ;;  %v15739_v55 = vld [vmem:[%s22407_s1 + $0xf64] ss:$16 sps:$4 sm:$0xff]  }
 0x1e1   : > { %8085 = vmatpush1.bf16.msra.mxu1 %v15665_v56  ;;  %8045 = vmatprep.subr.bf16.mxu0 %v15670_v57  ;;  %v15734_v56 = vld [vmem:[%s22407_s1 + $0xd60] ss:$16 sps:$4 sm:$0xff]  }
 0x1e2   : > { %8086 = vmatprep.subr.bf16.mxu1 %v15673_v58  ;;  %8075 = vmatprep.mubr.bf16.mxu0 %v18837_v54  ;;  %v15737_v57 = vld [vmem:[%s22407_s1 + $0xf60] ss:$16 sps:$4 sm:$0xff]   ;;  %v15742_v58 = vld [vmem:[%s22407_s1 + $0xd44] ss:$16 sps:$4 sm:$0xff]  }
 0x1e3   : > { %8116 = vmatprep.mubr.bf16.mxu1 %v18857_v59 }
 0x1e4   : > { %8046 = vmatpush1.bf16.msra.mxu0 %v15668_v61  ;;  %v15745_v61 = vld [vmem:[%s22407_s1 + $0xf44] ss:$16 sps:$4 sm:$0xff]  }
 0x1e5   : > { %8087 = vmatpush1.bf16.msra.mxu1 %v15671_v62  ;;  %8047 = vmatprep.subr.bf16.mxu0 %v15676_v63  ;;  %v15740_v62 = vld [vmem:[%s22407_s1 + $0xd40] ss:$16 sps:$4 sm:$0xff]  }
 0x1e6   : > { %8088 = vmatprep.subr.bf16.mxu1 %v15679_v1  ;;  %v15743_v63 = vld [vmem:[%s22407_s1 + $0xf40] ss:$16 sps:$4 sm:$0xff]  }
 0x1e7   : > { %v19016_v1 = vld [vmem:[%s22406_s0 + $0x10] sm:$0xff] }
 0x1e8   : > { %8048 = vmatpush1.bf16.msra.mxu0 %v15674_v2  ;;  %v15748_v2 = vld [vmem:[%s22407_s1 + $0xd24] ss:$16 sps:$4 sm:$0xff]  }
 0x1e9   : > { %8089 = vmatpush1.bf16.msra.mxu1 %v15677_v3  ;;  %8049 = vmatprep.subr.bf16.mxu0 %v15682_v4  ;;  %v15751_v3 = vld [vmem:[%s22407_s1 + $0xf24] ss:$16 sps:$4 sm:$0xff]   ;;  %v19026_v4 = vrot.slane %v19016_v1, %v18307_v49 }
 0x1ea   : > { %8090 = vmatprep.subr.bf16.mxu1 %v15685_v5  ;;  %v15746_v5 = vld [vmem:[%s22407_s1 + $0xd20] ss:$16 sps:$4 sm:$0xff]  }
 0x1ec   : > { %8050 = vmatpush1.bf16.msra.mxu0 %v15680_v7  ;;  %v15749_v7 = vld [vmem:[%s22407_s1 + $0xf20] ss:$16 sps:$4 sm:$0xff]  }
 0x1ed   : > { %8091 = vmatpush1.bf16.msra.mxu1 %v15683_v8  ;;  %8051 = vmatprep.subr.bf16.mxu0 %v15688_v9  ;;  %v15754_v8 = vld [vmem:[%s22407_s1 + $0xd04] ss:$16 sps:$4 sm:$0xff]  }
 0x1ee   : > { %8092 = vmatprep.subr.bf16.mxu1 %v15691_v10  ;;  %v15757_v9 = vld [vmem:[%s22407_s1 + $0xf04] ss:$16 sps:$4 sm:$0xff]   ;;  %v15752_v10 = vld [vmem:[%s22407_s1 + $0xd00] ss:$16 sps:$4 sm:$0xff]  }
 0x1f0   : > { %8052 = vmatpush1.bf16.msra.mxu0 %v15686_v11  ;;  %v2562_v11 = vcombine.high %v19026_v4, %v19026_v4 }
 0x1f1   : > { %8093 = vmatpush1.bf16.msra.mxu1 %v15689_v12  ;;  %8053 = vmatprep.subr.bf16.mxu0 %v15694_v14  ;;  %v15755_v12 = vld [vmem:[%s22407_s1 + $0xf00] ss:$16 sps:$4 sm:$0xff]  }
 0x1f2   : > { %8094 = vmatprep.subr.bf16.mxu1 %v15697_v15  ;;  %v2423_v14 = vld [vmem:[%s22408_s2] sm:$0xf]  ;;  %v19053_v15 = vrot.slane %v18804_v39, %v18307_v49  ;;  %v19068_v39 = vrot.slane %v2562_v11, %v18307_v49 }
 0x1f3   : > { %v15792_v11 = vld [vmem:[%s22407_s1 + $0x1240] ss:$16 sps:$4 sm:$0xff]  }
 0x1f4   : > { %8054 = vmatpush1.bf16.msra.mxu0 %v15692_v16  ;;  %v19056_v16 = vsub.s32 0, %v18289_v42 }
 0x1f5   : > { %8095 = vmatpush1.bf16.msra.mxu1 %v15695_v19  ;;  %8055 = vmatprep.subr.bf16.mxu0 %v15700_v20  ;;  %v15761_v19 = vld [vmem:[%s22407_s1 + $0x10e4] ss:$16 sps:$4 sm:$0xff]  }
 0x1f6   : > { %8096 = vmatprep.subr.bf16.mxu1 %v15703_v21  ;;  %v15764_v20 = vld [vmem:[%s22407_s1 + $0x12e4] ss:$16 sps:$4 sm:$0xff]   ;;  %v19065_v21 = vsub.s32 1, %v18289_v42 }
 0x1f8   : > { %8056 = vmatpush1.bf16.msra.mxu0 %v15698_v22  ;;  %v19072_v22 = vcombine.high %v19053_v15, %v19053_v15 }
 0x1f9   : > { %8097 = vmatpush1.bf16.msra.mxu1 %v15701_v24  ;;  %8057 = vmatprep.subr.bf16.mxu0 %v15706_v25  ;;  %v15759_v24 = vld [vmem:[%s22407_s1 + $0x10e0] ss:$16 sps:$4 sm:$0xff]  }
 0x1fa   : > { %8098 = vmatprep.subr.bf16.mxu1 %v15709_v27  ;;  %v15762_v25 = vld [vmem:[%s22407_s1 + $0x12e0] ss:$16 sps:$4 sm:$0xff]   ;;  %v2428_v27 = vrot.slane %v2423_v14, %v19056_v16 }
 0x1fc   : > { %8058 = vmatpush1.bf16.msra.mxu0 %v15704_v28  ;;  %v15767_v28 = vld [vmem:[%s22407_s1 + $0x10c4] ss:$16 sps:$4 sm:$0xff]  }
 0x1fd   : > { %8099 = vmatpush1.bf16.msra.mxu1 %v15707_v29  ;;  %8059 = vmatprep.subr.bf16.mxu0 %v15712_v30  ;;  %v15770_v29 = vld [vmem:[%s22407_s1 + $0x12c4] ss:$16 sps:$4 sm:$0xff]   ;;  %v2432_v30 = vrot.slane %v2423_v14, %v19065_v21 }
 0x1fe   : > { %8100 = vmatprep.subr.bf16.mxu1 %v15715_v31  ;;  %v19090_v31 = vcombine.high %v19068_v39, %v19068_v39  ;;  %v15800_v14 = vld [vmem:[%s22407_s1 + $0x1224] ss:$16 sps:$4 sm:$0xff]  }
 0x200   : > { %8060 = vmatpush2.bf16.msra.mxu0 %v15710_v33 }
 0x201   : > { %8101 = vmatpush2.bf16.msra.mxu1 %v15713_v34  ;;  %8061 = vmatprep.subr.bf16.mxu0 %v15718_v36  ;;  %v15765_v36 = vld [vmem:[%s22407_s1 + $0x10c0] ss:$16 sps:$4 sm:$0xff]  }
 0x202   : > { %8102 = vmatprep.subr.bf16.mxu1 %v15721_v37  ;;  %v15768_v37 = vld [vmem:[%s22407_s1 + $0x12c0] ss:$16 sps:$4 sm:$0xff]  }
 0x204   : > { %8062 = vmatpush2.bf16.msra.mxu0 %v15716_v38 }
 0x205   : > { %8103 = vmatpush2.bf16.msra.mxu1 %v15719_v32  ;;  %8063 = vmatprep.subr.bf16.mxu0 %v15724_v40 }
 0x206   : > { %8104 = vmatprep.subr.bf16.mxu1 %v15727_v44  ;;  %v15773_v44 = vld [vmem:[%s22407_s1 + $0x10a4] ss:$16 sps:$4 sm:$0xff]  }
 0x208   : > { %8064 = vmatpush2.bf16.msra.mxu0 %v15722_v45  ;;  %v15776_v45 = vld [vmem:[%s22407_s1 + $0x12a4] ss:$16 sps:$4 sm:$0xff]  }
 0x209   : > { %8105 = vmatpush2.bf16.msra.mxu1 %v15725_v46  ;;  %8065 = vmatprep.subr.bf16.mxu0 %v15730_v47 }
 0x20a   : > { %8106 = vmatprep.subr.bf16.mxu1 %v15733_v48  ;;  %v15771_v48 = vld [vmem:[%s22407_s1 + $0x10a0] ss:$16 sps:$4 sm:$0xff]  }
 0x20c   : > { %8066 = vmatpush2.bf16.msra.mxu0 %v15728_v51  ;;  %v15774_v51 = vld [vmem:[%s22407_s1 + $0x12a0] ss:$16 sps:$4 sm:$0xff]  }
 0x20d   : > { %8107 = vmatpush2.bf16.msra.mxu1 %v15731_v52  ;;  %8067 = vmatprep.subr.bf16.mxu0 %v15736_v53 }
 0x20e   : > { %8108 = vmatprep.subr.bf16.mxu1 %v15739_v55 }
 0x210   : > { %8068 = vmatpush2.bf16.msra.mxu0 %v15734_v56 }
 0x211   : > { %8109 = vmatpush2.bf16.msra.mxu1 %v15737_v57  ;;  %8069 = vmatprep.subr.bf16.mxu0 %v15742_v58  ;;  %v15779_v58 = vld [vmem:[%s22407_s1 + $0x1084] ss:$16 sps:$4 sm:$0xff]  }
 0x212   : > { %8110 = vmatprep.subr.bf16.mxu1 %v15745_v61  ;;  %v15782_v61 = vld [vmem:[%s22407_s1 + $0x1284] ss:$16 sps:$4 sm:$0xff]  }
 0x214   : > { %8070 = vmatpush2.bf16.msra.mxu0 %v15740_v62  ;;  %v15777_v62 = vld [vmem:[%s22407_s1 + $0x1080] ss:$16 sps:$4 sm:$0xff]  }
 0x215   : > { %8111 = vmatpush2.bf16.msra.mxu1 %v15743_v63  ;;  %8071 = vmatprep.subr.bf16.mxu0 %v15748_v2  ;;  %v15780_v63 = vld [vmem:[%s22407_s1 + $0x1280] ss:$16 sps:$4 sm:$0xff]   ;;  %v15785_v2 = vld [vmem:[%s22407_s1 + $0x1064] ss:$16 sps:$4 sm:$0xff]  }
 0x216   : > { %8112 = vmatprep.subr.bf16.mxu1 %v15751_v3  ;;  %v15788_v3 = vld [vmem:[%s22407_s1 + $0x1264] ss:$16 sps:$4 sm:$0xff]  }
 0x218   : > { %8072 = vmatpush2.bf16.msra.mxu0 %v15746_v5  ;;  %v15783_v5 = vld [vmem:[%s22407_s1 + $0x1060] ss:$16 sps:$4 sm:$0xff]  }
 0x219   : > { %8113 = vmatpush2.bf16.msra.mxu1 %v15749_v7  ;;  %8073 = vmatprep.subr.bf16.mxu0 %v15754_v8  ;;  %v15786_v7 = vld [vmem:[%s22407_s1 + $0x1260] ss:$16 sps:$4 sm:$0xff]   ;;  %v15791_v8 = vld [vmem:[%s22407_s1 + $0x1044] ss:$16 sps:$4 sm:$0xff]  }
 0x21a   : > { %8114 = vmatprep.subr.bf16.mxu1 %v15757_v9  ;;  %v15794_v9 = vld [vmem:[%s22407_s1 + $0x1244] ss:$16 sps:$4 sm:$0xff]  }
 0x21c   : > { %8074 = vmatpush2.bf16.msra.mxu0 %v15752_v10  ;;  %v15789_v10 = vld [vmem:[%s22407_s1 + $0x1040] ss:$16 sps:$4 sm:$0xff]  }
 0x21d   : > { %8115 = vmatpush2.bf16.msra.mxu1 %v15755_v12  ;;  %8125 = vmatprep.subr.bf16.mxu0 %v15761_v19  ;;  %v15797_v12 = vld [vmem:[%s22407_s1 + $0x1024] ss:$16 sps:$4 sm:$0xff]   ;;  %v15795_v19 = vld [vmem:[%s22407_s1 + $0x1020] ss:$16 sps:$4 sm:$0xff]  }
 0x21e   : > { %8166 = vmatprep.subr.bf16.mxu1 %v15764_v20  ;;  %v15798_v20 = vld [vmem:[%s22407_s1 + $0x1220] ss:$16 sps:$4 sm:$0xff]  }
 0x21f   : > { %v7831_v33 = vpop.f32.mrf.mxu0  ;;  %8076 = vmatmul.mubr.bf16.vlgmr.msra.gmra.mxu0 %v19053_v15 }
 0x220   : > { %v7872_v34 = vpop.f32.mrf.mxu1  ;;  %8117 = vmatmul.mubr.bf16.vlgmr.msra.gmra.mxu1 %v19072_v22  ;;  %v7832_v38 = vadd.f32 %v7831_v33, %v2428_v27  ;;  %8126 = vmatpush1.bf16.msra.mxu0 %v15759_v24  ;;  %v15803_v24 = vld [vmem:[%s22407_s1 + $0x1004] ss:$16 sps:$4 sm:$0xff]   ;;  %v15801_v27 = vld [vmem:[%s22407_s1 + $0x1000] ss:$16 sps:$4 sm:$0xff]  }
 0x221   : > { %8167 = vmatpush1.bf16.msra.mxu1 %v15762_v25  ;;  %v7833_v32 = vpop.f32.mrf.mxu0  ;;  %8127 = vmatprep.subr.bf16.mxu0 %v15767_v28  ;;  %v15806_v25 = vld [vmem:[%s22407_s1 + $0x1204] ss:$16 sps:$4 sm:$0xff]   ;;  %v15804_v28 = vld [vmem:[%s22407_s1 + $0x1200] ss:$16 sps:$4 sm:$0xff]  }
 0x222   : > { %v7874_v40 = vpop.f32.mrf.mxu1  ;;  %8168 = vmatprep.subr.bf16.mxu1 %v15770_v29  ;;  %v19106_v46 = vadd.f32 %v7872_v34, %v7832_v38  ;;  %v7834_v47 = vadd.f32 %v7833_v32, %v2432_v30  ;;  %8157 = vmatprep.mubr.bf16.mxu0 %v19068_v39  ;;  %v15809_v29 = vld [vmem:[%s22407_s1 + $0x11e4] ss:$16 sps:$4 sm:$0xff]   ;;  %v15807_v33 = vld [vmem:[%s22407_s1 + $0x11e0] ss:$16 sps:$4 sm:$0xff]  }
 0x223   : > { %8198 = vmatprep.mubr.bf16.mxu1 %v19090_v31  ;;  %v7835_v52 = vpop.f32.mrf.mxu0  ;;  %v15812_v30 = vld [vmem:[%s22407_s1 + $0x13e4] ss:$16 sps:$4 sm:$0xff]   ;;  %v15810_v34 = vld [vmem:[%s22407_s1 + $0x13e0] ss:$16 sps:$4 sm:$0xff]  }
 0x224   : > { %v7876_v53 = vpop.f32.mrf.mxu1  ;;  %v19116_v55 = vadd.f32 %v7874_v40, %v7834_v47  ;;  %8128 = vmatpush1.bf16.msra.mxu0 %v15765_v36  ;;  %v15815_v36 = vld [vmem:[%s22407_s1 + $0x11c4] ss:$16 sps:$4 sm:$0xff]   ;;  %v15813_v38 = vld [vmem:[%s22407_s1 + $0x11c0] ss:$16 sps:$4 sm:$0xff]  }
 0x225   : > { %8169 = vmatpush1.bf16.msra.mxu1 %v15768_v37  ;;  %v7836_v56 = vpop.f32.mrf.mxu0  ;;  %8129 = vmatprep.subr.bf16.mxu0 %v15773_v44  ;;  %v15818_v37 = vld [vmem:[%s22407_s1 + $0x13c4] ss:$16 sps:$4 sm:$0xff]   ;;  %v15816_v32 = vld [vmem:[%s22407_s1 + $0x13c0] ss:$16 sps:$4 sm:$0xff]  }
 0x226   : > { %v7877_v57 = vpop.f32.mrf.mxu1  ;;  %8170 = vmatprep.subr.bf16.mxu1 %v15776_v45  ;;  %v15821_v40 = vld [vmem:[%s22407_s1 + $0x11a4] ss:$16 sps:$4 sm:$0xff]   ;;  %v15819_v45 = vld [vmem:[%s22407_s1 + $0x11a0] ss:$16 sps:$4 sm:$0xff]  }
 0x227   : > { %v15824_v44 = vld [vmem:[%s22407_s1 + $0x13a4] ss:$16 sps:$4 sm:$0xff]   ;;  %v15822_v47 = vld [vmem:[%s22407_s1 + $0x13a0] ss:$16 sps:$4 sm:$0xff]  }
 0x228   : > { %8130 = vmatpush1.bf16.msra.mxu0 %v15771_v48  ;;  %v15827_v48 = vld [vmem:[%s22407_s1 + $0x1184] ss:$16 sps:$4 sm:$0xff]   ;;  %v15825_v52 = vld [vmem:[%s22407_s1 + $0x1180] ss:$16 sps:$4 sm:$0xff]  }
 0x229   : > { %8171 = vmatpush1.bf16.msra.mxu1 %v15774_v51  ;;  %8131 = vmatprep.subr.bf16.mxu0 %v15779_v58  ;;  %v15830_v51 = vld [vmem:[%s22407_s1 + $0x1384] ss:$16 sps:$4 sm:$0xff]   ;;  %v15828_v53 = vld [vmem:[%s22407_s1 + $0x1380] ss:$16 sps:$4 sm:$0xff]  }
 0x22a   : > { %8172 = vmatprep.subr.bf16.mxu1 %v15782_v61  ;;  %v15833_v56 = vld [vmem:[%s22407_s1 + $0x1164] ss:$16 sps:$4 sm:$0xff]   ;;  %v15831_v58 = vld [vmem:[%s22407_s1 + $0x1160] ss:$16 sps:$4 sm:$0xff]  }
 0x22b   : > { %v15836_v57 = vld [vmem:[%s22407_s1 + $0x1364] ss:$16 sps:$4 sm:$0xff]   ;;  %v15834_v61 = vld [vmem:[%s22407_s1 + $0x1360] ss:$16 sps:$4 sm:$0xff]  }
 0x22c   : > { %8132 = vmatpush1.bf16.msra.mxu0 %v15777_v62  ;;  %v15839_v62 = vld [vmem:[%s22407_s1 + $0x1144] ss:$16 sps:$4 sm:$0xff]  }
 0x22d   : > { %8173 = vmatpush1.bf16.msra.mxu1 %v15780_v63  ;;  %8133 = vmatprep.subr.bf16.mxu0 %v15785_v2  ;;  %v15842_v63 = vld [vmem:[%s22407_s1 + $0x1344] ss:$16 sps:$4 sm:$0xff]   ;;  %v2547_v2 = vcombine.high %v19016_v1, %v19016_v1 }
 0x22e   : > { %8174 = vmatprep.subr.bf16.mxu1 %v15788_v3  ;;  %v15837_v3 = vld [vmem:[%s22407_s1 + $0x1140] ss:$16 sps:$4 sm:$0xff]   ;;  %v15848_v1 = vld [vmem:[%s22407_s1 + $0x1324] ss:$16 sps:$4 sm:$0xff]  }
 0x230   : > { %8134 = vmatpush1.bf16.msra.mxu0 %v15783_v5  ;;  %v15840_v5 = vld [vmem:[%s22407_s1 + $0x1340] ss:$16 sps:$4 sm:$0xff]  }
 0x231   : > { %8175 = vmatpush1.bf16.msra.mxu1 %v15786_v7  ;;  %8135 = vmatprep.subr.bf16.mxu0 %v15791_v8  ;;  %v15845_v7 = vld [vmem:[%s22407_s1 + $0x1124] ss:$16 sps:$4 sm:$0xff]   ;;  %v19259_v8 = vrot.slane %v2547_v2, %v18307_v49 }
 0x232   : > { %8176 = vmatprep.subr.bf16.mxu1 %v15794_v9  ;;  %v15843_v9 = vld [vmem:[%s22407_s1 + $0x1120] ss:$16 sps:$4 sm:$0xff]   ;;  %v15878_v2 = vld [vmem:[%s22407_s1 + $0x1684] ss:$16 sps:$4 sm:$0xff]  }
 0x234   : > { %8136 = vmatpush1.bf16.msra.mxu0 %v15789_v10  ;;  %v15846_v10 = vld [vmem:[%s22407_s1 + $0x1320] ss:$16 sps:$4 sm:$0xff]  }
 0x235   : > { %8177 = vmatpush1.bf16.msra.mxu1 %v15792_v11  ;;  %8137 = vmatprep.subr.bf16.mxu0 %v15797_v12  ;;  %v15851_v11 = vld [vmem:[%s22407_s1 + $0x1104] ss:$16 sps:$4 sm:$0xff]  }
 0x236   : > { %8178 = vmatprep.subr.bf16.mxu1 %v15800_v14  ;;  %v15854_v12 = vld [vmem:[%s22407_s1 + $0x1304] ss:$16 sps:$4 sm:$0xff]   ;;  %v2563_v14 = vcombine.high %v19259_v8, %v19259_v8 }
 0x238   : > { %8138 = vmatpush1.bf16.msra.mxu0 %v15795_v19  ;;  %v19277_v19 = vrot.slane %v19026_v4, %v18307_v49  ;;  %v15860_v4 = vld [vmem:[%s22407_s1 + $0x16e4] ss:$16 sps:$4 sm:$0xff]  }
 0x239   : > { %8179 = vmatpush1.bf16.msra.mxu1 %v15798_v20  ;;  %8139 = vmatprep.subr.bf16.mxu0 %v15803_v24  ;;  %v15849_v20 = vld [vmem:[%s22407_s1 + $0x1100] ss:$16 sps:$4 sm:$0xff]  }
 0x23a   : > { %8180 = vmatprep.subr.bf16.mxu1 %v15806_v25  ;;  %v15852_v24 = vld [vmem:[%s22407_s1 + $0x1300] ss:$16 sps:$4 sm:$0xff]   ;;  %v15857_v25 = vld [vmem:[%s22407_s1 + $0x14e4] ss:$16 sps:$4 sm:$0xff]  }
 0x23c   : > { %8140 = vmatpush1.bf16.msra.mxu0 %v15801_v27  ;;  %v15855_v27 = vld [vmem:[%s22407_s1 + $0x14e0] ss:$16 sps:$4 sm:$0xff]  }
 0x23d   : > { %8181 = vmatpush1.bf16.msra.mxu1 %v15804_v28  ;;  %8141 = vmatprep.subr.bf16.mxu0 %v15809_v29  ;;  %v15858_v28 = vld [vmem:[%s22407_s1 + $0x16e0] ss:$16 sps:$4 sm:$0xff]   ;;  %v19298_v29 = vrot.slane %v2563_v14, %v18307_v49 }
 0x23e   : > { %8182 = vmatprep.subr.bf16.mxu1 %v15812_v30  ;;  %v19302_v30 = vcombine.high %v19277_v19, %v19277_v19  ;;  %v15885_v14 = vld [vmem:[%s22407_s1 + $0x1440] ss:$16 sps:$4 sm:$0xff]  }
 0x240   : > { %8142 = vmatpush2.bf16.msra.mxu0 %v15807_v33  ;;  %v15863_v33 = vld [vmem:[%s22407_s1 + $0x14c4] ss:$16 sps:$4 sm:$0xff]  }
 0x241   : > { %8183 = vmatpush2.bf16.msra.mxu1 %v15810_v34  ;;  %8143 = vmatprep.subr.bf16.mxu0 %v15815_v36  ;;  %v15866_v34 = vld [vmem:[%s22407_s1 + $0x16c4] ss:$16 sps:$4 sm:$0xff]   ;;  %v15861_v36 = vld [vmem:[%s22407_s1 + $0x14c0] ss:$16 sps:$4 sm:$0xff]  }
 0x242   : > { %8184 = vmatprep.subr.bf16.mxu1 %v15818_v37  ;;  %v15864_v37 = vld [vmem:[%s22407_s1 + $0x16c0] ss:$16 sps:$4 sm:$0xff]  }
 0x244   : > { %8144 = vmatpush2.bf16.msra.mxu0 %v15813_v38  ;;  %v19318_v38 = vcombine.high %v19298_v29, %v19298_v29 }
 0x245   : > { %8185 = vmatpush2.bf16.msra.mxu1 %v15816_v32  ;;  %8145 = vmatprep.subr.bf16.mxu0 %v15821_v40 }
 0x246   : > { %8186 = vmatprep.subr.bf16.mxu1 %v15824_v44 }
 0x248   : > { %8146 = vmatpush2.bf16.msra.mxu0 %v15819_v45 }
 0x249   : > { %8187 = vmatpush2.bf16.msra.mxu1 %v15822_v47  ;;  %8147 = vmatprep.subr.bf16.mxu0 %v15827_v48  ;;  %v15869_v48 = vld [vmem:[%s22407_s1 + $0x14a4] ss:$16 sps:$4 sm:$0xff]  }
 0x24a   : > { %8188 = vmatprep.subr.bf16.mxu1 %v15830_v51  ;;  %v15872_v51 = vld [vmem:[%s22407_s1 + $0x16a4] ss:$16 sps:$4 sm:$0xff]  }
 0x24c   : > { %8148 = vmatpush2.bf16.msra.mxu0 %v15825_v52 }
 0x24d   : > { %8189 = vmatpush2.bf16.msra.mxu1 %v15828_v53  ;;  %8149 = vmatprep.subr.bf16.mxu0 %v15833_v56  ;;  %v15870_v56 = vld [vmem:[%s22407_s1 + $0x16a0] ss:$16 sps:$4 sm:$0xff]  }
 0x24e   : > { %8190 = vmatprep.subr.bf16.mxu1 %v15836_v57 }
 0x250   : > { %8150 = vmatpush2.bf16.msra.mxu0 %v15831_v58 }
 0x251   : > { %8191 = vmatpush2.bf16.msra.mxu1 %v15834_v61  ;;  %8151 = vmatprep.subr.bf16.mxu0 %v15839_v62 }
 0x252   : > { %8192 = vmatprep.subr.bf16.mxu1 %v15842_v63  ;;  %v15875_v63 = vld [vmem:[%s22407_s1 + $0x1484] ss:$16 sps:$4 sm:$0xff]  }
 0x254   : > { %8152 = vmatpush2.bf16.msra.mxu0 %v15837_v3  ;;  %v15873_v3 = vld [vmem:[%s22407_s1 + $0x1480] ss:$16 sps:$4 sm:$0xff]  }
 0x255   : > { %8193 = vmatpush2.bf16.msra.mxu1 %v15840_v5  ;;  %8153 = vmatprep.subr.bf16.mxu0 %v15845_v7  ;;  %v15876_v5 = vld [vmem:[%s22407_s1 + $0x1680] ss:$16 sps:$4 sm:$0xff]   ;;  %v15881_v7 = vld [vmem:[%s22407_s1 + $0x1464] ss:$16 sps:$4 sm:$0xff]  }
 0x256   : > { %8194 = vmatprep.subr.bf16.mxu1 %v15848_v1  ;;  %v15884_v1 = vld [vmem:[%s22407_s1 + $0x1664] ss:$16 sps:$4 sm:$0xff]  }
 0x258   : > { %8154 = vmatpush2.bf16.msra.mxu0 %v15843_v9  ;;  %v15879_v9 = vld [vmem:[%s22407_s1 + $0x1460] ss:$16 sps:$4 sm:$0xff]  }
 0x259   : > { %8195 = vmatpush2.bf16.msra.mxu1 %v15846_v10  ;;  %8155 = vmatprep.subr.bf16.mxu0 %v15851_v11  ;;  %v15882_v10 = vld [vmem:[%s22407_s1 + $0x1660] ss:$16 sps:$4 sm:$0xff]   ;;  %v15887_v11 = vld [vmem:[%s22407_s1 + $0x1444] ss:$16 sps:$4 sm:$0xff]  }
 0x25a   : > { %8196 = vmatprep.subr.bf16.mxu1 %v15854_v12  ;;  %v15890_v12 = vld [vmem:[%s22407_s1 + $0x1644] ss:$16 sps:$4 sm:$0xff]  }
 0x25c   : > { %8156 = vmatpush2.bf16.msra.mxu0 %v15849_v20  ;;  %v15888_v20 = vld [vmem:[%s22407_s1 + $0x1640] ss:$16 sps:$4 sm:$0xff]  }
 0x25d   : > { %8197 = vmatpush2.bf16.msra.mxu1 %v15852_v24  ;;  %8207 = vmatprep.subr.bf16.mxu0 %v15857_v25  ;;  %v15893_v24 = vld [vmem:[%s22407_s1 + $0x1424] ss:$16 sps:$4 sm:$0xff]  }
 0x25e   : > { %8248 = vmatprep.subr.bf16.mxu1 %v15860_v4  ;;  %v15896_v25 = vld [vmem:[%s22407_s1 + $0x1624] ss:$16 sps:$4 sm:$0xff]   ;;  %v15891_v4 = vld [vmem:[%s22407_s1 + $0x1420] ss:$16 sps:$4 sm:$0xff]  }
 0x25f   : > { %v7913_v32 = vpop.f32.mrf.mxu0  ;;  %8158 = vmatmul.mubr.bf16.vlgmr.msra.gmra.mxu0 %v19277_v19 }
 0x260   : > { %v7954_v40 = vpop.f32.mrf.mxu1  ;;  %8199 = vmatmul.mubr.bf16.vlgmr.msra.gmra.mxu1 %v19302_v30  ;;  %v7914_v44 = vadd.f32 %v7913_v32, %v19106_v46  ;;  %8208 = vmatpush1.bf16.msra.mxu0 %v15855_v27  ;;  %v15867_v46 = vld [vmem:[%s22407_s1 + $0x14a0] ss:$16 sps:$4 sm:$0xff]   ;;  %v15908_v32 = vld [vmem:[%s22407_s1 + $0x17e4] ss:$16 sps:$4 sm:$0xff]  }
 0x261   : > { %8249 = vmatpush1.bf16.msra.mxu1 %v15858_v28  ;;  %v7915_v45 = vpop.f32.mrf.mxu0  ;;  %8209 = vmatprep.subr.bf16.mxu0 %v15863_v33  ;;  %v15894_v27 = vld [vmem:[%s22407_s1 + $0x1620] ss:$16 sps:$4 sm:$0xff]   ;;  %v15899_v28 = vld [vmem:[%s22407_s1 + $0x1404] ss:$16 sps:$4 sm:$0xff]  }
 0x262   : > { %v7956_v47 = vpop.f32.mrf.mxu1  ;;  %8250 = vmatprep.subr.bf16.mxu1 %v15866_v34  ;;  %v19329_v52 = vadd.f32 %v7954_v40, %v7914_v44  ;;  %v7916_v53 = vadd.f32 %v7915_v45, %v19116_v55  ;;  %8239 = vmatprep.mubr.bf16.mxu0 %v19298_v29  ;;  %v15902_v33 = vld [vmem:[%s22407_s1 + $0x1604] ss:$16 sps:$4 sm:$0xff]   ;;  %v15897_v34 = vld [vmem:[%s22407_s1 + $0x1400] ss:$16 sps:$4 sm:$0xff]  }
 0x263   : > { %8280 = vmatprep.mubr.bf16.mxu1 %v19318_v38  ;;  %v7917_v57 = vpop.f32.mrf.mxu0  ;;  %v15903_v40 = vld [vmem:[%s22407_s1 + $0x15e0] ss:$16 sps:$4 sm:$0xff]   ;;  %v15911_v45 = vld [vmem:[%s22407_s1 + $0x15c4] ss:$16 sps:$4 sm:$0xff]  }
 0x264   : > { %v7958_v58 = vpop.f32.mrf.mxu1  ;;  %v19340_v61 = vadd.f32 %v7956_v47, %v7916_v53  ;;  %8210 = vmatpush1.bf16.msra.mxu0 %v15861_v36  ;;  %v15900_v36 = vld [vmem:[%s22407_s1 + $0x1600] ss:$16 sps:$4 sm:$0xff]   ;;  %v15914_v47 = vld [vmem:[%s22407_s1 + $0x17c4] ss:$16 sps:$4 sm:$0xff]  }
 0x265   : > { %8251 = vmatpush1.bf16.msra.mxu1 %v15864_v37  ;;  %v7918_v62 = vpop.f32.mrf.mxu0  ;;  %8211 = vmatprep.subr.bf16.mxu0 %v15869_v48  ;;  %v15905_v37 = vld [vmem:[%s22407_s1 + $0x15e4] ss:$16 sps:$4 sm:$0xff]   ;;  %v15906_v44 = vld [vmem:[%s22407_s1 + $0x17e0] ss:$16 sps:$4 sm:$0xff]  }
 0x266   : > { %v7959_v55 = vpop.f32.mrf.mxu1  ;;  %8252 = vmatprep.subr.bf16.mxu1 %v15872_v51  ;;  %v15909_v48 = vld [vmem:[%s22407_s1 + $0x15c0] ss:$16 sps:$4 sm:$0xff]   ;;  %v15917_v53 = vld [vmem:[%s22407_s1 + $0x15a4] ss:$16 sps:$4 sm:$0xff]  }
 0x267   : > { %v15912_v51 = vld [vmem:[%s22407_s1 + $0x17c0] ss:$16 sps:$4 sm:$0xff]   ;;  %v15923_v58 = vld [vmem:[%s22407_s1 + $0x1584] ss:$16 sps:$4 sm:$0xff]  }
 0x268   : > { %8212 = vmatpush1.bf16.msra.mxu0 %v15867_v46  ;;  %v15920_v46 = vld [vmem:[%s22407_s1 + $0x17a4] ss:$16 sps:$4 sm:$0xff]   ;;  %v15918_v57 = vld [vmem:[%s22407_s1 + $0x17a0] ss:$16 sps:$4 sm:$0xff]  }
 0x269   : > { %8253 = vmatpush1.bf16.msra.mxu1 %v15870_v56  ;;  %8213 = vmatprep.subr.bf16.mxu0 %v15875_v63  ;;  %v15915_v56 = vld [vmem:[%s22407_s1 + $0x15a0] ss:$16 sps:$4 sm:$0xff]   ;;  %v15926_v62 = vld [vmem:[%s22407_s1 + $0x1784] ss:$16 sps:$4 sm:$0xff]  }
 0x26a   : > { %8254 = vmatprep.subr.bf16.mxu1 %v15878_v2  ;;  %v15921_v55 = vld [vmem:[%s22407_s1 + $0x1580] ss:$16 sps:$4 sm:$0xff]   ;;  %v15929_v2 = vld [vmem:[%s22407_s1 + $0x1564] ss:$16 sps:$4 sm:$0xff]  }
 0x26b   : > { %v15924_v63 = vld [vmem:[%s22407_s1 + $0x1780] ss:$16 sps:$4 sm:$0xff]  }
 0x26c   : > { %8214 = vmatpush1.bf16.msra.mxu0 %v15873_v3  ;;  %v15932_v3 = vld [vmem:[%s22407_s1 + $0x1764] ss:$16 sps:$4 sm:$0xff]  }
 0x26d   : > { %8255 = vmatpush1.bf16.msra.mxu1 %v15876_v5  ;;  %8215 = vmatprep.subr.bf16.mxu0 %v15881_v7  ;;  %v15927_v5 = vld [vmem:[%s22407_s1 + $0x1560] ss:$16 sps:$4 sm:$0xff]  }
 0x26e   : > { %8256 = vmatprep.subr.bf16.mxu1 %v15884_v1  ;;  %v15930_v7 = vld [vmem:[%s22407_s1 + $0x1760] ss:$16 sps:$4 sm:$0xff]   ;;  %v15935_v1 = vld [vmem:[%s22407_s1 + $0x1544] ss:$16 sps:$4 sm:$0xff]  }
 0x270   : > { %8216 = vmatpush1.bf16.msra.mxu0 %v15879_v9  ;;  %v15938_v9 = vld [vmem:[%s22407_s1 + $0x1744] ss:$16 sps:$4 sm:$0xff]  }
 0x271   : > { %8257 = vmatpush1.bf16.msra.mxu1 %v15882_v10  ;;  %8217 = vmatprep.subr.bf16.mxu0 %v15887_v11  ;;  %v19471_v10 = vld [vmem:[%s22406_s0 + $0x18] sm:$0xff]  ;;  %v15933_v11 = vld [vmem:[%s22407_s1 + $0x1540] ss:$16 sps:$4 sm:$0xff]  }
 0x272   : > { %8258 = vmatprep.subr.bf16.mxu1 %v15890_v12  ;;  %v15936_v12 = vld [vmem:[%s22407_s1 + $0x1740] ss:$16 sps:$4 sm:$0xff]  }
 0x274   : > { %8218 = vmatpush1.bf16.msra.mxu0 %v15885_v14  ;;  %v15941_v14 = vld [vmem:[%s22407_s1 + $0x1524] ss:$16 sps:$4 sm:$0xff]  }
 0x275   : > { %8259 = vmatpush1.bf16.msra.mxu1 %v15888_v20  ;;  %8219 = vmatprep.subr.bf16.mxu0 %v15893_v24  ;;  %v15944_v20 = vld [vmem:[%s22407_s1 + $0x1724] ss:$16 sps:$4 sm:$0xff]   ;;  %v19487_v24 = vrot.slane %v19471_v10, %v18307_v49 }
 0x276   : > { %8260 = vmatprep.subr.bf16.mxu1 %v15896_v25  ;;  %v15939_v25 = vld [vmem:[%s22407_s1 + $0x1520] ss:$16 sps:$4 sm:$0xff]  }
 0x278   : > { %8220 = vmatpush1.bf16.msra.mxu0 %v15891_v4  ;;  %v15942_v4 = vld [vmem:[%s22407_s1 + $0x1720] ss:$16 sps:$4 sm:$0xff]  }
 0x279   : > { %8261 = vmatpush1.bf16.msra.mxu1 %v15894_v27  ;;  %8221 = vmatprep.subr.bf16.mxu0 %v15899_v28  ;;  %v15947_v27 = vld [vmem:[%s22407_s1 + $0x1504] ss:$16 sps:$4 sm:$0xff]  }
 0x27a   : > { %8262 = vmatprep.subr.bf16.mxu1 %v15902_v33  ;;  %v15950_v28 = vld [vmem:[%s22407_s1 + $0x1704] ss:$16 sps:$4 sm:$0xff]   ;;  %v2611_v33 = vcombine.high %v19487_v24, %v19487_v24 }
 0x27c   : > { %8222 = vmatpush1.bf16.msra.mxu0 %v15897_v34  ;;  %v19505_v34 = vrot.slane %v19259_v8, %v18307_v49  ;;  %v15957_v8 = vld [vmem:[%s22407_s1 + $0x1ae4] ss:$16 sps:$4 sm:$0xff]  }
 0x27d   : > { %8263 = vmatpush1.bf16.msra.mxu1 %v15900_v36  ;;  %8223 = vmatprep.subr.bf16.mxu0 %v15905_v37  ;;  %v15945_v36 = vld [vmem:[%s22407_s1 + $0x1500] ss:$16 sps:$4 sm:$0xff]  }
 0x27e   : > { %8264 = vmatprep.subr.bf16.mxu1 %v15908_v32  ;;  %v15948_v37 = vld [vmem:[%s22407_s1 + $0x1700] ss:$16 sps:$4 sm:$0xff]   ;;  %v15954_v32 = vld [vmem:[%s22407_s1 + $0x18e4] ss:$16 sps:$4 sm:$0xff]  }
 0x280   : > { %8224 = vmatpush2.bf16.msra.mxu0 %v15903_v40  ;;  %v15952_v40 = vld [vmem:[%s22407_s1 + $0x18e0] ss:$16 sps:$4 sm:$0xff]  }
 0x281   : > { %8265 = vmatpush2.bf16.msra.mxu1 %v15906_v44  ;;  %8225 = vmatprep.subr.bf16.mxu0 %v15911_v45  ;;  %v15955_v44 = vld [vmem:[%s22407_s1 + $0x1ae0] ss:$16 sps:$4 sm:$0xff]   ;;  %v19526_v45 = vrot.slane %v2611_v33, %v18307_v49  ;;  %v15981_v33 = vld [vmem:[%s22407_s1 + $0x1a64] ss:$16 sps:$4 sm:$0xff]  }
 0x282   : > { %8266 = vmatprep.subr.bf16.mxu1 %v15914_v47  ;;  %v19530_v47 = vcombine.high %v19505_v34, %v19505_v34 }
 0x284   : > { %8226 = vmatpush2.bf16.msra.mxu0 %v15909_v48  ;;  %v15960_v48 = vld [vmem:[%s22407_s1 + $0x18c4] ss:$16 sps:$4 sm:$0xff]  }
 0x285   : > { %8267 = vmatpush2.bf16.msra.mxu1 %v15912_v51  ;;  %8227 = vmatprep.subr.bf16.mxu0 %v15917_v53  ;;  %v15963_v51 = vld [vmem:[%s22407_s1 + $0x1ac4] ss:$16 sps:$4 sm:$0xff]   ;;  %v15958_v53 = vld [vmem:[%s22407_s1 + $0x18c0] ss:$16 sps:$4 sm:$0xff]  }
 0x286   : > { %8268 = vmatprep.subr.bf16.mxu1 %v15920_v46  ;;  %v15961_v46 = vld [vmem:[%s22407_s1 + $0x1ac0] ss:$16 sps:$4 sm:$0xff]  }
 0x288   : > { %8228 = vmatpush2.bf16.msra.mxu0 %v15915_v56  ;;  %v19546_v56 = vcombine.high %v19526_v45, %v19526_v45 }
 0x289   : > { %8269 = vmatpush2.bf16.msra.mxu1 %v15918_v57  ;;  %8229 = vmatprep.subr.bf16.mxu0 %v15923_v58 }
 0x28a   : > { %8270 = vmatprep.subr.bf16.mxu1 %v15926_v62 }
 0x28c   : > { %8230 = vmatpush2.bf16.msra.mxu0 %v15921_v55 }
 0x28d   : > { %8271 = vmatpush2.bf16.msra.mxu1 %v15924_v63  ;;  %8231 = vmatprep.subr.bf16.mxu0 %v15929_v2  ;;  %v15966_v2 = vld [vmem:[%s22407_s1 + $0x18a4] ss:$16 sps:$4 sm:$0xff]  }
 0x28e   : > { %8272 = vmatprep.subr.bf16.mxu1 %v15932_v3  ;;  %v15969_v3 = vld [vmem:[%s22407_s1 + $0x1aa4] ss:$16 sps:$4 sm:$0xff]  }
 0x290   : > { %8232 = vmatpush2.bf16.msra.mxu0 %v15927_v5 }
 0x291   : > { %8273 = vmatpush2.bf16.msra.mxu1 %v15930_v7  ;;  %8233 = vmatprep.subr.bf16.mxu0 %v15935_v1  ;;  %v15967_v1 = vld [vmem:[%s22407_s1 + $0x1aa0] ss:$16 sps:$4 sm:$0xff]  }
 0x292   : > { %8274 = vmatprep.subr.bf16.mxu1 %v15938_v9 }
 0x294   : > { %8234 = vmatpush2.bf16.msra.mxu0 %v15933_v11 }
 0x295   : > { %8275 = vmatpush2.bf16.msra.mxu1 %v15936_v12  ;;  %8235 = vmatprep.subr.bf16.mxu0 %v15941_v14 }
 0x296   : > { %8276 = vmatprep.subr.bf16.mxu1 %v15944_v20  ;;  %v15972_v20 = vld [vmem:[%s22407_s1 + $0x1884] ss:$16 sps:$4 sm:$0xff]  }
 0x298   : > { %8236 = vmatpush2.bf16.msra.mxu0 %v15939_v25  ;;  %v15975_v25 = vld [vmem:[%s22407_s1 + $0x1a84] ss:$16 sps:$4 sm:$0xff]  }
 0x299   : > { %8277 = vmatpush2.bf16.msra.mxu1 %v15942_v4  ;;  %8237 = vmatprep.subr.bf16.mxu0 %v15947_v27  ;;  %v15970_v4 = vld [vmem:[%s22407_s1 + $0x1880] ss:$16 sps:$4 sm:$0xff]  }
 0x29a   : > { %8278 = vmatprep.subr.bf16.mxu1 %v15950_v28  ;;  %v15973_v27 = vld [vmem:[%s22407_s1 + $0x1a80] ss:$16 sps:$4 sm:$0xff]   ;;  %v15978_v28 = vld [vmem:[%s22407_s1 + $0x1864] ss:$16 sps:$4 sm:$0xff]  }
 0x29c   : > { %8238 = vmatpush2.bf16.msra.mxu0 %v15945_v36  ;;  %v15976_v36 = vld [vmem:[%s22407_s1 + $0x1860] ss:$16 sps:$4 sm:$0xff]  }
 0x29d   : > { %8279 = vmatpush2.bf16.msra.mxu1 %v15948_v37  ;;  %8289 = vmatprep.subr.bf16.mxu0 %v15954_v32  ;;  %v15979_v37 = vld [vmem:[%s22407_s1 + $0x1a60] ss:$16 sps:$4 sm:$0xff]   ;;  %v15984_v32 = vld [vmem:[%s22407_s1 + $0x1844] ss:$16 sps:$4 sm:$0xff]  }
 0x29e   : > { %8330 = vmatprep.subr.bf16.mxu1 %v15957_v8  ;;  %v15987_v8 = vld [vmem:[%s22407_s1 + $0x1a44] ss:$16 sps:$4 sm:$0xff]  }
 0x29f   : > { %v7995_v57 = vpop.f32.mrf.mxu0  ;;  %8240 = vmatmul.mubr.bf16.vlgmr.msra.gmra.mxu0 %v19505_v34 }
 0x2a0   : > { %v8036_v58 = vpop.f32.mrf.mxu1  ;;  %8281 = vmatmul.mubr.bf16.vlgmr.msra.gmra.mxu1 %v19530_v47  ;;  %v7996_v62 = vadd.f32 %v7995_v57, %v19329_v52  ;;  %8290 = vmatpush1.bf16.msra.mxu0 %v15952_v40  ;;  %v15964_v52 = vld [vmem:[%s22407_s1 + $0x18a0] ss:$16 sps:$4 sm:$0xff]   ;;  %v15996_v57 = vld [vmem:[%s22407_s1 + $0x1804] ss:$16 sps:$4 sm:$0xff]  }
 0x2a1   : > { %8331 = vmatpush1.bf16.msra.mxu1 %v15955_v44  ;;  %v7997_v55 = vpop.f32.mrf.mxu0  ;;  %8291 = vmatprep.subr.bf16.mxu0 %v15960_v48  ;;  %v15982_v40 = vld [vmem:[%s22407_s1 + $0x1840] ss:$16 sps:$4 sm:$0xff]   ;;  %v15990_v48 = vld [vmem:[%s22407_s1 + $0x1824] ss:$16 sps:$4 sm:$0xff]  }
 0x2a2   : > { %v8038_v63 = vpop.f32.mrf.mxu1  ;;  %8332 = vmatprep.subr.bf16.mxu1 %v15963_v51  ;;  %v19557_v5 = vadd.f32 %v8036_v58, %v7996_v62  ;;  %v7998_v7 = vadd.f32 %v7997_v55, %v19340_v61  ;;  %8321 = vmatprep.mubr.bf16.mxu0 %v19526_v45  ;;  %v15985_v44 = vld [vmem:[%s22407_s1 + $0x1a40] ss:$16 sps:$4 sm:$0xff]   ;;  %v15993_v51 = vld [vmem:[%s22407_s1 + $0x1a24] ss:$16 sps:$4 sm:$0xff]  }
 0x2a3   : > { %8362 = vmatprep.mubr.bf16.mxu1 %v19546_v56  ;;  %v7999_v9 = vpop.f32.mrf.mxu0  ;;  %v15999_v58 = vld [vmem:[%s22407_s1 + $0x1a04] ss:$16 sps:$4 sm:$0xff]   ;;  %v15994_v62 = vld [vmem:[%s22407_s1 + $0x1800] ss:$16 sps:$4 sm:$0xff]  }
 0x2a4   : > { %v8040_v11 = vpop.f32.mrf.mxu1  ;;  %v19568_v12 = vadd.f32 %v8038_v63, %v7998_v7  ;;  %8292 = vmatpush1.bf16.msra.mxu0 %v15958_v53  ;;  %v15988_v53 = vld [vmem:[%s22407_s1 + $0x1820] ss:$16 sps:$4 sm:$0xff]   ;;  %v16002_v63 = vld [vmem:[%s22407_s1 + $0x19e4] ss:$16 sps:$4 sm:$0xff]  }
 0x2a5   : > { %8333 = vmatpush1.bf16.msra.mxu1 %v15961_v46  ;;  %v8000_v14 = vpop.f32.mrf.mxu0  ;;  %8293 = vmatprep.subr.bf16.mxu0 %v15966_v2  ;;  %v15991_v46 = vld [vmem:[%s22407_s1 + $0x1a20] ss:$16 sps:$4 sm:$0xff]   ;;  %v16005_v2 = vld [vmem:[%s22407_s1 + $0x1be4] ss:$16 sps:$4 sm:$0xff]  }
 0x2a6   : > { %v8041_v61 = vpop.f32.mrf.mxu1  ;;  %8334 = vmatprep.subr.bf16.mxu1 %v15969_v3  ;;  %v15997_v55 = vld [vmem:[%s22407_s1 + $0x1a00] ss:$16 sps:$4 sm:$0xff]   ;;  %v16014_v14 = vld [vmem:[%s22407_s1 + $0x19a4] ss:$16 sps:$4 sm:$0xff]  }
 0x2a7   : > { %v16000_v3 = vld [vmem:[%s22407_s1 + $0x19e0] ss:$16 sps:$4 sm:$0xff]   ;;  %v16017_v61 = vld [vmem:[%s22407_s1 + $0x1ba4] ss:$16 sps:$4 sm:$0xff]  }
 0x2a8   : > { %8294 = vmatpush1.bf16.msra.mxu0 %v15964_v52  ;;  %v16003_v7 = vld [vmem:[%s22407_s1 + $0x1be0] ss:$16 sps:$4 sm:$0xff]   ;;  %v16008_v52 = vld [vmem:[%s22407_s1 + $0x19c4] ss:$16 sps:$4 sm:$0xff]  }
 0x2a9   : > { %8335 = vmatpush1.bf16.msra.mxu1 %v15967_v1  ;;  %8295 = vmatprep.subr.bf16.mxu0 %v15972_v20  ;;  %v16011_v1 = vld [vmem:[%s22407_s1 + $0x1bc4] ss:$16 sps:$4 sm:$0xff]   ;;  %v16006_v9 = vld [vmem:[%s22407_s1 + $0x19c0] ss:$16 sps:$4 sm:$0xff]  }
 0x2aa   : > { %8336 = vmatprep.subr.bf16.mxu1 %v15975_v25  ;;  %v16009_v11 = vld [vmem:[%s22407_s1 + $0x1bc0] ss:$16 sps:$4 sm:$0xff]  }
 0x2ab   : > { %v16012_v20 = vld [vmem:[%s22407_s1 + $0x19a0] ss:$16 sps:$4 sm:$0xff]  }
 0x2ac   : > { %8296 = vmatpush1.bf16.msra.mxu0 %v15970_v4  ;;  %v16015_v25 = vld [vmem:[%s22407_s1 + $0x1ba0] ss:$16 sps:$4 sm:$0xff]   ;;  %v16020_v4 = vld [vmem:[%s22407_s1 + $0x1984] ss:$16 sps:$4 sm:$0xff]  }
 0x2ad   : > { %8337 = vmatpush1.bf16.msra.mxu1 %v15973_v27  ;;  %8297 = vmatprep.subr.bf16.mxu0 %v15978_v28  ;;  %v16023_v27 = vld [vmem:[%s22407_s1 + $0x1b84] ss:$16 sps:$4 sm:$0xff]   ;;  %v16018_v28 = vld [vmem:[%s22407_s1 + $0x1980] ss:$16 sps:$4 sm:$0xff]  }
 0x2ae   : > { %8338 = vmatprep.subr.bf16.mxu1 %v15981_v33  ;;  %v16021_v33 = vld [vmem:[%s22407_s1 + $0x1b80] ss:$16 sps:$4 sm:$0xff]  }
 0x2b0   : > { %8298 = vmatpush1.bf16.msra.mxu0 %v15976_v36  ;;  %v16026_v36 = vld [vmem:[%s22407_s1 + $0x1964] ss:$16 sps:$4 sm:$0xff]  }
 0x2b1   : > { %8339 = vmatpush1.bf16.msra.mxu1 %v15979_v37  ;;  %8299 = vmatprep.subr.bf16.mxu0 %v15984_v32  ;;  %v16029_v37 = vld [vmem:[%s22407_s1 + $0x1b64] ss:$16 sps:$4 sm:$0xff]   ;;  %v16024_v32 = vld [vmem:[%s22407_s1 + $0x1960] ss:$16 sps:$4 sm:$0xff]  }
 0x2b2   : > { %8340 = vmatprep.subr.bf16.mxu1 %v15987_v8  ;;  %v16027_v8 = vld [vmem:[%s22407_s1 + $0x1b60] ss:$16 sps:$4 sm:$0xff]  }
 0x2b4   : > { %8300 = vmatpush1.bf16.msra.mxu0 %v15982_v40  ;;  %v16032_v40 = vld [vmem:[%s22407_s1 + $0x1944] ss:$16 sps:$4 sm:$0xff]  }
 0x2b5   : > { %8341 = vmatpush1.bf16.msra.mxu1 %v15985_v44  ;;  %8301 = vmatprep.subr.bf16.mxu0 %v15990_v48  ;;  %v16035_v44 = vld [vmem:[%s22407_s1 + $0x1b44] ss:$16 sps:$4 sm:$0xff]   ;;  %v2596_v48 = vcombine.high %v19471_v10, %v19471_v10 }
 0x2b6   : > { %8342 = vmatprep.subr.bf16.mxu1 %v15993_v51  ;;  %v16030_v51 = vld [vmem:[%s22407_s1 + $0x1940] ss:$16 sps:$4 sm:$0xff]   ;;  %v16041_v10 = vld [vmem:[%s22407_s1 + $0x1b24] ss:$16 sps:$4 sm:$0xff]  }
 0x2b8   : > { %8302 = vmatpush1.bf16.msra.mxu0 %v15988_v53  ;;  %v16033_v53 = vld [vmem:[%s22407_s1 + $0x1b40] ss:$16 sps:$4 sm:$0xff]  }
 0x2b9   : > { %8343 = vmatpush1.bf16.msra.mxu1 %v15991_v46  ;;  %8303 = vmatprep.subr.bf16.mxu0 %v15996_v57  ;;  %v16038_v46 = vld [vmem:[%s22407_s1 + $0x1924] ss:$16 sps:$4 sm:$0xff]   ;;  %v19711_v57 = vrot.slane %v2596_v48, %v18307_v49 }
 0x2ba   : > { %8344 = vmatprep.subr.bf16.mxu1 %v15999_v58  ;;  %v16036_v58 = vld [vmem:[%s22407_s1 + $0x1920] ss:$16 sps:$4 sm:$0xff]  }
 0x2bc   : > { %8304 = vmatpush1.bf16.msra.mxu0 %v15994_v62  ;;  %v16039_v62 = vld [vmem:[%s22407_s1 + $0x1b20] ss:$16 sps:$4 sm:$0xff]  }
 0x2bd   : > { %8345 = vmatpush1.bf16.msra.mxu1 %v15997_v55  ;;  %8305 = vmatprep.subr.bf16.mxu0 %v16002_v63  ;;  %v16044_v55 = vld [vmem:[%s22407_s1 + $0x1904] ss:$16 sps:$4 sm:$0xff]  }
 0x2be   : > { %8346 = vmatprep.subr.bf16.mxu1 %v16005_v2  ;;  %v16047_v63 = vld [vmem:[%s22407_s1 + $0x1b04] ss:$16 sps:$4 sm:$0xff]   ;;  %v2612_v2 = vcombine.high %v19711_v57, %v19711_v57 }
 0x2c0   : > { %8306 = vmatpush2.bf16.msra.mxu0 %v16000_v3  ;;  %v19729_v3 = vrot.slane %v19487_v24, %v18307_v49  ;;  %v16053_v24 = vld [vmem:[%s22407_s1 + $0x1ee4] ss:$16 sps:$4 sm:$0xff]  }
 0x2c1   : > { %8347 = vmatpush2.bf16.msra.mxu1 %v16003_v7  ;;  %8307 = vmatprep.subr.bf16.mxu0 %v16008_v52  ;;  %v16042_v7 = vld [vmem:[%s22407_s1 + $0x1900] ss:$16 sps:$4 sm:$0xff]  }
 0x2c2   : > { %8348 = vmatprep.subr.bf16.mxu1 %v16011_v1  ;;  %v16045_v52 = vld [vmem:[%s22407_s1 + $0x1b00] ss:$16 sps:$4 sm:$0xff]   ;;  %v16050_v1 = vld [vmem:[%s22407_s1 + $0x1ce4] ss:$16 sps:$4 sm:$0xff]  }
 0x2c4   : > { %8308 = vmatpush2.bf16.msra.mxu0 %v16006_v9  ;;  %v16048_v9 = vld [vmem:[%s22407_s1 + $0x1ce0] ss:$16 sps:$4 sm:$0xff]  }
 0x2c5   : > { %8349 = vmatpush2.bf16.msra.mxu1 %v16009_v11  ;;  %8309 = vmatprep.subr.bf16.mxu0 %v16014_v14  ;;  %v16051_v11 = vld [vmem:[%s22407_s1 + $0x1ee0] ss:$16 sps:$4 sm:$0xff]   ;;  %v19750_v14 = vrot.slane %v2612_v2, %v18307_v49 }
 0x2c6   : > { %8350 = vmatprep.subr.bf16.mxu1 %v16017_v61  ;;  %v19754_v61 = vcombine.high %v19729_v3, %v19729_v3  ;;  %v16066_v2 = vld [vmem:[%s22407_s1 + $0x1c80] ss:$16 sps:$4 sm:$0xff]  }
 0x2c8   : > { %8310 = vmatpush2.bf16.msra.mxu0 %v16012_v20  ;;  %v16056_v20 = vld [vmem:[%s22407_s1 + $0x1cc4] ss:$16 sps:$4 sm:$0xff]  }
 0x2c9   : > { %8351 = vmatpush2.bf16.msra.mxu1 %v16015_v25  ;;  %8311 = vmatprep.subr.bf16.mxu0 %v16020_v4  ;;  %v16059_v25 = vld [vmem:[%s22407_s1 + $0x1ec4] ss:$16 sps:$4 sm:$0xff]   ;;  %v16054_v4 = vld [vmem:[%s22407_s1 + $0x1cc0] ss:$16 sps:$4 sm:$0xff]  }
 0x2ca   : > { %8352 = vmatprep.subr.bf16.mxu1 %v16023_v27  ;;  %v16057_v27 = vld [vmem:[%s22407_s1 + $0x1ec0] ss:$16 sps:$4 sm:$0xff]  }
 0x2cc   : > { %8312 = vmatpush2.bf16.msra.mxu0 %v16018_v28  ;;  %v19770_v28 = vcombine.high %v19750_v14, %v19750_v14 }
 0x2cd   : > { %8353 = vmatpush2.bf16.msra.mxu1 %v16021_v33  ;;  %8313 = vmatprep.subr.bf16.mxu0 %v16026_v36 }
 0x2ce   : > { %8354 = vmatprep.subr.bf16.mxu1 %v16029_v37 }
 0x2d0   : > { %8314 = vmatpush2.bf16.msra.mxu0 %v16024_v32 }
 0x2d1   : > { %8355 = vmatpush2.bf16.msra.mxu1 %v16027_v8  ;;  %8315 = vmatprep.subr.bf16.mxu0 %v16032_v40  ;;  %v16062_v40 = vld [vmem:[%s22407_s1 + $0x1ca4] ss:$16 sps:$4 sm:$0xff]  }
 0x2d2   : > { %8356 = vmatprep.subr.bf16.mxu1 %v16035_v44  ;;  %v16065_v44 = vld [vmem:[%s22407_s1 + $0x1ea4] ss:$16 sps:$4 sm:$0xff]  }
 0x2d4   : > { %8316 = vmatpush2.bf16.msra.mxu0 %v16030_v51 }
 0x2d5   : > { %8357 = vmatpush2.bf16.msra.mxu1 %v16033_v53  ;;  %8317 = vmatprep.subr.bf16.mxu0 %v16038_v46  ;;  %v16063_v53 = vld [vmem:[%s22407_s1 + $0x1ea0] ss:$16 sps:$4 sm:$0xff]  }
 0x2d6   : > { %8358 = vmatprep.subr.bf16.mxu1 %v16041_v10 }
 0x2d8   : > { %8318 = vmatpush2.bf16.msra.mxu0 %v16036_v58 }
 0x2d9   : > { %8359 = vmatpush2.bf16.msra.mxu1 %v16039_v62  ;;  %8319 = vmatprep.subr.bf16.mxu0 %v16044_v55  ;;  %v16068_v55 = vld [vmem:[%s22407_s1 + $0x1c84] ss:$16 sps:$4 sm:$0xff]  }
 0x2da   : > { %8360 = vmatprep.subr.bf16.mxu1 %v16047_v63  ;;  %v16071_v63 = vld [vmem:[%s22407_s1 + $0x1e84] ss:$16 sps:$4 sm:$0xff]  }
 0x2dc   : > { %8320 = vmatpush2.bf16.msra.mxu0 %v16042_v7  ;;  %v16069_v7 = vld [vmem:[%s22407_s1 + $0x1e80] ss:$16 sps:$4 sm:$0xff]  }
 0x2dd   : > { %8361 = vmatpush2.bf16.msra.mxu1 %v16045_v52  ;;  %8371 = vmatprep.subr.bf16.mxu0 %v16050_v1  ;;  %v16074_v52 = vld [vmem:[%s22407_s1 + $0x1c64] ss:$16 sps:$4 sm:$0xff]  }
 0x2de   : > { %8412 = vmatprep.subr.bf16.mxu1 %v16053_v24  ;;  %v16077_v1 = vld [vmem:[%s22407_s1 + $0x1e64] ss:$16 sps:$4 sm:$0xff]   ;;  %v16072_v24 = vld [vmem:[%s22407_s1 + $0x1c60] ss:$16 sps:$4 sm:$0xff]  }
 0x2df   : > { %v8077_v33 = vpop.f32.mrf.mxu0  ;;  %8322 = vmatmul.mubr.bf16.vlgmr.msra.gmra.mxu0 %v19729_v3 }
 0x2e0   : > { %v8118_v36 = vpop.f32.mrf.mxu1  ;;  %8363 = vmatmul.mubr.bf16.vlgmr.msra.gmra.mxu1 %v19754_v61  ;;  %v8078_v37 = vadd.f32 %v8077_v33, %v19557_v5  ;;  %8372 = vmatpush1.bf16.msra.mxu0 %v16048_v9  ;;  %v16060_v5 = vld [vmem:[%s22407_s1 + $0x1ca0] ss:$16 sps:$4 sm:$0xff]   ;;  %v16089_v33 = vld [vmem:[%s22407_s1 + $0x1e24] ss:$16 sps:$4 sm:$0xff]  }
 0x2e1   : > { %8413 = vmatpush1.bf16.msra.mxu1 %v16051_v11  ;;  %v8079_v32 = vpop.f32.mrf.mxu0  ;;  %8373 = vmatprep.subr.bf16.mxu0 %v16056_v20  ;;  %v16075_v9 = vld [vmem:[%s22407_s1 + $0x1e60] ss:$16 sps:$4 sm:$0xff]   ;;  %v16080_v11 = vld [vmem:[%s22407_s1 + $0x1c44] ss:$16 sps:$4 sm:$0xff]  }
 0x2e2   : > { %v8120_v8 = vpop.f32.mrf.mxu1  ;;  %8414 = vmatprep.subr.bf16.mxu1 %v16059_v25  ;;  %v19781_v48 = vadd.f32 %v8118_v36, %v8078_v37  ;;  %v8080_v51 = vadd.f32 %v8079_v32, %v19568_v12  ;;  %8403 = vmatprep.mubr.bf16.mxu0 %v19750_v14  ;;  %v16083_v20 = vld [vmem:[%s22407_s1 + $0x1e44] ss:$16 sps:$4 sm:$0xff]   ;;  %v16078_v25 = vld [vmem:[%s22407_s1 + $0x1c40] ss:$16 sps:$4 sm:$0xff]  }
 0x2e3   : > { %8444 = vmatprep.mubr.bf16.mxu1 %v19770_v28  ;;  %v8081_v46 = vpop.f32.mrf.mxu0  ;;  %v16084_v36 = vld [vmem:[%s22407_s1 + $0x1c20] ss:$16 sps:$4 sm:$0xff]   ;;  %v16092_v32 = vld [vmem:[%s22407_s1 + $0x1c04] ss:$16 sps:$4 sm:$0xff]  }
 0x2e4   : > { %v8122_v10 = vpop.f32.mrf.mxu1  ;;  %v19792_v58 = vadd.f32 %v8120_v8, %v8080_v51  ;;  %8374 = vmatpush1.bf16.msra.mxu0 %v16054_v4  ;;  %v16081_v4 = vld [vmem:[%s22407_s1 + $0x1e40] ss:$16 sps:$4 sm:$0xff]   ;;  %v16095_v8 = vld [vmem:[%s22407_s1 + $0x1e04] ss:$16 sps:$4 sm:$0xff]  }
 0x2e5   : > { %8415 = vmatpush1.bf16.msra.mxu1 %v16057_v27  ;;  %v8082_v62 = vpop.f32.mrf.mxu0  ;;  %8375 = vmatprep.subr.bf16.mxu0 %v16062_v40  ;;  %v16086_v27 = vld [vmem:[%s22407_s1 + $0x1c24] ss:$16 sps:$4 sm:$0xff]   ;;  %v16087_v37 = vld [vmem:[%s22407_s1 + $0x1e20] ss:$16 sps:$4 sm:$0xff]  }
 0x2e6   : > { %v8123_v12 = vpop.f32.mrf.mxu1  ;;  %8416 = vmatprep.subr.bf16.mxu1 %v16065_v44  ;;  %v16090_v40 = vld [vmem:[%s22407_s1 + $0x1c00] ss:$16 sps:$4 sm:$0xff]   ;;  %v16098_v51 = vld [vmem:[%s22407_s1 + $0x1de4] ss:$16 sps:$4 sm:$0xff]  }
 0x2e7   : > { %v16093_v44 = vld [vmem:[%s22407_s1 + $0x1e00] ss:$16 sps:$4 sm:$0xff]   ;;  %v16104_v10 = vld [vmem:[%s22407_s1 + $0x1dc4] ss:$16 sps:$4 sm:$0xff]  }
 0x2e8   : > { %8376 = vmatpush1.bf16.msra.mxu0 %v16060_v5  ;;  %v16101_v5 = vld [vmem:[%s22407_s1 + $0x1fe4] ss:$16 sps:$4 sm:$0xff]   ;;  %v16099_v46 = vld [vmem:[%s22407_s1 + $0x1fe0] ss:$16 sps:$4 sm:$0xff]  }
 0x2e9   : > { %8417 = vmatpush1.bf16.msra.mxu1 %v16063_v53  ;;  %8377 = vmatprep.subr.bf16.mxu0 %v16068_v55  ;;  %v16096_v53 = vld [vmem:[%s22407_s1 + $0x1de0] ss:$16 sps:$4 sm:$0xff]   ;;  %v16107_v62 = vld [vmem:[%s22407_s1 + $0x1fc4] ss:$16 sps:$4 sm:$0xff]  }
 0x2ea   : > { %8418 = vmatprep.subr.bf16.mxu1 %v16071_v63  ;;  %v16102_v12 = vld [vmem:[%s22407_s1 + $0x1dc0] ss:$16 sps:$4 sm:$0xff]   ;;  %v16110_v63 = vld [vmem:[%s22407_s1 + $0x1da4] ss:$16 sps:$4 sm:$0xff]  }
 0x2eb   : > { %v16105_v55 = vld [vmem:[%s22407_s1 + $0x1fc0] ss:$16 sps:$4 sm:$0xff]  }
 0x2ec   : > { %8378 = vmatpush1.bf16.msra.mxu0 %v16066_v2  ;;  %v16113_v2 = vld [vmem:[%s22407_s1 + $0x1fa4] ss:$16 sps:$4 sm:$0xff]  }
 0x2ed   : > { %8419 = vmatpush1.bf16.msra.mxu1 %v16069_v7  ;;  %8379 = vmatprep.subr.bf16.mxu0 %v16074_v52  ;;  %v16108_v7 = vld [vmem:[%s22407_s1 + $0x1da0] ss:$16 sps:$4 sm:$0xff]  }
 0x2ee   : > { %8420 = vmatprep.subr.bf16.mxu1 %v16077_v1  ;;  %v16111_v52 = vld [vmem:[%s22407_s1 + $0x1fa0] ss:$16 sps:$4 sm:$0xff]   ;;  %v16116_v1 = vld [vmem:[%s22407_s1 + $0x1d84] ss:$16 sps:$4 sm:$0xff]  }
 0x2f0   : > { %8380 = vmatpush1.bf16.msra.mxu0 %v16072_v24  ;;  %v16119_v24 = vld [vmem:[%s22407_s1 + $0x1f84] ss:$16 sps:$4 sm:$0xff]  }
 0x2f1   : > { %8421 = vmatpush1.bf16.msra.mxu1 %v16075_v9  ;;  %8381 = vmatprep.subr.bf16.mxu0 %v16080_v11  ;;  %v16114_v9 = vld [vmem:[%s22407_s1 + $0x1d80] ss:$16 sps:$4 sm:$0xff]  }
 0x2f2   : > { %8422 = vmatprep.subr.bf16.mxu1 %v16083_v20  ;;  %v16117_v11 = vld [vmem:[%s22407_s1 + $0x1f80] ss:$16 sps:$4 sm:$0xff]   ;;  %v16122_v20 = vld [vmem:[%s22407_s1 + $0x1d64] ss:$16 sps:$4 sm:$0xff]  }
 0x2f4   : > { %8382 = vmatpush1.bf16.msra.mxu0 %v16078_v25  ;;  %v16125_v25 = vld [vmem:[%s22407_s1 + $0x1f64] ss:$16 sps:$4 sm:$0xff]  }
 0x2f5   : > { %8423 = vmatpush1.bf16.msra.mxu1 %v16081_v4  ;;  %8383 = vmatprep.subr.bf16.mxu0 %v16086_v27  ;;  %v16120_v4 = vld [vmem:[%s22407_s1 + $0x1d60] ss:$16 sps:$4 sm:$0xff]  }
 0x2f6   : > { %8424 = vmatprep.subr.bf16.mxu1 %v16089_v33  ;;  %v16123_v27 = vld [vmem:[%s22407_s1 + $0x1f60] ss:$16 sps:$4 sm:$0xff]   ;;  %v16128_v33 = vld [vmem:[%s22407_s1 + $0x1d44] ss:$16 sps:$4 sm:$0xff]  }
 0x2f8   : > { %8384 = vmatpush1.bf16.msra.mxu0 %v16084_v36  ;;  %v16131_v36 = vld [vmem:[%s22407_s1 + $0x1f44] ss:$16 sps:$4 sm:$0xff]  }
 0x2f9   : > { %8425 = vmatpush1.bf16.msra.mxu1 %v16087_v37  ;;  %8385 = vmatprep.subr.bf16.mxu0 %v16092_v32  ;;  %v16126_v37 = vld [vmem:[%s22407_s1 + $0x1d40] ss:$16 sps:$4 sm:$0xff]  }
 0x2fa   : > { %8426 = vmatprep.subr.bf16.mxu1 %v16095_v8  ;;  %v16129_v32 = vld [vmem:[%s22407_s1 + $0x1f40] ss:$16 sps:$4 sm:$0xff]   ;;  %v16134_v8 = vld [vmem:[%s22407_s1 + $0x1d24] ss:$16 sps:$4 sm:$0xff]  }
 0x2fc   : > { %8386 = vmatpush1.bf16.msra.mxu0 %v16090_v40  ;;  %v16137_v40 = vld [vmem:[%s22407_s1 + $0x1f24] ss:$16 sps:$4 sm:$0xff]  }
 0x2fd   : > { %8427 = vmatpush1.bf16.msra.mxu1 %v16093_v44  ;;  %8387 = vmatprep.subr.bf16.mxu0 %v16098_v51  ;;  %v16132_v44 = vld [vmem:[%s22407_s1 + $0x1d20] ss:$16 sps:$4 sm:$0xff]  }
 0x2fe   : > { %8428 = vmatprep.subr.bf16.mxu1 %v16101_v5  ;;  %v16135_v51 = vld [vmem:[%s22407_s1 + $0x1f20] ss:$16 sps:$4 sm:$0xff]   ;;  %v16140_v5 = vld [vmem:[%s22407_s1 + $0x1d04] ss:$16 sps:$4 sm:$0xff]  }
 0x300   : > { %8388 = vmatpush2.bf16.msra.mxu0 %v16096_v53  ;;  %v16143_v53 = vld [vmem:[%s22407_s1 + $0x1f04] ss:$16 sps:$4 sm:$0xff]  }
 0x301   : > { %8429 = vmatpush2.bf16.msra.mxu1 %v16099_v46  ;;  %8389 = vmatprep.subr.bf16.mxu0 %v16104_v10  ;;  %v19946_v46 = vrot.slane %v19711_v57, %v18307_v49  ;;  %v16138_v10 = vld [vmem:[%s22407_s1 + $0x1d00] ss:$16 sps:$4 sm:$0xff]   ;;  %v16150_v49 = vld [vmem:[%s22407_s1 + $0x2ec] ss:$16 sps:$4 sm:$0xff]   ;;  %v16145_v57 = vld [vmem:[%s22407_s1 + $0xe8] ss:$16 sps:$4 sm:$0xff]  }
 0x302   : > { %8430 = vmatprep.subr.bf16.mxu1 %v16107_v62  ;;  %v16141_v62 = vld [vmem:[%s22407_s1 + $0x1f00] ss:$16 sps:$4 sm:$0xff]  }
 0x304   : > { %8390 = vmatpush2.bf16.msra.mxu0 %v16102_v12  ;;  %v16147_v12 = vld [vmem:[%s22407_s1 + $0xec] ss:$16 sps:$4 sm:$0xff]  }
 0x305   : > { %8431 = vmatpush2.bf16.msra.mxu1 %v16105_v55  ;;  %8391 = vmatprep.subr.bf16.mxu0 %v16110_v63  ;;  %v16148_v55 = vld [vmem:[%s22407_s1 + $0x2e8] ss:$16 sps:$4 sm:$0xff]   ;;  %v19968_v63 = vcombine.high %v19946_v46, %v19946_v46 }
 0x306   : > { %8432 = vmatprep.subr.bf16.mxu1 %v16113_v2  ;;  %v16153_v2 = vld [vmem:[%s22407_s1 + $0xcc] ss:$16 sps:$4 sm:$0xff]  }
 0x308   : > { %8392 = vmatpush2.bf16.msra.mxu0 %v16108_v7  ;;  %v16156_v7 = vld [vmem:[%s22407_s1 + $0x2cc] ss:$16 sps:$4 sm:$0xff]  }
 0x309   : > { %8433 = vmatpush2.bf16.msra.mxu1 %v16111_v52  ;;  %8393 = vmatprep.subr.bf16.mxu0 %v16116_v1  ;;  %v16151_v52 = vld [vmem:[%s22407_s1 + $0xc8] ss:$16 sps:$4 sm:$0xff]  }
 0x30a   : > { %8434 = vmatprep.subr.bf16.mxu1 %v16119_v24  ;;  %v16154_v1 = vld [vmem:[%s22407_s1 + $0x2c8] ss:$16 sps:$4 sm:$0xff]  }
 0x30c   : > { %8394 = vmatpush2.bf16.msra.mxu0 %v16114_v9 }
 0x30d   : > { %8435 = vmatpush2.bf16.msra.mxu1 %v16117_v11  ;;  %8395 = vmatprep.subr.bf16.mxu0 %v16122_v20 }
 0x30e   : > { %8436 = vmatprep.subr.bf16.mxu1 %v16125_v25 }
 0x310   : > { %8396 = vmatpush2.bf16.msra.mxu0 %v16120_v4  ;;  %v16159_v4 = vld [vmem:[%s22407_s1 + $0xac] ss:$16 sps:$4 sm:$0xff]  }
 0x311   : > { %8437 = vmatpush2.bf16.msra.mxu1 %v16123_v27  ;;  %8397 = vmatprep.subr.bf16.mxu0 %v16128_v33  ;;  %v16162_v27 = vld [vmem:[%s22407_s1 + $0x2ac] ss:$16 sps:$4 sm:$0xff]  }
 0x312   : > { %8438 = vmatprep.subr.bf16.mxu1 %v16131_v36 }
 0x314   : > { %8398 = vmatpush2.bf16.msra.mxu0 %v16126_v37  ;;  %v16160_v37 = vld [vmem:[%s22407_s1 + $0x2a8] ss:$16 sps:$4 sm:$0xff]  }
 0x315   : > { %8439 = vmatpush2.bf16.msra.mxu1 %v16129_v32  ;;  %8399 = vmatprep.subr.bf16.mxu0 %v16134_v8 }
 0x316   : > { %8440 = vmatprep.subr.bf16.mxu1 %v16137_v40 }
 0x318   : > { %8400 = vmatpush2.bf16.msra.mxu0 %v16132_v44 }
 0x319   : > { %8441 = vmatpush2.bf16.msra.mxu1 %v16135_v51  ;;  %8401 = vmatprep.subr.bf16.mxu0 %v16140_v5  ;;  %v16165_v51 = vld [vmem:[%s22407_s1 + $0x8c] ss:$16 sps:$4 sm:$0xff]   ;;  %v16166_v5 = vld [vmem:[%s22407_s1 + $0x288] ss:$16 sps:$4 sm:$0xff]  }
 0x31a   : > { %8442 = vmatprep.subr.bf16.mxu1 %v16143_v53  ;;  %v16171_v53 = vld [vmem:[%s22407_s1 + $0x6c] ss:$16 sps:$4 sm:$0xff]  }
 0x31c   : > { %8402 = vmatpush2.bf16.msra.mxu0 %v16138_v10  ;;  %v16174_v10 = vld [vmem:[%s22407_s1 + $0x26c] ss:$16 sps:$4 sm:$0xff]  }
 0x31d   : > { %8443 = vmatpush2.bf16.msra.mxu1 %v16141_v62  ;;  %8453 = vmatprep.subr.bf16.mxu0 %v16147_v12  ;;  %v16169_v62 = vld [vmem:[%s22407_s1 + $0x68] ss:$16 sps:$4 sm:$0xff]  }
 0x31e   : > { %8494 = vmatprep.subr.bf16.mxu1 %v16150_v49  ;;  %v16172_v12 = vld [vmem:[%s22407_s1 + $0x268] ss:$16 sps:$4 sm:$0xff]   ;;  %v16177_v49 = vld [vmem:[%s22407_s1 + $0x4c] ss:$16 sps:$4 sm:$0xff]  }
 0x31f   : > { %v8159_v24 = vpop.f32.mrf.mxu0  ;;  %8404 = vmatmul.mubr.bf16.vlgmr.msra.gmra.mxu0 %v19946_v46 }
 0x320   : > { %v8200_v9 = vpop.f32.mrf.mxu1  ;;  %8445 = vmatmul.mubr.bf16.vlgmr.msra.gmra.mxu1 %v19968_v63  ;;  %v8160_v11 = vadd.f32 %v8159_v24, %v19781_v48  ;;  %8454 = vmatpush1.bf16.msra.mxu0 %v16145_v57  ;;  %v16157_v48 = vld [vmem:[%s22407_s1 + $0xa8] ss:$16 sps:$4 sm:$0xff]   ;;  %v16180_v57 = vld [vmem:[%s22407_s1 + $0x24c] ss:$16 sps:$4 sm:$0xff]  }
 0x321   : > { %8495 = vmatpush1.bf16.msra.mxu1 %v16148_v55  ;;  %v8161_v20 = vpop.f32.mrf.mxu0  ;;  %8455 = vmatprep.subr.bf16.mxu0 %v16153_v2  ;;  %v16175_v55 = vld [vmem:[%s22407_s1 + $0x48] ss:$16 sps:$4 sm:$0xff]  }
 0x322   : > { %v8202_v25 = vpop.f32.mrf.mxu1  ;;  %8496 = vmatprep.subr.bf16.mxu1 %v16156_v7  ;;  %v19991_v33 = vadd.f32 %v8200_v9, %v8160_v11  ;;  %v8162_v36 = vadd.f32 %v8161_v20, %v19792_v58  ;;  %8485 = vmatprep.mubr.bf16.mxu0 %v18335_v60  ;;  %v16168_v60 = vld [vmem:[%s22407_s1 + $0x28c] ss:$16 sps:$4 sm:$0xff]   ;;  %v16178_v2 = vld [vmem:[%s22407_s1 + $0x248] ss:$16 sps:$4 sm:$0xff]  }
 0x323   : > { %8526 = vmatprep.mubr.bf16.mxu1 %v18348_v0  ;;  %v8163_v32 = vpop.f32.mrf.mxu0  ;;  %v16163_v0 = vld [vmem:[%s22407_s1 + $0x88] ss:$16 sps:$4 sm:$0xff]   ;;  %v16183_v7 = vld [vmem:[%s22407_s1 + $0x2c] ss:$16 sps:$4 sm:$0xff]  }
 0x324   : > { %v8204_v8 = vpop.f32.mrf.mxu1  ;;  %v20002_v40 = vadd.f32 %v8202_v25, %v8162_v36  ;;  %8456 = vmatpush1.bf16.msra.mxu0 %v16151_v52  ;;  %v16186_v52 = vld [vmem:[%s22407_s1 + $0x22c] ss:$16 sps:$4 sm:$0xff]   ;;  %v16184_v24 = vld [vmem:[%s22407_s1 + $0x228] ss:$16 sps:$4 sm:$0xff]  }
 0x325   : > { %8497 = vmatpush1.bf16.msra.mxu1 %v16154_v1  ;;  %v8164_v44 = vpop.f32.mrf.mxu0  ;;  %8457 = vmatprep.subr.bf16.mxu0 %v16159_v4  ;;  %v16181_v1 = vld [vmem:[%s22407_s1 + $0x28] ss:$16 sps:$4 sm:$0xff]   ;;  %v16189_v9 = vld [vmem:[%s22407_s1 + $0xc] ss:$16 sps:$4 sm:$0xff]  }
 0x326   : > { %v8205_v58 = vpop.f32.mrf.mxu1  ;;  %8498 = vmatprep.subr.bf16.mxu1 %v16162_v27  ;;  %v16192_v11 = vld [vmem:[%s22407_s1 + $0x20c] ss:$16 sps:$4 sm:$0xff]   ;;  %v16187_v20 = vld [vmem:[%s22407_s1 + $0x8] ss:$16 sps:$4 sm:$0xff]  }
 0x327   : > { %v16190_v25 = vld [vmem:[%s22407_s1 + $0x208] ss:$16 sps:$4 sm:$0xff]   ;;  %v16195_v4 = vld [vmem:[%s22407_s1 + $0x1ec] ss:$16 sps:$4 sm:$0xff]  }
 0x328   : > { %8458 = vmatpush1.bf16.msra.mxu0 %v16157_v48  ;;  %v16198_v27 = vld [vmem:[%s22407_s1 + $0x3ec] ss:$16 sps:$4 sm:$0xff]   ;;  %v16193_v36 = vld [vmem:[%s22407_s1 + $0x1e8] ss:$16 sps:$4 sm:$0xff]  }
 0x329   : > { %8499 = vmatpush1.bf16.msra.mxu1 %v16160_v37  ;;  %8459 = vmatprep.subr.bf16.mxu0 %v16165_v51  ;;  %v16196_v48 = vld [vmem:[%s22407_s1 + $0x3e8] ss:$16 sps:$4 sm:$0xff]   ;;  %v16201_v37 = vld [vmem:[%s22407_s1 + $0x1cc] ss:$16 sps:$4 sm:$0xff]  }
 0x32a   : > { %8500 = vmatprep.subr.bf16.mxu1 %v16168_v60  ;;  %v16204_v32 = vld [vmem:[%s22407_s1 + $0x3cc] ss:$16 sps:$4 sm:$0xff]   ;;  %v16199_v8 = vld [vmem:[%s22407_s1 + $0x1c8] ss:$16 sps:$4 sm:$0xff]  }
 0x32b   : > { %v16202_v44 = vld [vmem:[%s22407_s1 + $0x3c8] ss:$16 sps:$4 sm:$0xff]   ;;  %v16207_v58 = vld [vmem:[%s22407_s1 + $0x1ac] ss:$16 sps:$4 sm:$0xff]  }
 0x32c   : > { %8460 = vmatpush1.bf16.msra.mxu0 %v16163_v0  ;;  %v16210_v51 = vld [vmem:[%s22407_s1 + $0x3ac] ss:$16 sps:$4 sm:$0xff]   ;;  %v16205_v60 = vld [vmem:[%s22407_s1 + $0x1a8] ss:$16 sps:$4 sm:$0xff]  }
 0x32d   : > { %8501 = vmatpush1.bf16.msra.mxu1 %v16166_v5  ;;  %8461 = vmatprep.subr.bf16.mxu0 %v16171_v53  ;;  %v16208_v0 = vld [vmem:[%s22407_s1 + $0x3a8] ss:$16 sps:$4 sm:$0xff]   ;;  %v16213_v5 = vld [vmem:[%s22407_s1 + $0x18c] ss:$16 sps:$4 sm:$0xff]  }
 0x32e   : > { %8502 = vmatprep.subr.bf16.mxu1 %v16174_v10  ;;  %v16216_v53 = vld [vmem:[%s22407_s1 + $0x38c] ss:$16 sps:$4 sm:$0xff]   ;;  %v16211_v10 = vld [vmem:[%s22407_s1 + $0x188] ss:$16 sps:$4 sm:$0xff]  }
 0x330   : > { %8462 = vmatpush1.bf16.msra.mxu0 %v16169_v62  ;;  %v16214_v62 = vld [vmem:[%s22407_s1 + $0x388] ss:$16 sps:$4 sm:$0xff]  }
 0x331   : > { %8503 = vmatpush1.bf16.msra.mxu1 %v16172_v12  ;;  %8463 = vmatprep.subr.bf16.mxu0 %v16177_v49  ;;  %v16219_v12 = vld [vmem:[%s22407_s1 + $0x16c] ss:$16 sps:$4 sm:$0xff]  }
 0x332   : > { %8504 = vmatprep.subr.bf16.mxu1 %v16180_v57  ;;  %v16222_v49 = vld [vmem:[%s22407_s1 + $0x36c] ss:$16 sps:$4 sm:$0xff]   ;;  %v16217_v57 = vld [vmem:[%s22407_s1 + $0x168] ss:$16 sps:$4 sm:$0xff]  }
 0x334   : > { %8464 = vmatpush1.bf16.msra.mxu0 %v16175_v55  ;;  %v16220_v55 = vld [vmem:[%s22407_s1 + $0x368] ss:$16 sps:$4 sm:$0xff]  }
 0x335   : > { %8505 = vmatpush1.bf16.msra.mxu1 %v16178_v2  ;;  %8465 = vmatprep.subr.bf16.mxu0 %v16183_v7  ;;  %v16225_v2 = vld [vmem:[%s22407_s1 + $0x14c] ss:$16 sps:$4 sm:$0xff]  }
 0x336   : > { %8506 = vmatprep.subr.bf16.mxu1 %v16186_v52  ;;  %v16228_v7 = vld [vmem:[%s22407_s1 + $0x34c] ss:$16 sps:$4 sm:$0xff]   ;;  %v16223_v52 = vld [vmem:[%s22407_s1 + $0x148] ss:$16 sps:$4 sm:$0xff]  }
 0x338   : > { %8466 = vmatpush1.bf16.msra.mxu0 %v16181_v1  ;;  %v16226_v1 = vld [vmem:[%s22407_s1 + $0x348] ss:$16 sps:$4 sm:$0xff]  }
 0x339   : > { %8507 = vmatpush1.bf16.msra.mxu1 %v16184_v24  ;;  %8467 = vmatprep.subr.bf16.mxu0 %v16189_v9  ;;  %v16231_v24 = vld [vmem:[%s22407_s1 + $0x12c] ss:$16 sps:$4 sm:$0xff]  }
 0x33a   : > { %8508 = vmatprep.subr.bf16.mxu1 %v16192_v11  ;;  %v16234_v9 = vld [vmem:[%s22407_s1 + $0x32c] ss:$16 sps:$4 sm:$0xff]   ;;  %v16229_v11 = vld [vmem:[%s22407_s1 + $0x128] ss:$16 sps:$4 sm:$0xff]  }
 0x33c   : > { %8468 = vmatpush1.bf16.msra.mxu0 %v16187_v20  ;;  %v16232_v20 = vld [vmem:[%s22407_s1 + $0x328] ss:$16 sps:$4 sm:$0xff]  }
 0x33d   : > { %8509 = vmatpush1.bf16.msra.mxu1 %v16190_v25  ;;  %8469 = vmatprep.subr.bf16.mxu0 %v16195_v4  ;;  %v16237_v25 = vld [vmem:[%s22407_s1 + $0x10c] ss:$16 sps:$4 sm:$0xff]  }
 0x33e   : > { %8510 = vmatprep.subr.bf16.mxu1 %v16198_v27  ;;  %v16240_v4 = vld [vmem:[%s22407_s1 + $0x30c] ss:$16 sps:$4 sm:$0xff]   ;;  %v16235_v27 = vld [vmem:[%s22407_s1 + $0x108] ss:$16 sps:$4 sm:$0xff]  }
 0x340   : > { %8470 = vmatpush2.bf16.msra.mxu0 %v16193_v36  ;;  %v16238_v36 = vld [vmem:[%s22407_s1 + $0x308] ss:$16 sps:$4 sm:$0xff]  }
 0x341   : > { %8511 = vmatpush2.bf16.msra.mxu1 %v16196_v48  ;;  %8471 = vmatprep.subr.bf16.mxu0 %v16201_v37  ;;  %v16243_v48 = vld [vmem:[%s22407_s1 + $0x4ec] ss:$16 sps:$4 sm:$0xff]  }
 0x342   : > { %8512 = vmatprep.subr.bf16.mxu1 %v16204_v32  ;;  %v16246_v37 = vld [vmem:[%s22407_s1 + $0x6ec] ss:$16 sps:$4 sm:$0xff]   ;;  %v16241_v32 = vld [vmem:[%s22407_s1 + $0x4e8] ss:$16 sps:$4 sm:$0xff]  }
 0x344   : > { %8472 = vmatpush2.bf16.msra.mxu0 %v16199_v8  ;;  %v16244_v8 = vld [vmem:[%s22407_s1 + $0x6e8] ss:$16 sps:$4 sm:$0xff]  }
 0x345   : > { %8513 = vmatpush2.bf16.msra.mxu1 %v16202_v44  ;;  %8473 = vmatprep.subr.bf16.mxu0 %v16207_v58  ;;  %v16249_v44 = vld [vmem:[%s22407_s1 + $0x4cc] ss:$16 sps:$4 sm:$0xff]  }
 0x346   : > { %8514 = vmatprep.subr.bf16.mxu1 %v16210_v51  ;;  %v16252_v58 = vld [vmem:[%s22407_s1 + $0x6cc] ss:$16 sps:$4 sm:$0xff]   ;;  %v16247_v51 = vld [vmem:[%s22407_s1 + $0x4c8] ss:$16 sps:$4 sm:$0xff]  }
 0x348   : > { %8474 = vmatpush2.bf16.msra.mxu0 %v16205_v60  ;;  %v16250_v60 = vld [vmem:[%s22407_s1 + $0x6c8] ss:$16 sps:$4 sm:$0xff]  }
 0x349   : > { %8515 = vmatpush2.bf16.msra.mxu1 %v16208_v0  ;;  %8475 = vmatprep.subr.bf16.mxu0 %v16213_v5 }
 0x34a   : > { %8516 = vmatprep.subr.bf16.mxu1 %v16216_v53 }
 0x34c   : > { %8476 = vmatpush2.bf16.msra.mxu0 %v16211_v10 }
 0x34d   : > { %8517 = vmatpush2.bf16.msra.mxu1 %v16214_v62  ;;  %8477 = vmatprep.subr.bf16.mxu0 %v16219_v12  ;;  %v16255_v12 = vld [vmem:[%s22407_s1 + $0x4ac] ss:$16 sps:$4 sm:$0xff]  }
 0x34e   : > { %8518 = vmatprep.subr.bf16.mxu1 %v16222_v49  ;;  %v16258_v49 = vld [vmem:[%s22407_s1 + $0x6ac] ss:$16 sps:$4 sm:$0xff]  }
 0x350   : > { %8478 = vmatpush2.bf16.msra.mxu0 %v16217_v57 }
 0x351   : > { %8519 = vmatpush2.bf16.msra.mxu1 %v16220_v55  ;;  %8479 = vmatprep.subr.bf16.mxu0 %v16225_v2 }
 0x352   : > { %8520 = vmatprep.subr.bf16.mxu1 %v16228_v7 }
 0x354   : > { %8480 = vmatpush2.bf16.msra.mxu0 %v16223_v52 }
 0x355   : > { %8521 = vmatpush2.bf16.msra.mxu1 %v16226_v1  ;;  %8481 = vmatprep.subr.bf16.mxu0 %v16231_v24  ;;  %v16261_v1 = vld [vmem:[%s22407_s1 + $0x48c] ss:$16 sps:$4 sm:$0xff]   ;;  %v16262_v24 = vld [vmem:[%s22407_s1 + $0x688] ss:$16 sps:$4 sm:$0xff]  }
 0x356   : > { %8522 = vmatprep.subr.bf16.mxu1 %v16234_v9  ;;  %v16267_v9 = vld [vmem:[%s22407_s1 + $0x46c] ss:$16 sps:$4 sm:$0xff]  }
 0x358   : > { %8482 = vmatpush2.bf16.msra.mxu0 %v16229_v11  ;;  %v16270_v11 = vld [vmem:[%s22407_s1 + $0x66c] ss:$16 sps:$4 sm:$0xff]  }
 0x359   : > { %8523 = vmatpush2.bf16.msra.mxu1 %v16232_v20  ;;  %8483 = vmatprep.subr.bf16.mxu0 %v16237_v25  ;;  %v16265_v20 = vld [vmem:[%s22407_s1 + $0x468] ss:$16 sps:$4 sm:$0xff]  }
 0x35a   : > { %8524 = vmatprep.subr.bf16.mxu1 %v16240_v4  ;;  %v16268_v25 = vld [vmem:[%s22407_s1 + $0x668] ss:$16 sps:$4 sm:$0xff]   ;;  %v16273_v4 = vld [vmem:[%s22407_s1 + $0x44c] ss:$16 sps:$4 sm:$0xff]  }
 0x35c   : > { %8484 = vmatpush2.bf16.msra.mxu0 %v16235_v27  ;;  %v16276_v27 = vld [vmem:[%s22407_s1 + $0x64c] ss:$16 sps:$4 sm:$0xff]  }
 0x35d   : > { %8525 = vmatpush2.bf16.msra.mxu1 %v16238_v36  ;;  %8535 = vmatprep.subr.bf16.mxu0 %v16243_v48  ;;  %v16271_v36 = vld [vmem:[%s22407_s1 + $0x448] ss:$16 sps:$4 sm:$0xff]  }
 0x35e   : > { %8576 = vmatprep.subr.bf16.mxu1 %v16246_v37  ;;  %v16274_v48 = vld [vmem:[%s22407_s1 + $0x648] ss:$16 sps:$4 sm:$0xff]   ;;  %v16279_v37 = vld [vmem:[%s22407_s1 + $0x42c] ss:$16 sps:$4 sm:$0xff]  }
 0x35f   : > { %v8241_v0 = vpop.f32.mrf.mxu0  ;;  %8486 = vmatmul.mubr.bf16.vlgmr.msra.gmra.mxu0 %v18385_v13 }
 0x360   : > { %v8282_v5 = vpop.f32.mrf.mxu1  ;;  %8527 = vmatmul.mubr.bf16.vlgmr.msra.gmra.mxu1 %v18401_v18  ;;  %v8242_v53 = vadd.f32 %v8241_v0, %v19991_v33  ;;  %8536 = vmatpush1.bf16.msra.mxu0 %v16241_v32  ;;  %v16253_v18 = vld [vmem:[%s22407_s1 + $0x4a8] ss:$16 sps:$4 sm:$0xff]   ;;  %v16282_v32 = vld [vmem:[%s22407_s1 + $0x62c] ss:$16 sps:$4 sm:$0xff]  }
 0x361   : > { %8577 = vmatpush1.bf16.msra.mxu1 %v16244_v8  ;;  %v8243_v10 = vpop.f32.mrf.mxu0  ;;  %8537 = vmatprep.subr.bf16.mxu0 %v16249_v44  ;;  %v16256_v33 = vld [vmem:[%s22407_s1 + $0x6a8] ss:$16 sps:$4 sm:$0xff]  }
 0x362   : > { %v8284_v62 = vpop.f32.mrf.mxu1  ;;  %8578 = vmatprep.subr.bf16.mxu1 %v16252_v58  ;;  %v20193_v57 = vadd.f32 %v8282_v5, %v8242_v53  ;;  %v8244_v13 = vadd.f32 %v8243_v10, %v20002_v40  ;;  %8567 = vmatprep.mubr.bf16.mxu0 %v18397_v17  ;;  %v16264_v17 = vld [vmem:[%s22407_s1 + $0x68c] ss:$16 sps:$4 sm:$0xff]   ;;  %v16277_v8 = vld [vmem:[%s22407_s1 + $0x428] ss:$16 sps:$4 sm:$0xff]  }
 0x363   : > { %8608 = vmatprep.mubr.bf16.mxu1 %v18417_v23  ;;  %v8245_v55 = vpop.f32.mrf.mxu0  ;;  %v16259_v23 = vld [vmem:[%s22407_s1 + $0x488] ss:$16 sps:$4 sm:$0xff]   ;;  %v16285_v58 = vld [vmem:[%s22407_s1 + $0x40c] ss:$16 sps:$4 sm:$0xff]  }
 0x364   : > { %v8286_v2 = vpop.f32.mrf.mxu1  ;;  %v20204_v7 = vadd.f32 %v8284_v62, %v8244_v13  ;;  %8538 = vmatpush1.bf16.msra.mxu0 %v16247_v51  ;;  %v16280_v44 = vld [vmem:[%s22407_s1 + $0x628] ss:$16 sps:$4 sm:$0xff]   ;;  %v16288_v51 = vld [vmem:[%s22407_s1 + $0x60c] ss:$16 sps:$4 sm:$0xff]  }
 0x365   : > { %8579 = vmatpush1.bf16.msra.mxu1 %v16250_v60  ;;  %v8246_v52 = vpop.f32.mrf.mxu0  ;;  %8539 = vmatprep.subr.bf16.mxu0 %v16255_v12  ;;  %v16283_v60 = vld [vmem:[%s22407_s1 + $0x408] ss:$16 sps:$4 sm:$0xff]   ;;  %v16291_v5 = vld [vmem:[%s22407_s1 + $0x5ec] ss:$16 sps:$4 sm:$0xff]  }
 0x366   : > { %v8287_v40 = vpop.f32.mrf.mxu1  ;;  %8580 = vmatprep.subr.bf16.mxu1 %v16258_v49  ;;  %v16286_v0 = vld [vmem:[%s22407_s1 + $0x608] ss:$16 sps:$4 sm:$0xff]   ;;  %v16294_v53 = vld [vmem:[%s22407_s1 + $0x7ec] ss:$16 sps:$4 sm:$0xff]  }
 0x367   : > { %v16289_v10 = vld [vmem:[%s22407_s1 + $0x5e8] ss:$16 sps:$4 sm:$0xff]   ;;  %v16297_v12 = vld [vmem:[%s22407_s1 + $0x5cc] ss:$16 sps:$4 sm:$0xff]  }
 0x368   : > { %8540 = vmatpush1.bf16.msra.mxu0 %v16253_v18  ;;  %v16292_v62 = vld [vmem:[%s22407_s1 + $0x7e8] ss:$16 sps:$4 sm:$0xff]   ;;  %v16300_v49 = vld [vmem:[%s22407_s1 + $0x7cc] ss:$16 sps:$4 sm:$0xff]  }
 0x369   : > { %8581 = vmatpush1.bf16.msra.mxu1 %v16256_v33  ;;  %8541 = vmatprep.subr.bf16.mxu0 %v16261_v1  ;;  %v16295_v13 = vld [vmem:[%s22407_s1 + $0x5c8] ss:$16 sps:$4 sm:$0xff]   ;;  %v16303_v33 = vld [vmem:[%s22407_s1 + $0x5ac] ss:$16 sps:$4 sm:$0xff]  }
 0x36a   : > { %8582 = vmatprep.subr.bf16.mxu1 %v16264_v17  ;;  %v16298_v18 = vld [vmem:[%s22407_s1 + $0x7c8] ss:$16 sps:$4 sm:$0xff]   ;;  %v16306_v55 = vld [vmem:[%s22407_s1 + $0x7ac] ss:$16 sps:$4 sm:$0xff]  }
 0x36b   : > { %v16301_v2 = vld [vmem:[%s22407_s1 + $0x5a8] ss:$16 sps:$4 sm:$0xff]   ;;  %v16309_v40 = vld [vmem:[%s22407_s1 + $0x58c] ss:$16 sps:$4 sm:$0xff]  }
 0x36c   : > { %8542 = vmatpush1.bf16.msra.mxu0 %v16259_v23  ;;  %v16304_v52 = vld [vmem:[%s22407_s1 + $0x7a8] ss:$16 sps:$4 sm:$0xff]   ;;  %v16312_v1 = vld [vmem:[%s22407_s1 + $0x78c] ss:$16 sps:$4 sm:$0xff]  }
 0x36d   : > { %8583 = vmatpush1.bf16.msra.mxu1 %v16262_v24  ;;  %8543 = vmatprep.subr.bf16.mxu0 %v16267_v9  ;;  %v16307_v17 = vld [vmem:[%s22407_s1 + $0x588] ss:$16 sps:$4 sm:$0xff]   ;;  %v16315_v24 = vld [vmem:[%s22407_s1 + $0x56c] ss:$16 sps:$4 sm:$0xff]  }
 0x36e   : > { %8584 = vmatprep.subr.bf16.mxu1 %v16270_v11  ;;  %v16310_v23 = vld [vmem:[%s22407_s1 + $0x788] ss:$16 sps:$4 sm:$0xff]   ;;  %v16318_v9 = vld [vmem:[%s22407_s1 + $0x76c] ss:$16 sps:$4 sm:$0xff]  }
 0x36f   : > { %v16313_v11 = vld [vmem:[%s22407_s1 + $0x568] ss:$16 sps:$4 sm:$0xff]  }
 0x370   : > { %8544 = vmatpush1.bf16.msra.mxu0 %v16265_v20  ;;  %v16316_v20 = vld [vmem:[%s22407_s1 + $0x768] ss:$16 sps:$4 sm:$0xff]  }
 0x371   : > { %8585 = vmatpush1.bf16.msra.mxu1 %v16268_v25  ;;  %8545 = vmatprep.subr.bf16.mxu0 %v16273_v4  ;;  %v16321_v25 = vld [vmem:[%s22407_s1 + $0x54c] ss:$16 sps:$4 sm:$0xff]  }
 0x372   : > { %8586 = vmatprep.subr.bf16.mxu1 %v16276_v27  ;;  %v16324_v4 = vld [vmem:[%s22407_s1 + $0x74c] ss:$16 sps:$4 sm:$0xff]   ;;  %v16319_v27 = vld [vmem:[%s22407_s1 + $0x548] ss:$16 sps:$4 sm:$0xff]  }
 0x374   : > { %8546 = vmatpush1.bf16.msra.mxu0 %v16271_v36  ;;  %v16322_v36 = vld [vmem:[%s22407_s1 + $0x748] ss:$16 sps:$4 sm:$0xff]  }
 0x375   : > { %8587 = vmatpush1.bf16.msra.mxu1 %v16274_v48  ;;  %8547 = vmatprep.subr.bf16.mxu0 %v16279_v37  ;;  %v16327_v48 = vld [vmem:[%s22407_s1 + $0x52c] ss:$16 sps:$4 sm:$0xff]  }
 0x376   : > { %8588 = vmatprep.subr.bf16.mxu1 %v16282_v32  ;;  %v16330_v37 = vld [vmem:[%s22407_s1 + $0x72c] ss:$16 sps:$4 sm:$0xff]   ;;  %v16325_v32 = vld [vmem:[%s22407_s1 + $0x528] ss:$16 sps:$4 sm:$0xff]  }
 0x378   : > { %8548 = vmatpush1.bf16.msra.mxu0 %v16277_v8  ;;  %v16328_v8 = vld [vmem:[%s22407_s1 + $0x728] ss:$16 sps:$4 sm:$0xff]  }
 0x379   : > { %8589 = vmatpush1.bf16.msra.mxu1 %v16280_v44  ;;  %8549 = vmatprep.subr.bf16.mxu0 %v16285_v58  ;;  %v16333_v44 = vld [vmem:[%s22407_s1 + $0x50c] ss:$16 sps:$4 sm:$0xff]  }
 0x37a   : > { %8590 = vmatprep.subr.bf16.mxu1 %v16288_v51  ;;  %v16336_v58 = vld [vmem:[%s22407_s1 + $0x70c] ss:$16 sps:$4 sm:$0xff]   ;;  %v16331_v51 = vld [vmem:[%s22407_s1 + $0x508] ss:$16 sps:$4 sm:$0xff]  }
 0x37c   : > { %8550 = vmatpush1.bf16.msra.mxu0 %v16283_v60  ;;  %v16334_v60 = vld [vmem:[%s22407_s1 + $0x708] ss:$16 sps:$4 sm:$0xff]  }
 0x37d   : > { %8591 = vmatpush1.bf16.msra.mxu1 %v16286_v0  ;;  %8551 = vmatprep.subr.bf16.mxu0 %v16291_v5  ;;  %v16339_v0 = vld [vmem:[%s22407_s1 + $0x8ec] ss:$16 sps:$4 sm:$0xff]  }
 0x37e   : > { %8592 = vmatprep.subr.bf16.mxu1 %v16294_v53  ;;  %v16342_v5 = vld [vmem:[%s22407_s1 + $0xaec] ss:$16 sps:$4 sm:$0xff]   ;;  %v16337_v53 = vld [vmem:[%s22407_s1 + $0x8e8] ss:$16 sps:$4 sm:$0xff]  }
 0x380   : > { %8552 = vmatpush2.bf16.msra.mxu0 %v16289_v10  ;;  %v16340_v10 = vld [vmem:[%s22407_s1 + $0xae8] ss:$16 sps:$4 sm:$0xff]  }
 0x381   : > { %8593 = vmatpush2.bf16.msra.mxu1 %v16292_v62  ;;  %8553 = vmatprep.subr.bf16.mxu0 %v16297_v12  ;;  %v16345_v62 = vld [vmem:[%s22407_s1 + $0x8cc] ss:$16 sps:$4 sm:$0xff]  }
 0x382   : > { %8594 = vmatprep.subr.bf16.mxu1 %v16300_v49  ;;  %v16348_v12 = vld [vmem:[%s22407_s1 + $0xacc] ss:$16 sps:$4 sm:$0xff]  }
 0x384   : > { %8554 = vmatpush2.bf16.msra.mxu0 %v16295_v13 }
 0x385   : > { %8595 = vmatpush2.bf16.msra.mxu1 %v16298_v18  ;;  %8555 = vmatprep.subr.bf16.mxu0 %v16303_v33  ;;  %v16343_v33 = vld [vmem:[%s22407_s1 + $0x8c8] ss:$16 sps:$4 sm:$0xff]  }
 0x386   : > { %8596 = vmatprep.subr.bf16.mxu1 %v16306_v55  ;;  %v16346_v55 = vld [vmem:[%s22407_s1 + $0xac8] ss:$16 sps:$4 sm:$0xff]  }
 0x388   : > { %8556 = vmatpush2.bf16.msra.mxu0 %v16301_v2 }
 0x389   : > { %8597 = vmatpush2.bf16.msra.mxu1 %v16304_v52  ;;  %8557 = vmatprep.subr.bf16.mxu0 %v16309_v40 }
 0x38a   : > { %8598 = vmatprep.subr.bf16.mxu1 %v16312_v1 }
 0x38c   : > { %8558 = vmatpush2.bf16.msra.mxu0 %v16307_v17 }
 0x38d   : > { %8599 = vmatpush2.bf16.msra.mxu1 %v16310_v23  ;;  %8559 = vmatprep.subr.bf16.mxu0 %v16315_v24  ;;  %v16349_v24 = vld [vmem:[%s22407_s1 + $0x8a8] ss:$16 sps:$4 sm:$0xff]  }
 0x38e   : > { %8600 = vmatprep.subr.bf16.mxu1 %v16318_v9  ;;  %v16352_v9 = vld [vmem:[%s22407_s1 + $0xaa8] ss:$16 sps:$4 sm:$0xff]  }
 0x390   : > { %8560 = vmatpush2.bf16.msra.mxu0 %v16313_v11 }
 0x391   : > { %8601 = vmatpush2.bf16.msra.mxu1 %v16316_v20  ;;  %8561 = vmatprep.subr.bf16.mxu0 %v16321_v25  ;;  %v16355_v20 = vld [vmem:[%s22407_s1 + $0x888] ss:$16 sps:$4 sm:$0xff]  }
 0x392   : > { %8602 = vmatprep.subr.bf16.mxu1 %v16324_v4  ;;  %v16358_v25 = vld [vmem:[%s22407_s1 + $0xa88] ss:$16 sps:$4 sm:$0xff]   ;;  %v16363_v4 = vld [vmem:[%s22407_s1 + $0x86c] ss:$16 sps:$4 sm:$0xff]  }
 0x394   : > { %8562 = vmatpush2.bf16.msra.mxu0 %v16319_v27  ;;  %v16366_v27 = vld [vmem:[%s22407_s1 + $0xa6c] ss:$16 sps:$4 sm:$0xff]  }
 0x395   : > { %8603 = vmatpush2.bf16.msra.mxu1 %v16322_v36  ;;  %8563 = vmatprep.subr.bf16.mxu0 %v16327_v48  ;;  %v16361_v36 = vld [vmem:[%s22407_s1 + $0x868] ss:$16 sps:$4 sm:$0xff]  }
 0x396   : > { %8604 = vmatprep.subr.bf16.mxu1 %v16330_v37  ;;  %v16364_v48 = vld [vmem:[%s22407_s1 + $0xa68] ss:$16 sps:$4 sm:$0xff]   ;;  %v16369_v37 = vld [vmem:[%s22407_s1 + $0x84c] ss:$16 sps:$4 sm:$0xff]  }
 0x398   : > { %8564 = vmatpush2.bf16.msra.mxu0 %v16325_v32  ;;  %v16372_v32 = vld [vmem:[%s22407_s1 + $0xa4c] ss:$16 sps:$4 sm:$0xff]  }
 0x399   : > { %8605 = vmatpush2.bf16.msra.mxu1 %v16328_v8  ;;  %8565 = vmatprep.subr.bf16.mxu0 %v16333_v44  ;;  %v16367_v8 = vld [vmem:[%s22407_s1 + $0x848] ss:$16 sps:$4 sm:$0xff]  }
 0x39a   : > { %8606 = vmatprep.subr.bf16.mxu1 %v16336_v58  ;;  %v16370_v44 = vld [vmem:[%s22407_s1 + $0xa48] ss:$16 sps:$4 sm:$0xff]   ;;  %v16375_v58 = vld [vmem:[%s22407_s1 + $0x82c] ss:$16 sps:$4 sm:$0xff]  }
 0x39c   : > { %8566 = vmatpush2.bf16.msra.mxu0 %v16331_v51  ;;  %v16378_v51 = vld [vmem:[%s22407_s1 + $0xa2c] ss:$16 sps:$4 sm:$0xff]  }
 0x39d   : > { %8607 = vmatpush2.bf16.msra.mxu1 %v16334_v60  ;;  %8617 = vmatprep.subr.bf16.mxu0 %v16339_v0  ;;  %v16373_v60 = vld [vmem:[%s22407_s1 + $0x828] ss:$16 sps:$4 sm:$0xff]  }
 0x39e   : > { %8658 = vmatprep.subr.bf16.mxu1 %v16342_v5  ;;  %v16376_v0 = vld [vmem:[%s22407_s1 + $0xa28] ss:$16 sps:$4 sm:$0xff]   ;;  %v16381_v5 = vld [vmem:[%s22407_s1 + $0x80c] ss:$16 sps:$4 sm:$0xff]  }
 0x39f   : > { %v8323_v49 = vpop.f32.mrf.mxu0  ;;  %8568 = vmatmul.mubr.bf16.vlgmr.msra.gmra.mxu0 %v18596_v26  ;;  %v16351_v26 = vld [vmem:[%s22407_s1 + $0x8ac] ss:$16 sps:$4 sm:$0xff]  }
 0x3a0   : > { %v8364_v13 = vpop.f32.mrf.mxu1  ;;  %8609 = vmatmul.mubr.bf16.vlgmr.msra.gmra.mxu1 %v18609_v6  ;;  %v8324_v18 = vadd.f32 %v8323_v49, %v20193_v57  ;;  %8618 = vmatpush1.bf16.msra.mxu0 %v16337_v53  ;;  %v16354_v6 = vld [vmem:[%s22407_s1 + $0xaac] ss:$16 sps:$4 sm:$0xff]  }
 0x3a1   : > { %8659 = vmatpush1.bf16.msra.mxu1 %v16340_v10  ;;  %v8325_v2 = vpop.f32.mrf.mxu0  ;;  %8619 = vmatprep.subr.bf16.mxu0 %v16345_v62  ;;  %v16384_v53 = vld [vmem:[%s22407_s1 + $0xa0c] ss:$16 sps:$4 sm:$0xff]   ;;  %v16379_v10 = vld [vmem:[%s22407_s1 + $0x808] ss:$16 sps:$4 sm:$0xff]  }
 0x3a2   : > { %v8366_v52 = vpop.f32.mrf.mxu1  ;;  %8660 = vmatprep.subr.bf16.mxu1 %v16348_v12  ;;  %v20395_v57 = vadd.f32 %v8364_v13, %v8324_v18  ;;  %v8326_v40 = vadd.f32 %v8325_v2, %v20204_v7  ;;  %8649 = vmatprep.mubr.bf16.mxu0 %v18649_v41  ;;  %v16357_v41 = vld [vmem:[%s22407_s1 + $0x88c] ss:$16 sps:$4 sm:$0xff]   ;;  %v16382_v62 = vld [vmem:[%s22407_s1 + $0xa08] ss:$16 sps:$4 sm:$0xff]  }
 0x3a3   : > { %8690 = vmatprep.mubr.bf16.mxu1 %v18654_v43  ;;  %v8327_v1 = vpop.f32.mrf.mxu0  ;;  %v16360_v43 = vld [vmem:[%s22407_s1 + $0xa8c] ss:$16 sps:$4 sm:$0xff]   ;;  %v16385_v13 = vld [vmem:[%s22407_s1 + $0x9e8] ss:$16 sps:$4 sm:$0xff]  }
 0x3a4   : > { %v8368_v17 = vpop.f32.mrf.mxu1  ;;  %v20400_v23 = vadd.f32 %v8366_v52, %v8326_v40  ;;  %8620 = vmatpush1.bf16.msra.mxu0 %v16343_v33  ;;  %v16387_v12 = vld [vmem:[%s22407_s1 + $0x9ec] ss:$16 sps:$4 sm:$0xff]   ;;  %v16388_v18 = vld [vmem:[%s22407_s1 + $0xbe8] ss:$16 sps:$4 sm:$0xff]  }
 0x3a5   : > { %8661 = vmatpush1.bf16.msra.mxu1 %v16346_v55  ;;  %v8328_v11 = vpop.f32.mrf.mxu0  ;;  %8621 = vmatprep.subr.bf16.mxu0 %v16351_v26  ;;  %v16390_v49 = vld [vmem:[%s22407_s1 + $0xbec] ss:$16 sps:$4 sm:$0xff]   ;;  %v16391_v2 = vld [vmem:[%s22407_s1 + $0x9c8] ss:$16 sps:$4 sm:$0xff]  }
 0x3a6   : > { %v8369_v7 = vpop.f32.mrf.mxu1  ;;  %8662 = vmatprep.subr.bf16.mxu1 %v16354_v6  ;;  %v16393_v33 = vld [vmem:[%s22407_s1 + $0x9cc] ss:$16 sps:$4 sm:$0xff]   ;;  %v16394_v52 = vld [vmem:[%s22407_s1 + $0xbc8] ss:$16 sps:$4 sm:$0xff]  }
 0x3a7   : > { %v16396_v55 = vld [vmem:[%s22407_s1 + $0xbcc] ss:$16 sps:$4 sm:$0xff]   ;;  %v16397_v40 = vld [vmem:[%s22407_s1 + $0x9a8] ss:$16 sps:$4 sm:$0xff]  }
 0x3a8   : > { %8622 = vmatpush1.bf16.msra.mxu0 %v16349_v24  ;;  %v16399_v26 = vld [vmem:[%s22407_s1 + $0x9ac] ss:$16 sps:$4 sm:$0xff]   ;;  %v16400_v1 = vld [vmem:[%s22407_s1 + $0xba8] ss:$16 sps:$4 sm:$0xff]  }
 0x3a9   : > { %8663 = vmatpush1.bf16.msra.mxu1 %v16352_v9  ;;  %8623 = vmatprep.subr.bf16.mxu0 %v16357_v41  ;;  %v16402_v6 = vld [vmem:[%s22407_s1 + $0xbac] ss:$16 sps:$4 sm:$0xff]   ;;  %v16403_v9 = vld [vmem:[%s22407_s1 + $0x988] ss:$16 sps:$4 sm:$0xff]  }
 0x3aa   : > { %8664 = vmatprep.subr.bf16.mxu1 %v16360_v43  ;;  %v16405_v17 = vld [vmem:[%s22407_s1 + $0x98c] ss:$16 sps:$4 sm:$0xff]   ;;  %v16406_v11 = vld [vmem:[%s22407_s1 + $0xb88] ss:$16 sps:$4 sm:$0xff]  }
 0x3ab   : > { %v16408_v24 = vld [vmem:[%s22407_s1 + $0xb8c] ss:$16 sps:$4 sm:$0xff]   ;;  %v16409_v43 = vld [vmem:[%s22407_s1 + $0x968] ss:$16 sps:$4 sm:$0xff]  }
 0x3ac   : > { %8624 = vmatpush1.bf16.msra.mxu0 %v16355_v20  ;;  %v16411_v7 = vld [vmem:[%s22407_s1 + $0x96c] ss:$16 sps:$4 sm:$0xff]   ;;  %v16412_v20 = vld [vmem:[%s22407_s1 + $0xb68] ss:$16 sps:$4 sm:$0xff]  }
 0x3ad   : > { %8665 = vmatpush1.bf16.msra.mxu1 %v16358_v25  ;;  %8625 = vmatprep.subr.bf16.mxu0 %v16363_v4  ;;  %v16414_v41 = vld [vmem:[%s22407_s1 + $0xb6c] ss:$16 sps:$4 sm:$0xff]  }
 0x3ae   : > { %8666 = vmatprep.subr.bf16.mxu1 %v16366_v27  ;;  %v16417_v25 = vld [vmem:[%s22407_s1 + $0x94c] ss:$16 sps:$4 sm:$0xff]   ;;  %v16415_v27 = vld [vmem:[%s22407_s1 + $0x948] ss:$16 sps:$4 sm:$0xff]  }
 0x3af   : > { %v16420_v4 = vld [vmem:[%s22407_s1 + $0xb4c] ss:$16 sps:$4 sm:$0xff]  }
 0x3b0   : > { %8626 = vmatpush1.bf16.msra.mxu0 %v16361_v36  ;;  %v16418_v36 = vld [vmem:[%s22407_s1 + $0xb48] ss:$16 sps:$4 sm:$0xff]  }
 0x3b1   : > { %8667 = vmatpush1.bf16.msra.mxu1 %v16364_v48  ;;  %8627 = vmatprep.subr.bf16.mxu0 %v16369_v37  ;;  %v16423_v48 = vld [vmem:[%s22407_s1 + $0x92c] ss:$16 sps:$4 sm:$0xff]  }
 0x3b2   : > { %8668 = vmatprep.subr.bf16.mxu1 %v16372_v32  ;;  %v16426_v37 = vld [vmem:[%s22407_s1 + $0xb2c] ss:$16 sps:$4 sm:$0xff]   ;;  %v16421_v32 = vld [vmem:[%s22407_s1 + $0x928] ss:$16 sps:$4 sm:$0xff]  }
 0x3b4   : > { %8628 = vmatpush1.bf16.msra.mxu0 %v16367_v8  ;;  %v16424_v8 = vld [vmem:[%s22407_s1 + $0xb28] ss:$16 sps:$4 sm:$0xff]  }
 0x3b5   : > { %8669 = vmatpush1.bf16.msra.mxu1 %v16370_v44  ;;  %8629 = vmatprep.subr.bf16.mxu0 %v16375_v58  ;;  %v16429_v44 = vld [vmem:[%s22407_s1 + $0x90c] ss:$16 sps:$4 sm:$0xff]  }
 0x3b6   : > { %8670 = vmatprep.subr.bf16.mxu1 %v16378_v51  ;;  %v16432_v58 = vld [vmem:[%s22407_s1 + $0xb0c] ss:$16 sps:$4 sm:$0xff]   ;;  %v16427_v51 = vld [vmem:[%s22407_s1 + $0x908] ss:$16 sps:$4 sm:$0xff]  }
 0x3b8   : > { %8630 = vmatpush1.bf16.msra.mxu0 %v16373_v60  ;;  %v16430_v60 = vld [vmem:[%s22407_s1 + $0xb08] ss:$16 sps:$4 sm:$0xff]  }
 0x3b9   : > { %8671 = vmatpush1.bf16.msra.mxu1 %v16376_v0  ;;  %8631 = vmatprep.subr.bf16.mxu0 %v16381_v5  ;;  %v16435_v0 = vld [vmem:[%s22407_s1 + $0xcec] ss:$16 sps:$4 sm:$0xff]  }
 0x3ba   : > { %8672 = vmatprep.subr.bf16.mxu1 %v16384_v53  ;;  %v16438_v5 = vld [vmem:[%s22407_s1 + $0xeec] ss:$16 sps:$4 sm:$0xff]   ;;  %v16433_v53 = vld [vmem:[%s22407_s1 + $0xce8] ss:$16 sps:$4 sm:$0xff]  }
 0x3bc   : > { %8632 = vmatpush1.bf16.msra.mxu0 %v16379_v10  ;;  %v16436_v10 = vld [vmem:[%s22407_s1 + $0xee8] ss:$16 sps:$4 sm:$0xff]  }
 0x3bd   : > { %8673 = vmatpush1.bf16.msra.mxu1 %v16382_v62  ;;  %8633 = vmatprep.subr.bf16.mxu0 %v16387_v12  ;;  %v16441_v62 = vld [vmem:[%s22407_s1 + $0xccc] ss:$16 sps:$4 sm:$0xff]  }
 0x3be   : > { %8674 = vmatprep.subr.bf16.mxu1 %v16390_v49  ;;  %v16444_v12 = vld [vmem:[%s22407_s1 + $0xecc] ss:$16 sps:$4 sm:$0xff]  }
 0x3c0   : > { %8634 = vmatpush2.bf16.msra.mxu0 %v16385_v13 }
 0x3c1   : > { %8675 = vmatpush2.bf16.msra.mxu1 %v16388_v18  ;;  %8635 = vmatprep.subr.bf16.mxu0 %v16393_v33  ;;  %v16439_v33 = vld [vmem:[%s22407_s1 + $0xcc8] ss:$16 sps:$4 sm:$0xff]  }
 0x3c2   : > { %8676 = vmatprep.subr.bf16.mxu1 %v16396_v55  ;;  %v16442_v55 = vld [vmem:[%s22407_s1 + $0xec8] ss:$16 sps:$4 sm:$0xff]  }
 0x3c4   : > { %8636 = vmatpush2.bf16.msra.mxu0 %v16391_v2 }
 0x3c5   : > { %8677 = vmatpush2.bf16.msra.mxu1 %v16394_v52  ;;  %8637 = vmatprep.subr.bf16.mxu0 %v16399_v26 }
 0x3c6   : > { %8678 = vmatprep.subr.bf16.mxu1 %v16402_v6 }
 0x3c8   : > { %8638 = vmatpush2.bf16.msra.mxu0 %v16397_v40 }
 0x3c9   : > { %8679 = vmatpush2.bf16.msra.mxu1 %v16400_v1  ;;  %8639 = vmatprep.subr.bf16.mxu0 %v16405_v17  ;;  %v16445_v17 = vld [vmem:[%s22407_s1 + $0xca8] ss:$16 sps:$4 sm:$0xff]  }
 0x3ca   : > { %8680 = vmatprep.subr.bf16.mxu1 %v16408_v24  ;;  %v16448_v24 = vld [vmem:[%s22407_s1 + $0xea8] ss:$16 sps:$4 sm:$0xff]  }
 0x3cc   : > { %8640 = vmatpush2.bf16.msra.mxu0 %v16403_v9 }
 0x3cd   : > { %8681 = vmatpush2.bf16.msra.mxu1 %v16406_v11  ;;  %8641 = vmatprep.subr.bf16.mxu0 %v16411_v7  ;;  %v16451_v11 = vld [vmem:[%s22407_s1 + $0xc88] ss:$16 sps:$4 sm:$0xff]  }
 0x3ce   : > { %8682 = vmatprep.subr.bf16.mxu1 %v16414_v41  ;;  %v16454_v7 = vld [vmem:[%s22407_s1 + $0xe88] ss:$16 sps:$4 sm:$0xff]   ;;  %v16459_v41 = vld [vmem:[%s22407_s1 + $0xc6c] ss:$16 sps:$4 sm:$0xff]  }
 0x3d0   : > { %8642 = vmatpush2.bf16.msra.mxu0 %v16409_v43  ;;  %v16462_v43 = vld [vmem:[%s22407_s1 + $0xe6c] ss:$16 sps:$4 sm:$0xff]  }
 0x3d1   : > { %8683 = vmatpush2.bf16.msra.mxu1 %v16412_v20  ;;  %8643 = vmatprep.subr.bf16.mxu0 %v16417_v25  ;;  %v16457_v20 = vld [vmem:[%s22407_s1 + $0xc68] ss:$16 sps:$4 sm:$0xff]  }
 0x3d2   : > { %8684 = vmatprep.subr.bf16.mxu1 %v16420_v4  ;;  %v16460_v25 = vld [vmem:[%s22407_s1 + $0xe68] ss:$16 sps:$4 sm:$0xff]   ;;  %v16465_v4 = vld [vmem:[%s22407_s1 + $0xc4c] ss:$16 sps:$4 sm:$0xff]  }
 0x3d4   : > { %8644 = vmatpush2.bf16.msra.mxu0 %v16415_v27  ;;  %v16468_v27 = vld [vmem:[%s22407_s1 + $0xe4c] ss:$16 sps:$4 sm:$0xff]  }
 0x3d5   : > { %8685 = vmatpush2.bf16.msra.mxu1 %v16418_v36  ;;  %8645 = vmatprep.subr.bf16.mxu0 %v16423_v48  ;;  %v16463_v36 = vld [vmem:[%s22407_s1 + $0xc48] ss:$16 sps:$4 sm:$0xff]  }
 0x3d6   : > { %8686 = vmatprep.subr.bf16.mxu1 %v16426_v37  ;;  %v16466_v48 = vld [vmem:[%s22407_s1 + $0xe48] ss:$16 sps:$4 sm:$0xff]   ;;  %v16471_v37 = vld [vmem:[%s22407_s1 + $0xc2c] ss:$16 sps:$4 sm:$0xff]  }
 0x3d8   : > { %8646 = vmatpush2.bf16.msra.mxu0 %v16421_v32  ;;  %v16474_v32 = vld [vmem:[%s22407_s1 + $0xe2c] ss:$16 sps:$4 sm:$0xff]  }
 0x3d9   : > { %8687 = vmatpush2.bf16.msra.mxu1 %v16424_v8  ;;  %8647 = vmatprep.subr.bf16.mxu0 %v16429_v44  ;;  %v16469_v8 = vld [vmem:[%s22407_s1 + $0xc28] ss:$16 sps:$4 sm:$0xff]  }
 0x3da   : > { %8688 = vmatprep.subr.bf16.mxu1 %v16432_v58  ;;  %v16472_v44 = vld [vmem:[%s22407_s1 + $0xe28] ss:$16 sps:$4 sm:$0xff]   ;;  %v16477_v58 = vld [vmem:[%s22407_s1 + $0xc0c] ss:$16 sps:$4 sm:$0xff]  }
 0x3dc   : > { %8648 = vmatpush2.bf16.msra.mxu0 %v16427_v51  ;;  %v16480_v51 = vld [vmem:[%s22407_s1 + $0xe0c] ss:$16 sps:$4 sm:$0xff]  }
 0x3dd   : > { %8689 = vmatpush2.bf16.msra.mxu1 %v16430_v60  ;;  %8699 = vmatprep.subr.bf16.mxu0 %v16435_v0  ;;  %v16475_v60 = vld [vmem:[%s22407_s1 + $0xc08] ss:$16 sps:$4 sm:$0xff]  }
 0x3de   : > { %8740 = vmatprep.subr.bf16.mxu1 %v16438_v5  ;;  %v16478_v0 = vld [vmem:[%s22407_s1 + $0xe08] ss:$16 sps:$4 sm:$0xff]   ;;  %v16483_v5 = vld [vmem:[%s22407_s1 + $0xdec] ss:$16 sps:$4 sm:$0xff]  }
 0x3df   : > { %v8405_v49 = vpop.f32.mrf.mxu0  ;;  %8650 = vmatmul.mubr.bf16.vlgmr.msra.gmra.mxu0 %v18825_v50  ;;  %v16447_v50 = vld [vmem:[%s22407_s1 + $0xcac] ss:$16 sps:$4 sm:$0xff]  }
 0x3e0   : > { %v8446_v13 = vpop.f32.mrf.mxu1  ;;  %8691 = vmatmul.mubr.bf16.vlgmr.msra.gmra.mxu1 %v18841_v35  ;;  %v8406_v18 = vadd.f32 %v8405_v49, %v20395_v57  ;;  %8700 = vmatpush1.bf16.msra.mxu0 %v16433_v53  ;;  %v16450_v35 = vld [vmem:[%s22407_s1 + $0xeac] ss:$16 sps:$4 sm:$0xff]  }
 0x3e1   : > { %8741 = vmatpush1.bf16.msra.mxu1 %v16436_v10  ;;  %v8407_v2 = vpop.f32.mrf.mxu0  ;;  %8701 = vmatprep.subr.bf16.mxu0 %v16441_v62  ;;  %v16486_v53 = vld [vmem:[%s22407_s1 + $0xfec] ss:$16 sps:$4 sm:$0xff]   ;;  %v16481_v10 = vld [vmem:[%s22407_s1 + $0xde8] ss:$16 sps:$4 sm:$0xff]  }
 0x3e2   : > { %v8448_v52 = vpop.f32.mrf.mxu1  ;;  %8742 = vmatprep.subr.bf16.mxu1 %v16444_v12  ;;  %v20597_v57 = vadd.f32 %v8446_v13, %v8406_v18  ;;  %v8408_v26 = vadd.f32 %v8407_v2, %v20400_v23  ;;  %8731 = vmatprep.mubr.bf16.mxu0 %v18837_v54  ;;  %v16453_v54 = vld [vmem:[%s22407_s1 + $0xc8c] ss:$16 sps:$4 sm:$0xff]   ;;  %v16484_v62 = vld [vmem:[%s22407_s1 + $0xfe8] ss:$16 sps:$4 sm:$0xff]  }
 0x3e3   : > { %8772 = vmatprep.mubr.bf16.mxu1 %v18857_v59  ;;  %v8409_v6 = vpop.f32.mrf.mxu0  ;;  %v16456_v59 = vld [vmem:[%s22407_s1 + $0xe8c] ss:$16 sps:$4 sm:$0xff]   ;;  %v16487_v13 = vld [vmem:[%s22407_s1 + $0xdc8] ss:$16 sps:$4 sm:$0xff]  }
 0x3e4   : > { %v8450_v40 = vpop.f32.mrf.mxu1  ;;  %v20602_v1 = vadd.f32 %v8448_v52, %v8408_v26  ;;  %8702 = vmatpush1.bf16.msra.mxu0 %v16439_v33  ;;  %v16489_v12 = vld [vmem:[%s22407_s1 + $0xdcc] ss:$16 sps:$4 sm:$0xff]   ;;  %v16490_v18 = vld [vmem:[%s22407_s1 + $0xfc8] ss:$16 sps:$4 sm:$0xff]  }
 0x3e5   : > { %8743 = vmatpush1.bf16.msra.mxu1 %v16442_v55  ;;  %v8410_v9 = vpop.f32.mrf.mxu0  ;;  %8703 = vmatprep.subr.bf16.mxu0 %v16447_v50  ;;  %v16492_v49 = vld [vmem:[%s22407_s1 + $0xfcc] ss:$16 sps:$4 sm:$0xff]   ;;  %v16493_v2 = vld [vmem:[%s22407_s1 + $0xda8] ss:$16 sps:$4 sm:$0xff]  }
 0x3e6   : > { %v8451_v23 = vpop.f32.mrf.mxu1  ;;  %8744 = vmatprep.subr.bf16.mxu1 %v16450_v35  ;;  %v16495_v33 = vld [vmem:[%s22407_s1 + $0xdac] ss:$16 sps:$4 sm:$0xff]   ;;  %v16496_v52 = vld [vmem:[%s22407_s1 + $0xfa8] ss:$16 sps:$4 sm:$0xff]  }
 0x3e7   : > { %v16498_v55 = vld [vmem:[%s22407_s1 + $0xfac] ss:$16 sps:$4 sm:$0xff]   ;;  %v16499_v26 = vld [vmem:[%s22407_s1 + $0xd88] ss:$16 sps:$4 sm:$0xff]  }
 0x3e8   : > { %8704 = vmatpush1.bf16.msra.mxu0 %v16445_v17  ;;  %v16501_v50 = vld [vmem:[%s22407_s1 + $0xd8c] ss:$16 sps:$4 sm:$0xff]   ;;  %v16502_v6 = vld [vmem:[%s22407_s1 + $0xf88] ss:$16 sps:$4 sm:$0xff]  }
 0x3e9   : > { %8745 = vmatpush1.bf16.msra.mxu1 %v16448_v24  ;;  %8705 = vmatprep.subr.bf16.mxu0 %v16453_v54  ;;  %v16504_v35 = vld [vmem:[%s22407_s1 + $0xf8c] ss:$16 sps:$4 sm:$0xff]   ;;  %v16505_v24 = vld [vmem:[%s22407_s1 + $0xd68] ss:$16 sps:$4 sm:$0xff]  }
 0x3ea   : > { %8746 = vmatprep.subr.bf16.mxu1 %v16456_v59  ;;  %v16507_v40 = vld [vmem:[%s22407_s1 + $0xd6c] ss:$16 sps:$4 sm:$0xff]   ;;  %v16508_v9 = vld [vmem:[%s22407_s1 + $0xf68] ss:$16 sps:$4 sm:$0xff]  }
 0x3eb   : > { %v16510_v17 = vld [vmem:[%s22407_s1 + $0xf6c] ss:$16 sps:$4 sm:$0xff]   ;;  %v16511_v59 = vld [vmem:[%s22407_s1 + $0xd48] ss:$16 sps:$4 sm:$0xff]  }
 0x3ec   : > { %8706 = vmatpush1.bf16.msra.mxu0 %v16451_v11  ;;  %v16513_v23 = vld [vmem:[%s22407_s1 + $0xd4c] ss:$16 sps:$4 sm:$0xff]   ;;  %v16514_v11 = vld [vmem:[%s22407_s1 + $0xf48] ss:$16 sps:$4 sm:$0xff]  }
 0x3ed   : > { %8747 = vmatpush1.bf16.msra.mxu1 %v16454_v7  ;;  %8707 = vmatprep.subr.bf16.mxu0 %v16459_v41  ;;  %v16516_v54 = vld [vmem:[%s22407_s1 + $0xf4c] ss:$16 sps:$4 sm:$0xff]  }
 0x3ee   : > { %8748 = vmatprep.subr.bf16.mxu1 %v16462_v43  ;;  %v16519_v7 = vld [vmem:[%s22407_s1 + $0xd2c] ss:$16 sps:$4 sm:$0xff]   ;;  %v16517_v43 = vld [vmem:[%s22407_s1 + $0xd28] ss:$16 sps:$4 sm:$0xff]  }
 0x3ef   : > { %v16522_v41 = vld [vmem:[%s22407_s1 + $0xf2c] ss:$16 sps:$4 sm:$0xff]  }
 0x3f0   : > { %8708 = vmatpush1.bf16.msra.mxu0 %v16457_v20  ;;  %v16520_v20 = vld [vmem:[%s22407_s1 + $0xf28] ss:$16 sps:$4 sm:$0xff]  }
 0x3f1   : > { %8749 = vmatpush1.bf16.msra.mxu1 %v16460_v25  ;;  %8709 = vmatprep.subr.bf16.mxu0 %v16465_v4  ;;  %v16525_v25 = vld [vmem:[%s22407_s1 + $0xd0c] ss:$16 sps:$4 sm:$0xff]  }
 0x3f2   : > { %8750 = vmatprep.subr.bf16.mxu1 %v16468_v27  ;;  %v16528_v4 = vld [vmem:[%s22407_s1 + $0xf0c] ss:$16 sps:$4 sm:$0xff]   ;;  %v16523_v27 = vld [vmem:[%s22407_s1 + $0xd08] ss:$16 sps:$4 sm:$0xff]  }
 0x3f4   : > { %8710 = vmatpush1.bf16.msra.mxu0 %v16463_v36  ;;  %v16526_v36 = vld [vmem:[%s22407_s1 + $0xf08] ss:$16 sps:$4 sm:$0xff]  }
 0x3f5   : > { %8751 = vmatpush1.bf16.msra.mxu1 %v16466_v48  ;;  %8711 = vmatprep.subr.bf16.mxu0 %v16471_v37  ;;  %v20767_v48 = vsub.s32 2, %v18289_v42  ;;  %v16531_v37 = vld [vmem:[%s22407_s1 + $0x10ec] ss:$16 sps:$4 sm:$0xff]  }
 0x3f6   : > { %8752 = vmatprep.subr.bf16.mxu1 %v16474_v32  ;;  %v16534_v32 = vld [vmem:[%s22407_s1 + $0x12ec] ss:$16 sps:$4 sm:$0xff]  }
 0x3f8   : > { %8712 = vmatpush1.bf16.msra.mxu0 %v16469_v8  ;;  %v20776_v8 = vsub.s32 3, %v18289_v42 }
 0x3f9   : > { %8753 = vmatpush1.bf16.msra.mxu1 %v16472_v44  ;;  %8713 = vmatprep.subr.bf16.mxu0 %v16477_v58  ;;  %v16969_v44 = vld [vmem:[%s22408_s2] sm:$0xf] }
 0x3fa   : > { %8754 = vmatprep.subr.bf16.mxu1 %v16480_v51  ;;  %v2436_v58 = vrot.slane %v16969_v44, %v20767_v48  ;;  %v16529_v51 = vld [vmem:[%s22407_s1 + $0x10e8] ss:$16 sps:$4 sm:$0xff]  }
 0x3fc   : > { %8714 = vmatpush1.bf16.msra.mxu0 %v16475_v60  ;;  %v16532_v60 = vld [vmem:[%s22407_s1 + $0x12e8] ss:$16 sps:$4 sm:$0xff]  }
 0x3fd   : > { %8755 = vmatpush1.bf16.msra.mxu1 %v16478_v0  ;;  %8715 = vmatprep.subr.bf16.mxu0 %v16483_v5  ;;  %v16537_v0 = vld [vmem:[%s22407_s1 + $0x10cc] ss:$16 sps:$4 sm:$0xff]  }
 0x3fe   : > { %8756 = vmatprep.subr.bf16.mxu1 %v16486_v53  ;;  %v16540_v5 = vld [vmem:[%s22407_s1 + $0x12cc] ss:$16 sps:$4 sm:$0xff]   ;;  %v2440_v53 = vrot.slane %v16969_v44, %v20776_v8  ;;  %v16571_v44 = vld [vmem:[%s22407_s1 + $0x1008] ss:$16 sps:$4 sm:$0xff]  }
 0x400   : > { %8716 = vmatpush2.bf16.msra.mxu0 %v16481_v10 }
 0x401   : > { %8757 = vmatpush2.bf16.msra.mxu1 %v16484_v62  ;;  %8717 = vmatprep.subr.bf16.mxu0 %v16489_v12 }
 0x402   : > { %8758 = vmatprep.subr.bf16.mxu1 %v16492_v49  ;;  %v16535_v49 = vld [vmem:[%s22407_s1 + $0x10c8] ss:$16 sps:$4 sm:$0xff]  }
 0x404   : > { %8718 = vmatpush2.bf16.msra.mxu0 %v16487_v13  ;;  %v16538_v13 = vld [vmem:[%s22407_s1 + $0x12c8] ss:$16 sps:$4 sm:$0xff]  }
 0x405   : > { %8759 = vmatpush2.bf16.msra.mxu1 %v16490_v18  ;;  %8719 = vmatprep.subr.bf16.mxu0 %v16495_v33 }
 0x406   : > { %8760 = vmatprep.subr.bf16.mxu1 %v16498_v55 }
 0x408   : > { %8720 = vmatpush2.bf16.msra.mxu0 %v16493_v2 }
 0x409   : > { %8761 = vmatpush2.bf16.msra.mxu1 %v16496_v52  ;;  %8721 = vmatprep.subr.bf16.mxu0 %v16501_v50 }
 0x40a   : > { %8762 = vmatprep.subr.bf16.mxu1 %v16504_v35 }
 0x40c   : > { %8722 = vmatpush2.bf16.msra.mxu0 %v16499_v26  ;;  %v16541_v26 = vld [vmem:[%s22407_s1 + $0x10a8] ss:$16 sps:$4 sm:$0xff]  }
 0x40d   : > { %8763 = vmatpush2.bf16.msra.mxu1 %v16502_v6  ;;  %8723 = vmatprep.subr.bf16.mxu0 %v16507_v40  ;;  %v16544_v6 = vld [vmem:[%s22407_s1 + $0x12a8] ss:$16 sps:$4 sm:$0xff]  }
 0x40e   : > { %8764 = vmatprep.subr.bf16.mxu1 %v16510_v17 }
 0x410   : > { %8724 = vmatpush2.bf16.msra.mxu0 %v16505_v24  ;;  %v16547_v24 = vld [vmem:[%s22407_s1 + $0x1088] ss:$16 sps:$4 sm:$0xff]  }
 0x411   : > { %8765 = vmatpush2.bf16.msra.mxu1 %v16508_v9  ;;  %8725 = vmatprep.subr.bf16.mxu0 %v16513_v23  ;;  %v16550_v9 = vld [vmem:[%s22407_s1 + $0x1288] ss:$16 sps:$4 sm:$0xff]   ;;  %v16555_v23 = vld [vmem:[%s22407_s1 + $0x106c] ss:$16 sps:$4 sm:$0xff]  }
 0x412   : > { %8766 = vmatprep.subr.bf16.mxu1 %v16516_v54  ;;  %v16558_v54 = vld [vmem:[%s22407_s1 + $0x126c] ss:$16 sps:$4 sm:$0xff]  }
 0x414   : > { %8726 = vmatpush2.bf16.msra.mxu0 %v16511_v59  ;;  %v16553_v59 = vld [vmem:[%s22407_s1 + $0x1068] ss:$16 sps:$4 sm:$0xff]  }
 0x415   : > { %8767 = vmatpush2.bf16.msra.mxu1 %v16514_v11  ;;  %8727 = vmatprep.subr.bf16.mxu0 %v16519_v7  ;;  %v16556_v11 = vld [vmem:[%s22407_s1 + $0x1268] ss:$16 sps:$4 sm:$0xff]   ;;  %v16561_v7 = vld [vmem:[%s22407_s1 + $0x104c] ss:$16 sps:$4 sm:$0xff]  }
 0x416   : > { %8768 = vmatprep.subr.bf16.mxu1 %v16522_v41  ;;  %v16564_v41 = vld [vmem:[%s22407_s1 + $0x124c] ss:$16 sps:$4 sm:$0xff]  }
 0x418   : > { %8728 = vmatpush2.bf16.msra.mxu0 %v16517_v43  ;;  %v16559_v43 = vld [vmem:[%s22407_s1 + $0x1048] ss:$16 sps:$4 sm:$0xff]  }
 0x419   : > { %8769 = vmatpush2.bf16.msra.mxu1 %v16520_v20  ;;  %8729 = vmatprep.subr.bf16.mxu0 %v16525_v25  ;;  %v16562_v20 = vld [vmem:[%s22407_s1 + $0x1248] ss:$16 sps:$4 sm:$0xff]   ;;  %v16567_v25 = vld [vmem:[%s22407_s1 + $0x102c] ss:$16 sps:$4 sm:$0xff]  }
 0x41a   : > { %8770 = vmatprep.subr.bf16.mxu1 %v16528_v4  ;;  %v16570_v4 = vld [vmem:[%s22407_s1 + $0x122c] ss:$16 sps:$4 sm:$0xff]  }
 0x41c   : > { %8730 = vmatpush2.bf16.msra.mxu0 %v16523_v27  ;;  %v16565_v27 = vld [vmem:[%s22407_s1 + $0x1028] ss:$16 sps:$4 sm:$0xff]  }
 0x41d   : > { %8771 = vmatpush2.bf16.msra.mxu1 %v16526_v36  ;;  %8781 = vmatprep.subr.bf16.mxu0 %v16531_v37  ;;  %v16568_v36 = vld [vmem:[%s22407_s1 + $0x1228] ss:$16 sps:$4 sm:$0xff]   ;;  %v16573_v37 = vld [vmem:[%s22407_s1 + $0x100c] ss:$16 sps:$4 sm:$0xff]  }
 0x41e   : > { %8822 = vmatprep.subr.bf16.mxu1 %v16534_v32  ;;  %v16576_v32 = vld [vmem:[%s22407_s1 + $0x120c] ss:$16 sps:$4 sm:$0xff]  }
 0x41f   : > { %v8487_v10 = vpop.f32.mrf.mxu0  ;;  %8732 = vmatmul.mubr.bf16.vlgmr.msra.gmra.mxu0 %v19053_v15  ;;  %v16543_v15 = vld [vmem:[%s22407_s1 + $0x10ac] ss:$16 sps:$4 sm:$0xff]  }
 0x420   : > { %v8528_v62 = vpop.f32.mrf.mxu1  ;;  %8773 = vmatmul.mubr.bf16.vlgmr.msra.gmra.mxu1 %v19072_v22  ;;  %v8488_v12 = vadd.f32 %v8487_v10, %v2436_v58  ;;  %8782 = vmatpush1.bf16.msra.mxu0 %v16529_v51  ;;  %v16546_v22 = vld [vmem:[%s22407_s1 + $0x12ac] ss:$16 sps:$4 sm:$0xff]   ;;  %v16574_v58 = vld [vmem:[%s22407_s1 + $0x1208] ss:$16 sps:$4 sm:$0xff]  }
 0x421   : > { %8823 = vmatpush1.bf16.msra.mxu1 %v16532_v60  ;;  %v8489_v18 = vpop.f32.mrf.mxu0  ;;  %8783 = vmatprep.subr.bf16.mxu0 %v16537_v0  ;;  %v16579_v51 = vld [vmem:[%s22407_s1 + $0x11ec] ss:$16 sps:$4 sm:$0xff]   ;;  %v16577_v0 = vld [vmem:[%s22407_s1 + $0x11e8] ss:$16 sps:$4 sm:$0xff]  }
 0x422   : > { %v8530_v33 = vpop.f32.mrf.mxu1  ;;  %8824 = vmatprep.subr.bf16.mxu1 %v16540_v5  ;;  %v20809_v55 = vadd.f32 %v8528_v62, %v8488_v12  ;;  %v8490_v2 = vadd.f32 %v8489_v18, %v2440_v53  ;;  %8813 = vmatprep.mubr.bf16.mxu0 %v19068_v39  ;;  %v16549_v39 = vld [vmem:[%s22407_s1 + $0x108c] ss:$16 sps:$4 sm:$0xff]   ;;  %v16580_v5 = vld [vmem:[%s22407_s1 + $0x13e8] ss:$16 sps:$4 sm:$0xff]  }
 0x423   : > { %8854 = vmatprep.mubr.bf16.mxu1 %v19090_v31  ;;  %v8491_v52 = vpop.f32.mrf.mxu0  ;;  %v16552_v31 = vld [vmem:[%s22407_s1 + $0x128c] ss:$16 sps:$4 sm:$0xff]   ;;  %v16583_v62 = vld [vmem:[%s22407_s1 + $0x11c8] ss:$16 sps:$4 sm:$0xff]  }
 0x424   : > { %v8532_v50 = vpop.f32.mrf.mxu1  ;;  %v20813_v35 = vadd.f32 %v8530_v33, %v8490_v2  ;;  %8784 = vmatpush1.bf16.msra.mxu0 %v16535_v49  ;;  %v16582_v60 = vld [vmem:[%s22407_s1 + $0x13ec] ss:$16 sps:$4 sm:$0xff]   ;;  %v16586_v12 = vld [vmem:[%s22407_s1 + $0x13c8] ss:$16 sps:$4 sm:$0xff]  }
 0x425   : > { %8825 = vmatpush1.bf16.msra.mxu1 %v16538_v13  ;;  %v8492_v40 = vpop.f32.mrf.mxu0  ;;  %8785 = vmatprep.subr.bf16.mxu0 %v16543_v15  ;;  %v16585_v53 = vld [vmem:[%s22407_s1 + $0x11cc] ss:$16 sps:$4 sm:$0xff]   ;;  %v16589_v18 = vld [vmem:[%s22407_s1 + $0x11a8] ss:$16 sps:$4 sm:$0xff]  }
 0x426   : > { %v8533_v17 = vpop.f32.mrf.mxu1  ;;  %8826 = vmatprep.subr.bf16.mxu1 %v16546_v22  ;;  %v16588_v10 = vld [vmem:[%s22407_s1 + $0x13cc] ss:$16 sps:$4 sm:$0xff]   ;;  %v16592_v33 = vld [vmem:[%s22407_s1 + $0x13a8] ss:$16 sps:$4 sm:$0xff]  }
 0x427   : > { %v16591_v49 = vld [vmem:[%s22407_s1 + $0x11ac] ss:$16 sps:$4 sm:$0xff]   ;;  %v16595_v2 = vld [vmem:[%s22407_s1 + $0x1188] ss:$16 sps:$4 sm:$0xff]  }
 0x428   : > { %8786 = vmatpush1.bf16.msra.mxu0 %v16541_v26  ;;  %v16594_v13 = vld [vmem:[%s22407_s1 + $0x13ac] ss:$16 sps:$4 sm:$0xff]   ;;  %v16598_v52 = vld [vmem:[%s22407_s1 + $0x1388] ss:$16 sps:$4 sm:$0xff]  }
 0x429   : > { %8827 = vmatpush1.bf16.msra.mxu1 %v16544_v6  ;;  %8787 = vmatprep.subr.bf16.mxu0 %v16549_v39  ;;  %v16597_v15 = vld [vmem:[%s22407_s1 + $0x118c] ss:$16 sps:$4 sm:$0xff]   ;;  %v16601_v6 = vld [vmem:[%s22407_s1 + $0x1168] ss:$16 sps:$4 sm:$0xff]  }
 0x42a   : > { %8828 = vmatprep.subr.bf16.mxu1 %v16552_v31  ;;  %v16600_v22 = vld [vmem:[%s22407_s1 + $0x138c] ss:$16 sps:$4 sm:$0xff]   ;;  %v16604_v40 = vld [vmem:[%s22407_s1 + $0x1368] ss:$16 sps:$4 sm:$0xff]  }
 0x42b   : > { %v16603_v50 = vld [vmem:[%s22407_s1 + $0x116c] ss:$16 sps:$4 sm:$0xff]   ;;  %v16607_v31 = vld [vmem:[%s22407_s1 + $0x1148] ss:$16 sps:$4 sm:$0xff]  }
 0x42c   : > { %8788 = vmatpush1.bf16.msra.mxu0 %v16547_v24  ;;  %v16606_v26 = vld [vmem:[%s22407_s1 + $0x136c] ss:$16 sps:$4 sm:$0xff]   ;;  %v16610_v24 = vld [vmem:[%s22407_s1 + $0x1348] ss:$16 sps:$4 sm:$0xff]  }
 0x42d   : > { %8829 = vmatpush1.bf16.msra.mxu1 %v16550_v9  ;;  %8789 = vmatprep.subr.bf16.mxu0 %v16555_v23  ;;  %v16609_v17 = vld [vmem:[%s22407_s1 + $0x114c] ss:$16 sps:$4 sm:$0xff]  }
 0x42e   : > { %8830 = vmatprep.subr.bf16.mxu1 %v16558_v54  ;;  %v16612_v39 = vld [vmem:[%s22407_s1 + $0x134c] ss:$16 sps:$4 sm:$0xff]   ;;  %v16613_v54 = vld [vmem:[%s22407_s1 + $0x1128] ss:$16 sps:$4 sm:$0xff]  }
 0x42f   : > { %v16615_v9 = vld [vmem:[%s22407_s1 + $0x112c] ss:$16 sps:$4 sm:$0xff]  }
 0x430   : > { %8790 = vmatpush1.bf16.msra.mxu0 %v16553_v59  ;;  %v16618_v23 = vld [vmem:[%s22407_s1 + $0x132c] ss:$16 sps:$4 sm:$0xff]   ;;  %v16616_v59 = vld [vmem:[%s22407_s1 + $0x1328] ss:$16 sps:$4 sm:$0xff]  }
 0x431   : > { %8831 = vmatpush1.bf16.msra.mxu1 %v16556_v11  ;;  %8791 = vmatprep.subr.bf16.mxu0 %v16561_v7  ;;  %v16621_v11 = vld [vmem:[%s22407_s1 + $0x110c] ss:$16 sps:$4 sm:$0xff]  }
 0x432   : > { %8832 = vmatprep.subr.bf16.mxu1 %v16564_v41  ;;  %v16624_v7 = vld [vmem:[%s22407_s1 + $0x130c] ss:$16 sps:$4 sm:$0xff]   ;;  %v16619_v41 = vld [vmem:[%s22407_s1 + $0x1108] ss:$16 sps:$4 sm:$0xff]  }
 0x434   : > { %8792 = vmatpush1.bf16.msra.mxu0 %v16559_v43  ;;  %v16622_v43 = vld [vmem:[%s22407_s1 + $0x1308] ss:$16 sps:$4 sm:$0xff]  }
 0x435   : > { %8833 = vmatpush1.bf16.msra.mxu1 %v16562_v20  ;;  %8793 = vmatprep.subr.bf16.mxu0 %v16567_v25  ;;  %v16627_v20 = vld [vmem:[%s22407_s1 + $0x14ec] ss:$16 sps:$4 sm:$0xff]  }
 0x436   : > { %8834 = vmatprep.subr.bf16.mxu1 %v16570_v4  ;;  %v16630_v25 = vld [vmem:[%s22407_s1 + $0x16ec] ss:$16 sps:$4 sm:$0xff]   ;;  %v16625_v4 = vld [vmem:[%s22407_s1 + $0x14e8] ss:$16 sps:$4 sm:$0xff]  }
 0x438   : > { %8794 = vmatpush1.bf16.msra.mxu0 %v16565_v27  ;;  %v16628_v27 = vld [vmem:[%s22407_s1 + $0x16e8] ss:$16 sps:$4 sm:$0xff]  }
 0x439   : > { %8835 = vmatpush1.bf16.msra.mxu1 %v16568_v36  ;;  %8795 = vmatprep.subr.bf16.mxu0 %v16573_v37  ;;  %v16633_v36 = vld [vmem:[%s22407_s1 + $0x14cc] ss:$16 sps:$4 sm:$0xff]  }
 0x43a   : > { %8836 = vmatprep.subr.bf16.mxu1 %v16576_v32  ;;  %v16636_v37 = vld [vmem:[%s22407_s1 + $0x16cc] ss:$16 sps:$4 sm:$0xff]  }
 0x43c   : > { %8796 = vmatpush1.bf16.msra.mxu0 %v16571_v44 }
 0x43d   : > { %8837 = vmatpush1.bf16.msra.mxu1 %v16574_v58  ;;  %8797 = vmatprep.subr.bf16.mxu0 %v16579_v51  ;;  %v16631_v51 = vld [vmem:[%s22407_s1 + $0x14c8] ss:$16 sps:$4 sm:$0xff]  }
 0x43e   : > { %8838 = vmatprep.subr.bf16.mxu1 %v16582_v60  ;;  %v16634_v60 = vld [vmem:[%s22407_s1 + $0x16c8] ss:$16 sps:$4 sm:$0xff]  }
 0x440   : > { %8798 = vmatpush2.bf16.msra.mxu0 %v16577_v0 }
 0x441   : > { %8839 = vmatpush2.bf16.msra.mxu1 %v16580_v5  ;;  %8799 = vmatprep.subr.bf16.mxu0 %v16585_v53 }
 0x442   : > { %8840 = vmatprep.subr.bf16.mxu1 %v16588_v10 }
 0x444   : > { %8800 = vmatpush2.bf16.msra.mxu0 %v16583_v62 }
 0x445   : > { %8841 = vmatpush2.bf16.msra.mxu1 %v16586_v12  ;;  %8801 = vmatprep.subr.bf16.mxu0 %v16591_v49  ;;  %v16637_v49 = vld [vmem:[%s22407_s1 + $0x14a8] ss:$16 sps:$4 sm:$0xff]  }
 0x446   : > { %8842 = vmatprep.subr.bf16.mxu1 %v16594_v13  ;;  %v16640_v13 = vld [vmem:[%s22407_s1 + $0x16a8] ss:$16 sps:$4 sm:$0xff]  }
 0x448   : > { %8802 = vmatpush2.bf16.msra.mxu0 %v16589_v18 }
 0x449   : > { %8843 = vmatpush2.bf16.msra.mxu1 %v16592_v33  ;;  %8803 = vmatprep.subr.bf16.mxu0 %v16597_v15  ;;  %v16643_v33 = vld [vmem:[%s22407_s1 + $0x1488] ss:$16 sps:$4 sm:$0xff]  }
 0x44a   : > { %8844 = vmatprep.subr.bf16.mxu1 %v16600_v22  ;;  %v16646_v15 = vld [vmem:[%s22407_s1 + $0x1688] ss:$16 sps:$4 sm:$0xff]   ;;  %v16651_v22 = vld [vmem:[%s22407_s1 + $0x146c] ss:$16 sps:$4 sm:$0xff]  }
 0x44c   : > { %8804 = vmatpush2.bf16.msra.mxu0 %v16595_v2  ;;  %v16654_v2 = vld [vmem:[%s22407_s1 + $0x166c] ss:$16 sps:$4 sm:$0xff]  }
 0x44d   : > { %8845 = vmatpush2.bf16.msra.mxu1 %v16598_v52  ;;  %8805 = vmatprep.subr.bf16.mxu0 %v16603_v50  ;;  %v16649_v52 = vld [vmem:[%s22407_s1 + $0x1468] ss:$16 sps:$4 sm:$0xff]  }
 0x44e   : > { %8846 = vmatprep.subr.bf16.mxu1 %v16606_v26  ;;  %v16652_v50 = vld [vmem:[%s22407_s1 + $0x1668] ss:$16 sps:$4 sm:$0xff]   ;;  %v16657_v26 = vld [vmem:[%s22407_s1 + $0x144c] ss:$16 sps:$4 sm:$0xff]  }
 0x450   : > { %8806 = vmatpush2.bf16.msra.mxu0 %v16601_v6  ;;  %v16660_v6 = vld [vmem:[%s22407_s1 + $0x164c] ss:$16 sps:$4 sm:$0xff]  }
 0x451   : > { %8847 = vmatpush2.bf16.msra.mxu1 %v16604_v40  ;;  %8807 = vmatprep.subr.bf16.mxu0 %v16609_v17  ;;  %v16655_v40 = vld [vmem:[%s22407_s1 + $0x1448] ss:$16 sps:$4 sm:$0xff]  }
 0x452   : > { %8848 = vmatprep.subr.bf16.mxu1 %v16612_v39  ;;  %v16658_v17 = vld [vmem:[%s22407_s1 + $0x1648] ss:$16 sps:$4 sm:$0xff]   ;;  %v16663_v39 = vld [vmem:[%s22407_s1 + $0x142c] ss:$16 sps:$4 sm:$0xff]  }
 0x454   : > { %8808 = vmatpush2.bf16.msra.mxu0 %v16607_v31  ;;  %v16666_v31 = vld [vmem:[%s22407_s1 + $0x162c] ss:$16 sps:$4 sm:$0xff]  }
 0x455   : > { %8849 = vmatpush2.bf16.msra.mxu1 %v16610_v24  ;;  %8809 = vmatprep.subr.bf16.mxu0 %v16615_v9  ;;  %v16661_v24 = vld [vmem:[%s22407_s1 + $0x1428] ss:$16 sps:$4 sm:$0xff]  }
 0x456   : > { %8850 = vmatprep.subr.bf16.mxu1 %v16618_v23  ;;  %v16664_v9 = vld [vmem:[%s22407_s1 + $0x1628] ss:$16 sps:$4 sm:$0xff]   ;;  %v16669_v23 = vld [vmem:[%s22407_s1 + $0x140c] ss:$16 sps:$4 sm:$0xff]  }
 0x458   : > { %8810 = vmatpush2.bf16.msra.mxu0 %v16613_v54  ;;  %v16672_v54 = vld [vmem:[%s22407_s1 + $0x160c] ss:$16 sps:$4 sm:$0xff]  }
 0x459   : > { %8851 = vmatpush2.bf16.msra.mxu1 %v16616_v59  ;;  %8811 = vmatprep.subr.bf16.mxu0 %v16621_v11  ;;  %v16667_v59 = vld [vmem:[%s22407_s1 + $0x1408] ss:$16 sps:$4 sm:$0xff]  }
 0x45a   : > { %8852 = vmatprep.subr.bf16.mxu1 %v16624_v7  ;;  %v16670_v11 = vld [vmem:[%s22407_s1 + $0x1608] ss:$16 sps:$4 sm:$0xff]   ;;  %v16675_v7 = vld [vmem:[%s22407_s1 + $0x15ec] ss:$16 sps:$4 sm:$0xff]  }
 0x45c   : > { %8812 = vmatpush2.bf16.msra.mxu0 %v16619_v41  ;;  %v16678_v41 = vld [vmem:[%s22407_s1 + $0x17ec] ss:$16 sps:$4 sm:$0xff]  }
 0x45d   : > { %8853 = vmatpush2.bf16.msra.mxu1 %v16622_v43  ;;  %8863 = vmatprep.subr.bf16.mxu0 %v16627_v20  ;;  %v16673_v43 = vld [vmem:[%s22407_s1 + $0x15e8] ss:$16 sps:$4 sm:$0xff]  }
 0x45e   : > { %8904 = vmatprep.subr.bf16.mxu1 %v16630_v25  ;;  %v16676_v20 = vld [vmem:[%s22407_s1 + $0x17e8] ss:$16 sps:$4 sm:$0xff]   ;;  %v16681_v25 = vld [vmem:[%s22407_s1 + $0x15cc] ss:$16 sps:$4 sm:$0xff]  }
 0x45f   : > { %v8569_v32 = vpop.f32.mrf.mxu0  ;;  %8814 = vmatmul.mubr.bf16.vlgmr.msra.gmra.mxu0 %v19277_v19  ;;  %v16639_v19 = vld [vmem:[%s22407_s1 + $0x14ac] ss:$16 sps:$4 sm:$0xff]  }
 0x460   : > { %v8610_v44 = vpop.f32.mrf.mxu1  ;;  %8855 = vmatmul.mubr.bf16.vlgmr.msra.gmra.mxu1 %v19302_v30  ;;  %v8570_v58 = vadd.f32 %v8569_v32, %v20809_v55  ;;  %8864 = vmatpush1.bf16.msra.mxu0 %v16625_v4  ;;  %v16642_v30 = vld [vmem:[%s22407_s1 + $0x16ac] ss:$16 sps:$4 sm:$0xff]  }
 0x461   : > { %8905 = vmatpush1.bf16.msra.mxu1 %v16628_v27  ;;  %v8571_v0 = vpop.f32.mrf.mxu0  ;;  %8865 = vmatprep.subr.bf16.mxu0 %v16633_v36  ;;  %v16684_v4 = vld [vmem:[%s22407_s1 + $0x17cc] ss:$16 sps:$4 sm:$0xff]   ;;  %v16679_v27 = vld [vmem:[%s22407_s1 + $0x15c8] ss:$16 sps:$4 sm:$0xff]  }
 0x462   : > { %v8612_v5 = vpop.f32.mrf.mxu1  ;;  %8906 = vmatprep.subr.bf16.mxu1 %v16636_v37  ;;  %v21010_v55 = vadd.f32 %v8610_v44, %v8570_v58  ;;  %v8572_v53 = vadd.f32 %v8571_v0, %v20813_v35  ;;  %8895 = vmatprep.mubr.bf16.mxu0 %v19298_v29  ;;  %v16645_v29 = vld [vmem:[%s22407_s1 + $0x148c] ss:$16 sps:$4 sm:$0xff]   ;;  %v16682_v36 = vld [vmem:[%s22407_s1 + $0x17c8] ss:$16 sps:$4 sm:$0xff]  }
 0x463   : > { %8936 = vmatprep.mubr.bf16.mxu1 %v19318_v38  ;;  %v8573_v10 = vpop.f32.mrf.mxu0  ;;  %v16648_v38 = vld [vmem:[%s22407_s1 + $0x168c] ss:$16 sps:$4 sm:$0xff]   ;;  %v16685_v44 = vld [vmem:[%s22407_s1 + $0x15a8] ss:$16 sps:$4 sm:$0xff]  }
 0x464   : > { %v8614_v62 = vpop.f32.mrf.mxu1  ;;  %v21015_v12 = vadd.f32 %v8612_v5, %v8572_v53  ;;  %8866 = vmatpush1.bf16.msra.mxu0 %v16631_v51  ;;  %v16687_v37 = vld [vmem:[%s22407_s1 + $0x15ac] ss:$16 sps:$4 sm:$0xff]   ;;  %v16688_v58 = vld [vmem:[%s22407_s1 + $0x17a8] ss:$16 sps:$4 sm:$0xff]  }
 0x465   : > { %8907 = vmatpush1.bf16.msra.mxu1 %v16634_v60  ;;  %v8574_v18 = vpop.f32.mrf.mxu0  ;;  %8867 = vmatprep.subr.bf16.mxu0 %v16639_v19  ;;  %v16690_v32 = vld [vmem:[%s22407_s1 + $0x17ac] ss:$16 sps:$4 sm:$0xff]   ;;  %v16691_v0 = vld [vmem:[%s22407_s1 + $0x1588] ss:$16 sps:$4 sm:$0xff]  }
 0x466   : > { %v8615_v35 = vpop.f32.mrf.mxu1  ;;  %8908 = vmatprep.subr.bf16.mxu1 %v16642_v30  ;;  %v16693_v51 = vld [vmem:[%s22407_s1 + $0x158c] ss:$16 sps:$4 sm:$0xff]   ;;  %v16694_v5 = vld [vmem:[%s22407_s1 + $0x1788] ss:$16 sps:$4 sm:$0xff]  }
 0x467   : > { %v16696_v60 = vld [vmem:[%s22407_s1 + $0x178c] ss:$16 sps:$4 sm:$0xff]   ;;  %v16697_v53 = vld [vmem:[%s22407_s1 + $0x1568] ss:$16 sps:$4 sm:$0xff]  }
 0x468   : > { %8868 = vmatpush1.bf16.msra.mxu0 %v16637_v49  ;;  %v16699_v19 = vld [vmem:[%s22407_s1 + $0x156c] ss:$16 sps:$4 sm:$0xff]   ;;  %v16700_v10 = vld [vmem:[%s22407_s1 + $0x1768] ss:$16 sps:$4 sm:$0xff]  }
 0x469   : > { %8909 = vmatpush1.bf16.msra.mxu1 %v16640_v13  ;;  %8869 = vmatprep.subr.bf16.mxu0 %v16645_v29  ;;  %v16702_v30 = vld [vmem:[%s22407_s1 + $0x176c] ss:$16 sps:$4 sm:$0xff]   ;;  %v16703_v13 = vld [vmem:[%s22407_s1 + $0x1548] ss:$16 sps:$4 sm:$0xff]  }
 0x46a   : > { %8910 = vmatprep.subr.bf16.mxu1 %v16648_v38  ;;  %v16705_v62 = vld [vmem:[%s22407_s1 + $0x154c] ss:$16 sps:$4 sm:$0xff]   ;;  %v16706_v18 = vld [vmem:[%s22407_s1 + $0x1748] ss:$16 sps:$4 sm:$0xff]  }
 0x46b   : > { %v16708_v49 = vld [vmem:[%s22407_s1 + $0x174c] ss:$16 sps:$4 sm:$0xff]   ;;  %v16709_v38 = vld [vmem:[%s22407_s1 + $0x1528] ss:$16 sps:$4 sm:$0xff]  }
 0x46c   : > { %8870 = vmatpush1.bf16.msra.mxu0 %v16643_v33  ;;  %v16711_v35 = vld [vmem:[%s22407_s1 + $0x152c] ss:$16 sps:$4 sm:$0xff]   ;;  %v16712_v33 = vld [vmem:[%s22407_s1 + $0x1728] ss:$16 sps:$4 sm:$0xff]  }
 0x46d   : > { %8911 = vmatpush1.bf16.msra.mxu1 %v16646_v15  ;;  %8871 = vmatprep.subr.bf16.mxu0 %v16651_v22  ;;  %v16714_v29 = vld [vmem:[%s22407_s1 + $0x172c] ss:$16 sps:$4 sm:$0xff]  }
 0x46e   : > { %8912 = vmatprep.subr.bf16.mxu1 %v16654_v2  ;;  %v16717_v15 = vld [vmem:[%s22407_s1 + $0x150c] ss:$16 sps:$4 sm:$0xff]   ;;  %v16715_v2 = vld [vmem:[%s22407_s1 + $0x1508] ss:$16 sps:$4 sm:$0xff]  }
 0x46f   : > { %v16720_v22 = vld [vmem:[%s22407_s1 + $0x170c] ss:$16 sps:$4 sm:$0xff]  }
 0x470   : > { %8872 = vmatpush1.bf16.msra.mxu0 %v16649_v52  ;;  %v16718_v52 = vld [vmem:[%s22407_s1 + $0x1708] ss:$16 sps:$4 sm:$0xff]  }
 0x471   : > { %8913 = vmatpush1.bf16.msra.mxu1 %v16652_v50  ;;  %8873 = vmatprep.subr.bf16.mxu0 %v16657_v26  ;;  %v16723_v50 = vld [vmem:[%s22407_s1 + $0x18ec] ss:$16 sps:$4 sm:$0xff]  }
 0x472   : > { %8914 = vmatprep.subr.bf16.mxu1 %v16660_v6  ;;  %v16726_v26 = vld [vmem:[%s22407_s1 + $0x1aec] ss:$16 sps:$4 sm:$0xff]   ;;  %v16721_v6 = vld [vmem:[%s22407_s1 + $0x18e8] ss:$16 sps:$4 sm:$0xff]  }
 0x474   : > { %8874 = vmatpush1.bf16.msra.mxu0 %v16655_v40  ;;  %v16724_v40 = vld [vmem:[%s22407_s1 + $0x1ae8] ss:$16 sps:$4 sm:$0xff]  }
 0x475   : > { %8915 = vmatpush1.bf16.msra.mxu1 %v16658_v17  ;;  %8875 = vmatprep.subr.bf16.mxu0 %v16663_v39  ;;  %v16729_v17 = vld [vmem:[%s22407_s1 + $0x18cc] ss:$16 sps:$4 sm:$0xff]  }
 0x476   : > { %8916 = vmatprep.subr.bf16.mxu1 %v16666_v31  ;;  %v16732_v39 = vld [vmem:[%s22407_s1 + $0x1acc] ss:$16 sps:$4 sm:$0xff]  }
 0x478   : > { %8876 = vmatpush1.bf16.msra.mxu0 %v16661_v24 }
 0x479   : > { %8917 = vmatpush1.bf16.msra.mxu1 %v16664_v9  ;;  %8877 = vmatprep.subr.bf16.mxu0 %v16669_v23  ;;  %v16727_v23 = vld [vmem:[%s22407_s1 + $0x18c8] ss:$16 sps:$4 sm:$0xff]  }
 0x47a   : > { %8918 = vmatprep.subr.bf16.mxu1 %v16672_v54  ;;  %v16730_v54 = vld [vmem:[%s22407_s1 + $0x1ac8] ss:$16 sps:$4 sm:$0xff]  }
 0x47c   : > { %8878 = vmatpush1.bf16.msra.mxu0 %v16667_v59 }
 0x47d   : > { %8919 = vmatpush1.bf16.msra.mxu1 %v16670_v11  ;;  %8879 = vmatprep.subr.bf16.mxu0 %v16675_v7 }
 0x47e   : > { %8920 = vmatprep.subr.bf16.mxu1 %v16678_v41 }
 0x480   : > { %8880 = vmatpush2.bf16.msra.mxu0 %v16673_v43 }
 0x481   : > { %8921 = vmatpush2.bf16.msra.mxu1 %v16676_v20  ;;  %8881 = vmatprep.subr.bf16.mxu0 %v16681_v25  ;;  %v16733_v25 = vld [vmem:[%s22407_s1 + $0x18a8] ss:$16 sps:$4 sm:$0xff]  }
 0x482   : > { %8922 = vmatprep.subr.bf16.mxu1 %v16684_v4  ;;  %v16736_v4 = vld [vmem:[%s22407_s1 + $0x1aa8] ss:$16 sps:$4 sm:$0xff]  }
 0x484   : > { %8882 = vmatpush2.bf16.msra.mxu0 %v16679_v27 }
 0x485   : > { %8923 = vmatpush2.bf16.msra.mxu1 %v16682_v36  ;;  %8883 = vmatprep.subr.bf16.mxu0 %v16687_v37  ;;  %v16739_v36 = vld [vmem:[%s22407_s1 + $0x1888] ss:$16 sps:$4 sm:$0xff]  }
 0x486   : > { %8924 = vmatprep.subr.bf16.mxu1 %v16690_v32  ;;  %v16742_v37 = vld [vmem:[%s22407_s1 + $0x1a88] ss:$16 sps:$4 sm:$0xff]   ;;  %v16747_v32 = vld [vmem:[%s22407_s1 + $0x186c] ss:$16 sps:$4 sm:$0xff]  }
 0x488   : > { %8884 = vmatpush2.bf16.msra.mxu0 %v16685_v44  ;;  %v16750_v44 = vld [vmem:[%s22407_s1 + $0x1a6c] ss:$16 sps:$4 sm:$0xff]  }
 0x489   : > { %8925 = vmatpush2.bf16.msra.mxu1 %v16688_v58  ;;  %8885 = vmatprep.subr.bf16.mxu0 %v16693_v51  ;;  %v16745_v58 = vld [vmem:[%s22407_s1 + $0x1868] ss:$16 sps:$4 sm:$0xff]  }
 0x48a   : > { %8926 = vmatprep.subr.bf16.mxu1 %v16696_v60  ;;  %v16748_v51 = vld [vmem:[%s22407_s1 + $0x1a68] ss:$16 sps:$4 sm:$0xff]   ;;  %v16753_v60 = vld [vmem:[%s22407_s1 + $0x184c] ss:$16 sps:$4 sm:$0xff]  }
 0x48c   : > { %8886 = vmatpush2.bf16.msra.mxu0 %v16691_v0  ;;  %v16756_v0 = vld [vmem:[%s22407_s1 + $0x1a4c] ss:$16 sps:$4 sm:$0xff]  }
 0x48d   : > { %8927 = vmatpush2.bf16.msra.mxu1 %v16694_v5  ;;  %8887 = vmatprep.subr.bf16.mxu0 %v16699_v19  ;;  %v16751_v5 = vld [vmem:[%s22407_s1 + $0x1848] ss:$16 sps:$4 sm:$0xff]  }
 0x48e   : > { %8928 = vmatprep.subr.bf16.mxu1 %v16702_v30  ;;  %v16754_v19 = vld [vmem:[%s22407_s1 + $0x1a48] ss:$16 sps:$4 sm:$0xff]   ;;  %v16759_v30 = vld [vmem:[%s22407_s1 + $0x182c] ss:$16 sps:$4 sm:$0xff]  }
 0x490   : > { %8888 = vmatpush2.bf16.msra.mxu0 %v16697_v53  ;;  %v16762_v53 = vld [vmem:[%s22407_s1 + $0x1a2c] ss:$16 sps:$4 sm:$0xff]  }
 0x491   : > { %8929 = vmatpush2.bf16.msra.mxu1 %v16700_v10  ;;  %8889 = vmatprep.subr.bf16.mxu0 %v16705_v62  ;;  %v16757_v10 = vld [vmem:[%s22407_s1 + $0x1828] ss:$16 sps:$4 sm:$0xff]  }
 0x492   : > { %8930 = vmatprep.subr.bf16.mxu1 %v16708_v49  ;;  %v16760_v62 = vld [vmem:[%s22407_s1 + $0x1a28] ss:$16 sps:$4 sm:$0xff]   ;;  %v16765_v49 = vld [vmem:[%s22407_s1 + $0x180c] ss:$16 sps:$4 sm:$0xff]  }
 0x494   : > { %8890 = vmatpush2.bf16.msra.mxu0 %v16703_v13  ;;  %v16768_v13 = vld [vmem:[%s22407_s1 + $0x1a0c] ss:$16 sps:$4 sm:$0xff]  }
 0x495   : > { %8931 = vmatpush2.bf16.msra.mxu1 %v16706_v18  ;;  %8891 = vmatprep.subr.bf16.mxu0 %v16711_v35  ;;  %v16763_v18 = vld [vmem:[%s22407_s1 + $0x1808] ss:$16 sps:$4 sm:$0xff]  }
 0x496   : > { %8932 = vmatprep.subr.bf16.mxu1 %v16714_v29  ;;  %v16766_v35 = vld [vmem:[%s22407_s1 + $0x1a08] ss:$16 sps:$4 sm:$0xff]   ;;  %v16771_v29 = vld [vmem:[%s22407_s1 + $0x19ec] ss:$16 sps:$4 sm:$0xff]  }
 0x498   : > { %8892 = vmatpush2.bf16.msra.mxu0 %v16709_v38  ;;  %v16774_v38 = vld [vmem:[%s22407_s1 + $0x1bec] ss:$16 sps:$4 sm:$0xff]  }
 0x499   : > { %8933 = vmatpush2.bf16.msra.mxu1 %v16712_v33  ;;  %8893 = vmatprep.subr.bf16.mxu0 %v16717_v15  ;;  %v16769_v33 = vld [vmem:[%s22407_s1 + $0x19e8] ss:$16 sps:$4 sm:$0xff]  }
 0x49a   : > { %8934 = vmatprep.subr.bf16.mxu1 %v16720_v22  ;;  %v16772_v15 = vld [vmem:[%s22407_s1 + $0x1be8] ss:$16 sps:$4 sm:$0xff]   ;;  %v16777_v22 = vld [vmem:[%s22407_s1 + $0x19cc] ss:$16 sps:$4 sm:$0xff]  }
 0x49c   : > { %8894 = vmatpush2.bf16.msra.mxu0 %v16715_v2  ;;  %v16780_v2 = vld [vmem:[%s22407_s1 + $0x1bcc] ss:$16 sps:$4 sm:$0xff]  }
 0x49d   : > { %8935 = vmatpush2.bf16.msra.mxu1 %v16718_v52  ;;  %8945 = vmatprep.subr.bf16.mxu0 %v16723_v50  ;;  %v16775_v52 = vld [vmem:[%s22407_s1 + $0x19c8] ss:$16 sps:$4 sm:$0xff]  }
 0x49e   : > { %8986 = vmatprep.subr.bf16.mxu1 %v16726_v26  ;;  %v16778_v50 = vld [vmem:[%s22407_s1 + $0x1bc8] ss:$16 sps:$4 sm:$0xff]   ;;  %v16783_v26 = vld [vmem:[%s22407_s1 + $0x19ac] ss:$16 sps:$4 sm:$0xff]  }
 0x49f   : > { %v8651_v31 = vpop.f32.mrf.mxu0  ;;  %8896 = vmatmul.mubr.bf16.vlgmr.msra.gmra.mxu0 %v19505_v34  ;;  %v16735_v34 = vld [vmem:[%s22407_s1 + $0x18ac] ss:$16 sps:$4 sm:$0xff]  }
 0x4a0   : > { %v8692_v24 = vpop.f32.mrf.mxu1  ;;  %8937 = vmatmul.mubr.bf16.vlgmr.msra.gmra.mxu1 %v19530_v47  ;;  %v8652_v9 = vadd.f32 %v8651_v31, %v21010_v55  ;;  %8946 = vmatpush1.bf16.msra.mxu0 %v16721_v6  ;;  %v16738_v47 = vld [vmem:[%s22407_s1 + $0x1aac] ss:$16 sps:$4 sm:$0xff]  }
 0x4a1   : > { %8987 = vmatpush1.bf16.msra.mxu1 %v16724_v40  ;;  %v8653_v59 = vpop.f32.mrf.mxu0  ;;  %8947 = vmatprep.subr.bf16.mxu0 %v16729_v17  ;;  %v16786_v6 = vld [vmem:[%s22407_s1 + $0x1bac] ss:$16 sps:$4 sm:$0xff]   ;;  %v16781_v40 = vld [vmem:[%s22407_s1 + $0x19a8] ss:$16 sps:$4 sm:$0xff]  }
 0x4a2   : > { %v8694_v11 = vpop.f32.mrf.mxu1  ;;  %8988 = vmatprep.subr.bf16.mxu1 %v16732_v39  ;;  %v21212_v55 = vadd.f32 %v8692_v24, %v8652_v9  ;;  %v8654_v7 = vadd.f32 %v8653_v59, %v21015_v12  ;;  %8977 = vmatprep.mubr.bf16.mxu0 %v19526_v45  ;;  %v16741_v45 = vld [vmem:[%s22407_s1 + $0x188c] ss:$16 sps:$4 sm:$0xff]   ;;  %v16784_v17 = vld [vmem:[%s22407_s1 + $0x1ba8] ss:$16 sps:$4 sm:$0xff]  }
 0x4a3   : > { %9018 = vmatprep.mubr.bf16.mxu1 %v19546_v56  ;;  %v8655_v41 = vpop.f32.mrf.mxu0  ;;  %v16744_v56 = vld [vmem:[%s22407_s1 + $0x1a8c] ss:$16 sps:$4 sm:$0xff]   ;;  %v16787_v24 = vld [vmem:[%s22407_s1 + $0x1988] ss:$16 sps:$4 sm:$0xff]  }
 0x4a4   : > { %v8696_v43 = vpop.f32.mrf.mxu1  ;;  %v21217_v20 = vadd.f32 %v8694_v11, %v8654_v7  ;;  %8948 = vmatpush1.bf16.msra.mxu0 %v16727_v23  ;;  %v16789_v39 = vld [vmem:[%s22407_s1 + $0x198c] ss:$16 sps:$4 sm:$0xff]   ;;  %v16790_v9 = vld [vmem:[%s22407_s1 + $0x1b88] ss:$16 sps:$4 sm:$0xff]  }
 0x4a5   : > { %8989 = vmatpush1.bf16.msra.mxu1 %v16730_v54  ;;  %v8656_v27 = vpop.f32.mrf.mxu0  ;;  %8949 = vmatprep.subr.bf16.mxu0 %v16735_v34  ;;  %v16792_v31 = vld [vmem:[%s22407_s1 + $0x1b8c] ss:$16 sps:$4 sm:$0xff]   ;;  %v16793_v59 = vld [vmem:[%s22407_s1 + $0x1968] ss:$16 sps:$4 sm:$0xff]  }
 0x4a6   : > { %v8697_v12 = vpop.f32.mrf.mxu1  ;;  %8990 = vmatprep.subr.bf16.mxu1 %v16738_v47  ;;  %v16795_v23 = vld [vmem:[%s22407_s1 + $0x196c] ss:$16 sps:$4 sm:$0xff]   ;;  %v16796_v11 = vld [vmem:[%s22407_s1 + $0x1b68] ss:$16 sps:$4 sm:$0xff]  }
 0x4a7   : > { %v16798_v54 = vld [vmem:[%s22407_s1 + $0x1b6c] ss:$16 sps:$4 sm:$0xff]   ;;  %v16799_v7 = vld [vmem:[%s22407_s1 + $0x1948] ss:$16 sps:$4 sm:$0xff]  }
 0x4a8   : > { %8950 = vmatpush1.bf16.msra.mxu0 %v16733_v25  ;;  %v16801_v34 = vld [vmem:[%s22407_s1 + $0x194c] ss:$16 sps:$4 sm:$0xff]   ;;  %v16802_v41 = vld [vmem:[%s22407_s1 + $0x1b48] ss:$16 sps:$4 sm:$0xff]  }
 0x4a9   : > { %8991 = vmatpush1.bf16.msra.mxu1 %v16736_v4  ;;  %8951 = vmatprep.subr.bf16.mxu0 %v16741_v45  ;;  %v16804_v47 = vld [vmem:[%s22407_s1 + $0x1b4c] ss:$16 sps:$4 sm:$0xff]   ;;  %v16805_v4 = vld [vmem:[%s22407_s1 + $0x1928] ss:$16 sps:$4 sm:$0xff]  }
 0x4aa   : > { %8992 = vmatprep.subr.bf16.mxu1 %v16744_v56  ;;  %v16807_v43 = vld [vmem:[%s22407_s1 + $0x192c] ss:$16 sps:$4 sm:$0xff]   ;;  %v16808_v27 = vld [vmem:[%s22407_s1 + $0x1b28] ss:$16 sps:$4 sm:$0xff]  }
 0x4ab   : > { %v16810_v25 = vld [vmem:[%s22407_s1 + $0x1b2c] ss:$16 sps:$4 sm:$0xff]   ;;  %v16811_v56 = vld [vmem:[%s22407_s1 + $0x1908] ss:$16 sps:$4 sm:$0xff]  }
 0x4ac   : > { %8952 = vmatpush1.bf16.msra.mxu0 %v16739_v36  ;;  %v16813_v12 = vld [vmem:[%s22407_s1 + $0x190c] ss:$16 sps:$4 sm:$0xff]   ;;  %v16814_v36 = vld [vmem:[%s22407_s1 + $0x1b08] ss:$16 sps:$4 sm:$0xff]  }
 0x4ad   : > { %8993 = vmatpush1.bf16.msra.mxu1 %v16742_v37  ;;  %8953 = vmatprep.subr.bf16.mxu0 %v16747_v32  ;;  %v16816_v45 = vld [vmem:[%s22407_s1 + $0x1b0c] ss:$16 sps:$4 sm:$0xff]  }
 0x4ae   : > { %8994 = vmatprep.subr.bf16.mxu1 %v16750_v44  ;;  %v16819_v37 = vld [vmem:[%s22407_s1 + $0x1cec] ss:$16 sps:$4 sm:$0xff]   ;;  %v16817_v44 = vld [vmem:[%s22407_s1 + $0x1ce8] ss:$16 sps:$4 sm:$0xff]  }
 0x4af   : > { %v16822_v32 = vld [vmem:[%s22407_s1 + $0x1eec] ss:$16 sps:$4 sm:$0xff]  }
 0x4b0   : > { %8954 = vmatpush1.bf16.msra.mxu0 %v16745_v58  ;;  %v16820_v58 = vld [vmem:[%s22407_s1 + $0x1ee8] ss:$16 sps:$4 sm:$0xff]  }
 0x4b1   : > { %8995 = vmatpush1.bf16.msra.mxu1 %v16748_v51  ;;  %8955 = vmatprep.subr.bf16.mxu0 %v16753_v60  ;;  %v16825_v51 = vld [vmem:[%s22407_s1 + $0x1ccc] ss:$16 sps:$4 sm:$0xff]  }
 0x4b2   : > { %8996 = vmatprep.subr.bf16.mxu1 %v16756_v0  ;;  %v16828_v60 = vld [vmem:[%s22407_s1 + $0x1ecc] ss:$16 sps:$4 sm:$0xff]  }
 0x4b4   : > { %8956 = vmatpush1.bf16.msra.mxu0 %v16751_v5 }
 0x4b5   : > { %8997 = vmatpush1.bf16.msra.mxu1 %v16754_v19  ;;  %8957 = vmatprep.subr.bf16.mxu0 %v16759_v30  ;;  %v16823_v30 = vld [vmem:[%s22407_s1 + $0x1cc8] ss:$16 sps:$4 sm:$0xff]  }
 0x4b6   : > { %8998 = vmatprep.subr.bf16.mxu1 %v16762_v53  ;;  %v16826_v53 = vld [vmem:[%s22407_s1 + $0x1ec8] ss:$16 sps:$4 sm:$0xff]  }
 0x4b8   : > { %8958 = vmatpush1.bf16.msra.mxu0 %v16757_v10 }
 0x4b9   : > { %8999 = vmatpush1.bf16.msra.mxu1 %v16760_v62  ;;  %8959 = vmatprep.subr.bf16.mxu0 %v16765_v49 }
 0x4ba   : > { %9000 = vmatprep.subr.bf16.mxu1 %v16768_v13 }
 0x4bc   : > { %8960 = vmatpush1.bf16.msra.mxu0 %v16763_v18 }
 0x4bd   : > { %9001 = vmatpush1.bf16.msra.mxu1 %v16766_v35  ;;  %8961 = vmatprep.subr.bf16.mxu0 %v16771_v29  ;;  %v16829_v29 = vld [vmem:[%s22407_s1 + $0x1ca8] ss:$16 sps:$4 sm:$0xff]  }
 0x4be   : > { %9002 = vmatprep.subr.bf16.mxu1 %v16774_v38  ;;  %v16832_v38 = vld [vmem:[%s22407_s1 + $0x1ea8] ss:$16 sps:$4 sm:$0xff]  }
 0x4c0   : > { %8962 = vmatpush2.bf16.msra.mxu0 %v16769_v33 }
 0x4c1   : > { %9003 = vmatpush2.bf16.msra.mxu1 %v16772_v15  ;;  %8963 = vmatprep.subr.bf16.mxu0 %v16777_v22  ;;  %v16835_v15 = vld [vmem:[%s22407_s1 + $0x1c88] ss:$16 sps:$4 sm:$0xff]  }
 0x4c2   : > { %9004 = vmatprep.subr.bf16.mxu1 %v16780_v2  ;;  %v16838_v22 = vld [vmem:[%s22407_s1 + $0x1e88] ss:$16 sps:$4 sm:$0xff]   ;;  %v16843_v2 = vld [vmem:[%s22407_s1 + $0x1c6c] ss:$16 sps:$4 sm:$0xff]  }
 0x4c4   : > { %8964 = vmatpush2.bf16.msra.mxu0 %v16775_v52  ;;  %v16846_v52 = vld [vmem:[%s22407_s1 + $0x1e6c] ss:$16 sps:$4 sm:$0xff]  }
 0x4c5   : > { %9005 = vmatpush2.bf16.msra.mxu1 %v16778_v50  ;;  %8965 = vmatprep.subr.bf16.mxu0 %v16783_v26  ;;  %v16841_v50 = vld [vmem:[%s22407_s1 + $0x1c68] ss:$16 sps:$4 sm:$0xff]  }
 0x4c6   : > { %9006 = vmatprep.subr.bf16.mxu1 %v16786_v6  ;;  %v16844_v26 = vld [vmem:[%s22407_s1 + $0x1e68] ss:$16 sps:$4 sm:$0xff]   ;;  %v16849_v6 = vld [vmem:[%s22407_s1 + $0x1c4c] ss:$16 sps:$4 sm:$0xff]  }
 0x4c8   : > { %8966 = vmatpush2.bf16.msra.mxu0 %v16781_v40  ;;  %v16852_v40 = vld [vmem:[%s22407_s1 + $0x1e4c] ss:$16 sps:$4 sm:$0xff]  }
 0x4c9   : > { %9007 = vmatpush2.bf16.msra.mxu1 %v16784_v17  ;;  %8967 = vmatprep.subr.bf16.mxu0 %v16789_v39  ;;  %v16847_v17 = vld [vmem:[%s22407_s1 + $0x1c48] ss:$16 sps:$4 sm:$0xff]  }
 0x4ca   : > { %9008 = vmatprep.subr.bf16.mxu1 %v16792_v31  ;;  %v16850_v39 = vld [vmem:[%s22407_s1 + $0x1e48] ss:$16 sps:$4 sm:$0xff]   ;;  %v16855_v31 = vld [vmem:[%s22407_s1 + $0x1c2c] ss:$16 sps:$4 sm:$0xff]  }
 0x4cc   : > { %8968 = vmatpush2.bf16.msra.mxu0 %v16787_v24  ;;  %v16858_v24 = vld [vmem:[%s22407_s1 + $0x1e2c] ss:$16 sps:$4 sm:$0xff]  }
 0x4cd   : > { %9009 = vmatpush2.bf16.msra.mxu1 %v16790_v9  ;;  %8969 = vmatprep.subr.bf16.mxu0 %v16795_v23  ;;  %v16853_v9 = vld [vmem:[%s22407_s1 + $0x1c28] ss:$16 sps:$4 sm:$0xff]  }
 0x4ce   : > { %9010 = vmatprep.subr.bf16.mxu1 %v16798_v54  ;;  %v16856_v23 = vld [vmem:[%s22407_s1 + $0x1e28] ss:$16 sps:$4 sm:$0xff]   ;;  %v16861_v54 = vld [vmem:[%s22407_s1 + $0x1c0c] ss:$16 sps:$4 sm:$0xff]  }
 0x4d0   : > { %8970 = vmatpush2.bf16.msra.mxu0 %v16793_v59  ;;  %v16864_v59 = vld [vmem:[%s22407_s1 + $0x1e0c] ss:$16 sps:$4 sm:$0xff]  }
 0x4d1   : > { %9011 = vmatpush2.bf16.msra.mxu1 %v16796_v11  ;;  %8971 = vmatprep.subr.bf16.mxu0 %v16801_v34  ;;  %v16859_v11 = vld [vmem:[%s22407_s1 + $0x1c08] ss:$16 sps:$4 sm:$0xff]  }
 0x4d2   : > { %9012 = vmatprep.subr.bf16.mxu1 %v16804_v47  ;;  %v16862_v34 = vld [vmem:[%s22407_s1 + $0x1e08] ss:$16 sps:$4 sm:$0xff]   ;;  %v16867_v47 = vld [vmem:[%s22407_s1 + $0x1dec] ss:$16 sps:$4 sm:$0xff]  }
 0x4d4   : > { %8972 = vmatpush2.bf16.msra.mxu0 %v16799_v7  ;;  %v16870_v7 = vld [vmem:[%s22407_s1 + $0x1fec] ss:$16 sps:$4 sm:$0xff]  }
 0x4d5   : > { %9013 = vmatpush2.bf16.msra.mxu1 %v16802_v41  ;;  %8973 = vmatprep.subr.bf16.mxu0 %v16807_v43  ;;  %v16865_v41 = vld [vmem:[%s22407_s1 + $0x1de8] ss:$16 sps:$4 sm:$0xff]  }
 0x4d6   : > { %9014 = vmatprep.subr.bf16.mxu1 %v16810_v25  ;;  %v16868_v43 = vld [vmem:[%s22407_s1 + $0x1fe8] ss:$16 sps:$4 sm:$0xff]   ;;  %v16873_v25 = vld [vmem:[%s22407_s1 + $0x1dcc] ss:$16 sps:$4 sm:$0xff]  }
 0x4d8   : > { %8974 = vmatpush2.bf16.msra.mxu0 %v16805_v4  ;;  %v16876_v4 = vld [vmem:[%s22407_s1 + $0x1fcc] ss:$16 sps:$4 sm:$0xff]  }
 0x4d9   : > { %9015 = vmatpush2.bf16.msra.mxu1 %v16808_v27  ;;  %8975 = vmatprep.subr.bf16.mxu0 %v16813_v12  ;;  %v16871_v27 = vld [vmem:[%s22407_s1 + $0x1dc8] ss:$16 sps:$4 sm:$0xff]  }
 0x4da   : > { %9016 = vmatprep.subr.bf16.mxu1 %v16816_v45  ;;  %v16874_v12 = vld [vmem:[%s22407_s1 + $0x1fc8] ss:$16 sps:$4 sm:$0xff]   ;;  %v16879_v45 = vld [vmem:[%s22407_s1 + $0x1dac] ss:$16 sps:$4 sm:$0xff]  }
 0x4dc   : > { %8976 = vmatpush2.bf16.msra.mxu0 %v16811_v56  ;;  %v16882_v56 = vld [vmem:[%s22407_s1 + $0x1fac] ss:$16 sps:$4 sm:$0xff]  }
 0x4dd   : > { %9017 = vmatpush2.bf16.msra.mxu1 %v16814_v36  ;;  %9027 = vmatprep.subr.bf16.mxu0 %v16819_v37  ;;  %v16877_v36 = vld [vmem:[%s22407_s1 + $0x1da8] ss:$16 sps:$4 sm:$0xff]  }
 0x4de   : > { %9068 = vmatprep.subr.bf16.mxu1 %v16822_v32  ;;  %v16880_v37 = vld [vmem:[%s22407_s1 + $0x1fa8] ss:$16 sps:$4 sm:$0xff]   ;;  %v16885_v32 = vld [vmem:[%s22407_s1 + $0x1d8c] ss:$16 sps:$4 sm:$0xff]  }
 0x4df   : > { %v8733_v0 = vpop.f32.mrf.mxu0  ;;  %8978 = vmatmul.mubr.bf16.vlgmr.msra.gmra.mxu0 %v19729_v3  ;;  %v16831_v3 = vld [vmem:[%s22407_s1 + $0x1cac] ss:$16 sps:$4 sm:$0xff]  }
 0x4e0   : > { %v8774_v5 = vpop.f32.mrf.mxu1  ;;  %9019 = vmatmul.mubr.bf16.vlgmr.msra.gmra.mxu1 %v19754_v61  ;;  %v8734_v19 = vadd.f32 %v8733_v0, %v21212_v55  ;;  %9028 = vmatpush1.bf16.msra.mxu0 %v16817_v44  ;;  %v16834_v61 = vld [vmem:[%s22407_s1 + $0x1eac] ss:$16 sps:$4 sm:$0xff]  }
 0x4e1   : > { %9069 = vmatpush1.bf16.msra.mxu1 %v16820_v58  ;;  %v8735_v10 = vpop.f32.mrf.mxu0  ;;  %9029 = vmatprep.subr.bf16.mxu0 %v16825_v51  ;;  %v16888_v44 = vld [vmem:[%s22407_s1 + $0x1f8c] ss:$16 sps:$4 sm:$0xff]   ;;  %v16883_v58 = vld [vmem:[%s22407_s1 + $0x1d88] ss:$16 sps:$4 sm:$0xff]  }
 0x4e2   : > { %v8776_v62 = vpop.f32.mrf.mxu1  ;;  %9070 = vmatprep.subr.bf16.mxu1 %v16828_v60  ;;  %v21414_v55 = vadd.f32 %v8774_v5, %v8734_v19  ;;  %v8736_v49 = vadd.f32 %v8735_v10, %v21217_v20  ;;  %9059 = vmatprep.mubr.bf16.mxu0 %v19750_v14  ;;  %v16837_v14 = vld [vmem:[%s22407_s1 + $0x1c8c] ss:$16 sps:$4 sm:$0xff]   ;;  %v16886_v51 = vld [vmem:[%s22407_s1 + $0x1f88] ss:$16 sps:$4 sm:$0xff]  }
 0x4e3   : > { %9100 = vmatprep.mubr.bf16.mxu1 %v19770_v28  ;;  %v8737_v13 = vpop.f32.mrf.mxu0  ;;  %v16840_v28 = vld [vmem:[%s22407_s1 + $0x1e8c] ss:$16 sps:$4 sm:$0xff]   ;;  %v16889_v5 = vld [vmem:[%s22407_s1 + $0x1d68] ss:$16 sps:$4 sm:$0xff]  }
 0x4e4   : > { %v8778_v18 = vpop.f32.mrf.mxu1  ;;  %v21419_v35 = vadd.f32 %v8776_v62, %v8736_v49  ;;  %9030 = vmatpush1.bf16.msra.mxu0 %v16823_v30  ;;  %v16891_v60 = vld [vmem:[%s22407_s1 + $0x1d6c] ss:$16 sps:$4 sm:$0xff]   ;;  %v16892_v19 = vld [vmem:[%s22407_s1 + $0x1f68] ss:$16 sps:$4 sm:$0xff]  }
 0x4e5   : > { %9071 = vmatpush1.bf16.msra.mxu1 %v16826_v53  ;;  %v8738_v33 = vpop.f32.mrf.mxu0  ;;  %9031 = vmatprep.subr.bf16.mxu0 %v16831_v3  ;;  %v16894_v0 = vld [vmem:[%s22407_s1 + $0x1f6c] ss:$16 sps:$4 sm:$0xff]   ;;  %v16895_v10 = vld [vmem:[%s22407_s1 + $0x1d48] ss:$16 sps:$4 sm:$0xff]  }
 0x4e6   : > { %v8779_v20 = vpop.f32.mrf.mxu1  ;;  %9072 = vmatprep.subr.bf16.mxu1 %v16834_v61  ;;  %v16897_v30 = vld [vmem:[%s22407_s1 + $0x1d4c] ss:$16 sps:$4 sm:$0xff]   ;;  %v16898_v62 = vld [vmem:[%s22407_s1 + $0x1f48] ss:$16 sps:$4 sm:$0xff]  }
 0x4e7   : > { %v16900_v53 = vld [vmem:[%s22407_s1 + $0x1f4c] ss:$16 sps:$4 sm:$0xff]   ;;  %v16901_v49 = vld [vmem:[%s22407_s1 + $0x1d28] ss:$16 sps:$4 sm:$0xff]  }
 0x4e8   : > { %9032 = vmatpush1.bf16.msra.mxu0 %v16829_v29  ;;  %v16903_v3 = vld [vmem:[%s22407_s1 + $0x1d2c] ss:$16 sps:$4 sm:$0xff]   ;;  %v16904_v13 = vld [vmem:[%s22407_s1 + $0x1f28] ss:$16 sps:$4 sm:$0xff]  }
 0x4e9   : > { %9073 = vmatpush1.bf16.msra.mxu1 %v16832_v38  ;;  %9033 = vmatprep.subr.bf16.mxu0 %v16837_v14  ;;  %v16906_v61 = vld [vmem:[%s22407_s1 + $0x1f2c] ss:$16 sps:$4 sm:$0xff]   ;;  %v16907_v38 = vld [vmem:[%s22407_s1 + $0x1d08] ss:$16 sps:$4 sm:$0xff]   ;;  %v9110_v14 = vmax.f32 %v20602_v1, 0.0 }
 0x4ea   : > { %9074 = vmatprep.subr.bf16.mxu1 %v16840_v28  ;;  %v16909_v18 = vld [vmem:[%s22407_s1 + $0x1d0c] ss:$16 sps:$4 sm:$0xff]   ;;  %v16910_v33 = vld [vmem:[%s22407_s1 + $0x1f08] ss:$16 sps:$4 sm:$0xff]  }
 0x4eb   : > { %v16912_v29 = vld [vmem:[%s22407_s1 + $0x1f0c] ss:$16 sps:$4 sm:$0xff]  }
 0x4ec   : > { %9034 = vmatpush1.bf16.msra.mxu0 %v16835_v15  ;;  %v16913_v20 = vld [vmem:[%s22409_s3 + $0x78] sm:$0xff]   ;;  %v16915_v15 = vld [vmem:[%s22409_s3 + $0x70] sm:$0xff]  }
 0x4ed   : > { %9075 = vmatpush1.bf16.msra.mxu1 %v16838_v22  ;;  %9035 = vmatprep.subr.bf16.mxu0 %v16843_v2  ;;  %v16914_v28 = vld [vmem:[%s22409_s3 + $0x38] sm:$0xff]   ;;  %v9114_v22 = vpack.c.bf16 %v9110_v14, %v9110_v14  ;;  %v16945_v14 = vld [vmem:[%s22411_s5 + $0x60] ss:$16 sps:$4 sm:$0xff]  }
 0x4ee   : > { %9076 = vmatprep.subr.bf16.mxu1 %v16846_v52 }
 0x4f0   : > { %9036 = vmatpush1.bf16.msra.mxu0 %v16841_v50  ;;  %v16916_v50 = vld [vmem:[%s22409_s3 + $0x30] sm:$0xff]  }
 0x4f1   : > { %9077 = vmatpush1.bf16.msra.mxu1 %v16844_v26  ;;  %9037 = vmatprep.subr.bf16.mxu0 %v16849_v6 }
 0x4f2   : > { %9078 = vmatprep.subr.bf16.mxu1 %v16852_v40  ;;  %v16917_v40 = vld [vmem:[%s22409_s3 + $0x68] sm:$0xff]  }
 0x4f4   : > { %9038 = vmatpush1.bf16.msra.mxu0 %v16847_v17 }
 0x4f5   : > { %9079 = vmatpush1.bf16.msra.mxu1 %v16850_v39  ;;  %9039 = vmatprep.subr.bf16.mxu0 %v16855_v31 }
 0x4f6   : > { %9080 = vmatprep.subr.bf16.mxu1 %v16858_v24  ;;  %v16919_v24 = vld [vmem:[%s22409_s3 + $0x60] sm:$0xff]  }
 0x4f8   : > { %9040 = vmatpush1.bf16.msra.mxu0 %v16853_v9 }
 0x4f9   : > { %9081 = vmatpush1.bf16.msra.mxu1 %v16856_v23  ;;  %9041 = vmatprep.subr.bf16.mxu0 %v16861_v54  ;;  %v16929_v54 = vld [vmem:[%s22409_s3 + $0xf8] sm:$0xff]  }
 0x4fa   : > { %9082 = vmatprep.subr.bf16.mxu1 %v16864_v59  ;;  %v16931_v59 = vld [vmem:[%s22409_s3 + $0xf0] sm:$0xff]  }
 0x4fc   : > { %9042 = vmatpush1.bf16.msra.mxu0 %v16859_v11  ;;  %v16920_v11 = vld [vmem:[%s22409_s3 + $0x20] sm:$0xff]  }
 0x4fd   : > { %9083 = vmatpush1.bf16.msra.mxu1 %v16862_v34  ;;  %9043 = vmatprep.subr.bf16.mxu0 %v16867_v47  ;;  %v16932_v34 = vld [vmem:[%s22409_s3 + $0xb0] sm:$0xff]   ;;  %v16921_v47 = vld [vmem:[%s22409_s3 + $0x58] sm:$0xff]  }
 0x4fe   : > { %9084 = vmatprep.subr.bf16.mxu1 %v16870_v7  ;;  %v16933_v7 = vld [vmem:[%s22409_s3 + $0xe8] sm:$0xff]  }
 0x500   : > { %9044 = vmatpush2.bf16.msra.mxu0 %v16865_v41  ;;  %v16922_v41 = vld [vmem:[%s22409_s3 + $0x18] sm:$0xff]  }
 0x501   : > { %9085 = vmatpush2.bf16.msra.mxu1 %v16868_v43  ;;  %9045 = vmatprep.subr.bf16.mxu0 %v16873_v25  ;;  %v16934_v43 = vld [vmem:[%s22409_s3 + $0xa8] sm:$0xff]   ;;  %v16923_v25 = vld [vmem:[%s22409_s3 + $0x50] sm:$0xff]  }
 0x502   : > { %9086 = vmatprep.subr.bf16.mxu1 %v16876_v4  ;;  %v16935_v4 = vld [vmem:[%s22409_s3 + $0xe0] sm:$0xff]  }
 0x504   : > { %9046 = vmatpush2.bf16.msra.mxu0 %v16871_v27  ;;  %v16924_v27 = vld [vmem:[%s22409_s3 + $0x10] sm:$0xff]  }
 0x505   : > { %9087 = vmatpush2.bf16.msra.mxu1 %v16874_v12  ;;  %9047 = vmatprep.subr.bf16.mxu0 %v16879_v45  ;;  %v16936_v12 = vld [vmem:[%s22409_s3 + $0xa0] sm:$0xff]   ;;  %v16925_v45 = vld [vmem:[%s22409_s3 + $0x48] sm:$0xff]  }
 0x506   : > { %9088 = vmatprep.subr.bf16.mxu1 %v16882_v56  ;;  %v16937_v56 = vld [vmem:[%s22409_s3 + $0xd8] sm:$0xff]  }
 0x508   : > { %9048 = vmatpush2.bf16.msra.mxu0 %v16877_v36  ;;  %v16926_v36 = vld [vmem:[%s22409_s3 + $0x8] sm:$0xff]  }
 0x509   : > { %9089 = vmatpush2.bf16.msra.mxu1 %v16880_v37  ;;  %9049 = vmatprep.subr.bf16.mxu0 %v16885_v32  ;;  %v16938_v37 = vld [vmem:[%s22409_s3 + $0x98] sm:$0xff]   ;;  %v16927_v32 = vld [vmem:[%s22409_s3 + $0x40] sm:$0xff]  }
 0x50a   : > { %9090 = vmatprep.subr.bf16.mxu1 %v16888_v44  ;;  %v16928_v44 = vld [vmem:[%s22409_s3] sm:$0xff]  }
 0x50c   : > { %9050 = vmatpush2.bf16.msra.mxu0 %v16883_v58  ;;  %v9109_v58 = vmax.f32 %v20597_v57, 0.0  ;;  %v16941_v57 = vld [vmem:[%s22409_s3 + $0xc8] sm:$0xff]  }
 0x50d   : > { %9091 = vmatpush2.bf16.msra.mxu1 %v16886_v51  ;;  %9051 = vmatprep.subr.bf16.mxu0 %v16891_v60  ;;  %v16939_v60 = vld [vmem:[%s22409_s3 + $0xd0] sm:$0xff]  }
 0x50e   : > { %9092 = vmatprep.subr.bf16.mxu1 %v16894_v0  ;;  %v9113_v51 = vpack.c.bf16 %v9109_v58, %v9109_v58  ;;  %v16940_v0 = vld [vmem:[%s22409_s3 + $0x90] sm:$0xff]  }
 0x510   : > { %9052 = vmatpush2.bf16.msra.mxu0 %v16889_v5 }
 0x511   : > { %9093 = vmatpush2.bf16.msra.mxu1 %v16892_v19  ;;  %9053 = vmatprep.subr.bf16.mxu0 %v16897_v30 }
 0x512   : > { %9094 = vmatprep.subr.bf16.mxu1 %v16900_v53 }
 0x514   : > { %9054 = vmatpush2.bf16.msra.mxu0 %v16895_v10 }
 0x515   : > { %9095 = vmatpush2.bf16.msra.mxu1 %v16898_v62  ;;  %9055 = vmatprep.subr.bf16.mxu0 %v16903_v3 }
 0x516   : > { %9096 = vmatprep.subr.bf16.mxu1 %v16906_v61  ;;  %v16942_v61 = vld [vmem:[%s22409_s3 + $0x88] sm:$0xff]  }
 0x518   : > { %9056 = vmatpush2.bf16.msra.mxu0 %v16901_v49 }
 0x519   : > { %9097 = vmatpush2.bf16.msra.mxu1 %v16904_v13  ;;  %9057 = vmatprep.subr.bf16.mxu0 %v16909_v18 }
 0x51a   : > { %9098 = vmatprep.subr.bf16.mxu1 %v16912_v29 }
 0x51c   : > { %9058 = vmatpush2.bf16.msra.mxu0 %v16907_v38 }
 0x51d   : > { %9099 = vmatpush2.bf16.msra.mxu1 %v16910_v33  ;;  %15287 = vmatprep.subr.bf16.mxu0 %v16913_v20  ;;  %v16943_v33 = vld [vmem:[%s22409_s3 + $0xc0] sm:$0xff]  }
 0x51e   : > { %15309 = vmatprep.subr.bf16.mxu1 %v16929_v54  ;;  %v16944_v20 = vld [vmem:[%s22409_s3 + $0x80] sm:$0xff]  }
 0x51f   : > { %v8815_v2 = vpop.f32.mrf.mxu0  ;;  %9060 = vmatmul.mubr.bf16.vlgmr.msra.gmra.mxu0 %v19946_v46 }
 0x520   : > { %v8856_v52 = vpop.f32.mrf.mxu1  ;;  %9101 = vmatmul.mubr.bf16.vlgmr.msra.gmra.mxu1 %v19968_v63  ;;  %v8816_v1 = vadd.f32 %v8815_v2, %v21414_v55  ;;  %15288 = vmatpush3.bf16.msra.mxu0 %v16914_v28  ;;  %v16918_v55 = vld [vmem:[%s22409_s3 + $0x28] sm:$0xff]   ;;  %v16947_v28 = vld [vmem:[%s22411_s5 + $0x64] ss:$16 sps:$4 sm:$0xff]   ;;  %v16951_v2 = vld [vmem:[%s22411_s5 + $0x40] ss:$16 sps:$4 sm:$0xff]  }
 0x521   : > { %9412 = vmatprep.mubr.bf16.mxu0 %v9114_v22  ;;  %v8817_v26 = vpop.f32.mrf.mxu0  ;;  %15289 = vmatprep.subr.bf16.mxu0 %v16915_v15  ;;  %v16950_v15 = vld [vmem:[%s22411_s5 + $0x6c] ss:$16 sps:$4 sm:$0xff]   ;;  %v16953_v22 = vld [vmem:[%s22411_s5 + $0x44] ss:$16 sps:$4 sm:$0xff]  }
 0x522   : > { %v8858_v6 = vpop.f32.mrf.mxu1  ;;  %v8857_v17 = vadd.f32 %v8856_v52, %v8816_v1  ;;  %v8818_v46 = vadd.f32 %v8817_v26, %v21419_v35  ;;  %v16930_v35 = vld [vmem:[%s22409_s3 + $0xb8] sm:$0xff]  }
 0x523   : > { %v8819_v39 = vpop.f32.mrf.mxu0  ;;  %15310 = vmatpush3.bf16.msra.mxu1 %v16930_v35 }
 0x524   : > { %v8860_v63 = vpop.f32.mrf.mxu1  ;;  %v8859_v31 = vadd.f32 %v8858_v6, %v8818_v46  ;;  %15290 = vmatpush3.bf16.msra.mxu0 %v16916_v50  ;;  %15311 = vmatprep.subr.bf16.mxu1 %v16931_v59 }
 0x525   : > { %v8820_v9 = vpop.f32.mrf.mxu0  ;;  %15291 = vmatprep.subr.bf16.mxu0 %v16917_v40 }
 0x526   : > { %v8861_v23 = vpop.f32.mrf.mxu1 }
 0x527   : > { %15312 = vmatpush3.bf16.msra.mxu1 %v16932_v34 }
 0x528   : > { %15292 = vmatpush3.bf16.msra.mxu0 %v16918_v55  ;;  %15313 = vmatprep.subr.bf16.mxu1 %v16933_v7 }
 0x529   : > { %15293 = vmatprep.subr.bf16.mxu0 %v16919_v24 }
 0x52b   : > { %15314 = vmatpush3.bf16.msra.mxu1 %v16934_v43 }
 0x52c   : > { %15294 = vmatpush3.bf16.msra.mxu0 %v16920_v11  ;;  %15315 = vmatprep.subr.bf16.mxu1 %v16935_v4 }
 0x52d   : > { %15295 = vmatprep.subr.bf16.mxu0 %v16921_v47 }
 0x52f   : > { %15316 = vmatpush3.bf16.msra.mxu1 %v16936_v12  ;;  %v16948_v12 = vld [vmem:[%s22411_s5 + $0x68] ss:$16 sps:$4 sm:$0xff]  }
 0x530   : > { %15296 = vmatpush3.bf16.msra.mxu0 %v16922_v41  ;;  %15317 = vmatprep.subr.bf16.mxu1 %v16937_v56  ;;  %v16956_v56 = vld [vmem:[%s22411_s5 + $0x4c] ss:$16 sps:$4 sm:$0xff]  }
 0x531   : > { %15297 = vmatprep.subr.bf16.mxu0 %v16923_v25 }
 0x533   : > { %15318 = vmatpush3.bf16.msra.mxu1 %v16938_v37 }
 0x534   : > { %15298 = vmatpush3.bf16.msra.mxu0 %v16924_v27  ;;  %15319 = vmatprep.subr.bf16.mxu1 %v16939_v60  ;;  %v16959_v60 = vld [vmem:[%s22411_s5 + $0x24] ss:$16 sps:$4 sm:$0xff]  }
 0x535   : > { %15299 = vmatprep.subr.bf16.mxu0 %v16925_v45 }
 0x537   : > { %15320 = vmatpush3.bf16.msra.mxu1 %v16940_v0  ;;  %v16962_v0 = vld [vmem:[%s22411_s5 + $0x2c] ss:$16 sps:$4 sm:$0xff]  }
 0x538   : > { %15300 = vmatpush3.bf16.msra.mxu0 %v16926_v36  ;;  %15321 = vmatprep.subr.bf16.mxu1 %v16941_v57  ;;  %v16954_v36 = vld [vmem:[%s22411_s5 + $0x48] ss:$16 sps:$4 sm:$0xff]  }
 0x539   : > { %15301 = vmatprep.subr.bf16.mxu0 %v16927_v32  ;;  %v16966_v57 = vld [vmem:[%s22411_s5 + $0x8] ss:$16 sps:$4 sm:$0xff]  }
 0x53b   : > { %15322 = vmatpush3.bf16.msra.mxu1 %v16942_v61  ;;  %v9794_v61 = vld [vmem:[%s21737_s26 + $0x3c0] sm:$0xff] }
 0x53c   : > { %15302 = vmatpush3.bf16.msra.mxu0 %v16928_v44  ;;  %15323 = vmatprep.subr.bf16.mxu1 %v16943_v33 }
 0x53d   : > { %9592 = vmatprep.subr.bf16.mxu0 %v16947_v28 }
 0x53f   : > { %9413 = vmatmul.mubr.bf16.vlgmr.msra.gmra.mxu0 %v9113_v51  ;;  %15324 = vmatpush3.bf16.msra.mxu1 %v16944_v20  ;;  %v14717_v20 = vld [vmem:[%s22410_s4] ss:$0 sm:$0xff] }
 0x540   : > { %9633 = vmatprep.subr.bf16.mxu1 %v16950_v15  ;;  %9593 = vmatpush1.bf16.msra.mxu0 %v16945_v14 }
 0x541   : > { %9594 = vmatprep.subr.bf16.mxu0 %v16953_v22 }
 0x544   : > { %9595 = vmatpush1.bf16.msra.mxu0 %v16951_v2 }
 0x545   : > { %9596 = vmatprep.subr.bf16.mxu0 %v16959_v60  ;;  %v9962_v60 = vld [vmem:[%s21737_s26 + $0x900] sm:$0xff] }
 0x55f   : > { %v8897_v5 = vpop.f32.mrf.mxu0 }
 0x560   : > { %v8938_v19 = vpop.f32.mrf.mxu1  ;;  %v8898_v30 = vadd.f32 %v8897_v5, %v8857_v17  ;;  %v16957_v5 = vld [vmem:[%s22411_s5 + $0x20] ss:$16 sps:$4 sm:$0xff]  }
 0x561   : > { %v8899_v53 = vpop.f32.mrf.mxu0  ;;  %9597 = vmatpush1.bf16.msra.mxu0 %v16957_v5 }
 0x562   : > { %v8940_v10 = vpop.f32.mrf.mxu1  ;;  %v8939_v62 = vadd.f32 %v8938_v19, %v8898_v30  ;;  %v8900_v3 = vadd.f32 %v8899_v53, %v8859_v31  ;;  %v16960_v19 = vld [vmem:[%s22411_s5 + $0x28] ss:$16 sps:$4 sm:$0xff]   ;;  %v16965_v30 = vld [vmem:[%s22411_s5 + $0x4] ss:$16 sps:$4 sm:$0xff]   ;;  %v16968_v53 = vld [vmem:[%s22411_s5 + $0xc] ss:$16 sps:$4 sm:$0xff]  }
 0x563   : > { %v8901_v49 = vpop.f32.mrf.mxu0  ;;  %9598 = vmatprep.subr.bf16.mxu0 %v16965_v30 }
 0x564   : > { %v8942_v13 = vpop.f32.mrf.mxu1  ;;  %v8941_v18 = vadd.f32 %v8940_v10, %v8900_v3  ;;  %v16963_v10 = vld [vmem:[%s22411_s5] ss:$16 sps:$4 sm:$0xff]  }
 0x565   : > { %v8902_v29 = vpop.f32.mrf.mxu0  ;;  %9599 = vmatpush1.bf16.msra.mxu0 %v16963_v10  ;;  %v9786_v3 = vld [vmem:[%s21737_s26 + $0x380] sm:$0xff] }
 0x566   : > { %v8943_v38 = vpop.f32.mrf.mxu1  ;;  %v10042_v49 = vld [vmem:[%s21737_s26 + $0xb80] sm:$0xff]  ;;  %v14880_v13 = vcombine.low %v9786_v3, %v9794_v61 }
 0x567   : > { %v10050_v29 = vld [vmem:[%s21737_s26 + $0xbc0] sm:$0xff] }
 0x568   : > { %v15136_v38 = vcombine.low %v10042_v49, %v10050_v29  ;;  %v15137_v33 = vcombine.high %v10042_v49, %v10050_v29  ;;  %v9690_v10 = vld [vmem:[%s21737_s26 + $0x80] sm:$0xff] }
 0x569   : > { %v9674_v29 = vld [vmem:[%s21737_s26] sm:$0xff] }
 0x59f   : > { %v8979_v52 = vpop.f32.mrf.mxu0 }
 0x5a0   : > { %v9020_v1 = vpop.f32.mrf.mxu1  ;;  %v8980_v50 = vadd.f32 %v8979_v52, %v8939_v62  ;;  %v17034_v62 = vmov 0  }
 0x5a1   : > { %v8981_v26 = vpop.f32.mrf.mxu0  ;;  %9616 = vmatprep.mubr.bf16.mxu0 %v17034_v62 }
 0x5a2   : > { %v9022_v6 = vpop.f32.mrf.mxu1  ;;  %v9021_v40 = vadd.f32 %v9020_v1, %v8980_v50  ;;  %v8982_v31 = vadd.f32 %v8981_v26, %v8941_v18  ;;  %v14881_v18 = vcombine.high %v9786_v3, %v9794_v61  ;;  %v9770_v1 = vld [vmem:[%s21737_s26 + $0x300] sm:$0xff] }
 0x5a3   : > { %v8983_v17 = vpop.f32.mrf.mxu0  ;;  %v9778_v26 = vld [vmem:[%s21737_s26 + $0x340] sm:$0xff] }
 0x5a4   : > { %v9024_v46 = vpop.f32.mrf.mxu1  ;;  %v9023_v9 = vadd.f32 %v9022_v6, %v8982_v31  ;;  %12830 = vmatprep.subr.bf16.mxu0 %v14881_v18  ;;  %v10026_v6 = vld [vmem:[%s21737_s26 + $0xb00] sm:$0xff] }
 0x5a5   : > { %v8984_v39 = vpop.f32.mrf.mxu0  ;;  %v9754_v31 = vld [vmem:[%s21737_s26 + $0x280] sm:$0xff] }
 0x5a6   : > { %v9025_v63 = vpop.f32.mrf.mxu1  ;;  %v14865_v39 = vcombine.high %v9770_v1, %v9778_v26  ;;  %v9954_v3 = vld [vmem:[%s21737_s26 + $0x8c0] sm:$0xff] }
 0x5df   : > { %v9061_v55 = vpop.f32.mrf.mxu0 }
 0x5e0   : > { %v9102_v24 = vpop.f32.mrf.mxu1  ;;  %v9062_v23 = vadd.f32 %v9061_v55, %v9021_v40  ;;  %v10034_v40 = vld [vmem:[%s21737_s26 + $0xb40] sm:$0xff] }
 0x5e1   : > { %v9063_v54 = vpop.f32.mrf.mxu0  ;;  %v15121_v63 = vcombine.high %v10026_v6, %v10034_v40  ;;  %v9762_v55 = vld [vmem:[%s21737_s26 + $0x2c0] sm:$0xff] }
 0x5e2   : > { %v9104_v35 = vpop.f32.mrf.mxu1  ;;  %v9103_v59 = vadd.f32 %v9102_v24, %v9062_v23  ;;  %v9064_v11 = vadd.f32 %v9063_v54, %v9023_v9  ;;  %v10010_v24 = vld [vmem:[%s21737_s26 + $0xa80] sm:$0xff]  ;;  %v14864_v23 = vcombine.low %v9770_v1, %v9778_v26  ;;  %v15120_v54 = vcombine.low %v10026_v6, %v10034_v40 }
 0x5e3   : > { %v9065_v34 = vpop.f32.mrf.mxu0  ;;  %v10018_v9 = vld [vmem:[%s21737_s26 + $0xac0] sm:$0xff] }
 0x5e4   : > { %v9106_v47 = vpop.f32.mrf.mxu1  ;;  %v9105_v7 = vadd.f32 %v9104_v35, %v9064_v11  ;;  %v9111_v41 = vmax.f32 %v9103_v59, 0.0  ;;  %v14849_v35 = vcombine.high %v9754_v31, %v9762_v55  ;;  %v15105_v59 = vcombine.high %v10010_v24, %v10018_v9  ;;  %v9738_v11 = vld [vmem:[%s21737_s26 + $0x200] sm:$0xff] }
 0x5e5   : > { %v9066_v43 = vpop.f32.mrf.mxu0  ;;  %v9746_v34 = vld [vmem:[%s21737_s26 + $0x240] sm:$0xff] }
 0x5e6   : > { %v9107_v25 = vpop.f32.mrf.mxu1  ;;  %v9112_v4 = vmax.f32 %v9105_v7, 0.0  ;;  %v9115_v45 = vpack.c.bf16 %v9111_v41, %v9111_v41  ;;  %v9994_v47 = vld [vmem:[%s21737_s26 + $0xa00] sm:$0xff]  ;;  %v14848_v41 = vcombine.low %v9754_v31, %v9762_v55  ;;  %v15104_v43 = vcombine.low %v10010_v24, %v10018_v9 }
 0x5e7   : > { %v10002_v7 = vld [vmem:[%s21737_s26 + $0xa40] sm:$0xff]  ;;  %v14833_v25 = vcombine.high %v9738_v11, %v9746_v34 }
 0x5e8   : > { %v9116_v27 = vpack.c.bf16 %v9112_v4, %v9112_v4  ;;  %v15089_v4 = vcombine.high %v9994_v47, %v10002_v7  ;;  %v10170_v1 = vld [vmem:[%s21737_s26 + $0xf80] sm:$0xff] }
 0x5e9   : > { %v10162_v31 = vld [vmem:[%s21737_s26 + $0xf40] sm:$0xff] }
 0x5ea   : > { %9452 = vmatprep.mubr.bf16.mxu1 %v9116_v27  ;;  %v9722_v27 = vld [vmem:[%s21737_s26 + $0x180] sm:$0xff] }
 0x5eb   : > { %9453 = vmatmul.mubr.bf16.vlgmr.msra.gmra.mxu1 %v9115_v45  ;;  %v9978_v45 = vld [vmem:[%s21737_s26 + $0x980] sm:$0xff] }
 0x5ec   : > { %9634 = vmatpush1.bf16.msra.mxu1 %v16948_v12  ;;  %9657 = vmatprep.mubr.bf16.mxu1 %v17034_v62  ;;  %v9730_v12 = vld [vmem:[%s21737_s26 + $0x1c0] sm:$0xff] }
 0x5ed   : > { %9635 = vmatprep.subr.bf16.mxu1 %v16956_v56  ;;  %v9986_v56 = vld [vmem:[%s21737_s26 + $0x9c0] sm:$0xff]  ;;  %v14816_v5 = vcombine.low %v9722_v27, %v9730_v12 }
 0x5ee   : > { %v9946_v62 = vld [vmem:[%s21737_s26 + $0x880] sm:$0xff] }
 0x5ef   : > { %v15041_v18 = vcombine.high %v9946_v62, %v9954_v3 }
 0x5f0   : > { %9636 = vmatpush1.bf16.msra.mxu1 %v16954_v36  ;;  %v14832_v36 = vcombine.low %v9738_v11, %v9746_v34  ;;  %v10146_v11 = vld [vmem:[%s21737_s26 + $0xec0] sm:$0xff] }
 0x5f1   : > { %9637 = vmatprep.subr.bf16.mxu1 %v16962_v0  ;;  %v9970_v0 = vld [vmem:[%s21737_s26 + $0x940] sm:$0xff] }
 0x5f2   : > { %v15056_v49 = vcombine.low %v9962_v60, %v9970_v0 }
 0x5f4   : > { %9638 = vmatpush1.bf16.msra.mxu1 %v16960_v19  ;;  %v15072_v19 = vcombine.low %v9978_v45, %v9986_v56 }
 0x5f5   : > { %9639 = vmatprep.subr.bf16.mxu1 %v16968_v53  ;;  %v15057_v53 = vcombine.high %v9962_v60, %v9970_v0 }
 0x5f8   : > { %9640 = vmatpush1.bf16.msra.mxu1 %v16966_v57  ;;  %v9698_v57 = vld [vmem:[%s21737_s26 + $0xc0] sm:$0xff] }
 0x5f9   : > { %12871 = vmatprep.subr.bf16.mxu1 %v15137_v33  ;;  %v9930_v33 = vld [vmem:[%s21737_s26 + $0x800] sm:$0xff] }
 0x5ff   : > { %v15303_v37 = vpop.f32.mrf.mxu0 }
 0x601   : > { %v15304_v32 = vpop.f32.mrf.mxu0 }
 0x602   : > { %v15305_v44 = vadd.f32 %v15304_v32, %v15303_v37  ;;  %v15088_v37 = vcombine.low %v9994_v47, %v10002_v7  ;;  %v14817_v32 = vcombine.high %v9722_v27, %v9730_v12  ;;  %v10130_v27 = vld [vmem:[%s21737_s26 + $0xe40] sm:$0xff] }
 0x603   : > { %v15306_v58 = vpop.f32.mrf.mxu0 }
 0x604   : > { %v9415_v15 = vadd.f32 %v15305_v44, %v14717_v20  ;;  %v15073_v44 = vcombine.high %v9978_v45, %v9986_v56  ;;  %v9706_v58 = vld [vmem:[%s21737_s26 + $0x100] sm:$0xff] }
 0x605   : > { %v15307_v51 = vpop.f32.mrf.mxu0  ;;  %v9938_v20 = vld [vmem:[%s21737_s26 + $0x840] sm:$0xff] }
 0x606   : > { %v9714_v51 = vld [vmem:[%s21737_s26 + $0x140] sm:$0xff]  ;;  %v15024_v6 = vcombine.low %v9930_v33, %v9938_v20 }
 0x607   : > { %v14801_v30 = vcombine.high %v9706_v58, %v9714_v51  ;;  %v14800_v61 = vcombine.low %v9706_v58, %v9714_v51  ;;  %v10114_v58 = vld [vmem:[%s21737_s26 + $0xdc0] sm:$0xff] }
 0x6ab   : > { %v15325_v14 = vpop.f32.mrf.mxu1 }
 0x6ad   : > { %v15326_v28 = vpop.f32.mrf.mxu1 }
 0x6ae   : > { %v15327_v22 = vadd.f32 %v15326_v28, %v15325_v14  ;;  %v14784_v14 = vcombine.low %v9690_v10, %v9698_v57  ;;  %v15040_v28 = vcombine.low %v9946_v62, %v9954_v3 }
 0x6af   : > { %v15328_v2 = vpop.f32.mrf.mxu1 }
 0x6b0   : > { %v9455_v52 = vadd.f32 %v15327_v22, %v9415_v15  ;;  %v15025_v22 = vcombine.high %v9930_v33, %v9938_v20  ;;  %v9914_v2 = vld [vmem:[%s21737_s26 + $0x780] sm:$0xff] }
 0x6b1   : > { %v15329_v50 = vpop.f32.mrf.mxu1  ;;  %v10082_v20 = vld [vmem:[%s21737_s26 + $0xcc0] sm:$0xff] }
 0x6b2   : > { %v9460_v17 = vmax.f32 %v9455_v52, 0.0  ;;  %v9922_v52 = vld [vmem:[%s21737_s26 + $0x7c0] sm:$0xff] }
 0x6b3   : > { %v10178_v50 = vld [vmem:[%s21737_s26 + $0xfc0] sm:$0xff]  ;;  %v15009_v40 = vcombine.high %v9914_v2, %v9922_v52  ;;  %v15008_v55 = vcombine.low %v9914_v2, %v9922_v52 }
 0x6b4   : > { %v9461_v46 = vpack.c.bf16 %v9460_v17, %v9460_v17  ;;  %v15265_v17 = vcombine.high %v10170_v1, %v10178_v50  ;;  %v15264_v24 = vcombine.low %v10170_v1, %v10178_v50  ;;  %v9810_v2 = vld [vmem:[%s21737_s26 + $0x440] sm:$0xff] }
 0x6b5   : > { %v10058_v52 = vld [vmem:[%s21737_s26 + $0xc00] sm:$0xff] }
 0x6b6   : > { %14766 = vmatmul.mubr.msk.bf16.vlgmr.msra.gmra.mxu0 %vm9580_vm0, %v9461_v46  ;;  %14767 = vmatmul.mubr.msk.bf16.vlgmr.msra.gmra.mxu1 %vm9580_vm0, %v9461_v46  ;;  %v9898_v46 = vld [vmem:[%s21737_s26 + $0x700] sm:$0xff] }
 0x6b7   : > { %12831 = vmatpush1.bf16.msra.mxu0 %v14880_v13  ;;  %12872 = vmatpush1.bf16.msra.mxu1 %v15136_v38  ;;  %v14785_v13 = vcombine.high %v9690_v10, %v9698_v57  ;;  %v9682_v38 = vld [vmem:[%s21737_s26 + $0x40] sm:$0xff] }
 0x6b8   : > { %12832 = vmatprep.subr.bf16.mxu0 %v14865_v39  ;;  %12873 = vmatprep.subr.bf16.mxu1 %v15121_v63  ;;  %v14769_v15 = vcombine.high %v9674_v29, %v9682_v38  ;;  %v14768_v26 = vcombine.low %v9674_v29, %v9682_v38  ;;  %v9906_v39 = vld [vmem:[%s21737_s26 + $0x740] sm:$0xff] }
 0x6b9   : > { %v10154_v63 = vld [vmem:[%s21737_s26 + $0xf00] sm:$0xff]  ;;  %v14993_v9 = vcombine.high %v9898_v46, %v9906_v39  ;;  %v14992_v34 = vcombine.low %v9898_v46, %v9906_v39  ;;  %v9795_v46 = vld [vmem:[%s21737_s26 + $0x3c8] sm:$0xff] }
 0x6ba   : > { %v15248_v47 = vcombine.low %v10154_v63, %v10162_v31  ;;  %v10098_v10 = vld [vmem:[%s21737_s26 + $0xd40] sm:$0xff]  ;;  %v10043_v39 = vld [vmem:[%s21737_s26 + $0xb88] sm:$0xff] }
 0x6bb   : > { %12833 = vmatpush1.bf16.msra.mxu0 %v14864_v23  ;;  %12874 = vmatpush1.bf16.msra.mxu1 %v15120_v54  ;;  %v15249_v23 = vcombine.high %v10154_v63, %v10162_v31  ;;  %v9882_v54 = vld [vmem:[%s21737_s26 + $0x680] sm:$0xff]  ;;  %v10051_v31 = vld [vmem:[%s21737_s26 + $0xbc8] sm:$0xff] }
 0x6bc   : > { %12834 = vmatprep.subr.bf16.mxu0 %v14849_v35  ;;  %12875 = vmatprep.subr.bf16.mxu1 %v15105_v59  ;;  %v9890_v35 = vld [vmem:[%s21737_s26 + $0x6c0] sm:$0xff] }
 0x6bd   : > { %v10138_v59 = vld [vmem:[%s21737_s26 + $0xe80] sm:$0xff]  ;;  %v14977_v7 = vcombine.high %v9882_v54, %v9890_v35  ;;  %v14976_v12 = vcombine.low %v9882_v54, %v9890_v35 }
 0x6be   : > { %v15232_v45 = vcombine.low %v10138_v59, %v10146_v11  ;;  %v9826_v29 = vld [vmem:[%s21737_s26 + $0x4c0] sm:$0xff] }
 0x6bf   : > { %12835 = vmatpush1.bf16.msra.mxu0 %v14848_v41  ;;  %12876 = vmatpush1.bf16.msra.mxu1 %v15104_v43  ;;  %v15233_v41 = vcombine.high %v10138_v59, %v10146_v11  ;;  %v9866_v43 = vld [vmem:[%s21737_s26 + $0x600] sm:$0xff] }
 0x6c0   : > { %12836 = vmatprep.subr.bf16.mxu0 %v14833_v25  ;;  %12877 = vmatprep.subr.bf16.mxu1 %v15089_v4  ;;  %v9874_v25 = vld [vmem:[%s21737_s26 + $0x640] sm:$0xff] }
 0x6c1   : > { %v10122_v4 = vld [vmem:[%s21737_s26 + $0xe00] sm:$0xff]  ;;  %v14961_v56 = vcombine.high %v9866_v43, %v9874_v25  ;;  %v14960_v51 = vcombine.low %v9866_v43, %v9874_v25 }
 0x6c2   : > { %v15216_v60 = vcombine.low %v10122_v4, %v10130_v27  ;;  %v10074_v38 = vld [vmem:[%s21737_s26 + $0xc80] sm:$0xff] }
 0x6c3   : > { %12837 = vmatpush1.bf16.msra.mxu0 %v14832_v36  ;;  %12878 = vmatpush1.bf16.msra.mxu1 %v15088_v37  ;;  %v15217_v36 = vcombine.high %v10122_v4, %v10130_v27  ;;  %v9850_v37 = vld [vmem:[%s21737_s26 + $0x580] sm:$0xff] }
 0x6c4   : > { %12838 = vmatprep.subr.bf16.mxu0 %v14817_v32  ;;  %12879 = vmatprep.subr.bf16.mxu1 %v15073_v44  ;;  %v9858_v32 = vld [vmem:[%s21737_s26 + $0x5c0] sm:$0xff] }
 0x6c5   : > { %v10106_v44 = vld [vmem:[%s21737_s26 + $0xd80] sm:$0xff]  ;;  %v14945_v0 = vcombine.high %v9850_v37, %v9858_v32  ;;  %v14944_v57 = vcombine.low %v9850_v37, %v9858_v32 }
 0x6c6   : > { %v15200_v62 = vcombine.low %v10106_v44, %v10114_v58  ;;  %v10066_v50 = vld [vmem:[%s21737_s26 + $0xc40] sm:$0xff] }
 0x6c7   : > { %12839 = vmatpush1.bf16.msra.mxu0 %v14816_v5  ;;  %12880 = vmatpush1.bf16.msra.mxu1 %v15072_v19  ;;  %v15201_v5 = vcombine.high %v10106_v44, %v10114_v58  ;;  %v9834_v19 = vld [vmem:[%s21737_s26 + $0x500] sm:$0xff]  ;;  %v9771_v44 = vld [vmem:[%s21737_s26 + $0x308] sm:$0xff] }
 0x6c8   : > { %12840 = vmatprep.subr.bf16.mxu0 %v14801_v30  ;;  %12881 = vmatprep.subr.bf16.mxu1 %v15057_v53  ;;  %v9842_v30 = vld [vmem:[%s21737_s26 + $0x540] sm:$0xff] }
 0x6c9   : > { %v10090_v53 = vld [vmem:[%s21737_s26 + $0xd00] sm:$0xff]  ;;  %v14929_v3 = vcombine.high %v9834_v19, %v9842_v30 }
 0x6cb   : > { %12841 = vmatpush1.bf16.msra.mxu0 %v14800_v61  ;;  %12882 = vmatpush1.bf16.msra.mxu1 %v15056_v49  ;;  %v15185_v61 = vcombine.high %v10090_v53, %v10098_v10  ;;  %v14928_v49 = vcombine.low %v9834_v19, %v9842_v30 }
 0x6cc   : > { %12842 = vmatprep.subr.bf16.mxu0 %v14785_v13  ;;  %12883 = vmatprep.subr.bf16.mxu1 %v15041_v18  ;;  %v15184_v13 = vcombine.low %v10090_v53, %v10098_v10  ;;  %v9818_v18 = vld [vmem:[%s21737_s26 + $0x480] sm:$0xff] }
 0x6cd   : > { %v14913_v33 = vcombine.high %v9818_v18, %v9826_v29 }
 0x6cf   : > { %12843 = vmatpush1.bf16.msra.mxu0 %v14784_v14  ;;  %12884 = vmatpush1.bf16.msra.mxu1 %v15040_v28  ;;  %v14912_v14 = vcombine.low %v9818_v18, %v9826_v29  ;;  %v15168_v28 = vcombine.low %v10074_v38, %v10082_v20 }
 0x6d0   : > { %12844 = vmatprep.subr.bf16.mxu0 %v14769_v15  ;;  %12885 = vmatprep.subr.bf16.mxu1 %v15025_v22  ;;  %v15169_v15 = vcombine.high %v10074_v38, %v10082_v20  ;;  %v9802_v22 = vld [vmem:[%s21737_s26 + $0x400] sm:$0xff]  ;;  %v9739_v20 = vld [vmem:[%s21737_s26 + $0x208] sm:$0xff] }
 0x6d1   : > { %v14897_v1 = vcombine.high %v9802_v22, %v9810_v2 }
 0x6d3   : > { %12845 = vmatpush1.bf16.msra.mxu0 %v14768_v26  ;;  %12886 = vmatpush1.bf16.msra.mxu1 %v15024_v6  ;;  %v14896_v26 = vcombine.low %v9802_v22, %v9810_v2  ;;  %v15152_v6 = vcombine.low %v10058_v52, %v10066_v50 }
 0x6d4   : > { %12846 = vmatprep.subr.bf16.mxu0 %v15009_v40  ;;  %12887 = vmatprep.subr.bf16.mxu1 %v15265_v17  ;;  %v15153_v40 = vcombine.high %v10058_v52, %v10066_v50  ;;  %v9787_v17 = vld [vmem:[%s21737_s26 + $0x388] sm:$0xff] }
 0x6d5   : > { %v14883_v63 = vcombine.high %v9787_v17, %v9795_v46  ;;  %v9723_v50 = vld [vmem:[%s21737_s26 + $0x188] sm:$0xff] }
 0x6d7   : > { %12847 = vmatpush2.bf16.msra.mxu0 %v15008_v55  ;;  %12888 = vmatpush2.bf16.msra.mxu1 %v15264_v24  ;;  %v14882_v55 = vcombine.low %v9787_v17, %v9795_v46  ;;  %v15138_v24 = vcombine.low %v10043_v39, %v10051_v31 }
 0x6d8   : > { %12848 = vmatprep.subr.bf16.mxu0 %v14993_v9  ;;  %12889 = vmatprep.subr.bf16.mxu1 %v15249_v23  ;;  %v15139_v9 = vcombine.high %v10043_v39, %v10051_v31  ;;  %v9478_v23 = vld [vmem:[%s22412_s6] sm:$0xf]  ;;  %v9707_v31 = vld [vmem:[%s21737_s26 + $0x108] sm:$0xff] }
 0x6d9   : > { %v9483_v54 = vrot.slane %v9478_v23, %v19056_v16  ;;  %v9491_v35 = vrot.slane %v9478_v23, %v20767_v48  ;;  %v9487_v59 = vrot.slane %v9478_v23, %v19065_v21  ;;  %v9495_v11 = vrot.slane %v9478_v23, %v20776_v8 }
 0x6db   : > { %12849 = vmatpush2.bf16.msra.mxu0 %v14992_v34  ;;  %12890 = vmatpush2.bf16.msra.mxu1 %v15248_v47 }
 0x6dc   : > { %12850 = vmatprep.subr.bf16.mxu0 %v14977_v7  ;;  %12891 = vmatprep.subr.bf16.mxu1 %v15233_v41 }
 0x6df   : > { %12851 = vmatpush2.bf16.msra.mxu0 %v14976_v12  ;;  %12892 = vmatpush2.bf16.msra.mxu1 %v15232_v45 }
 0x6e0   : > { %12852 = vmatprep.subr.bf16.mxu0 %v14961_v56  ;;  %12893 = vmatprep.subr.bf16.mxu1 %v15217_v36 }
 0x6e3   : > { %12853 = vmatpush2.bf16.msra.mxu0 %v14960_v51  ;;  %12894 = vmatpush2.bf16.msra.mxu1 %v15216_v60  ;;  %v9779_v60 = vld [vmem:[%s21737_s26 + $0x348] sm:$0xff] }
 0x6e4   : > { %12854 = vmatprep.subr.bf16.mxu0 %v14945_v0  ;;  %12895 = vmatprep.subr.bf16.mxu1 %v15201_v5  ;;  %v10027_v0 = vld [vmem:[%s21737_s26 + $0xb08] sm:$0xff]  ;;  %v14866_v18 = vcombine.low %v9771_v44, %v9779_v60 }
 0x6e5   : > { %v10035_v5 = vld [vmem:[%s21737_s26 + $0xb48] sm:$0xff] }
 0x6e6   : > { %v15122_v29 = vcombine.low %v10027_v0, %v10035_v5 }
 0x6e7   : > { %12855 = vmatpush2.bf16.msra.mxu0 %v14944_v57  ;;  %12896 = vmatpush2.bf16.msra.mxu1 %v15200_v62  ;;  %v9755_v57 = vld [vmem:[%s21737_s26 + $0x288] sm:$0xff]  ;;  %v14867_v62 = vcombine.high %v9771_v44, %v9779_v60 }
 0x6e8   : > { %12856 = vmatprep.subr.bf16.mxu0 %v14929_v3  ;;  %12897 = vmatprep.subr.bf16.mxu1 %v15185_v61  ;;  %v15123_v3 = vcombine.high %v10027_v0, %v10035_v5  ;;  %v9763_v61 = vld [vmem:[%s21737_s26 + $0x2c8] sm:$0xff] }
 0x6e9   : > { %v14851_v38 = vcombine.high %v9755_v57, %v9763_v61  ;;  %v14850_v22 = vcombine.low %v9755_v57, %v9763_v61  ;;  %v10171_v60 = vld [vmem:[%s21737_s26 + $0xf88] sm:$0xff] }
 0x6ea   : > { %v10179_v0 = vld [vmem:[%s21737_s26 + $0xfc8] sm:$0xff] }
 0x6eb   : > { %12857 = vmatpush2.bf16.msra.mxu0 %v14928_v49  ;;  %12898 = vmatpush2.bf16.msra.mxu1 %v15184_v13  ;;  %v10011_v49 = vld [vmem:[%s21737_s26 + $0xa88] sm:$0xff] }
 0x6ec   : > { %12858 = vmatprep.subr.bf16.mxu0 %v14913_v33  ;;  %12899 = vmatprep.subr.bf16.mxu1 %v15169_v15  ;;  %v10019_v13 = vld [vmem:[%s21737_s26 + $0xac8] sm:$0xff] }
 0x6ed   : > { %v15107_v33 = vcombine.high %v10011_v49, %v10019_v13  ;;  %v10003_v15 = vld [vmem:[%s21737_s26 + $0xa48] sm:$0xff]  ;;  %v15106_v2 = vcombine.low %v10011_v49, %v10019_v13 }
 0x6ee   : > { %v9899_v61 = vld [vmem:[%s21737_s26 + $0x708] sm:$0xff] }
 0x6ef   : > { %12859 = vmatpush2.bf16.msra.mxu0 %v14912_v14  ;;  %12900 = vmatpush2.bf16.msra.mxu1 %v15168_v28  ;;  %v9747_v14 = vld [vmem:[%s21737_s26 + $0x248] sm:$0xff] }
 0x6f0   : > { %12860 = vmatprep.subr.bf16.mxu0 %v14897_v1  ;;  %12901 = vmatprep.subr.bf16.mxu1 %v15153_v40  ;;  %v9995_v28 = vld [vmem:[%s21737_s26 + $0xa08] sm:$0xff]  ;;  %v14835_v52 = vcombine.high %v9739_v20, %v9747_v14  ;;  %v14834_v17 = vcombine.low %v9739_v20, %v9747_v14 }
 0x6f1   : > { %v15091_v1 = vcombine.high %v9995_v28, %v10003_v15  ;;  %v9987_v40 = vld [vmem:[%s21737_s26 + $0x9c8] sm:$0xff]  ;;  %v15090_v46 = vcombine.low %v9995_v28, %v10003_v15 }
 0x6f2   : > { %v9907_v49 = vld [vmem:[%s21737_s26 + $0x748] sm:$0xff] }
 0x6f3   : > { %12861 = vmatpush2.bf16.msra.mxu0 %v14896_v26  ;;  %12902 = vmatpush2.bf16.msra.mxu1 %v15152_v6  ;;  %v9731_v26 = vld [vmem:[%s21737_s26 + $0x1c8] sm:$0xff] }
 0x6f4   : > { %12912 = vmatprep.subr.bf16.mxu0 %v14883_v63  ;;  %12953 = vmatprep.subr.bf16.mxu1 %v15139_v9  ;;  %v9979_v6 = vld [vmem:[%s21737_s26 + $0x988] sm:$0xff]  ;;  %v14819_v39 = vcombine.high %v9723_v50, %v9731_v26  ;;  %v14818_v23 = vcombine.low %v9723_v50, %v9731_v26 }
 0x6f5   : > { %v15075_v63 = vcombine.high %v9979_v6, %v9987_v40  ;;  %v9971_v9 = vld [vmem:[%s21737_s26 + $0x948] sm:$0xff] }
 0x6f6   : > { %v10155_v13 = vld [vmem:[%s21737_s26 + $0xf08] sm:$0xff] }
 0x6f7   : > { %v9883_v14 = vld [vmem:[%s21737_s26 + $0x688] sm:$0xff] }
 0x6f8   : > { %v9891_v28 = vld [vmem:[%s21737_s26 + $0x6c8] sm:$0xff] }
 0x6f9   : > { %v10139_v15 = vld [vmem:[%s21737_s26 + $0xe88] sm:$0xff] }
 0x6fa   : > { %v9867_v26 = vld [vmem:[%s21737_s26 + $0x608] sm:$0xff] }
 0x776   : > { %v9618_v34 = vpop.f32.mrf.mxu0  ;;  %v9659_v47 = vpop.f32.mrf.mxu1 }
 0x777   : > { %v9619_v7 = vadd.f32 %v9618_v34, %v9483_v54  ;;  %v9660_v41 = vadd.f32 %v9659_v47, %v9491_v35  ;;  %v15074_v54 = vcombine.low %v9979_v6, %v9987_v40  ;;  %v9699_v34 = vld [vmem:[%s21737_s26 + $0xc8] sm:$0xff] }
 0x778   : > { %v9620_v43 = vpop.f32.mrf.mxu0  ;;  %v9661_v25 = vpop.f32.mrf.mxu1  ;;  %v9947_v47 = vld [vmem:[%s21737_s26 + $0x888] sm:$0xff] }
 0x779   : > { %v9621_v4 = vadd.f32 %v9620_v43, %v9487_v59  ;;  %v9662_v27 = vadd.f32 %v9661_v25, %v9495_v11  ;;  %v9666_v12 = vmax.f32 %v9619_v7, 0.0  ;;  %v9668_v45 = vmax.f32 %v9660_v41, 0.0  ;;  %v9691_v11 = vld [vmem:[%s21737_s26 + $0x88] sm:$0xff] }
 0x77a   : > { %v9622_v56 = vpop.f32.mrf.mxu0  ;;  %v9663_v36 = vpop.f32.mrf.mxu1  ;;  %v9955_v7 = vld [vmem:[%s21737_s26 + $0x8c8] sm:$0xff]  ;;  %v14787_v25 = vcombine.high %v9691_v11, %v9699_v34 }
 0x77b   : > { %v9667_v37 = vmax.f32 %v9621_v4, 0.0  ;;  %v9669_v32 = vmax.f32 %v9662_v27, 0.0  ;;  %v21825_v53 = vpack.c.bf16 %v9666_v12, %v9666_v12  ;;  %v21827_v10 = vpack.c.bf16 %v9668_v45, %v9668_v45  ;;  %v9675_v27 = vld [vmem:[%s21737_s26 + $0x8] sm:$0xff] }
 0x77c   : > { %v9623_v58 = vpop.f32.mrf.mxu0  ;;  %v9664_v51 = vpop.f32.mrf.mxu1  ;;  %v15043_v4 = vcombine.high %v9947_v47, %v9955_v7  ;;  %v9683_v12 = vld [vmem:[%s21737_s26 + $0x48] sm:$0xff]  ;;  %v14786_v36 = vcombine.low %v9691_v11, %v9699_v34 }
 0x77d   : > { %v21821_v19 = vpack.c.bf16 %v9667_v37, %v9667_v37  ;;  %v21823_v30 = vpack.c.bf16 %v9669_v32, %v9669_v32  ;;  %v9931_v45 = vld [vmem:[%s21737_s26 + $0x808] sm:$0xff]  ;;  %v15042_v37 = vcombine.low %v9947_v47, %v9955_v7  ;;  %v14771_v32 = vcombine.high %v9675_v27, %v9683_v12 }
 0x77e   : > { %v9939_v56 = vld [vmem:[%s21737_s26 + $0x848] sm:$0xff]  ;;  %v14770_v5 = vcombine.low %v9675_v27, %v9683_v12 }
 0x77f   : > { %12862 = vmatprep.mubr.bf16.mxu0 %v21821_v19  ;;  %12903 = vmatprep.mubr.bf16.mxu1 %v21823_v30  ;;  %v15027_v44 = vcombine.high %v9931_v45, %v9939_v56  ;;  %v9915_v58 = vld [vmem:[%s21737_s26 + $0x788] sm:$0xff]  ;;  %v15026_v57 = vcombine.low %v9931_v45, %v9939_v56 }
 0x780   : > { %12863 = vmatmul.mubr.bf16.vlgmr.msra.gmra.mxu0 %v21825_v53  ;;  %12904 = vmatmul.mubr.bf16.vlgmr.msra.gmra.mxu1 %v21827_v10  ;;  %v9923_v51 = vld [vmem:[%s21737_s26 + $0x7c8] sm:$0xff] }
 0x781   : > { %12913 = vmatpush1.bf16.msra.mxu0 %v14882_v55  ;;  %12954 = vmatpush1.bf16.msra.mxu1 %v15138_v24  ;;  %v9715_v55 = vld [vmem:[%s21737_s26 + $0x148] sm:$0xff] }
 0x782   : > { %12944 = vmatprep.mubr.bf16.mxu0 %v21821_v19  ;;  %12985 = vmatprep.mubr.bf16.mxu1 %v21823_v30  ;;  %v9963_v24 = vld [vmem:[%s21737_s26 + $0x908] sm:$0xff]  ;;  %v14803_v35 = vcombine.high %v9707_v31, %v9715_v55  ;;  %v14802_v41 = vcombine.low %v9707_v31, %v9715_v55 }
 0x783   : > { %12914 = vmatprep.subr.bf16.mxu0 %v14867_v62  ;;  %12955 = vmatprep.subr.bf16.mxu1 %v15123_v3  ;;  %v15059_v59 = vcombine.high %v9963_v24, %v9971_v9  ;;  %v15058_v43 = vcombine.low %v9963_v24, %v9971_v9  ;;  %v15011_v62 = vcombine.high %v9915_v58, %v9923_v51  ;;  %v9875_v6 = vld [vmem:[%s21737_s26 + $0x648] sm:$0xff] }
 0x784   : > { %v15267_v3 = vcombine.high %v10171_v60, %v10179_v0  ;;  %v10123_v40 = vld [vmem:[%s21737_s26 + $0xe08] sm:$0xff] }
 0x785   : > { %12915 = vmatpush1.bf16.msra.mxu0 %v14866_v18  ;;  %12956 = vmatpush1.bf16.msra.mxu1 %v15122_v29  ;;  %v10163_v18 = vld [vmem:[%s21737_s26 + $0xf48] sm:$0xff]  ;;  %v15010_v29 = vcombine.low %v9915_v58, %v9923_v51 }
 0x786   : > { %12916 = vmatprep.subr.bf16.mxu0 %v14851_v38  ;;  %12957 = vmatprep.subr.bf16.mxu1 %v15107_v33  ;;  %v15266_v38 = vcombine.low %v10171_v60, %v10179_v0  ;;  %v14995_v33 = vcombine.high %v9899_v61, %v9907_v49  ;;  %v15251_v20 = vcombine.high %v10155_v13, %v10163_v18  ;;  %v9851_v55 = vld [vmem:[%s21737_s26 + $0x588] sm:$0xff] }
 0x787   : > { %v9859_v24 = vld [vmem:[%s21737_s26 + $0x5c8] sm:$0xff] }
 0x788   : > { %v10107_v9 = vld [vmem:[%s21737_s26 + $0xd88] sm:$0xff] }
 0x789   : > { %12917 = vmatpush1.bf16.msra.mxu0 %v14850_v22  ;;  %12958 = vmatpush1.bf16.msra.mxu1 %v15106_v2  ;;  %v10147_v22 = vld [vmem:[%s21737_s26 + $0xec8] sm:$0xff]  ;;  %v14994_v2 = vcombine.low %v9899_v61, %v9907_v49  ;;  %v9788_v49 = vld [vmem:[%s21737_s26 + $0x390] sm:$0xff] }
 0x78a   : > { %12918 = vmatprep.subr.bf16.mxu0 %v14835_v52  ;;  %12959 = vmatprep.subr.bf16.mxu1 %v15091_v1  ;;  %v15250_v52 = vcombine.low %v10155_v13, %v10163_v18  ;;  %v14979_v1 = vcombine.high %v9883_v14, %v9891_v28  ;;  %v15235_v50 = vcombine.high %v10139_v15, %v10147_v22  ;;  %v9835_v34 = vld [vmem:[%s21737_s26 + $0x508] sm:$0xff]  ;;  %v9796_v13 = vld [vmem:[%s21737_s26 + $0x3d0] sm:$0xff] }
 0x78b   : > { %v9843_v47 = vld [vmem:[%s21737_s26 + $0x548] sm:$0xff]  ;;  %v10044_v18 = vld [vmem:[%s21737_s26 + $0xb90] sm:$0xff] }
 0x78c   : > { %v10091_v7 = vld [vmem:[%s21737_s26 + $0xd08] sm:$0xff] }
 0x78d   : > { %12919 = vmatpush1.bf16.msra.mxu0 %v14834_v17  ;;  %12960 = vmatpush1.bf16.msra.mxu1 %v15090_v46  ;;  %v10131_v17 = vld [vmem:[%s21737_s26 + $0xe48] sm:$0xff]  ;;  %v14978_v46 = vcombine.low %v9883_v14, %v9891_v28  ;;  %v9772_v28 = vld [vmem:[%s21737_s26 + $0x310] sm:$0xff] }
 0x78e   : > { %12920 = vmatprep.subr.bf16.mxu0 %v14819_v39  ;;  %12961 = vmatprep.subr.bf16.mxu1 %v15075_v63  ;;  %v15234_v39 = vcombine.low %v10139_v15, %v10147_v22  ;;  %v14963_v63 = vcombine.high %v9867_v26, %v9875_v6  ;;  %v15219_v31 = vcombine.high %v10123_v40, %v10131_v17  ;;  %v9819_v12 = vld [vmem:[%s21737_s26 + $0x488] sm:$0xff]  ;;  %v9780_v15 = vld [vmem:[%s21737_s26 + $0x350] sm:$0xff] }
 0x78f   : > { %v9827_v45 = vld [vmem:[%s21737_s26 + $0x4c8] sm:$0xff]  ;;  %v10028_v22 = vld [vmem:[%s21737_s26 + $0xb10] sm:$0xff] }
 0x790   : > { %v10075_v56 = vld [vmem:[%s21737_s26 + $0xc88] sm:$0xff] }
 0x791   : > { %12921 = vmatpush1.bf16.msra.mxu0 %v14818_v23  ;;  %12962 = vmatpush1.bf16.msra.mxu1 %v15074_v54  ;;  %v10115_v23 = vld [vmem:[%s21737_s26 + $0xdc8] sm:$0xff]  ;;  %v14962_v54 = vcombine.low %v9867_v26, %v9875_v6  ;;  %v9756_v6 = vld [vmem:[%s21737_s26 + $0x290] sm:$0xff] }
 0x792   : > { %12922 = vmatprep.subr.bf16.mxu0 %v14803_v35  ;;  %12963 = vmatprep.subr.bf16.mxu1 %v15059_v59  ;;  %v15218_v35 = vcombine.low %v10123_v40, %v10131_v17  ;;  %v14947_v59 = vcombine.high %v9851_v55, %v9859_v24  ;;  %v15203_v11 = vcombine.high %v10107_v9, %v10115_v23  ;;  %v9803_v51 = vld [vmem:[%s21737_s26 + $0x408] sm:$0xff]  ;;  %v9764_v40 = vld [vmem:[%s21737_s26 + $0x2d0] sm:$0xff] }
 0x793   : > { %v9811_v60 = vld [vmem:[%s21737_s26 + $0x448] sm:$0xff]  ;;  %v10012_v17 = vld [vmem:[%s21737_s26 + $0xa90] sm:$0xff] }
 0x794   : > { %v10059_v0 = vld [vmem:[%s21737_s26 + $0xc08] sm:$0xff] }
 0x795   : > { %12923 = vmatpush1.bf16.msra.mxu0 %v14802_v41  ;;  %12964 = vmatpush1.bf16.msra.mxu1 %v15058_v43  ;;  %v10099_v41 = vld [vmem:[%s21737_s26 + $0xd48] sm:$0xff]  ;;  %v14946_v43 = vcombine.low %v9851_v55, %v9859_v24  ;;  %v9740_v24 = vld [vmem:[%s21737_s26 + $0x210] sm:$0xff] }
 0x796   : > { %12924 = vmatprep.subr.bf16.mxu0 %v14787_v25  ;;  %12965 = vmatprep.subr.bf16.mxu1 %v15043_v4  ;;  %v15202_v25 = vcombine.low %v10107_v9, %v10115_v23  ;;  %v14931_v4 = vcombine.high %v9835_v34, %v9843_v47  ;;  %v15187_v27 = vcombine.high %v10091_v7, %v10099_v41  ;;  %v9748_v9 = vld [vmem:[%s21737_s26 + $0x250] sm:$0xff] }
 0x797   : > { %v9996_v23 = vld [vmem:[%s21737_s26 + $0xa10] sm:$0xff] }
 0x799   : > { %12925 = vmatpush1.bf16.msra.mxu0 %v14786_v36  ;;  %12966 = vmatpush1.bf16.msra.mxu1 %v15042_v37  ;;  %v10083_v36 = vld [vmem:[%s21737_s26 + $0xcc8] sm:$0xff]  ;;  %v14930_v37 = vcombine.low %v9835_v34, %v9843_v47  ;;  %v9724_v47 = vld [vmem:[%s21737_s26 + $0x190] sm:$0xff] }
 0x79a   : > { %12926 = vmatprep.subr.bf16.mxu0 %v14771_v32  ;;  %12967 = vmatprep.subr.bf16.mxu1 %v15027_v44  ;;  %v15186_v32 = vcombine.low %v10091_v7, %v10099_v41  ;;  %v14915_v44 = vcombine.high %v9819_v12, %v9827_v45  ;;  %v15171_v58 = vcombine.high %v10075_v56, %v10083_v36  ;;  %v9732_v7 = vld [vmem:[%s21737_s26 + $0x1d0] sm:$0xff] }
 0x79b   : > { %v9980_v41 = vld [vmem:[%s21737_s26 + $0x990] sm:$0xff] }
 0x79d   : > { %12927 = vmatpush1.bf16.msra.mxu0 %v14770_v5  ;;  %12968 = vmatpush1.bf16.msra.mxu1 %v15026_v57  ;;  %v10067_v5 = vld [vmem:[%s21737_s26 + $0xc48] sm:$0xff]  ;;  %v14914_v57 = vcombine.low %v9819_v12, %v9827_v45  ;;  %v9708_v45 = vld [vmem:[%s21737_s26 + $0x110] sm:$0xff] }
 0x79e   : > { %12928 = vmatprep.subr.bf16.mxu0 %v15011_v62  ;;  %12969 = vmatprep.subr.bf16.mxu1 %v15267_v3  ;;  %v15170_v62 = vcombine.low %v10075_v56, %v10083_v36  ;;  %v14899_v3 = vcombine.high %v9803_v51, %v9811_v60  ;;  %v15155_v61 = vcombine.high %v10059_v0, %v10067_v5  ;;  %v9716_v56 = vld [vmem:[%s21737_s26 + $0x150] sm:$0xff] }
 0x79f   : > { %v9964_v36 = vld [vmem:[%s21737_s26 + $0x910] sm:$0xff] }
 0x7a1   : > { %12929 = vmatpush2.bf16.msra.mxu0 %v15010_v29  ;;  %12970 = vmatpush2.bf16.msra.mxu1 %v15266_v38  ;;  %v10052_v29 = vld [vmem:[%s21737_s26 + $0xbd0] sm:$0xff]  ;;  %v14898_v38 = vcombine.low %v9803_v51, %v9811_v60 }
 0x7a2   : > { %12930 = vmatprep.subr.bf16.mxu0 %v14995_v33  ;;  %12971 = vmatprep.subr.bf16.mxu1 %v15251_v20  ;;  %v15154_v33 = vcombine.low %v10059_v0, %v10067_v5  ;;  %v14885_v20 = vcombine.high %v9788_v49, %v9796_v13  ;;  %v15141_v14 = vcombine.high %v10044_v18, %v10052_v29  ;;  %v9692_v60 = vld [vmem:[%s21737_s26 + $0x90] sm:$0xff] }
 0x7a3   : > { %v9700_v0 = vld [vmem:[%s21737_s26 + $0xd0] sm:$0xff] }
 0x7a4   : > { %v9948_v5 = vld [vmem:[%s21737_s26 + $0x890] sm:$0xff] }
 0x7a5   : > { %12931 = vmatpush2.bf16.msra.mxu0 %v14994_v2  ;;  %12972 = vmatpush2.bf16.msra.mxu1 %v15250_v52  ;;  %v10036_v2 = vld [vmem:[%s21737_s26 + $0xb50] sm:$0xff]  ;;  %v14884_v52 = vcombine.low %v9788_v49, %v9796_v13 }
 0x7a6   : > { %12932 = vmatprep.subr.bf16.mxu0 %v14979_v1  ;;  %12973 = vmatprep.subr.bf16.mxu1 %v15235_v50  ;;  %v15140_v1 = vcombine.low %v10044_v18, %v10052_v29  ;;  %v14869_v50 = vcombine.high %v9772_v28, %v9780_v15  ;;  %v15125_v26 = vcombine.high %v10028_v22, %v10036_v2  ;;  %v9676_v13 = vld [vmem:[%s21737_s26 + $0x10] sm:$0xff] }
 0x7a7   : > { %v9684_v18 = vld [vmem:[%s21737_s26 + $0x50] sm:$0xff] }
 0x7a8   : > { %v9932_v29 = vld [vmem:[%s21737_s26 + $0x810] sm:$0xff] }
 0x7a9   : > { %12933 = vmatpush2.bf16.msra.mxu0 %v14978_v46  ;;  %12974 = vmatpush2.bf16.msra.mxu1 %v15234_v39  ;;  %v10020_v46 = vld [vmem:[%s21737_s26 + $0xad0] sm:$0xff]  ;;  %v14868_v39 = vcombine.low %v9772_v28, %v9780_v15 }
 0x7aa   : > { %12934 = vmatprep.subr.bf16.mxu0 %v14963_v63  ;;  %12975 = vmatprep.subr.bf16.mxu1 %v15219_v31  ;;  %v15124_v63 = vcombine.low %v10028_v22, %v10036_v2  ;;  %v14853_v31 = vcombine.high %v9756_v6, %v9764_v40  ;;  %v15109_v55 = vcombine.high %v10012_v17, %v10020_v46  ;;  %v9916_v15 = vld [vmem:[%s21737_s26 + $0x790] sm:$0xff] }
 0x7ab   : > { %v9924_v22 = vld [vmem:[%s21737_s26 + $0x7d0] sm:$0xff] }
 0x7ac   : > { %v10172_v2 = vld [vmem:[%s21737_s26 + $0xf90] sm:$0xff] }
 0x7ad   : > { %12935 = vmatpush2.bf16.msra.mxu0 %v14962_v54  ;;  %12976 = vmatpush2.bf16.msra.mxu1 %v15218_v35  ;;  %v10004_v54 = vld [vmem:[%s21737_s26 + $0xa50] sm:$0xff]  ;;  %v14852_v35 = vcombine.low %v9756_v6, %v9764_v40 }
 0x7ae   : > { %12936 = vmatprep.subr.bf16.mxu0 %v14947_v59  ;;  %12977 = vmatprep.subr.bf16.mxu1 %v15203_v11  ;;  %v15108_v59 = vcombine.low %v10012_v17, %v10020_v46  ;;  %v14837_v11 = vcombine.high %v9740_v24, %v9748_v9  ;;  %v15093_v34 = vcombine.high %v9996_v23, %v10004_v54  ;;  %v9900_v40 = vld [vmem:[%s21737_s26 + $0x710] sm:$0xff] }
 0x7af   : > { %v9908_v17 = vld [vmem:[%s21737_s26 + $0x750] sm:$0xff] }
 0x7b0   : > { %v10156_v46 = vld [vmem:[%s21737_s26 + $0xf10] sm:$0xff] }
 0x7b1   : > { %12937 = vmatpush2.bf16.msra.mxu0 %v14946_v43  ;;  %12978 = vmatpush2.bf16.msra.mxu1 %v15202_v25  ;;  %v9988_v43 = vld [vmem:[%s21737_s26 + $0x9d0] sm:$0xff]  ;;  %v14836_v25 = vcombine.low %v9740_v24, %v9748_v9 }
 0x7b2   : > { %12938 = vmatprep.subr.bf16.mxu0 %v14931_v4  ;;  %12979 = vmatprep.subr.bf16.mxu1 %v15187_v27  ;;  %v15092_v4 = vcombine.low %v9996_v23, %v10004_v54  ;;  %v14821_v27 = vcombine.high %v9724_v47, %v9732_v7  ;;  %v15077_v12 = vcombine.high %v9980_v41, %v9988_v43  ;;  %v9884_v9 = vld [vmem:[%s21737_s26 + $0x690] sm:$0xff] }
 0x7b3   : > { %v9892_v23 = vld [vmem:[%s21737_s26 + $0x6d0] sm:$0xff] }
 0x7b4   : > { %v10140_v54 = vld [vmem:[%s21737_s26 + $0xe90] sm:$0xff] }
 0x7b5   : > { %12939 = vmatpush2.bf16.msra.mxu0 %v14930_v37  ;;  %12980 = vmatpush2.bf16.msra.mxu1 %v15186_v32  ;;  %v9972_v37 = vld [vmem:[%s21737_s26 + $0x950] sm:$0xff]  ;;  %v14820_v32 = vcombine.low %v9724_v47, %v9732_v7 }
 0x7b6   : > { %12940 = vmatprep.subr.bf16.mxu0 %v14915_v44  ;;  %12981 = vmatprep.subr.bf16.mxu1 %v15171_v58  ;;  %v15076_v44 = vcombine.low %v9980_v41, %v9988_v43  ;;  %v14805_v58 = vcombine.high %v9708_v45, %v9716_v56  ;;  %v15061_v51 = vcombine.high %v9964_v36, %v9972_v37  ;;  %v9868_v7 = vld [vmem:[%s21737_s26 + $0x610] sm:$0xff] }
 0x7b7   : > { %v9876_v41 = vld [vmem:[%s21737_s26 + $0x650] sm:$0xff] }
 0x7b8   : > { %v10124_v43 = vld [vmem:[%s21737_s26 + $0xe10] sm:$0xff] }
 0x7b9   : > { %12941 = vmatpush2.bf16.msra.mxu0 %v14914_v57  ;;  %12982 = vmatpush2.bf16.msra.mxu1 %v15170_v62  ;;  %v9956_v57 = vld [vmem:[%s21737_s26 + $0x8d0] sm:$0xff]  ;;  %v14804_v62 = vcombine.low %v9708_v45, %v9716_v56 }
 0x7ba   : > { %12942 = vmatprep.subr.bf16.mxu0 %v14899_v3  ;;  %12983 = vmatprep.subr.bf16.mxu1 %v15155_v61  ;;  %v15060_v3 = vcombine.low %v9964_v36, %v9972_v37  ;;  %v14789_v61 = vcombine.high %v9692_v60, %v9700_v0  ;;  %v15045_v49 = vcombine.high %v9948_v5, %v9956_v57  ;;  %v9852_v56 = vld [vmem:[%s21737_s26 + $0x590] sm:$0xff] }
 0x7bb   : > { %v9860_v36 = vld [vmem:[%s21737_s26 + $0x5d0] sm:$0xff] }
 0x7bc   : > { %v10108_v37 = vld [vmem:[%s21737_s26 + $0xd90] sm:$0xff] }
 0x7bd   : > { %12943 = vmatpush2.bf16.msra.mxu0 %v14898_v38  ;;  %12984 = vmatpush2.bf16.msra.mxu1 %v15154_v33  ;;  %v9940_v38 = vld [vmem:[%s21737_s26 + $0x850] sm:$0xff]  ;;  %v14788_v33 = vcombine.low %v9692_v60, %v9700_v0 }
 0x7be   : > { %12994 = vmatprep.subr.bf16.mxu0 %v14885_v20  ;;  %13035 = vmatprep.subr.bf16.mxu1 %v15141_v14  ;;  %v15044_v20 = vcombine.low %v9948_v5, %v9956_v57  ;;  %v14773_v14 = vcombine.high %v9676_v13, %v9684_v18  ;;  %v15029_v28 = vcombine.high %v9932_v29, %v9940_v38  ;;  %v9836_v0 = vld [vmem:[%s21737_s26 + $0x510] sm:$0xff] }
 0x7bf   : > { %v9844_v5 = vld [vmem:[%s21737_s26 + $0x550] sm:$0xff] }
 0x7c0   : > { %12945 = vmatmul.mubr.bf16.vlgmr.msra.gmra.mxu0 %v21825_v53  ;;  %12986 = vmatmul.mubr.bf16.vlgmr.msra.gmra.mxu1 %v21827_v10  ;;  %v10092_v57 = vld [vmem:[%s21737_s26 + $0xd10] sm:$0xff] }
 0x7c1   : > { %12995 = vmatpush1.bf16.msra.mxu0 %v14884_v52  ;;  %13026 = vmatprep.mubr.bf16.mxu0 %v21821_v19  ;;  %v10180_v52 = vld [vmem:[%s21737_s26 + $0xfd0] sm:$0xff] }
 0x7c2   : > { %13036 = vmatpush1.bf16.msra.mxu1 %v15140_v1  ;;  %13067 = vmatprep.mubr.bf16.mxu1 %v21823_v30  ;;  %v14772_v1 = vcombine.low %v9676_v13, %v9684_v18  ;;  %v15269_v6 = vcombine.high %v10172_v2, %v10180_v52  ;;  %v9820_v18 = vld [vmem:[%s21737_s26 + $0x490] sm:$0xff] }
 0x7c3   : > { %12996 = vmatprep.subr.bf16.mxu0 %v14869_v50  ;;  %13037 = vmatprep.subr.bf16.mxu1 %v15125_v26  ;;  %v15028_v50 = vcombine.low %v9932_v29, %v9940_v38  ;;  %v15013_v26 = vcombine.high %v9916_v15, %v9924_v22  ;;  %v9828_v29 = vld [vmem:[%s21737_s26 + $0x4d0] sm:$0xff] }
 0x7c4   : > { %v10076_v38 = vld [vmem:[%s21737_s26 + $0xc90] sm:$0xff] }
 0x7c5   : > { %12997 = vmatpush1.bf16.msra.mxu0 %v14868_v39  ;;  %v10164_v39 = vld [vmem:[%s21737_s26 + $0xf50] sm:$0xff] }
 0x7c6   : > { %13038 = vmatpush1.bf16.msra.mxu1 %v15124_v63  ;;  %12998 = vmatprep.subr.bf16.mxu0 %v14853_v31  ;;  %v15012_v63 = vcombine.low %v9916_v15, %v9924_v22  ;;  %v15268_v31 = vcombine.low %v10172_v2, %v10180_v52  ;;  %v15253_v24 = vcombine.high %v10156_v46, %v10164_v39  ;;  %v9804_v22 = vld [vmem:[%s21737_s26 + $0x410] sm:$0xff] }
 0x7c7   : > { %13039 = vmatprep.subr.bf16.mxu1 %v15109_v55  ;;  %v14997_v55 = vcombine.high %v9900_v40, %v9908_v17  ;;  %v9812_v2 = vld [vmem:[%s21737_s26 + $0x450] sm:$0xff] }
 0x7c8   : > { %v10060_v52 = vld [vmem:[%s21737_s26 + $0xc10] sm:$0xff] }
 0x7c9   : > { %12999 = vmatpush1.bf16.msra.mxu0 %v14852_v35  ;;  %v10148_v35 = vld [vmem:[%s21737_s26 + $0xed0] sm:$0xff] }
 0x7ca   : > { %13040 = vmatpush1.bf16.msra.mxu1 %v15108_v59  ;;  %13000 = vmatprep.subr.bf16.mxu0 %v14837_v11  ;;  %v14996_v59 = vcombine.low %v9900_v40, %v9908_v17  ;;  %v15252_v11 = vcombine.low %v10156_v46, %v10164_v39  ;;  %v15237_v47 = vcombine.high %v10140_v54, %v10148_v35  ;;  %v9789_v17 = vld [vmem:[%s21737_s26 + $0x398] sm:$0xff] }
 0x7cb   : > { %13041 = vmatprep.subr.bf16.mxu1 %v15093_v34  ;;  %v14981_v34 = vcombine.high %v9884_v9, %v9892_v23  ;;  %v9797_v46 = vld [vmem:[%s21737_s26 + $0x3d8] sm:$0xff] }
 0x7cc   : > { %v10045_v39 = vld [vmem:[%s21737_s26 + $0xb98] sm:$0xff] }
 0x7cd   : > { %13001 = vmatpush1.bf16.msra.mxu0 %v14836_v25  ;;  %v10132_v25 = vld [vmem:[%s21737_s26 + $0xe50] sm:$0xff] }
 0x7ce   : > { %13042 = vmatpush1.bf16.msra.mxu1 %v15092_v4  ;;  %13002 = vmatprep.subr.bf16.mxu0 %v14821_v27  ;;  %v14980_v4 = vcombine.low %v9884_v9, %v9892_v23  ;;  %v15236_v27 = vcombine.low %v10140_v54, %v10148_v35  ;;  %v15221_v45 = vcombine.high %v10124_v43, %v10132_v25  ;;  %v9773_v23 = vld [vmem:[%s21737_s26 + $0x318] sm:$0xff] }
 0x7cf   : > { %13043 = vmatprep.subr.bf16.mxu1 %v15077_v12  ;;  %v14965_v12 = vcombine.high %v9868_v7, %v9876_v41  ;;  %v9781_v54 = vld [vmem:[%s21737_s26 + $0x358] sm:$0xff]  ;;  %v14886_v35 = vcombine.low %v9789_v17, %v9797_v46 }
 0x7d1   : > { %13003 = vmatpush1.bf16.msra.mxu0 %v14820_v32  ;;  %v10116_v32 = vld [vmem:[%s21737_s26 + $0xdd0] sm:$0xff] }
 0x7d2   : > { %13044 = vmatpush1.bf16.msra.mxu1 %v15076_v44  ;;  %13004 = vmatprep.subr.bf16.mxu0 %v14805_v58  ;;  %v14964_v44 = vcombine.low %v9868_v7, %v9876_v41  ;;  %v15220_v58 = vcombine.low %v10124_v43, %v10132_v25  ;;  %v15205_v60 = vcombine.high %v10108_v37, %v10116_v32  ;;  %v9757_v7 = vld [vmem:[%s21737_s26 + $0x298] sm:$0xff] }
 0x7d3   : > { %13045 = vmatprep.subr.bf16.mxu1 %v15061_v51  ;;  %v14949_v51 = vcombine.high %v9852_v56, %v9860_v36  ;;  %v9765_v41 = vld [vmem:[%s21737_s26 + $0x2d8] sm:$0xff] }
 0x7d4   : > { %v10013_v25 = vld [vmem:[%s21737_s26 + $0xa98] sm:$0xff] }
 0x7d5   : > { %13005 = vmatpush1.bf16.msra.mxu0 %v14804_v62  ;;  %v10100_v62 = vld [vmem:[%s21737_s26 + $0xd50] sm:$0xff] }
 0x7d6   : > { %13046 = vmatpush1.bf16.msra.mxu1 %v15060_v3  ;;  %13006 = vmatprep.subr.bf16.mxu0 %v14789_v61  ;;  %v14948_v3 = vcombine.low %v9852_v56, %v9860_v36  ;;  %v15204_v61 = vcombine.low %v10108_v37, %v10116_v32  ;;  %v15189_v13 = vcombine.high %v10092_v57, %v10100_v62  ;;  %v9741_v36 = vld [vmem:[%s21737_s26 + $0x218] sm:$0xff] }
 0x7d7   : > { %13047 = vmatprep.subr.bf16.mxu1 %v15045_v49  ;;  %v14933_v49 = vcombine.high %v9836_v0, %v9844_v5  ;;  %v9749_v37 = vld [vmem:[%s21737_s26 + $0x258] sm:$0xff] }
 0x7d8   : > { %v9997_v32 = vld [vmem:[%s21737_s26 + $0xa18] sm:$0xff] }
 0x7d9   : > { %13007 = vmatpush1.bf16.msra.mxu0 %v14788_v33  ;;  %v10084_v33 = vld [vmem:[%s21737_s26 + $0xcd0] sm:$0xff] }
 0x7da   : > { %13048 = vmatpush1.bf16.msra.mxu1 %v15044_v20  ;;  %13008 = vmatprep.subr.bf16.mxu0 %v14773_v14  ;;  %v14932_v20 = vcombine.low %v9836_v0, %v9844_v5  ;;  %v15188_v14 = vcombine.low %v10092_v57, %v10100_v62  ;;  %v15173_v15 = vcombine.high %v10076_v38, %v10084_v33  ;;  %v9725_v5 = vld [vmem:[%s21737_s26 + $0x198] sm:$0xff] }
 0x7db   : > { %13049 = vmatprep.subr.bf16.mxu1 %v15029_v28  ;;  %v14917_v28 = vcombine.high %v9820_v18, %v9828_v29  ;;  %v9733_v57 = vld [vmem:[%s21737_s26 + $0x1d8] sm:$0xff] }
 0x7dc   : > { %v9981_v62 = vld [vmem:[%s21737_s26 + $0x998] sm:$0xff] }
 0x7dd   : > { %13009 = vmatpush1.bf16.msra.mxu0 %v14772_v1  ;;  %v10068_v1 = vld [vmem:[%s21737_s26 + $0xc50] sm:$0xff] }
 0x7de   : > { %13050 = vmatpush1.bf16.msra.mxu1 %v15028_v50  ;;  %13010 = vmatprep.subr.bf16.mxu0 %v15013_v26  ;;  %v14916_v50 = vcombine.low %v9820_v18, %v9828_v29  ;;  %v15172_v26 = vcombine.low %v10076_v38, %v10084_v33  ;;  %v15157_v40 = vcombine.high %v10060_v52, %v10068_v1  ;;  %v9709_v29 = vld [vmem:[%s21737_s26 + $0x118] sm:$0xff] }
 0x7df   : > { %13051 = vmatprep.subr.bf16.mxu1 %v15269_v6  ;;  %v14901_v6 = vcombine.high %v9804_v22, %v9812_v2  ;;  %v9717_v38 = vld [vmem:[%s21737_s26 + $0x158] sm:$0xff] }
 0x7e0   : > { %v9965_v33 = vld [vmem:[%s21737_s26 + $0x918] sm:$0xff] }
 0x7e1   : > { %13011 = vmatpush2.bf16.msra.mxu0 %v15012_v63  ;;  %v10053_v63 = vld [vmem:[%s21737_s26 + $0xbd8] sm:$0xff] }
 0x7e2   : > { %13052 = vmatpush2.bf16.msra.mxu1 %v15268_v31  ;;  %13012 = vmatprep.subr.bf16.mxu0 %v14997_v55  ;;  %v14900_v31 = vcombine.low %v9804_v22, %v9812_v2  ;;  %v15156_v55 = vcombine.low %v10060_v52, %v10068_v1  ;;  %v15143_v9 = vcombine.high %v10045_v39, %v10053_v63  ;;  %v9693_v2 = vld [vmem:[%s21737_s26 + $0x98] sm:$0xff] }
 0x7e3   : > { %13053 = vmatprep.subr.bf16.mxu1 %v15253_v24  ;;  %v14887_v24 = vcombine.high %v9789_v17, %v9797_v46  ;;  %v9701_v52 = vld [vmem:[%s21737_s26 + $0xd8] sm:$0xff] }
 0x7e4   : > { %v9949_v1 = vld [vmem:[%s21737_s26 + $0x898] sm:$0xff] }
 0x7e5   : > { %13013 = vmatpush2.bf16.msra.mxu0 %v14996_v59  ;;  %v10029_v59 = vld [vmem:[%s21737_s26 + $0xb18] sm:$0xff] }
 0x7e6   : > { %13054 = vmatpush2.bf16.msra.mxu1 %v15252_v11  ;;  %13014 = vmatprep.subr.bf16.mxu0 %v14981_v34  ;;  %v10037_v11 = vld [vmem:[%s21737_s26 + $0xb58] sm:$0xff]  ;;  %v15142_v34 = vcombine.low %v10045_v39, %v10053_v63 }
 0x7e7   : > { %13055 = vmatprep.subr.bf16.mxu1 %v15237_v47  ;;  %v14871_v47 = vcombine.high %v9773_v23, %v9781_v54  ;;  %v15127_v43 = vcombine.high %v10029_v59, %v10037_v11  ;;  %v9677_v46 = vld [vmem:[%s21737_s26 + $0x18] sm:$0xff] }
 0x7e8   : > { %v9685_v39 = vld [vmem:[%s21737_s26 + $0x58] sm:$0xff] }
 0x7e9   : > { %13015 = vmatpush2.bf16.msra.mxu0 %v14980_v4  ;;  %v10021_v4 = vld [vmem:[%s21737_s26 + $0xad8] sm:$0xff] }
 0x7ea   : > { %13056 = vmatpush2.bf16.msra.mxu1 %v15236_v27  ;;  %13016 = vmatprep.subr.bf16.mxu0 %v14965_v12  ;;  %v14870_v27 = vcombine.low %v9773_v23, %v9781_v54  ;;  %v15126_v12 = vcombine.low %v10029_v59, %v10037_v11  ;;  %v15111_v56 = vcombine.high %v10013_v25, %v10021_v4  ;;  %v9933_v63 = vld [vmem:[%s21737_s26 + $0x818] sm:$0xff] }
 0x7eb   : > { %13057 = vmatprep.subr.bf16.mxu1 %v15221_v45  ;;  %v14855_v45 = vcombine.high %v9757_v7, %v9765_v41  ;;  %v9917_v54 = vld [vmem:[%s21737_s26 + $0x798] sm:$0xff] }
 0x7ec   : > { %v10173_v59 = vld [vmem:[%s21737_s26 + $0xf98] sm:$0xff] }
 0x7ed   : > { %13017 = vmatpush2.bf16.msra.mxu0 %v14964_v44  ;;  %v10005_v44 = vld [vmem:[%s21737_s26 + $0xa58] sm:$0xff] }
 0x7ee   : > { %13058 = vmatpush2.bf16.msra.mxu1 %v15220_v58  ;;  %13018 = vmatprep.subr.bf16.mxu0 %v14949_v51  ;;  %v14854_v58 = vcombine.low %v9757_v7, %v9765_v41  ;;  %v15110_v51 = vcombine.low %v10013_v25, %v10021_v4  ;;  %v15095_v0 = vcombine.high %v9997_v32, %v10005_v44  ;;  %v10181_v11 = vld [vmem:[%s21737_s26 + $0xfd8] sm:$0xff] }
 0x7ef   : > { %13059 = vmatprep.subr.bf16.mxu1 %v15205_v60  ;;  %v14839_v60 = vcombine.high %v9741_v36, %v9749_v37  ;;  %v15271_v41 = vcombine.high %v10173_v59, %v10181_v11  ;;  %v9909_v25 = vld [vmem:[%s21737_s26 + $0x758] sm:$0xff] }
 0x7f0   : > { %v10157_v4 = vld [vmem:[%s21737_s26 + $0xf18] sm:$0xff] }
 0x7f1   : > { %13019 = vmatpush2.bf16.msra.mxu0 %v14948_v3  ;;  %v9989_v3 = vld [vmem:[%s21737_s26 + $0x9d8] sm:$0xff] }
 0x7f2   : > { %13060 = vmatpush2.bf16.msra.mxu1 %v15204_v61  ;;  %13020 = vmatprep.subr.bf16.mxu0 %v14933_v49  ;;  %v14838_v61 = vcombine.low %v9741_v36, %v9749_v37  ;;  %v15094_v49 = vcombine.low %v9997_v32, %v10005_v44  ;;  %v15079_v18 = vcombine.high %v9981_v62, %v9989_v3  ;;  %v9885_v37 = vld [vmem:[%s21737_s26 + $0x698] sm:$0xff] }
 0x7f3   : > { %13061 = vmatprep.subr.bf16.mxu1 %v15189_v13  ;;  %v14823_v13 = vcombine.high %v9725_v5, %v9733_v57  ;;  %v9893_v32 = vld [vmem:[%s21737_s26 + $0x6d8] sm:$0xff] }
 0x7f4   : > { %v10141_v44 = vld [vmem:[%s21737_s26 + $0xe98] sm:$0xff] }
 0x7f5   : > { %13021 = vmatpush2.bf16.msra.mxu0 %v14932_v20  ;;  %v9973_v20 = vld [vmem:[%s21737_s26 + $0x958] sm:$0xff] }
 0x7f6   : > { %13062 = vmatpush2.bf16.msra.mxu1 %v15188_v14  ;;  %13022 = vmatprep.subr.bf16.mxu0 %v14917_v28  ;;  %v14822_v14 = vcombine.low %v9725_v5, %v9733_v57  ;;  %v15078_v28 = vcombine.low %v9981_v62, %v9989_v3  ;;  %v15063_v22 = vcombine.high %v9965_v33, %v9973_v20  ;;  %v9869_v57 = vld [vmem:[%s21737_s26 + $0x618] sm:$0xff] }
 0x7f7   : > { %13063 = vmatprep.subr.bf16.mxu1 %v15173_v15  ;;  %v14807_v15 = vcombine.high %v9709_v29, %v9717_v38  ;;  %v9877_v62 = vld [vmem:[%s21737_s26 + $0x658] sm:$0xff] }
 0x7f8   : > { %v10125_v3 = vld [vmem:[%s21737_s26 + $0xe18] sm:$0xff] }
 0x7f9   : > { %13023 = vmatpush2.bf16.msra.mxu0 %v14916_v50  ;;  %v9957_v50 = vld [vmem:[%s21737_s26 + $0x8d8] sm:$0xff] }
 0x7fa   : > { %13064 = vmatpush2.bf16.msra.mxu1 %v15172_v26  ;;  %13024 = vmatprep.subr.bf16.mxu0 %v14901_v6  ;;  %v14806_v26 = vcombine.low %v9709_v29, %v9717_v38  ;;  %v15062_v6 = vcombine.low %v9965_v33, %v9973_v20  ;;  %v15047_v17 = vcombine.high %v9949_v1, %v9957_v50  ;;  %v9853_v38 = vld [vmem:[%s21737_s26 + $0x598] sm:$0xff] }
 0x7fb   : > { %13065 = vmatprep.subr.bf16.mxu1 %v15157_v40  ;;  %v14791_v40 = vcombine.high %v9693_v2, %v9701_v52  ;;  %v9861_v33 = vld [vmem:[%s21737_s26 + $0x5d8] sm:$0xff] }
 0x7fc   : > { %v10109_v20 = vld [vmem:[%s21737_s26 + $0xd98] sm:$0xff] }
 0x7fd   : > { %13025 = vmatpush2.bf16.msra.mxu0 %v14900_v31  ;;  %v9941_v31 = vld [vmem:[%s21737_s26 + $0x858] sm:$0xff] }
 0x7fe   : > { %13066 = vmatpush2.bf16.msra.mxu1 %v15156_v55  ;;  %13076 = vmatprep.subr.bf16.mxu0 %v14887_v24  ;;  %v14790_v55 = vcombine.low %v9693_v2, %v9701_v52  ;;  %v15046_v24 = vcombine.low %v9949_v1, %v9957_v50  ;;  %v15031_v23 = vcombine.high %v9933_v63, %v9941_v31  ;;  %v9837_v52 = vld [vmem:[%s21737_s26 + $0x518] sm:$0xff] }
 0x7ff   : > { %13117 = vmatprep.subr.bf16.mxu1 %v15143_v9  ;;  %v14775_v9 = vcombine.high %v9677_v46, %v9685_v39  ;;  %v9845_v1 = vld [vmem:[%s21737_s26 + $0x558] sm:$0xff] }
 0x800   : > { %13027 = vmatmul.mubr.bf16.vlgmr.msra.gmra.mxu0 %v21825_v53  ;;  %v10093_v50 = vld [vmem:[%s21737_s26 + $0xd18] sm:$0xff] }
 0x801   : > { %13068 = vmatmul.mubr.bf16.vlgmr.msra.gmra.mxu1 %v21827_v10  ;;  %13077 = vmatpush1.bf16.msra.mxu0 %v14886_v35  ;;  %v9925_v35 = vld [vmem:[%s21737_s26 + $0x7d8] sm:$0xff] }
 0x802   : > { %13108 = vmatprep.mubr.bf16.mxu0 %v21821_v19  ;;  %13118 = vmatpush1.bf16.msra.mxu1 %v15142_v34  ;;  %v14774_v34 = vcombine.low %v9677_v46, %v9685_v39  ;;  %v15015_v7 = vcombine.high %v9917_v54, %v9925_v35  ;;  %v9821_v39 = vld [vmem:[%s21737_s26 + $0x498] sm:$0xff] }
 0x803   : > { %13149 = vmatprep.mubr.bf16.mxu1 %v21823_v30  ;;  %13078 = vmatprep.subr.bf16.mxu0 %v14871_v47  ;;  %v15030_v47 = vcombine.low %v9933_v63, %v9941_v31  ;;  %v9829_v63 = vld [vmem:[%s21737_s26 + $0x4d8] sm:$0xff] }
 0x804   : > { %13119 = vmatprep.subr.bf16.mxu1 %v15127_v43  ;;  %v9901_v43 = vld [vmem:[%s21737_s26 + $0x718] sm:$0xff] }
 0x805   : > { %13079 = vmatpush1.bf16.msra.mxu0 %v14870_v27  ;;  %v10165_v27 = vld [vmem:[%s21737_s26 + $0xf58] sm:$0xff] }
 0x806   : > { %13120 = vmatpush1.bf16.msra.mxu1 %v15126_v12  ;;  %13080 = vmatprep.subr.bf16.mxu0 %v14855_v45  ;;  %v15014_v12 = vcombine.low %v9917_v54, %v9925_v35  ;;  %v15270_v45 = vcombine.low %v10173_v59, %v10181_v11  ;;  %v15255_v36 = vcombine.high %v10157_v4, %v10165_v27  ;;  %v10077_v31 = vld [vmem:[%s21737_s26 + $0xc98] sm:$0xff] }
 0x807   : > { %13121 = vmatprep.subr.bf16.mxu1 %v15111_v56  ;;  %v14999_v56 = vcombine.high %v9901_v43, %v9909_v25  ;;  %v9805_v35 = vld [vmem:[%s21737_s26 + $0x418] sm:$0xff] }
 0x808   : > { %v9813_v59 = vld [vmem:[%s21737_s26 + $0x458] sm:$0xff] }
 0x809   : > { %13081 = vmatpush1.bf16.msra.mxu0 %v14854_v58  ;;  %v10149_v58 = vld [vmem:[%s21737_s26 + $0xed8] sm:$0xff] }
 0x80a   : > { %13122 = vmatpush1.bf16.msra.mxu1 %v15110_v51  ;;  %13082 = vmatprep.subr.bf16.mxu0 %v14839_v60  ;;  %v14998_v51 = vcombine.low %v9901_v43, %v9909_v25  ;;  %v15254_v60 = vcombine.low %v10157_v4, %v10165_v27  ;;  %v15239_v5 = vcombine.high %v10141_v44, %v10149_v58  ;;  %v10061_v11 = vld [vmem:[%s21737_s26 + $0xc18] sm:$0xff]  ;;  %v9790_v25 = vld [vmem:[%s21737_s26 + $0x3a0] sm:$0xff] }
 0x80b   : > { %13123 = vmatprep.subr.bf16.mxu1 %v15095_v0  ;;  %v14983_v0 = vcombine.high %v9885_v37, %v9893_v32  ;;  %v9798_v4 = vld [vmem:[%s21737_s26 + $0x3e0] sm:$0xff] }
 0x80c   : > { %v10046_v27 = vld [vmem:[%s21737_s26 + $0xba0] sm:$0xff] }
 0x80d   : > { %13083 = vmatpush1.bf16.msra.mxu0 %v14838_v61  ;;  %v10133_v61 = vld [vmem:[%s21737_s26 + $0xe58] sm:$0xff] }
 0x80e   : > { %13124 = vmatpush1.bf16.msra.mxu1 %v15094_v49  ;;  %13084 = vmatprep.subr.bf16.mxu0 %v14823_v13  ;;  %v14982_v49 = vcombine.low %v9885_v37, %v9893_v32  ;;  %v15238_v13 = vcombine.low %v10141_v44, %v10149_v58  ;;  %v15223_v29 = vcombine.high %v10125_v3, %v10133_v61  ;;  %v22038_v37 = vld [vmem:[%s22033_s22] sm:$0xff] }
 0x80f   : > { %13125 = vmatprep.subr.bf16.mxu1 %v15079_v18  ;;  %v14967_v18 = vcombine.high %v9869_v57, %v9877_v62  ;;  %v9774_v44 = vld [vmem:[%s21737_s26 + $0x320] sm:$0xff] }
 0x810   : > { %v9782_v58 = vld [vmem:[%s21737_s26 + $0x360] sm:$0xff] }
 0x811   : > { %13085 = vmatpush1.bf16.msra.mxu0 %v14822_v14  ;;  %v10117_v14 = vld [vmem:[%s21737_s26 + $0xdd8] sm:$0xff] }
 0x812   : > { %13126 = vmatpush1.bf16.msra.mxu1 %v15078_v28  ;;  %13086 = vmatprep.subr.bf16.mxu0 %v14807_v15  ;;  %v14966_v28 = vcombine.low %v9869_v57, %v9877_v62  ;;  %v15222_v15 = vcombine.low %v10125_v3, %v10133_v61  ;;  %v15207_v2 = vcombine.high %v10109_v20, %v10117_v14  ;;  %v9758_v61 = vld [vmem:[%s21737_s26 + $0x2a0] sm:$0xff] }
 0x813   : > { %13127 = vmatprep.subr.bf16.mxu1 %v15063_v22  ;;  %v14951_v22 = vcombine.high %v9853_v38, %v9861_v33  ;;  %v10197_v62 = vrot.slane %v22038_v37, %v19065_v21  ;;  %v14873_v3 = vcombine.high %v9774_v44, %v9782_v58 }
 0x815   : > { %13087 = vmatpush1.bf16.msra.mxu0 %v14806_v26  ;;  %v10101_v26 = vld [vmem:[%s21737_s26 + $0xd58] sm:$0xff] }
 0x816   : > { %13128 = vmatpush1.bf16.msra.mxu1 %v15062_v6  ;;  %13088 = vmatprep.subr.bf16.mxu0 %v14791_v40  ;;  %v14950_v6 = vcombine.low %v9853_v38, %v9861_v33  ;;  %v15206_v40 = vcombine.low %v10109_v20, %v10117_v14  ;;  %v15191_v46 = vcombine.high %v10093_v50, %v10101_v26  ;;  %v10014_v38 = vld [vmem:[%s21737_s26 + $0xaa0] sm:$0xff] }
 0x817   : > { %13129 = vmatprep.subr.bf16.mxu1 %v15047_v17  ;;  %v14935_v17 = vcombine.high %v9837_v52, %v9845_v1  ;;  %v10022_v33 = vld [vmem:[%s21737_s26 + $0xae0] sm:$0xff]  ;;  %v14872_v14 = vcombine.low %v9774_v44, %v9782_v58 }
 0x819   : > { %13089 = vmatpush1.bf16.msra.mxu0 %v14790_v55  ;;  %v10085_v55 = vld [vmem:[%s21737_s26 + $0xcd8] sm:$0xff] }
 0x81a   : > { %13130 = vmatpush1.bf16.msra.mxu1 %v15046_v24  ;;  %13090 = vmatprep.subr.bf16.mxu0 %v14775_v9  ;;  %v14934_v24 = vcombine.low %v9837_v52, %v9845_v1  ;;  %v15190_v9 = vcombine.low %v10093_v50, %v10101_v26  ;;  %v15175_v54 = vcombine.high %v10077_v31, %v10085_v55  ;;  %v9742_v26 = vld [vmem:[%s21737_s26 + $0x220] sm:$0xff] }
 0x81b   : > { %13131 = vmatprep.subr.bf16.mxu1 %v15031_v23  ;;  %v14919_v23 = vcombine.high %v9821_v39, %v9829_v63  ;;  %v15113_v50 = vcombine.high %v10014_v38, %v10022_v33 }
 0x81d   : > { %13091 = vmatpush1.bf16.msra.mxu0 %v14774_v34  ;;  %v10069_v34 = vld [vmem:[%s21737_s26 + $0xc58] sm:$0xff] }
 0x81e   : > { %13132 = vmatpush1.bf16.msra.mxu1 %v15030_v47  ;;  %13092 = vmatprep.subr.bf16.mxu0 %v15015_v7  ;;  %v14918_v47 = vcombine.low %v9821_v39, %v9829_v63  ;;  %v15174_v7 = vcombine.low %v10077_v31, %v10085_v55  ;;  %v15159_v43 = vcombine.high %v10061_v11, %v10069_v34  ;;  %v10006_v39 = vld [vmem:[%s21737_s26 + $0xa60] sm:$0xff] }
 0x81f   : > { %13133 = vmatprep.subr.bf16.mxu1 %v15271_v41  ;;  %v14903_v41 = vcombine.high %v9805_v35, %v9813_v59 }
 0x821   : > { %13093 = vmatpush2.bf16.msra.mxu0 %v15014_v12  ;;  %v10054_v12 = vld [vmem:[%s21737_s26 + $0xbe0] sm:$0xff] }
 0x822   : > { %13134 = vmatpush2.bf16.msra.mxu1 %v15270_v45  ;;  %13094 = vmatprep.subr.bf16.mxu0 %v14999_v56  ;;  %v14902_v45 = vcombine.low %v9805_v35, %v9813_v59  ;;  %v15158_v56 = vcombine.low %v10061_v11, %v10069_v34  ;;  %v15145_v32 = vcombine.high %v10046_v27, %v10054_v12  ;;  %v9726_v11 = vld [vmem:[%s21737_s26 + $0x1a0] sm:$0xff] }
 0x823   : > { %13135 = vmatprep.subr.bf16.mxu1 %v15255_v36  ;;  %v14889_v36 = vcombine.high %v9790_v25, %v9798_v4  ;;  %v15144_v57 = vcombine.low %v10046_v27, %v10054_v12  ;;  %v9734_v34 = vld [vmem:[%s21737_s26 + $0x1e0] sm:$0xff] }
 0x824   : > { %v9710_v12 = vld [vmem:[%s21737_s26 + $0x120] sm:$0xff] }
 0x825   : > { %13095 = vmatpush2.bf16.msra.mxu0 %v14998_v51  ;;  %v14888_v51 = vcombine.low %v9790_v25, %v9798_v4  ;;  %v14825_v4 = vcombine.high %v9726_v11, %v9734_v34 }
 0x826   : > { %13136 = vmatpush2.bf16.msra.mxu1 %v15254_v60  ;;  %13096 = vmatprep.subr.bf16.mxu0 %v14983_v0  ;;  %v10193_v60 = vrot.slane %v22038_v37, %v19056_v16  ;;  %v10030_v0 = vld [vmem:[%s21737_s26 + $0xb20] sm:$0xff] }
 0x827   : > { %13137 = vmatprep.subr.bf16.mxu1 %v15239_v5  ;;  %v10038_v5 = vld [vmem:[%s21737_s26 + $0xb60] sm:$0xff] }
 0x829   : > { %13097 = vmatpush2.bf16.msra.mxu0 %v14982_v49  ;;  %v9766_v49 = vld [vmem:[%s21737_s26 + $0x2e0] sm:$0xff] }
 0x82a   : > { %13138 = vmatpush2.bf16.msra.mxu1 %v15238_v13  ;;  %13098 = vmatprep.subr.bf16.mxu0 %v14967_v18  ;;  %v14856_v31 = vcombine.low %v9758_v61, %v9766_v49 }
 0x82b   : > { %13139 = vmatprep.subr.bf16.mxu1 %v15223_v29  ;;  %v15129_v29 = vcombine.high %v10030_v0, %v10038_v5 }
 0x82d   : > { %13099 = vmatpush2.bf16.msra.mxu0 %v14966_v28 }
 0x82e   : > { %13140 = vmatpush2.bf16.msra.mxu1 %v15222_v15  ;;  %13100 = vmatprep.subr.bf16.mxu0 %v14951_v22  ;;  %v15128_v22 = vcombine.low %v10030_v0, %v10038_v5  ;;  %v9702_v0 = vld [vmem:[%s21737_s26 + $0xe0] sm:$0xff] }
 0x82f   : > { %13141 = vmatprep.subr.bf16.mxu1 %v15207_v2  ;;  %v14857_v2 = vcombine.high %v9758_v61, %v9766_v49  ;;  %v9950_v5 = vld [vmem:[%s21737_s26 + $0x8a0] sm:$0xff] }
 0x831   : > { %13101 = vmatpush2.bf16.msra.mxu0 %v14950_v6  ;;  %v9750_v6 = vld [vmem:[%s21737_s26 + $0x260] sm:$0xff] }
 0x832   : > { %13142 = vmatpush2.bf16.msra.mxu1 %v15206_v40  ;;  %13102 = vmatprep.subr.bf16.mxu0 %v14935_v17 }
 0x833   : > { %13143 = vmatprep.subr.bf16.mxu1 %v15191_v46  ;;  %v9998_v46 = vld [vmem:[%s21737_s26 + $0xa20] sm:$0xff] }
 0x834   : > { %v15097_v59 = vcombine.high %v9998_v46, %v10006_v39  ;;  %v15096_v25 = vcombine.low %v9998_v46, %v10006_v39  ;;  %v10158_v46 = vld [vmem:[%s21737_s26 + $0xf20] sm:$0xff] }
 0x835   : > { %13103 = vmatpush2.bf16.msra.mxu0 %v14934_v24  ;;  %v10166_v39 = vld [vmem:[%s21737_s26 + $0xf60] sm:$0xff] }
 0x836   : > { %13144 = vmatpush2.bf16.msra.mxu1 %v15190_v9  ;;  %13104 = vmatprep.subr.bf16.mxu0 %v14919_v23  ;;  %v15112_v9 = vcombine.low %v10014_v38, %v10022_v33  ;;  %v14841_v23 = vcombine.high %v9742_v26, %v9750_v6  ;;  %v9942_v38 = vld [vmem:[%s21737_s26 + $0x860] sm:$0xff] }
 0x837   : > { %13145 = vmatprep.subr.bf16.mxu1 %v15175_v54 }
 0x839   : > { %13105 = vmatpush2.bf16.msra.mxu0 %v14918_v47  ;;  %v9982_v47 = vld [vmem:[%s21737_s26 + $0x9a0] sm:$0xff] }
 0x83a   : > { %13146 = vmatpush2.bf16.msra.mxu1 %v15174_v7  ;;  %13106 = vmatprep.subr.bf16.mxu0 %v14903_v41  ;;  %v9990_v7 = vld [vmem:[%s21737_s26 + $0x9e0] sm:$0xff] }
 0x83b   : > { %13147 = vmatprep.subr.bf16.mxu1 %v15159_v43  ;;  %v14840_v43 = vcombine.low %v9742_v26, %v9750_v6  ;;  %v15081_v27 = vcombine.high %v9982_v47, %v9990_v7  ;;  %v15080_v44 = vcombine.low %v9982_v47, %v9990_v7  ;;  %v9870_v7 = vld [vmem:[%s21737_s26 + $0x620] sm:$0xff] }
 0x83d   : > { %13107 = vmatpush2.bf16.msra.mxu0 %v14902_v45  ;;  %v9718_v45 = vld [vmem:[%s21737_s26 + $0x160] sm:$0xff] }
 0x83e   : > { %13148 = vmatpush2.bf16.msra.mxu1 %v15158_v56  ;;  %13158 = vmatprep.subr.bf16.mxu0 %v14889_v36  ;;  %v9966_v56 = vld [vmem:[%s21737_s26 + $0x920] sm:$0xff]  ;;  %v14809_v58 = vcombine.high %v9710_v12, %v9718_v45 }
 0x83f   : > { %13199 = vmatprep.subr.bf16.mxu1 %v15145_v32  ;;  %v9974_v36 = vld [vmem:[%s21737_s26 + $0x960] sm:$0xff]  ;;  %v14824_v32 = vcombine.low %v9726_v11, %v9734_v34  ;;  %v15256_v11 = vcombine.low %v10158_v46, %v10166_v39 }
 0x840   : > { %13109 = vmatmul.mubr.bf16.vlgmr.msra.gmra.mxu0 %v21825_v53  ;;  %v12864_v13 = vpop.f32.mrf.mxu0  ;;  %v12905_v18 = vpop.f32.mrf.mxu1 }
 0x841   : > { %13150 = vmatmul.mubr.bf16.vlgmr.msra.gmra.mxu1 %v21827_v10  ;;  %v12865_v20 = vadd.f32 %v12864_v13, %v10193_v60  ;;  %13159 = vmatpush1.bf16.msra.mxu0 %v14888_v51  ;;  %v15065_v51 = vcombine.high %v9966_v56, %v9974_v36  ;;  %v9694_v60 = vld [vmem:[%s21737_s26 + $0xa0] sm:$0xff] }
 0x842   : > { %13190 = vmatprep.mubr.bf16.mxu0 %v21821_v19  ;;  %13200 = vmatpush1.bf16.msra.mxu1 %v15144_v57  ;;  %v12866_v28 = vpop.f32.mrf.mxu0  ;;  %v12907_v15 = vpop.f32.mrf.mxu1  ;;  %v9958_v57 = vld [vmem:[%s21737_s26 + $0x8e0] sm:$0xff]  ;;  %v14793_v61 = vcombine.high %v9694_v60, %v9702_v0  ;;  %v14792_v33 = vcombine.low %v9694_v60, %v9702_v0 }
 0x843   : > { %v12906_v52 = vadd.f32 %v12905_v18, %v12865_v20  ;;  %13231 = vmatprep.mubr.bf16.mxu1 %v21823_v30  ;;  %v12867_v1 = vadd.f32 %v12866_v28, %v10197_v62  ;;  %13160 = vmatprep.subr.bf16.mxu0 %v14873_v3  ;;  %v14808_v62 = vcombine.low %v9710_v12, %v9718_v45  ;;  %v9678_v13 = vld [vmem:[%s21737_s26 + $0x20] sm:$0xff] }
 0x844   : > { %13201 = vmatprep.subr.bf16.mxu1 %v15129_v29  ;;  %v12868_v40 = vpop.f32.mrf.mxu0  ;;  %v12909_v17 = vpop.f32.mrf.mxu1  ;;  %v15064_v3 = vcombine.low %v9966_v56, %v9974_v36  ;;  %v15049_v49 = vcombine.high %v9950_v5, %v9958_v57  ;;  %v9686_v18 = vld [vmem:[%s21737_s26 + $0x60] sm:$0xff]  ;;  %v15048_v20 = vcombine.low %v9950_v5, %v9958_v57 }
 0x845   : > { %v12908_v63 = vadd.f32 %v12907_v15, %v12867_v1  ;;  %13161 = vmatpush1.bf16.msra.mxu0 %v14872_v14  ;;  %v13486_v54 = vmax.f32 %v12906_v52, 0.0  ;;  %v9934_v29 = vld [vmem:[%s21737_s26 + $0x820] sm:$0xff]  ;;  %v14777_v14 = vcombine.high %v9678_v13, %v9686_v18  ;;  %v14776_v1 = vcombine.low %v9678_v13, %v9686_v18 }
 0x846   : > { %13202 = vmatpush1.bf16.msra.mxu1 %v15128_v22  ;;  %v12869_v55 = vpop.f32.mrf.mxu0  ;;  %v12910_v24 = vpop.f32.mrf.mxu1  ;;  %13162 = vmatprep.subr.bf16.mxu0 %v14857_v2  ;;  %v15033_v28 = vcombine.high %v9934_v29, %v9942_v38  ;;  %v9918_v15 = vld [vmem:[%s21737_s26 + $0x7a0] sm:$0xff] }
 0x847   : > { %v13487_v35 = vmax.f32 %v12908_v63, 0.0  ;;  %13203 = vmatprep.subr.bf16.mxu1 %v15113_v50  ;;  %v9926_v22 = vld [vmem:[%s21737_s26 + $0x7e0] sm:$0xff]  ;;  %v15032_v50 = vcombine.low %v9934_v29, %v9942_v38  ;;  %v15257_v24 = vcombine.high %v10158_v46, %v10166_v39  ;;  %v9791_v39 = vld [vmem:[%s21737_s26 + $0x3a8] sm:$0xff] }
 0x848   : > { %v10174_v2 = vld [vmem:[%s21737_s26 + $0xfa0] sm:$0xff]  ;;  %v15017_v26 = vcombine.high %v9918_v15, %v9926_v22  ;;  %v15016_v63 = vcombine.low %v9918_v15, %v9926_v22 }
 0x849   : > { %v22064_v41 = vcombine.low %v13486_v54, %v13487_v35  ;;  %13163 = vmatpush1.bf16.msra.mxu0 %v14856_v31  ;;  %v10182_v52 = vld [vmem:[%s21737_s26 + $0xfe0] sm:$0xff] }
 0x84a   : > { %13204 = vmatpush1.bf16.msra.mxu1 %v15112_v9  ;;  %13164 = vmatprep.subr.bf16.mxu0 %v14841_v23  ;;  %v15273_v6 = vcombine.high %v10174_v2, %v10182_v52  ;;  %v9902_v40 = vld [vmem:[%s21737_s26 + $0x720] sm:$0xff]  ;;  %v15272_v31 = vcombine.low %v10174_v2, %v10182_v52 }
 0x84b   : > { %13205 = vmatprep.subr.bf16.mxu1 %v15097_v59  ;;  %v9910_v17 = vld [vmem:[%s21737_s26 + $0x760] sm:$0xff] }
 0x84c   : > { %v15001_v55 = vcombine.high %v9902_v40, %v9910_v17  ;;  %v9886_v9 = vld [vmem:[%s21737_s26 + $0x6a0] sm:$0xff]  ;;  %v15000_v59 = vcombine.low %v9902_v40, %v9910_v17 }
 0x84d   : > { %13165 = vmatpush1.bf16.msra.mxu0 %v14840_v43  ;;  %v9894_v23 = vld [vmem:[%s21737_s26 + $0x6e0] sm:$0xff] }
 0x84e   : > { %13206 = vmatpush1.bf16.msra.mxu1 %v15096_v25  ;;  %13166 = vmatprep.subr.bf16.mxu0 %v14825_v4  ;;  %v10142_v54 = vld [vmem:[%s21737_s26 + $0xea0] sm:$0xff]  ;;  %v14985_v34 = vcombine.high %v9886_v9, %v9894_v23 }
 0x84f   : > { %13207 = vmatprep.subr.bf16.mxu1 %v15081_v27  ;;  %v10150_v35 = vld [vmem:[%s21737_s26 + $0xee0] sm:$0xff]  ;;  %v14984_v27 = vcombine.low %v9886_v9, %v9894_v23 }
 0x850   : > { %v15241_v47 = vcombine.high %v10142_v54, %v10150_v35  ;;  %v9878_v43 = vld [vmem:[%s21737_s26 + $0x660] sm:$0xff]  ;;  %v15240_v12 = vcombine.low %v10142_v54, %v10150_v35  ;;  %v9775_v35 = vld [vmem:[%s21737_s26 + $0x328] sm:$0xff] }
 0x851   : > { %13167 = vmatpush1.bf16.msra.mxu0 %v14824_v32  ;;  %v10126_v25 = vld [vmem:[%s21737_s26 + $0xe20] sm:$0xff]  ;;  %v14969_v45 = vcombine.high %v9870_v7, %v9878_v43 }
 0x852   : > { %13208 = vmatpush1.bf16.msra.mxu1 %v15080_v44  ;;  %13168 = vmatprep.subr.bf16.mxu0 %v14809_v58  ;;  %v10134_v4 = vld [vmem:[%s21737_s26 + $0xe60] sm:$0xff] }
 0x853   : > { %13209 = vmatprep.subr.bf16.mxu1 %v15065_v51  ;;  %v15225_v56 = vcombine.high %v10126_v25, %v10134_v4  ;;  %v9854_v36 = vld [vmem:[%s21737_s26 + $0x5a0] sm:$0xff]  ;;  %v14968_v51 = vcombine.low %v9870_v7, %v9878_v43  ;;  %v15224_v60 = vcombine.low %v10126_v25, %v10134_v4  ;;  %v10039_v7 = vld [vmem:[%s21737_s26 + $0xb68] sm:$0xff]  ;;  %v17035_v25 = vmov 1983009808  }
 0x854   : > { %v9862_v32 = vld [vmem:[%s21737_s26 + $0x5e0] sm:$0xff]  ;;  %v13521_v4 = vunpack.c.l.s4 %v17035_v25 }
 0x855   : > { %13169 = vmatpush1.bf16.msra.mxu0 %v14808_v62  ;;  %v10110_v44 = vld [vmem:[%s21737_s26 + $0xda0] sm:$0xff]  ;;  %v14953_v0 = vcombine.high %v9854_v36, %v9862_v32 }
 0x856   : > { %13210 = vmatpush1.bf16.msra.mxu1 %v15064_v3  ;;  %13170 = vmatprep.subr.bf16.mxu0 %v14793_v61  ;;  %v10118_v58 = vld [vmem:[%s21737_s26 + $0xde0] sm:$0xff] }
 0x857   : > { %13211 = vmatprep.subr.bf16.mxu1 %v15049_v49  ;;  %v15209_v5 = vcombine.high %v10110_v44, %v10118_v58  ;;  %v9838_v57 = vld [vmem:[%s21737_s26 + $0x520] sm:$0xff]  ;;  %v14952_v49 = vcombine.low %v9854_v36, %v9862_v32  ;;  %v15208_v13 = vcombine.low %v10110_v44, %v10118_v58  ;;  %v10015_v58 = vld [vmem:[%s21737_s26 + $0xaa8] sm:$0xff] }
 0x858   : > { %v9846_v62 = vld [vmem:[%s21737_s26 + $0x560] sm:$0xff] }
 0x859   : > { %13171 = vmatpush1.bf16.msra.mxu0 %v14792_v33  ;;  %v10094_v3 = vld [vmem:[%s21737_s26 + $0xd20] sm:$0xff]  ;;  %v14937_v18 = vcombine.high %v9838_v57, %v9846_v62 }
 0x85a   : > { %13212 = vmatpush1.bf16.msra.mxu1 %v15048_v20  ;;  %13172 = vmatprep.subr.bf16.mxu0 %v14777_v14  ;;  %v10102_v61 = vld [vmem:[%s21737_s26 + $0xd60] sm:$0xff] }
 0x85b   : > { %13213 = vmatprep.subr.bf16.mxu1 %v15033_v28  ;;  %v15193_v29 = vcombine.high %v10094_v3, %v10102_v61  ;;  %v9822_v38 = vld [vmem:[%s21737_s26 + $0x4a0] sm:$0xff]  ;;  %v14936_v28 = vcombine.low %v9838_v57, %v9846_v62  ;;  %v15192_v15 = vcombine.low %v10094_v3, %v10102_v61  ;;  %v13522_v61 = vunpack.c.0.s8 %v13521_v4 }
 0x85c   : > { %v9830_v33 = vld [vmem:[%s21737_s26 + $0x4e0] sm:$0xff] }
 0x85d   : > { %13173 = vmatpush1.bf16.msra.mxu0 %v14776_v1  ;;  %v10078_v20 = vld [vmem:[%s21737_s26 + $0xca0] sm:$0xff]  ;;  %v14921_v22 = vcombine.high %v9822_v38, %v9830_v33 }
 0x85e   : > { %13214 = vmatpush1.bf16.msra.mxu1 %v15032_v50  ;;  %13174 = vmatprep.subr.bf16.mxu0 %v15017_v26  ;;  %v10086_v14 = vld [vmem:[%s21737_s26 + $0xce0] sm:$0xff] }
 0x85f   : > { %13215 = vmatprep.subr.bf16.mxu1 %v15273_v6  ;;  %v15177_v2 = vcombine.high %v10078_v20, %v10086_v14  ;;  %v9806_v52 = vld [vmem:[%s21737_s26 + $0x420] sm:$0xff]  ;;  %v14920_v6 = vcombine.low %v9822_v38, %v9830_v33  ;;  %v15176_v40 = vcombine.low %v10078_v20, %v10086_v14  ;;  %v9751_v38 = vld [vmem:[%s21737_s26 + $0x268] sm:$0xff] }
 0x860   : > { %v9814_v1 = vld [vmem:[%s21737_s26 + $0x460] sm:$0xff]  ;;  %v9999_v14 = vld [vmem:[%s21737_s26 + $0xa28] sm:$0xff] }
 0x861   : > { %13175 = vmatpush2.bf16.msra.mxu0 %v15016_v63  ;;  %v10062_v50 = vld [vmem:[%s21737_s26 + $0xc20] sm:$0xff]  ;;  %v14905_v17 = vcombine.high %v9806_v52, %v9814_v1  ;;  %v9799_v63 = vld [vmem:[%s21737_s26 + $0x3e8] sm:$0xff] }
 0x862   : > { %13216 = vmatpush2.bf16.msra.mxu1 %v15272_v31  ;;  %13176 = vmatprep.subr.bf16.mxu0 %v15001_v55  ;;  %v10070_v26 = vld [vmem:[%s21737_s26 + $0xc60] sm:$0xff]  ;;  %v10047_v31 = vld [vmem:[%s21737_s26 + $0xba8] sm:$0xff]  ;;  %v14891_v23 = vcombine.high %v9791_v39, %v9799_v63 }
 0x863   : > { %13217 = vmatprep.subr.bf16.mxu1 %v15257_v24  ;;  %v15161_v46 = vcombine.high %v10062_v50, %v10070_v26  ;;  %v10055_v55 = vld [vmem:[%s21737_s26 + $0xbe8] sm:$0xff]  ;;  %v14904_v24 = vcombine.low %v9806_v52, %v9814_v1  ;;  %v15160_v9 = vcombine.low %v10062_v50, %v10070_v26  ;;  %v22135_v26 = vsub.s32 %v13522_v61, %v18289_v42 }
 0x864   : > { %v15147_v54 = vcombine.high %v10047_v31, %v10055_v55  ;;  %v15146_v43 = vcombine.low %v10047_v31, %v10055_v55  ;;  %v9991_v31 = vld [vmem:[%s21737_s26 + $0x9e8] sm:$0xff] }
 0x865   : > { %13177 = vmatpush2.bf16.msra.mxu0 %v15000_v59  ;;  %v9783_v59 = vld [vmem:[%s21737_s26 + $0x368] sm:$0xff] }
 0x866   : > { %13218 = vmatpush2.bf16.msra.mxu1 %v15256_v11  ;;  %13178 = vmatprep.subr.bf16.mxu0 %v14985_v34  ;;  %v10201_v11 = vrot.slane %v22038_v37, %v20767_v48  ;;  %v14890_v34 = vcombine.low %v9791_v39, %v9799_v63  ;;  %v9735_v39 = vld [vmem:[%s21737_s26 + $0x1e8] sm:$0xff] }
 0x867   : > { %13219 = vmatprep.subr.bf16.mxu1 %v15241_v47  ;;  %v10031_v47 = vld [vmem:[%s21737_s26 + $0xb28] sm:$0xff] }
 0x868   : > { %v15131_v44 = vcombine.high %v10031_v47, %v10039_v7  ;;  %v15130_v62 = vcombine.low %v10031_v47, %v10039_v7  ;;  %v9983_v63 = vld [vmem:[%s21737_s26 + $0x9a8] sm:$0xff] }
 0x869   : > { %13179 = vmatpush2.bf16.msra.mxu0 %v14984_v27  ;;  %v10205_v27 = vrot.slane %v22038_v37, %v20776_v8  ;;  %v9967_v47 = vld [vmem:[%s21737_s26 + $0x928] sm:$0xff]  ;;  %v15082_v4 = vcombine.low %v9983_v63, %v9991_v31 }
 0x86a   : > { %13220 = vmatpush2.bf16.msra.mxu1 %v15240_v12  ;;  %13180 = vmatprep.subr.bf16.mxu0 %v14969_v45  ;;  %v14875_v12 = vcombine.high %v9775_v35, %v9783_v59  ;;  %v9759_v45 = vld [vmem:[%s21737_s26 + $0x2a8] sm:$0xff] }
 0x86b   : > { %13221 = vmatprep.subr.bf16.mxu1 %v15225_v56  ;;  %v9767_v56 = vld [vmem:[%s21737_s26 + $0x2e8] sm:$0xff] }
 0x86c   : > { %v14859_v3 = vcombine.high %v9759_v45, %v9767_v56  ;;  %v9975_v7 = vld [vmem:[%s21737_s26 + $0x968] sm:$0xff] }
 0x86d   : > { %13181 = vmatpush2.bf16.msra.mxu0 %v14968_v51  ;;  %v10023_v51 = vld [vmem:[%s21737_s26 + $0xae8] sm:$0xff] }
 0x86e   : > { %13222 = vmatpush2.bf16.msra.mxu1 %v15224_v60  ;;  %13182 = vmatprep.subr.bf16.mxu0 %v14953_v0  ;;  %v14874_v0 = vcombine.low %v9775_v35, %v9783_v59  ;;  %v15114_v1 = vcombine.low %v10015_v58, %v10023_v51  ;;  %v15083_v59 = vcombine.high %v9983_v63, %v9991_v31  ;;  %v10151_v63 = vld [vmem:[%s21737_s26 + $0xee8] sm:$0xff] }
 0x86f   : > { %13223 = vmatprep.subr.bf16.mxu1 %v15209_v5 }
 0x871   : > { %13183 = vmatpush2.bf16.msra.mxu0 %v14952_v49 }
 0x872   : > { %13224 = vmatpush2.bf16.msra.mxu1 %v15208_v13  ;;  %13184 = vmatprep.subr.bf16.mxu0 %v14937_v18  ;;  %v15115_v18 = vcombine.high %v10015_v58, %v10023_v51 }
 0x873   : > { %13225 = vmatprep.subr.bf16.mxu1 %v15193_v29  ;;  %v9743_v29 = vld [vmem:[%s21737_s26 + $0x228] sm:$0xff] }
 0x874   : > { %v14843_v50 = vcombine.high %v9743_v29, %v9751_v38 }
 0x875   : > { %13185 = vmatpush2.bf16.msra.mxu0 %v14936_v28  ;;  %v10007_v28 = vld [vmem:[%s21737_s26 + $0xa68] sm:$0xff] }
 0x876   : > { %13226 = vmatpush2.bf16.msra.mxu1 %v15192_v15  ;;  %13186 = vmatprep.subr.bf16.mxu0 %v14921_v22  ;;  %v14858_v22 = vcombine.low %v9759_v45, %v9767_v56  ;;  %v9703_v45 = vld [vmem:[%s21737_s26 + $0xe8] sm:$0xff] }
 0x877   : > { %13227 = vmatprep.subr.bf16.mxu1 %v15177_v2  ;;  %v9951_v56 = vld [vmem:[%s21737_s26 + $0x8a8] sm:$0xff] }
 0x879   : > { %13187 = vmatpush2.bf16.msra.mxu0 %v14920_v6 }
 0x87a   : > { %13228 = vmatpush2.bf16.msra.mxu1 %v15176_v40  ;;  %13188 = vmatprep.subr.bf16.mxu0 %v14905_v17  ;;  %v15099_v17 = vcombine.high %v9999_v14, %v10007_v28 }
 0x87b   : > { %13229 = vmatprep.subr.bf16.mxu1 %v15161_v46  ;;  %v9727_v46 = vld [vmem:[%s21737_s26 + $0x1a8] sm:$0xff] }
 0x87c   : > { %v14826_v25 = vcombine.low %v9727_v46, %v9735_v39 }
 0x87d   : > { %13189 = vmatpush2.bf16.msra.mxu0 %v14904_v24  ;;  %v14842_v24 = vcombine.low %v9743_v29, %v9751_v38  ;;  %v10175_v29 = vld [vmem:[%s21737_s26 + $0xfa8] sm:$0xff] }
 0x87e   : > { %13230 = vmatpush2.bf16.msra.mxu1 %v15160_v9  ;;  %13240 = vmatprep.subr.bf16.mxu0 %v14891_v23  ;;  %v15098_v9 = vcombine.low %v9999_v14, %v10007_v28  ;;  %v14827_v23 = vcombine.high %v9727_v46, %v9735_v39  ;;  %v10183_v38 = vld [vmem:[%s21737_s26 + $0xfe8] sm:$0xff] }
 0x87f   : > { %13281 = vmatprep.subr.bf16.mxu1 %v15147_v54  ;;  %v13526_v54 = vrot.slane %v22064_v41, %v22135_v26  ;;  %v15067_v41 = vcombine.high %v9967_v47, %v9975_v7  ;;  %v15275_v28 = vcombine.high %v10175_v29, %v10183_v38  ;;  %v9895_v46 = vld [vmem:[%s21737_s26 + $0x6e8] sm:$0xff] }
 0x880   : > { %v12946_v36 = vpop.f32.mrf.mxu0  ;;  %v12987_v32 = vpop.f32.mrf.mxu1  ;;  %13191 = vmatmul.mubr.bf16.vlgmr.msra.gmra.mxu0 %v21825_v53  ;;  %v10143_v39 = vld [vmem:[%s21737_s26 + $0xea8] sm:$0xff] }
 0x881   : > { %v12947_v60 = vadd.f32 %v12946_v36, %v10201_v11  ;;  %13232 = vmatmul.mubr.bf16.vlgmr.msra.gmra.mxu1 %v21827_v10  ;;  %13241 = vmatpush1.bf16.msra.mxu0 %v14890_v34  ;;  %v9711_v11 = vld [vmem:[%s21737_s26 + $0x128] sm:$0xff] }
 0x882   : > { %13272 = vmatprep.mubr.bf16.mxu0 %v21821_v19  ;;  %13282 = vmatpush1.bf16.msra.mxu1 %v15146_v43  ;;  %v12948_v5 = vpop.f32.mrf.mxu0  ;;  %v12989_v57 = vpop.f32.mrf.mxu1  ;;  %v9719_v34 = vld [vmem:[%s21737_s26 + $0x168] sm:$0xff] }
 0x883   : > { %v12988_v49 = vadd.f32 %v12987_v32, %v12947_v60  ;;  %13313 = vmatprep.mubr.bf16.mxu1 %v21823_v30  ;;  %v12949_v13 = vadd.f32 %v12948_v5, %v10205_v27  ;;  %13242 = vmatprep.subr.bf16.mxu0 %v14875_v12  ;;  %v14811_v27 = vcombine.high %v9711_v11, %v9719_v34  ;;  %v9695_v12 = vld [vmem:[%s21737_s26 + $0xa8] sm:$0xff] }
 0x884   : > { %v12950_v33 = vpop.f32.mrf.mxu0  ;;  %v12991_v20 = vpop.f32.mrf.mxu1  ;;  %13283 = vmatprep.subr.bf16.mxu1 %v15131_v44  ;;  %v9959_v36 = vld [vmem:[%s21737_s26 + $0x8e8] sm:$0xff]  ;;  %v14810_v32 = vcombine.low %v9711_v11, %v9719_v34  ;;  %v15066_v44 = vcombine.low %v9967_v47, %v9975_v7  ;;  %v14795_v58 = vcombine.high %v9695_v12, %v9703_v45  ;;  %v15242_v34 = vcombine.low %v10143_v39, %v10151_v63 }
 0x885   : > { %v12990_v15 = vadd.f32 %v12989_v57, %v12949_v13  ;;  %13243 = vmatpush1.bf16.msra.mxu0 %v14874_v0  ;;  %v13488_v6 = vmax.f32 %v12988_v49, 0.0  ;;  %v15051_v51 = vcombine.high %v9951_v56, %v9959_v36  ;;  %v9679_v60 = vld [vmem:[%s21737_s26 + $0x28] sm:$0xff] }
 0x886   : > { %13284 = vmatpush1.bf16.msra.mxu1 %v15130_v62  ;;  %v12951_v2 = vpop.f32.mrf.mxu0  ;;  %v12992_v52 = vpop.f32.mrf.mxu1  ;;  %13244 = vmatprep.subr.bf16.mxu0 %v14859_v3  ;;  %v9687_v0 = vld [vmem:[%s21737_s26 + $0x68] sm:$0xff]  ;;  %v14794_v62 = vcombine.low %v9695_v12, %v9703_v45  ;;  %v15050_v3 = vcombine.low %v9951_v56, %v9959_v36 }
 0x887   : > { %v13489_v40 = vmax.f32 %v12990_v15, 0.0  ;;  %13285 = vmatprep.subr.bf16.mxu1 %v15115_v18  ;;  %v9935_v5 = vld [vmem:[%s21737_s26 + $0x828] sm:$0xff]  ;;  %v14779_v61 = vcombine.high %v9679_v60, %v9687_v0  ;;  %v14778_v33 = vcombine.low %v9679_v60, %v9687_v0 }
 0x888   : > { %v9943_v57 = vld [vmem:[%s21737_s26 + $0x868] sm:$0xff] }
 0x889   : > { %v13519_v55 = vcombine.low %v13488_v6, %v13489_v40  ;;  %13245 = vmatpush1.bf16.msra.mxu0 %v14858_v22  ;;  %v15035_v49 = vcombine.high %v9935_v5, %v9943_v57  ;;  %v9919_v13 = vld [vmem:[%s21737_s26 + $0x7a8] sm:$0xff]  ;;  %v15034_v20 = vcombine.low %v9935_v5, %v9943_v57 }
 0x88a   : > { %13286 = vmatpush1.bf16.msra.mxu1 %v15114_v1  ;;  %13246 = vmatprep.subr.bf16.mxu0 %v14843_v50  ;;  %v9927_v18 = vld [vmem:[%s21737_s26 + $0x7e8] sm:$0xff]  ;;  %v15274_v50 = vcombine.low %v10175_v29, %v10183_v38 }
 0x88b   : > { %v13533_v35 = vrot.slane %v13519_v55, %v22135_v26  ;;  %13287 = vmatprep.subr.bf16.mxu1 %v15099_v17  ;;  %v15019_v14 = vcombine.high %v9919_v13, %v9927_v18  ;;  %v9903_v15 = vld [vmem:[%s21737_s26 + $0x728] sm:$0xff]  ;;  %v15018_v1 = vcombine.low %v9919_v13, %v9927_v18 }
 0x88c   : > { %v9911_v22 = vld [vmem:[%s21737_s26 + $0x768] sm:$0xff] }
 0x88d   : > { %v13534_v43 = vcombine.low %v13526_v54, %v13533_v35  ;;  %13247 = vmatpush1.bf16.msra.mxu0 %v14842_v24  ;;  %v10159_v2 = vld [vmem:[%s21737_s26 + $0xf28] sm:$0xff]  ;;  %v15003_v6 = vcombine.high %v9903_v15, %v9911_v22  ;;  %v15002_v31 = vcombine.low %v9903_v15, %v9911_v22 }
 0x88e   : > { %13288 = vmatpush1.bf16.msra.mxu1 %v15098_v9  ;;  %13248 = vmatprep.subr.bf16.mxu0 %v14827_v23  ;;  %v10167_v52 = vld [vmem:[%s21737_s26 + $0xf68] sm:$0xff]  ;;  %v15243_v9 = vcombine.high %v10143_v39, %v10151_v63 }
 0x88f   : > { %13590 = vst [vmem:[%s22149_s25] sm:$0xff] %v13534_v43  ;;  %13289 = vmatprep.subr.bf16.mxu1 %v15083_v59  ;;  %v15259_v40 = vcombine.high %v10159_v2, %v10167_v52  ;;  %v9887_v17 = vld [vmem:[%s21737_s26 + $0x6a8] sm:$0xff]  ;;  %v15258_v55 = vcombine.low %v10159_v2, %v10167_v52  ;;  %v9792_v52 = vld [vmem:[%s21737_s26 + $0x3b0] sm:$0xff] }
 0x890   : > { %v14987_v24 = vcombine.high %v9887_v17, %v9895_v46  ;;  %v9871_v23 = vld [vmem:[%s21737_s26 + $0x628] sm:$0xff]  ;;  %v14986_v11 = vcombine.low %v9887_v17, %v9895_v46  ;;  %v10208_v17 = vsub.s32 4, %v18289_v42 }
 0x891   : > { %13249 = vmatpush1.bf16.msra.mxu0 %v14826_v25  ;;  %v9879_v54 = vld [vmem:[%s21737_s26 + $0x668] sm:$0xff] }
 0x892   : > { %13290 = vmatpush1.bf16.msra.mxu1 %v15082_v4  ;;  %13250 = vmatprep.subr.bf16.mxu0 %v14811_v27  ;;  %v10127_v35 = vld [vmem:[%s21737_s26 + $0xe28] sm:$0xff]  ;;  %v14971_v47 = vcombine.high %v9871_v23, %v9879_v54 }
 0x893   : > { %13291 = vmatprep.subr.bf16.mxu1 %v15067_v41  ;;  %v10135_v59 = vld [vmem:[%s21737_s26 + $0xe68] sm:$0xff]  ;;  %v14970_v41 = vcombine.low %v9871_v23, %v9879_v54  ;;  %v10032_v54 = vld [vmem:[%s21737_s26 + $0xb30] sm:$0xff] }
 0x894   : > { %v15227_v7 = vcombine.high %v10127_v35, %v10135_v59  ;;  %v9855_v43 = vld [vmem:[%s21737_s26 + $0x5a8] sm:$0xff]  ;;  %v15226_v12 = vcombine.low %v10127_v35, %v10135_v59  ;;  %v10040_v35 = vld [vmem:[%s21737_s26 + $0xb70] sm:$0xff] }
 0x895   : > { %13251 = vmatpush1.bf16.msra.mxu0 %v14810_v32  ;;  %v9863_v25 = vld [vmem:[%s21737_s26 + $0x5e8] sm:$0xff] }
 0x896   : > { %13292 = vmatpush1.bf16.msra.mxu1 %v15066_v44  ;;  %13252 = vmatprep.subr.bf16.mxu0 %v14795_v58  ;;  %v10111_v4 = vld [vmem:[%s21737_s26 + $0xda8] sm:$0xff]  ;;  %v14955_v45 = vcombine.high %v9855_v43, %v9863_v25 }
 0x897   : > { %13293 = vmatprep.subr.bf16.mxu1 %v15051_v51  ;;  %v10119_v27 = vld [vmem:[%s21737_s26 + $0xde8] sm:$0xff]  ;;  %v14954_v51 = vcombine.low %v9855_v43, %v9863_v25  ;;  %v15133_v25 = vcombine.high %v10032_v54, %v10040_v35 }
 0x898   : > { %v15211_v56 = vcombine.high %v10111_v4, %v10119_v27  ;;  %v9839_v36 = vld [vmem:[%s21737_s26 + $0x528] sm:$0xff]  ;;  %v15210_v60 = vcombine.low %v10111_v4, %v10119_v27  ;;  %v10016_v4 = vld [vmem:[%s21737_s26 + $0xab0] sm:$0xff] }
 0x899   : > { %13253 = vmatpush1.bf16.msra.mxu0 %v14794_v62  ;;  %v9847_v32 = vld [vmem:[%s21737_s26 + $0x568] sm:$0xff]  ;;  %v10024_v27 = vld [vmem:[%s21737_s26 + $0xaf0] sm:$0xff] }
 0x89a   : > { %13294 = vmatpush1.bf16.msra.mxu1 %v15050_v3  ;;  %13254 = vmatprep.subr.bf16.mxu0 %v14779_v61  ;;  %v10095_v44 = vld [vmem:[%s21737_s26 + $0xd28] sm:$0xff]  ;;  %v14939_v0 = vcombine.high %v9839_v36, %v9847_v32 }
 0x89b   : > { %13295 = vmatprep.subr.bf16.mxu1 %v15035_v49  ;;  %v10103_v58 = vld [vmem:[%s21737_s26 + $0xd68] sm:$0xff]  ;;  %v14938_v49 = vcombine.low %v9839_v36, %v9847_v32 }
 0x89c   : > { %v15195_v5 = vcombine.high %v10095_v44, %v10103_v58  ;;  %v9823_v57 = vld [vmem:[%s21737_s26 + $0x4a8] sm:$0xff]  ;;  %v15194_v13 = vcombine.low %v10095_v44, %v10103_v58 }
 0x89d   : > { %13255 = vmatpush1.bf16.msra.mxu0 %v14778_v33  ;;  %v9831_v62 = vld [vmem:[%s21737_s26 + $0x4e8] sm:$0xff] }
 0x89e   : > { %13296 = vmatpush1.bf16.msra.mxu1 %v15034_v20  ;;  %13256 = vmatprep.subr.bf16.mxu0 %v15019_v14  ;;  %v10079_v3 = vld [vmem:[%s21737_s26 + $0xca8] sm:$0xff]  ;;  %v14923_v18 = vcombine.high %v9823_v57, %v9831_v62 }
 0x89f   : > { %13297 = vmatprep.subr.bf16.mxu1 %v15275_v28  ;;  %v10087_v61 = vld [vmem:[%s21737_s26 + $0xce8] sm:$0xff]  ;;  %v14922_v28 = vcombine.low %v9823_v57, %v9831_v62  ;;  %v10000_v57 = vld [vmem:[%s21737_s26 + $0xa30] sm:$0xff] }
 0x8a0   : > { %v15179_v29 = vcombine.high %v10079_v3, %v10087_v61  ;;  %v9807_v38 = vld [vmem:[%s21737_s26 + $0x428] sm:$0xff]  ;;  %v15178_v15 = vcombine.low %v10079_v3, %v10087_v61  ;;  %v10008_v62 = vld [vmem:[%s21737_s26 + $0xa70] sm:$0xff] }
 0x8a1   : > { %13257 = vmatpush2.bf16.msra.mxu0 %v15018_v1  ;;  %v9815_v33 = vld [vmem:[%s21737_s26 + $0x468] sm:$0xff]  ;;  %v9800_v1 = vld [vmem:[%s21737_s26 + $0x3f0] sm:$0xff] }
 0x8a2   : > { %13298 = vmatpush2.bf16.msra.mxu1 %v15274_v50  ;;  %13258 = vmatprep.subr.bf16.mxu0 %v15003_v6  ;;  %v10063_v20 = vld [vmem:[%s21737_s26 + $0xc28] sm:$0xff]  ;;  %v14907_v22 = vcombine.high %v9807_v38, %v9815_v33  ;;  %v10048_v50 = vld [vmem:[%s21737_s26 + $0xbb0] sm:$0xff]  ;;  %v14893_v39 = vcombine.high %v9792_v52, %v9800_v1  ;;  %v14892_v23 = vcombine.low %v9792_v52, %v9800_v1 }
 0x8a3   : > { %13299 = vmatprep.subr.bf16.mxu1 %v15259_v40  ;;  %v10071_v14 = vld [vmem:[%s21737_s26 + $0xc68] sm:$0xff]  ;;  %v10056_v6 = vld [vmem:[%s21737_s26 + $0xbf0] sm:$0xff]  ;;  %v14906_v40 = vcombine.low %v9807_v38, %v9815_v33 }
 0x8a4   : > { %v15163_v2 = vcombine.high %v10063_v20, %v10071_v14  ;;  %v15162_v46 = vcombine.low %v10063_v20, %v10071_v14  ;;  %v15149_v63 = vcombine.high %v10048_v50, %v10056_v6  ;;  %v15148_v59 = vcombine.low %v10048_v50, %v10056_v6 }
 0x8a5   : > { %13259 = vmatpush2.bf16.msra.mxu0 %v15002_v31  ;;  %v10212_v31 = vsub.s32 5, %v18289_v42  ;;  %v15101_v14 = vcombine.high %v10000_v57, %v10008_v62  ;;  %v15100_v50 = vcombine.low %v10000_v57, %v10008_v62  ;;  %v9904_v62 = vld [vmem:[%s21737_s26 + $0x730] sm:$0xff] }
 0x8a6   : > { %13300 = vmatpush2.bf16.msra.mxu1 %v15258_v55  ;;  %13260 = vmatprep.subr.bf16.mxu0 %v14987_v24  ;;  %v9776_v55 = vld [vmem:[%s21737_s26 + $0x330] sm:$0xff] }
 0x8a7   : > { %13301 = vmatprep.subr.bf16.mxu1 %v15243_v9  ;;  %v9784_v24 = vld [vmem:[%s21737_s26 + $0x370] sm:$0xff]  ;;  %v10209_v9 = vrot.slane %v22038_v37, %v10208_v17 }
 0x8a9   : > { %13261 = vmatpush2.bf16.msra.mxu0 %v14986_v11  ;;  %v10213_v11 = vrot.slane %v22038_v37, %v10212_v31 }
 0x8aa   : > { %13302 = vmatpush2.bf16.msra.mxu1 %v15242_v34  ;;  %13262 = vmatprep.subr.bf16.mxu0 %v14971_v47  ;;  %v14877_v34 = vcombine.high %v9776_v55, %v9784_v24  ;;  %v9760_v47 = vld [vmem:[%s21737_s26 + $0x2b0] sm:$0xff] }
 0x8ab   : > { %13303 = vmatprep.subr.bf16.mxu1 %v15227_v7  ;;  %v9768_v7 = vld [vmem:[%s21737_s26 + $0x2f0] sm:$0xff] }
 0x8ac   : > { %v14861_v36 = vcombine.high %v9760_v47, %v9768_v7 }
 0x8ad   : > { %13263 = vmatpush2.bf16.msra.mxu0 %v14970_v41 }
 0x8ae   : > { %13304 = vmatpush2.bf16.msra.mxu1 %v15226_v12  ;;  %13264 = vmatprep.subr.bf16.mxu0 %v14955_v45  ;;  %v14876_v45 = vcombine.low %v9776_v55, %v9784_v24  ;;  %v9976_v55 = vld [vmem:[%s21737_s26 + $0x970] sm:$0xff] }
 0x8af   : > { %13305 = vmatprep.subr.bf16.mxu1 %v15211_v56  ;;  %v15132_v56 = vcombine.low %v10032_v54, %v10040_v35  ;;  %v9696_v35 = vld [vmem:[%s21737_s26 + $0xb0] sm:$0xff] }
 0x8b1   : > { %13265 = vmatpush2.bf16.msra.mxu0 %v14954_v51  ;;  %v15117_v51 = vcombine.high %v10016_v4, %v10024_v27 }
 0x8b2   : > { %13306 = vmatpush2.bf16.msra.mxu1 %v15210_v60  ;;  %13266 = vmatprep.subr.bf16.mxu0 %v14939_v0  ;;  %v9744_v60 = vld [vmem:[%s21737_s26 + $0x230] sm:$0xff] }
 0x8b3   : > { %13307 = vmatprep.subr.bf16.mxu1 %v15195_v5  ;;  %v9752_v0 = vld [vmem:[%s21737_s26 + $0x270] sm:$0xff] }
 0x8b4   : > { %v14844_v1 = vcombine.low %v9744_v60, %v9752_v0 }
 0x8b5   : > { %13267 = vmatpush2.bf16.msra.mxu0 %v14938_v49  ;;  %v14860_v49 = vcombine.low %v9760_v47, %v9768_v7 }
 0x8b6   : > { %13308 = vmatpush2.bf16.msra.mxu1 %v15194_v13  ;;  %13268 = vmatprep.subr.bf16.mxu0 %v14923_v18  ;;  %v15116_v18 = vcombine.low %v10016_v4, %v10024_v27  ;;  %v9680_v4 = vld [vmem:[%s21737_s26 + $0x30] sm:$0xff] }
 0x8b7   : > { %13309 = vmatprep.subr.bf16.mxu1 %v15179_v29  ;;  %v14845_v29 = vcombine.high %v9744_v60, %v9752_v0  ;;  %v9688_v27 = vld [vmem:[%s21737_s26 + $0x70] sm:$0xff] }
 0x8b8   : > { %v14780_v60 = vcombine.low %v9680_v4, %v9688_v27 }
 0x8b9   : > { %13269 = vmatpush2.bf16.msra.mxu0 %v14922_v28  ;;  %v9728_v28 = vld [vmem:[%s21737_s26 + $0x1b0] sm:$0xff] }
 0x8ba   : > { %13310 = vmatpush2.bf16.msra.mxu1 %v15178_v15  ;;  %13270 = vmatprep.subr.bf16.mxu0 %v14907_v22  ;;  %v9736_v15 = vld [vmem:[%s21737_s26 + $0x1f0] sm:$0xff] }
 0x8bb   : > { %13311 = vmatprep.subr.bf16.mxu1 %v15163_v2  ;;  %v9984_v22 = vld [vmem:[%s21737_s26 + $0x9b0] sm:$0xff]  ;;  %v14829_v6 = vcombine.high %v9728_v28, %v9736_v15  ;;  %v14828_v24 = vcombine.low %v9728_v28, %v9736_v15 }
 0x8bc   : > { %v9992_v2 = vld [vmem:[%s21737_s26 + $0x9f0] sm:$0xff] }
 0x8bd   : > { %13271 = vmatpush2.bf16.msra.mxu0 %v14906_v40  ;;  %v15085_v40 = vcombine.high %v9984_v22, %v9992_v2  ;;  %v10152_v28 = vld [vmem:[%s21737_s26 + $0xef0] sm:$0xff] }
 0x8be   : > { %13312 = vmatpush2.bf16.msra.mxu1 %v15162_v46  ;;  %13322 = vmatprep.subr.bf16.mxu0 %v14893_v39  ;;  %v9712_v46 = vld [vmem:[%s21737_s26 + $0x130] sm:$0xff] }
 0x8bf   : > { %13363 = vmatprep.subr.bf16.mxu1 %v15149_v63  ;;  %v9720_v39 = vld [vmem:[%s21737_s26 + $0x170] sm:$0xff] }
 0x8c0   : > { %v13028_v43 = vpop.f32.mrf.mxu0  ;;  %13273 = vmatmul.mubr.bf16.vlgmr.msra.gmra.mxu0 %v21825_v53  ;;  %v9968_v63 = vld [vmem:[%s21737_s26 + $0x930] sm:$0xff]  ;;  %v14812_v47 = vcombine.low %v9712_v46, %v9720_v39 }
 0x8c1   : > { %v13029_v41 = vadd.f32 %v13028_v43, %v10209_v9  ;;  %v13069_v12 = vpop.f32.mrf.mxu1  ;;  %13314 = vmatmul.mubr.bf16.vlgmr.msra.gmra.mxu1 %v21827_v10  ;;  %13323 = vmatpush1.bf16.msra.mxu0 %v14892_v23  ;;  %v15084_v9 = vcombine.low %v9984_v22, %v9992_v2  ;;  %v14813_v23 = vcombine.high %v9712_v46, %v9720_v39  ;;  %v10136_v46 = vld [vmem:[%s21737_s26 + $0xe70] sm:$0xff] }
 0x8c2   : > { %13354 = vmatprep.mubr.bf16.mxu0 %v21821_v19  ;;  %13364 = vmatpush1.bf16.msra.mxu1 %v15148_v59  ;;  %v13030_v37 = vpop.f32.mrf.mxu0  ;;  %v15069_v54 = vcombine.high %v9968_v63, %v9976_v55  ;;  %v9704_v59 = vld [vmem:[%s21737_s26 + $0xf0] sm:$0xff]  ;;  %v15068_v7 = vcombine.low %v9968_v63, %v9976_v55 }
 0x8c3   : > { %v13070_v32 = vadd.f32 %v13069_v12, %v13029_v41  ;;  %13395 = vmatprep.mubr.bf16.mxu1 %v21823_v30  ;;  %v13031_v44 = vadd.f32 %v13030_v37, %v10213_v11  ;;  %v13071_v58 = vpop.f32.mrf.mxu1  ;;  %13324 = vmatprep.subr.bf16.mxu0 %v14877_v34  ;;  %v9952_v11 = vld [vmem:[%s21737_s26 + $0x8b0] sm:$0xff]  ;;  %v14797_v43 = vcombine.high %v9696_v35, %v9704_v59 }
 0x8c4   : > { %v13032_v5 = vpop.f32.mrf.mxu0  ;;  %13365 = vmatprep.subr.bf16.mxu1 %v15133_v25  ;;  %v9960_v34 = vld [vmem:[%s21737_s26 + $0x8f0] sm:$0xff] }
 0x8c5   : > { %v13072_v3 = vadd.f32 %v13071_v58, %v13031_v44  ;;  %v13073_v61 = vpop.f32.mrf.mxu1  ;;  %13325 = vmatpush1.bf16.msra.mxu0 %v14876_v45  ;;  %v13490_v38 = vmax.f32 %v13070_v32, 0.0  ;;  %v15053_v25 = vcombine.high %v9952_v11, %v9960_v34  ;;  %v9936_v41 = vld [vmem:[%s21737_s26 + $0x830] sm:$0xff]  ;;  %v14796_v45 = vcombine.low %v9696_v35, %v9704_v59 }
 0x8c6   : > { %13366 = vmatpush1.bf16.msra.mxu1 %v15132_v56  ;;  %v13033_v13 = vpop.f32.mrf.mxu0  ;;  %13326 = vmatprep.subr.bf16.mxu0 %v14861_v36  ;;  %v9944_v12 = vld [vmem:[%s21737_s26 + $0x870] sm:$0xff]  ;;  %v15052_v37 = vcombine.low %v9952_v11, %v9960_v34  ;;  %v14781_v56 = vcombine.high %v9680_v4, %v9688_v27 }
 0x8c7   : > { %v13491_v33 = vmax.f32 %v13072_v3, 0.0  ;;  %v13074_v20 = vpop.f32.mrf.mxu1  ;;  %13367 = vmatprep.subr.bf16.mxu1 %v15117_v51  ;;  %v15037_v36 = vcombine.high %v9936_v41, %v9944_v12  ;;  %v9920_v32 = vld [vmem:[%s21737_s26 + $0x7b0] sm:$0xff]  ;;  %v15036_v0 = vcombine.low %v9936_v41, %v9944_v12 }
 0x8c8   : > { %v9928_v44 = vld [vmem:[%s21737_s26 + $0x7f0] sm:$0xff] }
 0x8c9   : > { %v22224_v52 = vcombine.low %v13490_v38, %v13491_v33  ;;  %13327 = vmatpush1.bf16.msra.mxu0 %v14860_v49  ;;  %v10176_v58 = vld [vmem:[%s21737_s26 + $0xfb0] sm:$0xff]  ;;  %v15021_v5 = vcombine.high %v9920_v32, %v9928_v44  ;;  %v15020_v13 = vcombine.low %v9920_v32, %v9928_v44 }
 0x8ca   : > { %13368 = vmatpush1.bf16.msra.mxu1 %v15116_v18  ;;  %13328 = vmatprep.subr.bf16.mxu0 %v14845_v29  ;;  %v10184_v51 = vld [vmem:[%s21737_s26 + $0xff0] sm:$0xff] }
 0x8cb   : > { %13369 = vmatprep.subr.bf16.mxu1 %v15101_v14  ;;  %v15277_v57 = vcombine.high %v10176_v58, %v10184_v51  ;;  %v9912_v3 = vld [vmem:[%s21737_s26 + $0x770] sm:$0xff]  ;;  %v15276_v18 = vcombine.low %v10176_v58, %v10184_v51 }
 0x8cc   : > { %v10160_v61 = vld [vmem:[%s21737_s26 + $0xf30] sm:$0xff]  ;;  %v15005_v29 = vcombine.high %v9904_v62, %v9912_v3  ;;  %v15004_v15 = vcombine.low %v9904_v62, %v9912_v3 }
 0x8cd   : > { %13329 = vmatpush1.bf16.msra.mxu0 %v14844_v1  ;;  %v10168_v49 = vld [vmem:[%s21737_s26 + $0xf70] sm:$0xff] }
 0x8ce   : > { %13370 = vmatpush1.bf16.msra.mxu1 %v15100_v50  ;;  %13330 = vmatprep.subr.bf16.mxu0 %v14829_v6  ;;  %v15261_v38 = vcombine.high %v10160_v61, %v10168_v49  ;;  %v9888_v33 = vld [vmem:[%s21737_s26 + $0x6b0] sm:$0xff]  ;;  %v15260_v22 = vcombine.low %v10160_v61, %v10168_v49 }
 0x8cf   : > { %13371 = vmatprep.subr.bf16.mxu1 %v15085_v40  ;;  %v9896_v20 = vld [vmem:[%s21737_s26 + $0x6f0] sm:$0xff] }
 0x8d0   : > { %v10144_v14 = vld [vmem:[%s21737_s26 + $0xeb0] sm:$0xff]  ;;  %v14989_v2 = vcombine.high %v9888_v33, %v9896_v20  ;;  %v14988_v39 = vcombine.low %v9888_v33, %v9896_v20  ;;  %v10057_v33 = vld [vmem:[%s21737_s26 + $0xbf8] sm:$0xff] }
 0x8d1   : > { %13331 = vmatpush1.bf16.msra.mxu0 %v14828_v24  ;;  %v15245_v1 = vcombine.high %v10144_v14, %v10152_v28  ;;  %v9872_v50 = vld [vmem:[%s21737_s26 + $0x630] sm:$0xff]  ;;  %v15244_v63 = vcombine.low %v10144_v14, %v10152_v28  ;;  %v10216_v14 = vsub.s32 6, %v18289_v42 }
 0x8d2   : > { %13372 = vmatpush1.bf16.msra.mxu1 %v15084_v9  ;;  %13332 = vmatprep.subr.bf16.mxu0 %v14813_v23  ;;  %v9880_v6 = vld [vmem:[%s21737_s26 + $0x670] sm:$0xff] }
 0x8d3   : > { %13373 = vmatprep.subr.bf16.mxu1 %v15069_v54  ;;  %v10128_v40 = vld [vmem:[%s21737_s26 + $0xe30] sm:$0xff]  ;;  %v14973_v55 = vcombine.high %v9872_v50, %v9880_v6  ;;  %v14972_v59 = vcombine.low %v9872_v50, %v9880_v6  ;;  %v9785_v50 = vld [vmem:[%s21737_s26 + $0x378] sm:$0xff]  ;;  %v16970_v6 = vld [vmem:[%s22033_s22] sm:$0xff] }
 0x8d4   : > { %v15229_v24 = vcombine.high %v10128_v40, %v10136_v46  ;;  %v9856_v9 = vld [vmem:[%s21737_s26 + $0x5b0] sm:$0xff]  ;;  %v15228_v11 = vcombine.low %v10128_v40, %v10136_v46  ;;  %v10217_v40 = vrot.slane %v16970_v6, %v10216_v14 }
 0x8d5   : > { %13333 = vmatpush1.bf16.msra.mxu0 %v14812_v47  ;;  %v9864_v23 = vld [vmem:[%s21737_s26 + $0x5f0] sm:$0xff] }
 0x8d6   : > { %13374 = vmatpush1.bf16.msra.mxu1 %v15068_v7  ;;  %13334 = vmatprep.subr.bf16.mxu0 %v14797_v43  ;;  %v10112_v54 = vld [vmem:[%s21737_s26 + $0xdb0] sm:$0xff]  ;;  %v14957_v34 = vcombine.high %v9856_v9, %v9864_v23  ;;  %v14956_v27 = vcombine.low %v9856_v9, %v9864_v23  ;;  %v9761_v23 = vld [vmem:[%s21737_s26 + $0x2b8] sm:$0xff] }
 0x8d7   : > { %13375 = vmatprep.subr.bf16.mxu1 %v15053_v25  ;;  %v10120_v35 = vld [vmem:[%s21737_s26 + $0xdf0] sm:$0xff] }
 0x8d8   : > { %v15213_v47 = vcombine.high %v10112_v54, %v10120_v35  ;;  %v9840_v7 = vld [vmem:[%s21737_s26 + $0x530] sm:$0xff]  ;;  %v15212_v41 = vcombine.low %v10112_v54, %v10120_v35  ;;  %v9769_v54 = vld [vmem:[%s21737_s26 + $0x2f8] sm:$0xff] }
 0x8d9   : > { %13335 = vmatpush1.bf16.msra.mxu0 %v14796_v45  ;;  %v9848_v43 = vld [vmem:[%s21737_s26 + $0x570] sm:$0xff] }
 0x8da   : > { %13376 = vmatpush1.bf16.msra.mxu1 %v15052_v37  ;;  %13336 = vmatprep.subr.bf16.mxu0 %v14781_v56  ;;  %v10096_v25 = vld [vmem:[%s21737_s26 + $0xd30] sm:$0xff]  ;;  %v14941_v12 = vcombine.high %v9840_v7, %v9848_v43  ;;  %v14940_v44 = vcombine.low %v9840_v7, %v9848_v43 }
 0x8db   : > { %13377 = vmatprep.subr.bf16.mxu1 %v15037_v36  ;;  %v10104_v4 = vld [vmem:[%s21737_s26 + $0xd70] sm:$0xff] }
 0x8dc   : > { %v15197_v45 = vcombine.high %v10096_v25, %v10104_v4  ;;  %v9824_v37 = vld [vmem:[%s21737_s26 + $0x4b0] sm:$0xff]  ;;  %v15196_v58 = vcombine.low %v10096_v25, %v10104_v4 }
 0x8dd   : > { %13337 = vmatpush1.bf16.msra.mxu0 %v14780_v60  ;;  %v9832_v56 = vld [vmem:[%s21737_s26 + $0x4f0] sm:$0xff] }
 0x8de   : > { %13378 = vmatpush1.bf16.msra.mxu1 %v15036_v0  ;;  %13338 = vmatprep.subr.bf16.mxu0 %v15021_v5  ;;  %v10080_v36 = vld [vmem:[%s21737_s26 + $0xcb0] sm:$0xff]  ;;  %v14925_v51 = vcombine.high %v9824_v37, %v9832_v56  ;;  %v14924_v3 = vcombine.low %v9824_v37, %v9832_v56  ;;  %v9745_v56 = vld [vmem:[%s21737_s26 + $0x238] sm:$0xff] }
 0x8df   : > { %13379 = vmatprep.subr.bf16.mxu1 %v15277_v57  ;;  %v10088_v32 = vld [vmem:[%s21737_s26 + $0xcf0] sm:$0xff] }
 0x8e0   : > { %v15181_v60 = vcombine.high %v10080_v36, %v10088_v32  ;;  %v9808_v0 = vld [vmem:[%s21737_s26 + $0x430] sm:$0xff]  ;;  %v15180_v61 = vcombine.low %v10080_v36, %v10088_v32  ;;  %v9753_v36 = vld [vmem:[%s21737_s26 + $0x278] sm:$0xff] }
 0x8e1   : > { %13339 = vmatpush2.bf16.msra.mxu0 %v15020_v13  ;;  %v9816_v5 = vld [vmem:[%s21737_s26 + $0x470] sm:$0xff] }
 0x8e2   : > { %13380 = vmatpush2.bf16.msra.mxu1 %v15276_v18  ;;  %13340 = vmatprep.subr.bf16.mxu0 %v15005_v29  ;;  %v10064_v57 = vld [vmem:[%s21737_s26 + $0xc30] sm:$0xff]  ;;  %v14909_v49 = vcombine.high %v9808_v0, %v9816_v5  ;;  %v9793_v18 = vld [vmem:[%s21737_s26 + $0x3b8] sm:$0xff]  ;;  %v14908_v20 = vcombine.low %v9808_v0, %v9816_v5  ;;  %v14847_v5 = vcombine.high %v9745_v56, %v9753_v36 }
 0x8e3   : > { %13381 = vmatprep.subr.bf16.mxu1 %v15261_v38  ;;  %v10072_v62 = vld [vmem:[%s21737_s26 + $0xc70] sm:$0xff]  ;;  %v9801_v29 = vld [vmem:[%s21737_s26 + $0x3f8] sm:$0xff] }
 0x8e4   : > { %v15165_v13 = vcombine.high %v10064_v57, %v10072_v62  ;;  %v10049_v38 = vld [vmem:[%s21737_s26 + $0xbb8] sm:$0xff]  ;;  %v15164_v28 = vcombine.low %v10064_v57, %v10072_v62  ;;  %v14894_v46 = vcombine.low %v9793_v18, %v9801_v29 }
 0x8e5   : > { %13341 = vmatpush2.bf16.msra.mxu0 %v15004_v15  ;;  %v14895_v15 = vcombine.high %v9793_v18, %v9801_v29  ;;  %v9985_v18 = vld [vmem:[%s21737_s26 + $0x9b8] sm:$0xff] }
 0x8e6   : > { %13382 = vmatpush2.bf16.msra.mxu1 %v15260_v22  ;;  %13342 = vmatprep.subr.bf16.mxu0 %v14989_v2  ;;  %v15151_v22 = vcombine.high %v10049_v38, %v10057_v33  ;;  %v10220_v2 = vsub.s32 7, %v18289_v42  ;;  %v9993_v29 = vld [vmem:[%s21737_s26 + $0x9f8] sm:$0xff] }
 0x8e7   : > { %13383 = vmatprep.subr.bf16.mxu1 %v15245_v1  ;;  %v9777_v1 = vld [vmem:[%s21737_s26 + $0x338] sm:$0xff] }
 0x8e8   : > { %v14879_v9 = vcombine.high %v9777_v1, %v9785_v50  ;;  %v14878_v43 = vcombine.low %v9777_v1, %v9785_v50  ;;  %v15087_v1 = vcombine.high %v9985_v18, %v9993_v29  ;;  %v9713_v50 = vld [vmem:[%s21737_s26 + $0x138] sm:$0xff] }
 0x8e9   : > { %13343 = vmatpush2.bf16.msra.mxu0 %v14988_v39  ;;  %v10033_v39 = vld [vmem:[%s21737_s26 + $0xb38] sm:$0xff] }
 0x8ea   : > { %13384 = vmatpush2.bf16.msra.mxu1 %v15244_v63  ;;  %13344 = vmatprep.subr.bf16.mxu0 %v14973_v55  ;;  %v10041_v63 = vld [vmem:[%s21737_s26 + $0xb78] sm:$0xff]  ;;  %v15150_v55 = vcombine.low %v10049_v38, %v10057_v33  ;;  %v14846_v33 = vcombine.low %v9745_v56, %v9753_v36 }
 0x8eb   : > { %13385 = vmatprep.subr.bf16.mxu1 %v15229_v24  ;;  %v10221_v24 = vrot.slane %v16970_v6, %v10220_v2  ;;  %v15134_v4 = vcombine.low %v10033_v39, %v10041_v63  ;;  %v9721_v6 = vld [vmem:[%s21737_s26 + $0x178] sm:$0xff] }
 0x8ec   : > { %v9929_v56 = vld [vmem:[%s21737_s26 + $0x7f8] sm:$0xff] }
 0x8ed   : > { %13345 = vmatpush2.bf16.msra.mxu0 %v14972_v59  ;;  %v15135_v59 = vcombine.high %v10033_v39, %v10041_v63  ;;  %v10177_v36 = vld [vmem:[%s21737_s26 + $0xfb8] sm:$0xff] }
 0x8ee   : > { %13386 = vmatpush2.bf16.msra.mxu1 %v15228_v11  ;;  %13346 = vmatprep.subr.bf16.mxu0 %v14957_v34  ;;  %v10017_v11 = vld [vmem:[%s21737_s26 + $0xab8] sm:$0xff] }
 0x8ef   : > { %13387 = vmatprep.subr.bf16.mxu1 %v15213_v47  ;;  %v10025_v34 = vld [vmem:[%s21737_s26 + $0xaf8] sm:$0xff] }
 0x8f0   : > { %v15119_v37 = vcombine.high %v10017_v11, %v10025_v34  ;;  %v15118_v0 = vcombine.low %v10017_v11, %v10025_v34 }
 0x8f1   : > { %13347 = vmatpush2.bf16.msra.mxu0 %v14956_v27  ;;  %v14863_v27 = vcombine.high %v9761_v23, %v9769_v54 }
 0x8f2   : > { %13388 = vmatpush2.bf16.msra.mxu1 %v15212_v41  ;;  %13348 = vmatprep.subr.bf16.mxu0 %v14941_v12 }
 0x8f3   : > { %13389 = vmatprep.subr.bf16.mxu1 %v15197_v45 }
 0x8f5   : > { %13349 = vmatpush2.bf16.msra.mxu0 %v14940_v44  ;;  %v10001_v44 = vld [vmem:[%s21737_s26 + $0xa38] sm:$0xff] }
 0x8f6   : > { %13390 = vmatpush2.bf16.msra.mxu1 %v15196_v58  ;;  %13350 = vmatprep.subr.bf16.mxu0 %v14925_v51  ;;  %v10009_v58 = vld [vmem:[%s21737_s26 + $0xa78] sm:$0xff] }
 0x8f7   : > { %13391 = vmatprep.subr.bf16.mxu1 %v15181_v60  ;;  %v14862_v60 = vcombine.low %v9761_v23, %v9769_v54  ;;  %v9705_v23 = vld [vmem:[%s21737_s26 + $0xf8] sm:$0xff] }
 0x8f8   : > { %v9953_v54 = vld [vmem:[%s21737_s26 + $0x8b8] sm:$0xff] }
 0x8f9   : > { %13351 = vmatpush2.bf16.msra.mxu0 %v14924_v3 }
 0x8fa   : > { %13392 = vmatpush2.bf16.msra.mxu1 %v15180_v61  ;;  %13352 = vmatprep.subr.bf16.mxu0 %v14909_v49  ;;  %v15103_v61 = vcombine.high %v10001_v44, %v10009_v58  ;;  %v9729_v49 = vld [vmem:[%s21737_s26 + $0x1b8] sm:$0xff] }
 0x8fb   : > { %13393 = vmatprep.subr.bf16.mxu1 %v15165_v13  ;;  %v9737_v13 = vld [vmem:[%s21737_s26 + $0x1f8] sm:$0xff] }
 0x8fc   : > { %v14830_v63 = vcombine.low %v9729_v49, %v9737_v13 }
 0x8fd   : > { %13353 = vmatpush2.bf16.msra.mxu0 %v14908_v20  ;;  %v15102_v20 = vcombine.low %v10001_v44, %v10009_v58 }
 0x8fe   : > { %13394 = vmatpush2.bf16.msra.mxu1 %v15164_v28  ;;  %13404 = vmatprep.subr.bf16.mxu0 %v14895_v15  ;;  %v14831_v28 = vcombine.high %v9729_v49, %v9737_v13  ;;  %v13543_v15 = vrot.slane %v22224_v52, %v22135_v26  ;;  %v9889_v49 = vld [vmem:[%s21737_s26 + $0x6b8] sm:$0xff] }
 0x8ff   : > { %13445 = vmatprep.subr.bf16.mxu1 %v15151_v22  ;;  %v9897_v13 = vld [vmem:[%s21737_s26 + $0x6f8] sm:$0xff] }
 0x900   : > { %v13110_v35 = vpop.f32.mrf.mxu0  ;;  %13355 = vmatmul.mubr.bf16.vlgmr.msra.gmra.mxu0 %v21825_v53 }
 0x901   : > { %v13111_v47 = vadd.f32 %v13110_v35, %v10217_v40  ;;  %v13151_v7 = vpop.f32.mrf.mxu1  ;;  %13396 = vmatmul.mubr.bf16.vlgmr.msra.gmra.mxu1 %v21827_v10  ;;  %13405 = vmatpush1.bf16.msra.mxu0 %v14894_v46  ;;  %v9969_v40 = vld [vmem:[%s21737_s26 + $0x938] sm:$0xff] }
 0x902   : > { %13436 = vmatprep.mubr.bf16.mxu0 %v21821_v19  ;;  %13446 = vmatpush1.bf16.msra.mxu1 %v15150_v55  ;;  %v13112_v25 = vpop.f32.mrf.mxu0  ;;  %v9977_v46 = vld [vmem:[%s21737_s26 + $0x978] sm:$0xff]  ;;  %v15086_v55 = vcombine.low %v9985_v18, %v9993_v29 }
 0x903   : > { %v13152_v41 = vadd.f32 %v13151_v7, %v13111_v47  ;;  %13477 = vmatprep.mubr.bf16.mxu1 %v21823_v30  ;;  %v13113_v12 = vadd.f32 %v13112_v25, %v10221_v24  ;;  %v13153_v45 = vpop.f32.mrf.mxu1  ;;  %13406 = vmatprep.subr.bf16.mxu0 %v14879_v9  ;;  %v14815_v24 = vcombine.high %v9713_v50, %v9721_v6  ;;  %v9697_v9 = vld [vmem:[%s21737_s26 + $0xb8] sm:$0xff] }
 0x904   : > { %v13114_v32 = vpop.f32.mrf.mxu0  ;;  %13447 = vmatprep.subr.bf16.mxu1 %v15135_v59  ;;  %v15071_v52 = vcombine.high %v9969_v40, %v9977_v46  ;;  %v9961_v35 = vld [vmem:[%s21737_s26 + $0x8f8] sm:$0xff]  ;;  %v14814_v59 = vcombine.low %v9713_v50, %v9721_v6  ;;  %v15070_v11 = vcombine.low %v9969_v40, %v9977_v46  ;;  %v14799_v34 = vcombine.high %v9697_v9, %v9705_v23 }
 0x905   : > { %v13154_v19 = vadd.f32 %v13153_v45, %v13113_v12  ;;  %v13155_v51 = vpop.f32.mrf.mxu1  ;;  %13407 = vmatpush1.bf16.msra.mxu0 %v14878_v43  ;;  %v13492_v57 = vmax.f32 %v13152_v41, 0.0  ;;  %v15055_v47 = vcombine.high %v9953_v54, %v9961_v35  ;;  %v9681_v7 = vld [vmem:[%s21737_s26 + $0x38] sm:$0xff]  ;;  %v15054_v41 = vcombine.low %v9953_v54, %v9961_v35 }
 0x906   : > { %13448 = vmatpush1.bf16.msra.mxu1 %v15134_v4  ;;  %v13115_v30 = vpop.f32.mrf.mxu0  ;;  %13408 = vmatprep.subr.bf16.mxu0 %v14863_v27  ;;  %v9689_v43 = vld [vmem:[%s21737_s26 + $0x78] sm:$0xff]  ;;  %v14798_v27 = vcombine.low %v9697_v9, %v9705_v23  ;;  %v14990_v6 = vcombine.low %v9889_v49, %v9897_v13 }
 0x907   : > { %v13493_v62 = vmax.f32 %v13154_v19, 0.0  ;;  %v13156_v3 = vpop.f32.mrf.mxu1  ;;  %13449 = vmatprep.subr.bf16.mxu1 %v15119_v37  ;;  %v9937_v25 = vld [vmem:[%s21737_s26 + $0x838] sm:$0xff]  ;;  %v14783_v12 = vcombine.high %v9681_v7, %v9689_v43  ;;  %v14782_v44 = vcombine.low %v9681_v7, %v9689_v43 }
 0x908   : > { %v9945_v4 = vld [vmem:[%s21737_s26 + $0x878] sm:$0xff] }
 0x909   : > { %v13536_v38 = vcombine.low %v13492_v57, %v13493_v62  ;;  %13409 = vmatpush1.bf16.msra.mxu0 %v14862_v60  ;;  %v15039_v45 = vcombine.high %v9937_v25, %v9945_v4  ;;  %v9921_v37 = vld [vmem:[%s21737_s26 + $0x7b8] sm:$0xff]  ;;  %v15038_v58 = vcombine.low %v9937_v25, %v9945_v4 }
 0x90a   : > { %13450 = vmatpush1.bf16.msra.mxu1 %v15118_v0  ;;  %13410 = vmatprep.subr.bf16.mxu0 %v14847_v5  ;;  %v10185_v32 = vld [vmem:[%s21737_s26 + $0xff8] sm:$0xff]  ;;  %v15023_v19 = vcombine.high %v9921_v37, %v9929_v56  ;;  %v15022_v57 = vcombine.low %v9921_v37, %v9929_v56 }
 0x90b   : > { %v13550_v22 = vrot.slane %v13536_v38, %v22135_v26  ;;  %13451 = vmatprep.subr.bf16.mxu1 %v15103_v61  ;;  %v15279_v51 = vcombine.high %v10177_v36, %v10185_v32  ;;  %v9905_v60 = vld [vmem:[%s21737_s26 + $0x738] sm:$0xff]  ;;  %v15278_v62 = vcombine.low %v10177_v36, %v10185_v32 }
 0x90c   : > { %v9913_v30 = vld [vmem:[%s21737_s26 + $0x778] sm:$0xff] }
 0x90d   : > { %v13551_v39 = vcombine.low %v13543_v15, %v13550_v22  ;;  %13411 = vmatpush1.bf16.msra.mxu0 %v14846_v33  ;;  %v10161_v0 = vld [vmem:[%s21737_s26 + $0xf38] sm:$0xff]  ;;  %v15007_v3 = vcombine.high %v9905_v60, %v9913_v30  ;;  %v15006_v38 = vcombine.low %v9905_v60, %v9913_v30 }
 0x90e   : > { %13452 = vmatpush1.bf16.msra.mxu1 %v15102_v20  ;;  %13412 = vmatprep.subr.bf16.mxu0 %v14831_v28  ;;  %v10169_v5 = vld [vmem:[%s21737_s26 + $0xf78] sm:$0xff]  ;;  %v14991_v20 = vcombine.high %v9889_v49, %v9897_v13 }
 0x90f   : > { %13591 = vst [vmem:[%s22149_s25 + $0x8] sm:$0xff] %v13551_v39  ;;  %13453 = vmatprep.subr.bf16.mxu1 %v15087_v1  ;;  %v15263_v61 = vcombine.high %v10161_v0, %v10169_v5  ;;  %v10145_v18 = vld [vmem:[%s21737_s26 + $0xeb8] sm:$0xff]  ;;  %v15262_v33 = vcombine.low %v10161_v0, %v10169_v5 }
 0x910   : > { %v10153_v29 = vld [vmem:[%s21737_s26 + $0xef8] sm:$0xff] }
 0x911   : > { %13413 = vmatpush1.bf16.msra.mxu0 %v14830_v63  ;;  %v15247_v28 = vcombine.high %v10145_v18, %v10153_v29  ;;  %v9873_v15 = vld [vmem:[%s21737_s26 + $0x638] sm:$0xff]  ;;  %v15246_v40 = vcombine.low %v10145_v18, %v10153_v29 }
 0x912   : > { %13454 = vmatpush1.bf16.msra.mxu1 %v15086_v55  ;;  %13414 = vmatprep.subr.bf16.mxu0 %v14815_v24  ;;  %v9881_v22 = vld [vmem:[%s21737_s26 + $0x678] sm:$0xff] }
 0x913   : > { %13455 = vmatprep.subr.bf16.mxu1 %v15071_v52  ;;  %v10129_v1 = vld [vmem:[%s21737_s26 + $0xe38] sm:$0xff]  ;;  %v14975_v46 = vcombine.high %v9873_v15, %v9881_v22  ;;  %v14974_v9 = vcombine.low %v9873_v15, %v9881_v22 }
 0x914   : > { %v10137_v50 = vld [vmem:[%s21737_s26 + $0xe78] sm:$0xff] }
 0x915   : > { %13415 = vmatpush1.bf16.msra.mxu0 %v14814_v59  ;;  %v15231_v39 = vcombine.high %v10129_v1, %v10137_v50  ;;  %v9857_v63 = vld [vmem:[%s21737_s26 + $0x5b8] sm:$0xff]  ;;  %v15230_v23 = vcombine.low %v10129_v1, %v10137_v50 }
 0x916   : > { %13456 = vmatpush1.bf16.msra.mxu1 %v15070_v11  ;;  %13416 = vmatprep.subr.bf16.mxu0 %v14799_v34  ;;  %v9865_v55 = vld [vmem:[%s21737_s26 + $0x5f8] sm:$0xff] }
 0x917   : > { %13457 = vmatprep.subr.bf16.mxu1 %v15055_v47  ;;  %v10113_v24 = vld [vmem:[%s21737_s26 + $0xdb8] sm:$0xff]  ;;  %v14959_v54 = vcombine.high %v9857_v63, %v9865_v55  ;;  %v14958_v7 = vcombine.low %v9857_v63, %v9865_v55 }
 0x918   : > { %v10121_v52 = vld [vmem:[%s21737_s26 + $0xdf8] sm:$0xff] }
 0x919   : > { %13417 = vmatpush1.bf16.msra.mxu0 %v14798_v27  ;;  %v15215_v35 = vcombine.high %v10113_v24, %v10121_v52  ;;  %v9841_v59 = vld [vmem:[%s21737_s26 + $0x538] sm:$0xff]  ;;  %v15214_v43 = vcombine.low %v10113_v24, %v10121_v52 }
 0x91a   : > { %13458 = vmatpush1.bf16.msra.mxu1 %v15054_v41  ;;  %13418 = vmatprep.subr.bf16.mxu0 %v14783_v12  ;;  %v9849_v11 = vld [vmem:[%s21737_s26 + $0x578] sm:$0xff] }
 0x91b   : > { %13459 = vmatprep.subr.bf16.mxu1 %v15039_v45  ;;  %v10097_v34 = vld [vmem:[%s21737_s26 + $0xd38] sm:$0xff]  ;;  %v14943_v25 = vcombine.high %v9841_v59, %v9849_v11  ;;  %v14942_v37 = vcombine.low %v9841_v59, %v9849_v11 }
 0x91c   : > { %v10105_v47 = vld [vmem:[%s21737_s26 + $0xd78] sm:$0xff] }
 0x91d   : > { %13419 = vmatpush1.bf16.msra.mxu0 %v14782_v44  ;;  %v15199_v4 = vcombine.high %v10097_v34, %v10105_v47  ;;  %v9825_v27 = vld [vmem:[%s21737_s26 + $0x4b8] sm:$0xff]  ;;  %v15198_v56 = vcombine.low %v10097_v34, %v10105_v47 }
 0x91e   : > { %13460 = vmatpush1.bf16.msra.mxu1 %v15038_v58  ;;  %13420 = vmatprep.subr.bf16.mxu0 %v15023_v19  ;;  %v9833_v41 = vld [vmem:[%s21737_s26 + $0x4f8] sm:$0xff] }
 0x91f   : > { %13461 = vmatprep.subr.bf16.mxu1 %v15279_v51  ;;  %v10081_v12 = vld [vmem:[%s21737_s26 + $0xcb8] sm:$0xff]  ;;  %v14927_v36 = vcombine.high %v9825_v27, %v9833_v41  ;;  %v14926_v60 = vcombine.low %v9825_v27, %v9833_v41 }
 0x920   : > { %v10089_v45 = vld [vmem:[%s21737_s26 + $0xcf8] sm:$0xff] }
 0x921   : > { %13421 = vmatpush2.bf16.msra.mxu0 %v15022_v57  ;;  %v15183_v32 = vcombine.high %v10081_v12, %v10089_v45  ;;  %v9809_v44 = vld [vmem:[%s21737_s26 + $0x438] sm:$0xff]  ;;  %v15182_v30 = vcombine.low %v10081_v12, %v10089_v45 }
 0x922   : > { %13462 = vmatpush2.bf16.msra.mxu1 %v15278_v62  ;;  %13422 = vmatprep.subr.bf16.mxu0 %v15007_v3  ;;  %v9817_v58 = vld [vmem:[%s21737_s26 + $0x478] sm:$0xff]  ;;  %v10187_v3 = vld [vmem:[%s22033_s22 + $0x8] sm:$0xff] }
 0x923   : > { %13463 = vmatprep.subr.bf16.mxu1 %v15263_v61  ;;  %v10065_v19 = vld [vmem:[%s21737_s26 + $0xc38] sm:$0xff]  ;;  %v14911_v0 = vcombine.high %v9809_v44, %v9817_v58  ;;  %v14910_v57 = vcombine.low %v9809_v44, %v9817_v58  ;;  %v10225_v61 = vrot.slane %v10187_v3, %v19056_v16  ;;  %v10229_v49 = vrot.slane %v10187_v3, %v19065_v21 }
 0x924   : > { %v10073_v51 = vld [vmem:[%s21737_s26 + $0xc78] sm:$0xff]  ;;  %v10233_v21 = vrot.slane %v10187_v3, %v20767_v48  ;;  %s15286_s26 = sshll.u32 %s17108_s13, 9  ;;  %s16975_s13 = sshll.u32 %s17036_s21, 4  ;;  %s16976_s13 = int_to_ptr.vmem [resolvable:$false] %s16975_s13 }
 0x925   : > { %13423 = vmatpush2.bf16.msra.mxu0 %v15006_v38  ;;  %v15167_v5 = vcombine.high %v10065_v19, %v10073_v51  ;;  %v15166_v62 = vcombine.low %v10065_v19, %v10073_v51  ;;  %s13607_s14 = scalar_lea.hbm %s22415_s9, %s15286_s26  ;;  %s16977_s22 = scalar_lea.vmem %s16976_s13, 1024 }
 0x926   : > { %13464 = vmatpush2.bf16.msra.mxu1 %v15262_v33  ;;  %13424 = vmatprep.subr.bf16.mxu0 %v14991_v20  ;;  %p16978_p3 = scmp.lt.s32.totalorder %s13610_s27, %s16976_s13  ;;  %p16979_p4 = scmp.lt.s32.totalorder %s16977_s22, %s16971_s17 }
 0x927   : > { %13465 = vmatprep.subr.bf16.mxu1 %v15247_v28 }
 0x928   : > { %p16980_p5 = por %p16979_p4, %p16978_p3 }
 0x929   : > { %13425 = vmatpush2.bf16.msra.mxu0 %v14990_v6 }
 0x92a   : > { %13466 = vmatpush2.bf16.msra.mxu1 %v15246_v40  ;;  %13426 = vmatprep.subr.bf16.mxu0 %v14975_v46  ;;  %p16981_p7 = pnand %p16980_p5, %p16974_p2 }
 0x92b   : > { %13467 = vmatprep.subr.bf16.mxu1 %v15231_v39 }
 0x92d   : > { %13427 = vmatpush2.bf16.msra.mxu0 %v14974_v9 }
 0x92e   : > { %13468 = vmatpush2.bf16.msra.mxu1 %v15230_v23  ;;  %13428 = vmatprep.subr.bf16.mxu0 %v14959_v54 }
 0x92f   : > { %13469 = vmatprep.subr.bf16.mxu1 %v15215_v35 }
 0x931   : > { %13429 = vmatpush2.bf16.msra.mxu0 %v14958_v7 }
 0x932   : > { %13470 = vmatpush2.bf16.msra.mxu1 %v15214_v43  ;;  %13430 = vmatprep.subr.bf16.mxu0 %v14943_v25  ;;  %v10241_v25 = vrot.slane %v10187_v3, %v10208_v17  ;;  %v10249_v17 = vrot.slane %v10187_v3, %v10216_v14 }
 0x933   : > { %13471 = vmatprep.subr.bf16.mxu1 %v15199_v4  ;;  %v10245_v4 = vrot.slane %v10187_v3, %v10212_v31  ;;  %v10253_v31 = vrot.slane %v10187_v3, %v10220_v2 }
 0x935   : > { %13431 = vmatpush2.bf16.msra.mxu0 %v14942_v37 }
 0x936   : > { %13472 = vmatpush2.bf16.msra.mxu1 %v15198_v56  ;;  %13432 = vmatprep.subr.bf16.mxu0 %v14927_v36 }
 0x937   : > { %13473 = vmatprep.subr.bf16.mxu1 %v15183_v32 }
 0x939   : > { %13433 = vmatpush2.bf16.msra.mxu0 %v14926_v60 }
 0x93a   : > { %13474 = vmatpush2.bf16.msra.mxu1 %v15182_v30  ;;  %13434 = vmatprep.subr.bf16.mxu0 %v14911_v0 }
 0x93b   : > { %13475 = vmatprep.subr.bf16.mxu1 %v15167_v5 }
 0x93d   : > { %13435 = vmatpush2.bf16.msra.mxu0 %v14910_v57 }
 0x93e   : > { %13476 = vmatpush2.bf16.msra.mxu1 %v15166_v62 }
 0x940   : > { %v13192_v13 = vpop.f32.mrf.mxu0  ;;  %13437 = vmatmul.mubr.bf16.vlgmr.msra.gmra.mxu0 %v21825_v53  ;;  %v10237_v53 = vrot.slane %v10187_v3, %v20776_v8 }
 0x941   : > { %v13193_v18 = vadd.f32 %v13192_v13, %v10225_v61  ;;  %v13233_v29 = vpop.f32.mrf.mxu1  ;;  %13478 = vmatmul.mubr.bf16.vlgmr.msra.gmra.mxu1 %v21827_v10 }
 0x942   : > { %v13194_v38 = vpop.f32.mrf.mxu0 }
 0x943   : > { %v13234_v33 = vadd.f32 %v13233_v29, %v13193_v18  ;;  %v13195_v20 = vadd.f32 %v13194_v38, %v10229_v49  ;;  %v13235_v28 = vpop.f32.mrf.mxu1 }
 0x944   : > { %v13196_v15 = vpop.f32.mrf.mxu0 }
 0x945   : > { %v13236_v22 = vadd.f32 %v13235_v28, %v13195_v20  ;;  %v13237_v1 = vpop.f32.mrf.mxu1  ;;  %v13494_v6 = vmax.f32 %v13234_v33, 0.0 }
 0x946   : > { %v13197_v50 = vpop.f32.mrf.mxu0 }
 0x947   : > { %v13495_v16 = vmax.f32 %v13236_v22, 0.0  ;;  %v13238_v40 = vpop.f32.mrf.mxu1 }
 0x949   : > { %v13552_v46 = vcombine.low %v13494_v6, %v13495_v16 }
 0x94b   : > { %v13560_v48 = vrot.slane %v13552_v46, %v22135_v26 }
 0x980   : > { %v13274_v39 = vpop.f32.mrf.mxu0 }
 0x981   : > { %v13275_v63 = vadd.f32 %v13274_v39, %v10233_v21  ;;  %v13315_v55 = vpop.f32.mrf.mxu1 }
 0x982   : > { %v13276_v10 = vpop.f32.mrf.mxu0 }
 0x983   : > { %v13316_v24 = vadd.f32 %v13315_v55, %v13275_v63  ;;  %v13277_v52 = vadd.f32 %v13276_v10, %v10237_v53  ;;  %v13317_v9 = vpop.f32.mrf.mxu1 }
 0x984   : > { %v13278_v23 = vpop.f32.mrf.mxu0 }
 0x985   : > { %v13318_v54 = vadd.f32 %v13317_v9, %v13277_v52  ;;  %v13319_v35 = vpop.f32.mrf.mxu1  ;;  %v13496_v11 = vmax.f32 %v13316_v24, 0.0 }
 0x986   : > { %v13279_v59 = vpop.f32.mrf.mxu0 }
 0x987   : > { %v13497_v34 = vmax.f32 %v13318_v54, 0.0  ;;  %v13320_v47 = vpop.f32.mrf.mxu1 }
 0x989   : > { %v13553_v7 = vcombine.low %v13496_v11, %v13497_v34 }
 0x98b   : > { %v13567_v8 = vrot.slane %v13553_v7, %v22135_v26 }
 0x98d   : > { %v13568_v43 = vcombine.low %v13560_v48, %v13567_v8 }
 0x98f   : > { %13592 = vst [vmem:[%s22149_s25 + $0x10] sm:$0xff] %v13568_v43 }
 0x9c0   : > { %v13356_v27 = vpop.f32.mrf.mxu0 }
 0x9c1   : > { %v13357_v41 = vadd.f32 %v13356_v27, %v10241_v25  ;;  %v13397_v12 = vpop.f32.mrf.mxu1 }
 0x9c2   : > { %v13358_v45 = vpop.f32.mrf.mxu0 }
 0x9c3   : > { %v13398_v37 = vadd.f32 %v13397_v12, %v13357_v41  ;;  %v13359_v56 = vadd.f32 %v13358_v45, %v10245_v4  ;;  %v13399_v36 = vpop.f32.mrf.mxu1 }
 0x9c4   : > { %v13360_v32 = vpop.f32.mrf.mxu0 }
 0x9c5   : > { %v13400_v44 = vadd.f32 %v13399_v36, %v13359_v56  ;;  %v13401_v58 = vpop.f32.mrf.mxu1  ;;  %v13498_v51 = vmax.f32 %v13398_v37, 0.0 }
 0x9c6   : > { %v13361_v19 = vpop.f32.mrf.mxu0 }
 0x9c7   : > { %v13499_v60 = vmax.f32 %v13400_v44, 0.0  ;;  %v13402_v30 = vpop.f32.mrf.mxu1 }
 0x9c9   : > { %v13569_v0 = vcombine.low %v13498_v51, %v13499_v60 }
 0x9cb   : > { %v13577_v3 = vrot.slane %v13569_v0, %v22135_v26 }
 0xa00   : > { %v13438_v5 = vpop.f32.mrf.mxu0 }
 0xa01   : > { %v13439_v57 = vadd.f32 %v13438_v5, %v10249_v17  ;;  %v13479_v62 = vpop.f32.mrf.mxu1 }
 0xa02   : > { %v13440_v61 = vpop.f32.mrf.mxu0 }
 0xa03   : > { %v13480_v49 = vadd.f32 %v13479_v62, %v13439_v57  ;;  %v13441_v13 = vadd.f32 %v13440_v61, %v10253_v31  ;;  %v13481_v18 = vpop.f32.mrf.mxu1 }
 0xa04   : > { %v13442_v29 = vpop.f32.mrf.mxu0 }
 0xa05   : > { %v13482_v38 = vadd.f32 %v13481_v18, %v13441_v13  ;;  %v13483_v33 = vpop.f32.mrf.mxu1  ;;  %v13500_v14 = vmax.f32 %v13480_v49, 0.0 }
 0xa06   : > { %v13443_v20 = vpop.f32.mrf.mxu0 }
 0xa07   : > { %v13501_v28 = vmax.f32 %v13482_v38, 0.0  ;;  %v13484_v42 = vpop.f32.mrf.mxu1 }
 0xa09   : > { %v13570_v2 = vcombine.low %v13500_v14, %v13501_v28 }
 0xa0b   : > { %v13584_v15 = vrot.slane %v13570_v2, %v22135_v26 }
 0xa0d   : > { %v13585_v22 = vcombine.low %v13577_v3, %v13584_v15 }
 0xa0f   : > { %13593 = vst [vmem:[%s22149_s25 + $0x18] sm:$0xff] %v13585_v22 }
 0xa10   : > { %16984 = shalt.err (!%p16981_p7)
}
 0xa11   : > { %s16985_s23 = scalar_lea.hbm %s13607_s14, 512  ;;  %s16989_s26 = scalar_lea.hbm %s22415_s9, 1024 }
 0xa12   : > { %p16986_p10 = scmp.ne.s32.totalorder %s13607_s14, %s16985_s23  ;;  %p16990_p13 = scmp.lt.s32.totalorder %s13607_s14, %s22415_s9 }
 0xa13   : > { %p16991_p0 = scmp.lt.s32.totalorder %s16989_s26, %s16985_s23 }
 0xa14   : > { %p16987_p11 = pnand %p16986_p10, %p17126_p6 }
 0xa15   : > { %p16992_p1 = por %p16991_p0, %p16990_p13 }
 0xa16   : > { %p16988_p12 = pneg %p16987_p11 }
 0xa18   : > { %p16993_p9 = pnand %p16992_p1, %p16988_p12 }
 0xa1a   : > { %16996 = shalt.err (!%p16993_p9)
}
 0xa1b   : > { %15331 = dma.vmem_to_hbm [thread:$0]  (%p17126_p6), %s13610_s27, 512, %s13607_s14, %s13595_s16  }
 0xa1c PF: > { %s13621_s17 = sand.u32 1, %s17019_s30   ;;  %p22419_p2 = scmp.ge.s32.totalorder %s17031_s12, 2 }
 0xa1d   : > { %s13622_s21 = scalar_lea.sflag [#allocation4], %s13621_s17 }
 0xa1e   : > { %p15334_p3 = pnand %p22419_p2, %p17130_p8 }
 0xa20   : > { %p15335_p4 = pneg %p15334_p3 }
 0xa22   : > { %17014 = dma.done.wait (%p15335_p4), %s13622_s21, 512  }
 0xa23   : > { %17016 = vsyncadd (%p15335_p4), %s13622_s21, 4294966784  ;;  %p19_p9 = scmp.ge.s32.totalorder %s17112_s15, 4   ;;  %s22420_s30 = smov %s17023_s10 }
 0xa24   : > { %s22421_s10 = smov %s17027_s11  ;;  %s22422_s11 = smov %s17124_s18 }
 0xa25   : > { %s22423_s12 = smov %s17112_s15  ;;  %21 = sbr.rel (!%p19_p9) target bundleno = 3 (0x3), region = 122 }
 0xa2a   :  { %13627 = vsyncpa [#allocation4], 1 }
 0xa2b   :  { %13629 = vsyncpa [#allocation4 + $0x1], 1 }

</bundles_post_ra>
